<compile_context>
chip_gen: v7x
topology: tpu7x:2x2x1
jax: 0.10.0
libtpu: 0.0.40
codegen_flags: <defaults>
</compile_context>

<pallas_src>
import functools

import jax
import jax.numpy as jnp
from jax import lax
from jax.experimental import pallas as pl
from jax.experimental.pallas import tpu as pltpu

VOCAB = 256
HIDDEN = 32          # true model hidden size
HP = 128             # lane-padded hidden size used inside the kernel
SEQ_LEN = 8          # encoder input length
TGT_LEN = 6          # decoder / target length
SOS_TOKEN = ord('V')  # 86


def _seq2seq_kernel(
    emb_in_ref,     # (S, HP)        encoder input embeddings (lane padded)
    emb_dec_ref,    # (T, HP)        decoder input embeddings (teacher forcing)
    e_wi0_ref,      # (HP, 3*HP)     encoder layer 0 input weights  [r|z|n]
    e_wh0_ref,      # (HP, 3*HP)     encoder layer 0 hidden weights [r|z|n]
    e_wcat1_ref,    # (2*HP, 4*HP)   encoder layer 1 fused [x;h] -> [r|z|gi_n|gh_n]
    d_wi0_ref,      # (HP, 3*HP)     decoder layer 0 input weights
    d_wh0_ref,      # (HP, 3*HP)     decoder layer 0 hidden weights
    d_wcat1_ref,    # (2*HP, 4*HP)   decoder layer 1 fused weights
    wp_ref,         # (2*HP, VOCAB)  projection weight (padded, transposed)
    bp_ref,         # (1, VOCAB)     projection bias (zeros)
    out_ref,        # (T, VOCAB)
    enc_out_ref,    # scratch VMEM (S, HP): top-layer encoder outputs
    dec_out_ref,    # scratch VMEM (T, HP): top-layer decoder outputs
):
    S = emb_in_ref.shape[0]
    T = emb_dec_ref.shape[0]
    f32 = jnp.float32

    def layer0_step(gi_row, h, wh_ref):
        # gi_row: (1, 3*HP) precomputed input gates; h: (1, HP)
        gh = jnp.dot(h, wh_ref[...], preferred_element_type=f32)      # (1, 3*HP)
        r = jax.nn.sigmoid(gi_row[:, 0:HP] + gh[:, 0:HP])
        z = jax.nn.sigmoid(gi_row[:, HP:2 * HP] + gh[:, HP:2 * HP])
        n = jnp.tanh(gi_row[:, 2 * HP:3 * HP] + r * gh[:, 2 * HP:3 * HP])
        return (1.0 - z) * n + z * h

    def layer1_step(x, h, wcat_ref):
        # single fused matmul: [x, h] @ Wcat -> [gi_r+gh_r | gi_z+gh_z | gi_n | gh_n]
        g = jnp.dot(jnp.concatenate([x, h], axis=-1), wcat_ref[...],
                    preferred_element_type=f32)                        # (1, 4*HP)
        r = jax.nn.sigmoid(g[:, 0:HP])
        z = jax.nn.sigmoid(g[:, HP:2 * HP])
        n = jnp.tanh(g[:, 2 * HP:3 * HP] + r * g[:, 3 * HP:4 * HP])
        return (1.0 - z) * n + z * h

    # ---- hoisted input-side layer-0 matmuls (batched over time, off the chain) ----
    gi_enc0 = jnp.dot(emb_in_ref[...], e_wi0_ref[...],
                      preferred_element_type=f32)                      # (S, 3*HP)
    gi_dec0 = jnp.dot(emb_dec_ref[...], d_wi0_ref[...],
                      preferred_element_type=f32)                      # (T, 3*HP)

    h_init = jnp.zeros((1, HP), f32)

    # ---------------- encoder: 2-layer GRU, Python-unrolled (S static) ------------
    h0, h1 = h_init, h_init
    for t in range(S):
        h0 = layer0_step(gi_enc0[t:t + 1, :], h0, e_wh0_ref)
        h1 = layer1_step(h0, h1, e_wcat1_ref)
        enc_out_ref[t:t + 1, :] = h1

    # ---------------- decoder: teacher-forced 2-layer GRU -------------------------
    d0, d1 = h0, h1                      # decoder initial state = final encoder state
    for t in range(T):
        d0 = layer0_step(gi_dec0[t:t + 1, :], d0, d_wh0_ref)
        d1 = layer1_step(d0, d1, d_wcat1_ref)
        dec_out_ref[t:t + 1, :] = d1

    # -------- batched attention + projection (completely off the serial path) -----
    enc_out = enc_out_ref[...]                                         # (S, HP)
    dec_out = dec_out_ref[...]                                         # (T, HP)
    # scores[t, s] = <dec_out[t], enc_out[s]>  (padded lanes are 0 -> exact)
    scores = lax.dot_general(dec_out, enc_out, (((1,), (1,)), ((), ())),
                             preferred_element_type=f32)               # (T, S)
    scores = scores - jnp.max(scores, axis=-1, keepdims=True)
    e = jnp.exp(scores)
    attn = e / jnp.sum(e, axis=-1, keepdims=True)                      # softmax
    ctx = jnp.dot(attn, enc_out, preferred_element_type=f32)           # (T, HP)
    combined = jnp.concatenate([dec_out, ctx], axis=-1)                # (T, 2*HP)
    out_ref[...] = (jnp.dot(combined, wp_ref[...],
                            preferred_element_type=f32) + bp_ref[...])


def _xavier_uniform(key, shape):
    # PyTorch convention for 2-D weights: shape = (fan_out, fan_in)
    fan_out, fan_in = shape
    bound = (6.0 / (fan_in + fan_out)) ** 0.5
    return jax.random.uniform(key, shape, jnp.float32, -bound, bound)


def init_params(key, vocab_size=VOCAB, hidden=HIDDEN):
    """Canonical (PyTorch-shaped) parameters. All biases are zero (as in the ref)."""
    keys = jax.random.split(key, 10)
    p = {}
    p["embedding"] = _xavier_uniform(keys[0], (vocab_size, hidden))
    # GRU weights, PyTorch shapes (3H, H), gate order [r | z | n].
    p["enc_wi0"] = _xavier_uniform(keys[1], (3 * hidden, hidden))
    p["enc_wh0"] = _xavier_uniform(keys[2], (3 * hidden, hidden))
    p["enc_wi1"] = _xavier_uniform(keys[3], (3 * hidden, hidden))
    p["enc_wh1"] = _xavier_uniform(keys[4], (3 * hidden, hidden))
    p["dec_wi0"] = _xavier_uniform(keys[5], (3 * hidden, hidden))
    p["dec_wh0"] = _xavier_uniform(keys[6], (3 * hidden, hidden))
    p["dec_wi1"] = _xavier_uniform(keys[7], (3 * hidden, hidden))
    p["dec_wh1"] = _xavier_uniform(keys[8], (3 * hidden, hidden))
    # projection Linear(2H -> vocab): PyTorch weight (vocab, 2H), zero bias.
    p["proj_w"] = _xavier_uniform(keys[9], (vocab_size, 2 * hidden))
    p["proj_b"] = jnp.zeros((vocab_size,), jnp.float32)
    # NOTE: GRU biases and the unused `self.attention` Linear are zero-init / unused
    # in the forward pass and are therefore omitted.
    return p


def pack_params(raw, hidden=HIDDEN, hp=HP, vocab=VOCAB):
    """Lane-pad (H -> HP) and fuse weights into the layout the kernel expects."""
    H = hidden

    def pad_gate_w(w):  # w: (3H, H) PyTorch layout -> (HP, 3*HP), x @ W^T form
        out = jnp.zeros((hp, 3 * hp), jnp.float32)
        for g in range(3):
            out = out.at[:H, g * hp:g * hp + H].set(w[g * H:(g + 1) * H, :].T)
        return out

    def fuse_layer1(wi, wh):  # -> (2*HP, 4*HP): [gi_r+gh_r | gi_z+gh_z | gi_n | gh_n]
        out = jnp.zeros((2 * hp, 4 * hp), jnp.float32)
        # r gate: input rows 0:H, hidden rows HP:HP+H, columns block 0
        out = out.at[:H, 0 * hp:0 * hp + H].set(wi[0:H, :].T)
        out = out.at[hp:hp + H, 0 * hp:0 * hp + H].set(wh[0:H, :].T)
        # z gate: columns block 1
        out = out.at[:H, 1 * hp:1 * hp + H].set(wi[H:2 * H, :].T)
        out = out.at[hp:hp + H, 1 * hp:1 * hp + H].set(wh[H:2 * H, :].T)
        # n gate kept separable (PyTorch semantics): gi_n block 2, gh_n block 3
        out = out.at[:H, 2 * hp:2 * hp + H].set(wi[2 * H:3 * H, :].T)
        out = out.at[hp:hp + H, 3 * hp:3 * hp + H].set(wh[2 * H:3 * H, :].T)
        return out

    packed = {}
    packed["embedding"] = (jnp.zeros((vocab, hp), jnp.float32)
                           .at[:, :H].set(raw["embedding"]))
    packed["enc_wi0"] = pad_gate_w(raw["enc_wi0"])
    packed["enc_wh0"] = pad_gate_w(raw["enc_wh0"])
    packed["enc_wcat1"] = fuse_layer1(raw["enc_wi1"], raw["enc_wh1"])
    packed["dec_wi0"] = pad_gate_w(raw["dec_wi0"])
    packed["dec_wh0"] = pad_gate_w(raw["dec_wh0"])
    packed["dec_wcat1"] = fuse_layer1(raw["dec_wi1"], raw["dec_wh1"])
    # projection: combined = [dec_out (lanes 0:H) | ctx (lanes HP:HP+H)]
    wp = raw["proj_w"]                                  # (vocab, 2H)
    wp_p = jnp.zeros((2 * hp, vocab), jnp.float32)
    wp_p = wp_p.at[:H, :].set(wp[:, 0:H].T)             # decoder-output half
    wp_p = wp_p.at[hp:hp + H, :].set(wp[:, H:2 * H].T)  # context half
    packed["proj_w"] = wp_p
    packed["proj_b"] = raw["proj_b"].reshape(1, vocab)
    return packed


@functools.partial(jax.jit, static_argnames=())
def seq2seq_forward(inputs, targets, params):
    """inputs: (SEQ_LEN,) int32 tokens; targets: (TGT_LEN,) int32 tokens.
    params: packed params from pack_params().
    Returns (TGT_LEN, VOCAB) float32 logits, matching the PyTorch forward output."""
    emb = params["embedding"]                                     # (VOCAB, HP)
    emb_in = jnp.take(emb, inputs, axis=0)                        # (S, HP)
    sos = jnp.array([SOS_TOKEN], dtype=inputs.dtype)
    dec_tokens = jnp.concatenate([sos, targets[:-1]])             # teacher forcing
    emb_dec = jnp.take(emb, dec_tokens, axis=0)                   # (T, HP)

    T = targets.shape[0]
    vmem = pl.BlockSpec(memory_space=pltpu.MemorySpace.VMEM)

    out = pl.pallas_call(
        _seq2seq_kernel,
        out_shape=jax.ShapeDtypeStruct((T, VOCAB), jnp.float32),
        in_specs=[vmem] * 10,
        out_specs=vmem,
        scratch_shapes=[
            pltpu.VMEM((SEQ_LEN, HP), jnp.float32),   # encoder top-layer outputs
            pltpu.VMEM((TGT_LEN, HP), jnp.float32),   # decoder top-layer outputs
        ],
    )(
        emb_in, emb_dec,
        params["enc_wi0"], params["enc_wh0"], params["enc_wcat1"],
        params["dec_wi0"], params["dec_wh0"], params["dec_wcat1"],
        params["proj_w"], params["proj_b"],
    )
    return out


if __name__ == "__main__":
    key = jax.random.PRNGKey(0)
    k_param, k_in, k_tgt = jax.random.split(key, 3)

    raw_params = init_params(k_param)
    params = jax.tree.map(lambda x: x, pack_params(raw_params))

    inputs = jax.random.randint(k_in, (SEQ_LEN,), 0, VOCAB, dtype=jnp.int32)
    targets = jax.random.randint(k_tgt, (TGT_LEN,), 0, VOCAB, dtype=jnp.int32)

    logits = seq2seq_forward(inputs, targets, params)
    jax.block_until_ready(logits)

    assert logits.shape == (TGT_LEN, VOCAB)
    assert bool(jnp.all(jnp.isfinite(logits)))
    print("KERNEL_OK")
</pallas_src>

<mosaic_0001>
module attributes {stable_mosaic.version = 11 : i64} {
  func.func @_seq2seq_kernel(%arg0: memref<8x128xf32, #tpu.memory_space<vmem>>, %arg1: memref<6x128xf32, #tpu.memory_space<vmem>>, %arg2: memref<128x384xf32, #tpu.memory_space<vmem>>, %arg3: memref<128x384xf32, #tpu.memory_space<vmem>>, %arg4: memref<256x512xf32, #tpu.memory_space<vmem>>, %arg5: memref<128x384xf32, #tpu.memory_space<vmem>>, %arg6: memref<128x384xf32, #tpu.memory_space<vmem>>, %arg7: memref<256x512xf32, #tpu.memory_space<vmem>>, %arg8: memref<256x256xf32, #tpu.memory_space<vmem>>, %arg9: memref<1x256xf32, #tpu.memory_space<vmem>>, %arg10: memref<6x256xf32, #tpu.memory_space<vmem>>, %arg11: memref<8x128xf32, #tpu.memory_space<vmem>>, %arg12: memref<6x128xf32, #tpu.memory_space<vmem>>) attributes {dimension_semantics = [], scalar_prefetch = 0 : i64, scratch_operands = 2 : i64, tpu.core_type = #tpu.core_type<tc>} {
    %c0 = arith.constant 0 : index
    %c0_0 = arith.constant 0 : index
    %0 = vector.load %arg0[%c0, %c0_0] : memref<8x128xf32, #tpu.memory_space<vmem>>, vector<8x128xf32>
    %c0_1 = arith.constant 0 : index
    %c0_2 = arith.constant 0 : index
    %1 = vector.load %arg2[%c0_1, %c0_2] : memref<128x384xf32, #tpu.memory_space<vmem>>, vector<128x384xf32>
    %cst = arith.constant dense<0.000000e+00> : vector<8x384xf32>
    %2 = tpu.matmul %0, %1, %cst {dimension_numbers = #tpu.dot_dimension_numbers<[1], [0], [0], [1], [0, 0, 1, 1], [], []>} : vector<8x128xf32>, vector<128x384xf32>, vector<8x384xf32> -> vector<8x384xf32>
    %c0_3 = arith.constant 0 : index
    %c0_4 = arith.constant 0 : index
    %3 = vector.load %arg1[%c0_3, %c0_4] : memref<6x128xf32, #tpu.memory_space<vmem>>, vector<6x128xf32>
    %c0_5 = arith.constant 0 : index
    %c0_6 = arith.constant 0 : index
    %4 = vector.load %arg5[%c0_5, %c0_6] : memref<128x384xf32, #tpu.memory_space<vmem>>, vector<128x384xf32>
    %cst_7 = arith.constant dense<0.000000e+00> : vector<6x384xf32>
    %5 = tpu.matmul %3, %4, %cst_7 {dimension_numbers = #tpu.dot_dimension_numbers<[1], [0], [0], [1], [0, 0, 1, 1], [], []>} : vector<6x128xf32>, vector<128x384xf32>, vector<6x384xf32> -> vector<6x384xf32>
    %cst_8 = arith.constant 0.000000e+00 : f32
    %6 = vector.broadcast %cst_8 : f32 to vector<1x128xf32>
    %7 = vector.extract_strided_slice %2 {offsets = [0, 0], sizes = [1, 384], strides = [1, 1]} : vector<8x384xf32> to vector<1x384xf32>
    %c0_9 = arith.constant 0 : index
    %c0_10 = arith.constant 0 : index
    %8 = vector.load %arg3[%c0_9, %c0_10] : memref<128x384xf32, #tpu.memory_space<vmem>>, vector<128x384xf32>
    %cst_11 = arith.constant dense<0.000000e+00> : vector<1x384xf32>
    %9 = tpu.matmul %6, %8, %cst_11 {dimension_numbers = #tpu.dot_dimension_numbers<[1], [0], [0], [1], [0, 0, 1, 1], [], []>} : vector<1x128xf32>, vector<128x384xf32>, vector<1x384xf32> -> vector<1x384xf32>
    %10 = vector.extract_strided_slice %7 {offsets = [0, 0], sizes = [1, 128], strides = [1, 1]} : vector<1x384xf32> to vector<1x128xf32>
    %11 = vector.extract_strided_slice %9 {offsets = [0, 0], sizes = [1, 128], strides = [1, 1]} : vector<1x384xf32> to vector<1x128xf32>
    %12 = arith.addf %10, %11 : vector<1x128xf32>
    %13 = arith.negf %12 : vector<1x128xf32>
    %14 = math.exp %13 : vector<1x128xf32>
    %cst_12 = arith.constant 1.000000e+00 : f32
    %15 = vector.broadcast %cst_12 : f32 to vector<1x128xf32>
    %16 = arith.addf %15, %14 : vector<1x128xf32>
    %17 = arith.divf %15, %16 : vector<1x128xf32>
    %18 = vector.extract_strided_slice %7 {offsets = [0, 128], sizes = [1, 128], strides = [1, 1]} : vector<1x384xf32> to vector<1x128xf32>
    %19 = vector.extract_strided_slice %9 {offsets = [0, 128], sizes = [1, 128], strides = [1, 1]} : vector<1x384xf32> to vector<1x128xf32>
    %20 = arith.addf %18, %19 : vector<1x128xf32>
    %21 = arith.negf %20 : vector<1x128xf32>
    %22 = math.exp %21 : vector<1x128xf32>
    %cst_13 = arith.constant 1.000000e+00 : f32
    %23 = vector.broadcast %cst_13 : f32 to vector<1x128xf32>
    %24 = arith.addf %23, %22 : vector<1x128xf32>
    %25 = arith.divf %23, %24 : vector<1x128xf32>
    %26 = vector.extract_strided_slice %7 {offsets = [0, 256], sizes = [1, 128], strides = [1, 1]} : vector<1x384xf32> to vector<1x128xf32>
    %27 = vector.extract_strided_slice %9 {offsets = [0, 256], sizes = [1, 128], strides = [1, 1]} : vector<1x384xf32> to vector<1x128xf32>
    %28 = arith.mulf %17, %27 : vector<1x128xf32>
    %29 = arith.addf %26, %28 : vector<1x128xf32>
    %30 = math.tanh %29 : vector<1x128xf32>
    %cst_14 = arith.constant 1.000000e+00 : f32
    %31 = vector.broadcast %cst_14 : f32 to vector<1x128xf32>
    %32 = arith.subf %31, %25 : vector<1x128xf32>
    %33 = arith.mulf %32, %30 : vector<1x128xf32>
    %34 = arith.mulf %25, %6 : vector<1x128xf32>
    %35 = arith.addf %33, %34 : vector<1x128xf32>
    %36 = tpu.concatenate %35, %6 in 1 : vector<1x128xf32>, vector<1x128xf32> -> vector<1x256xf32>
    %c0_15 = arith.constant 0 : index
    %c0_16 = arith.constant 0 : index
    %37 = vector.load %arg4[%c0_15, %c0_16] : memref<256x512xf32, #tpu.memory_space<vmem>>, vector<256x512xf32>
    %cst_17 = arith.constant dense<0.000000e+00> : vector<1x512xf32>
    %38 = tpu.matmul %36, %37, %cst_17 {dimension_numbers = #tpu.dot_dimension_numbers<[1], [0], [0], [1], [0, 0, 1, 1], [], []>} : vector<1x256xf32>, vector<256x512xf32>, vector<1x512xf32> -> vector<1x512xf32>
    %39 = vector.extract_strided_slice %38 {offsets = [0, 0], sizes = [1, 128], strides = [1, 1]} : vector<1x512xf32> to vector<1x128xf32>
    %40 = arith.negf %39 : vector<1x128xf32>
    %41 = math.exp %40 : vector<1x128xf32>
    %cst_18 = arith.constant 1.000000e+00 : f32
    %42 = vector.broadcast %cst_18 : f32 to vector<1x128xf32>
    %43 = arith.addf %42, %41 : vector<1x128xf32>
    %44 = arith.divf %42, %43 : vector<1x128xf32>
    %45 = vector.extract_strided_slice %38 {offsets = [0, 128], sizes = [1, 128], strides = [1, 1]} : vector<1x512xf32> to vector<1x128xf32>
    %46 = arith.negf %45 : vector<1x128xf32>
    %47 = math.exp %46 : vector<1x128xf32>
    %cst_19 = arith.constant 1.000000e+00 : f32
    %48 = vector.broadcast %cst_19 : f32 to vector<1x128xf32>
    %49 = arith.addf %48, %47 : vector<1x128xf32>
    %50 = arith.divf %48, %49 : vector<1x128xf32>
    %51 = vector.extract_strided_slice %38 {offsets = [0, 256], sizes = [1, 128], strides = [1, 1]} : vector<1x512xf32> to vector<1x128xf32>
    %52 = vector.extract_strided_slice %38 {offsets = [0, 384], sizes = [1, 128], strides = [1, 1]} : vector<1x512xf32> to vector<1x128xf32>
    %53 = arith.mulf %44, %52 : vector<1x128xf32>
    %54 = arith.addf %51, %53 : vector<1x128xf32>
    %55 = math.tanh %54 : vector<1x128xf32>
    %cst_20 = arith.constant 1.000000e+00 : f32
    %56 = vector.broadcast %cst_20 : f32 to vector<1x128xf32>
    %57 = arith.subf %56, %50 : vector<1x128xf32>
    %58 = arith.mulf %57, %55 : vector<1x128xf32>
    %59 = arith.mulf %50, %6 : vector<1x128xf32>
    %60 = arith.addf %58, %59 : vector<1x128xf32>
    %c0_21 = arith.constant 0 : index
    %c0_22 = arith.constant 0 : index
    %61 = vector.load %arg11[%c0_21, %c0_22] : memref<8x128xf32, #tpu.memory_space<vmem>>, vector<1x128xf32>
    tpu.vector_store %arg11[%c0_21, %c0_22], %60 {strides = array<i32>} : memref<8x128xf32, #tpu.memory_space<vmem>>, vector<1x128xf32>,
    %62 = vector.extract_strided_slice %2 {offsets = [1, 0], sizes = [1, 384], strides = [1, 1]} : vector<8x384xf32> to vector<1x384xf32>
    %c0_23 = arith.constant 0 : index
    %c0_24 = arith.constant 0 : index
    %63 = vector.load %arg3[%c0_23, %c0_24] : memref<128x384xf32, #tpu.memory_space<vmem>>, vector<128x384xf32>
    %cst_25 = arith.constant dense<0.000000e+00> : vector<1x384xf32>
    %64 = tpu.matmul %35, %63, %cst_25 {dimension_numbers = #tpu.dot_dimension_numbers<[1], [0], [0], [1], [0, 0, 1, 1], [], []>} : vector<1x128xf32>, vector<128x384xf32>, vector<1x384xf32> -> vector<1x384xf32>
    %65 = vector.extract_strided_slice %62 {offsets = [0, 0], sizes = [1, 128], strides = [1, 1]} : vector<1x384xf32> to vector<1x128xf32>
    %66 = vector.extract_strided_slice %64 {offsets = [0, 0], sizes = [1, 128], strides = [1, 1]} : vector<1x384xf32> to vector<1x128xf32>
    %67 = arith.addf %65, %66 : vector<1x128xf32>
    %68 = arith.negf %67 : vector<1x128xf32>
    %69 = math.exp %68 : vector<1x128xf32>
    %cst_26 = arith.constant 1.000000e+00 : f32
    %70 = vector.broadcast %cst_26 : f32 to vector<1x128xf32>
    %71 = arith.addf %70, %69 : vector<1x128xf32>
    %72 = arith.divf %70, %71 : vector<1x128xf32>
    %73 = vector.extract_strided_slice %62 {offsets = [0, 128], sizes = [1, 128], strides = [1, 1]} : vector<1x384xf32> to vector<1x128xf32>
    %74 = vector.extract_strided_slice %64 {offsets = [0, 128], sizes = [1, 128], strides = [1, 1]} : vector<1x384xf32> to vector<1x128xf32>
    %75 = arith.addf %73, %74 : vector<1x128xf32>
    %76 = arith.negf %75 : vector<1x128xf32>
    %77 = math.exp %76 : vector<1x128xf32>
    %cst_27 = arith.constant 1.000000e+00 : f32
    %78 = vector.broadcast %cst_27 : f32 to vector<1x128xf32>
    %79 = arith.addf %78, %77 : vector<1x128xf32>
    %80 = arith.divf %78, %79 : vector<1x128xf32>
    %81 = vector.extract_strided_slice %62 {offsets = [0, 256], sizes = [1, 128], strides = [1, 1]} : vector<1x384xf32> to vector<1x128xf32>
    %82 = vector.extract_strided_slice %64 {offsets = [0, 256], sizes = [1, 128], strides = [1, 1]} : vector<1x384xf32> to vector<1x128xf32>
    %83 = arith.mulf %72, %82 : vector<1x128xf32>
    %84 = arith.addf %81, %83 : vector<1x128xf32>
    %85 = math.tanh %84 : vector<1x128xf32>
    %cst_28 = arith.constant 1.000000e+00 : f32
    %86 = vector.broadcast %cst_28 : f32 to vector<1x128xf32>
    %87 = arith.subf %86, %80 : vector<1x128xf32>
    %88 = arith.mulf %87, %85 : vector<1x128xf32>
    %89 = arith.mulf %80, %35 : vector<1x128xf32>
    %90 = arith.addf %88, %89 : vector<1x128xf32>
    %91 = tpu.concatenate %90, %60 in 1 : vector<1x128xf32>, vector<1x128xf32> -> vector<1x256xf32>
    %c0_29 = arith.constant 0 : index
    %c0_30 = arith.constant 0 : index
    %92 = vector.load %arg4[%c0_29, %c0_30] : memref<256x512xf32, #tpu.memory_space<vmem>>, vector<256x512xf32>
    %cst_31 = arith.constant dense<0.000000e+00> : vector<1x512xf32>
    %93 = tpu.matmul %91, %92, %cst_31 {dimension_numbers = #tpu.dot_dimension_numbers<[1], [0], [0], [1], [0, 0, 1, 1], [], []>} : vector<1x256xf32>, vector<256x512xf32>, vector<1x512xf32> -> vector<1x512xf32>
    %94 = vector.extract_strided_slice %93 {offsets = [0, 0], sizes = [1, 128], strides = [1, 1]} : vector<1x512xf32> to vector<1x128xf32>
    %95 = arith.negf %94 : vector<1x128xf32>
    %96 = math.exp %95 : vector<1x128xf32>
    %cst_32 = arith.constant 1.000000e+00 : f32
    %97 = vector.broadcast %cst_32 : f32 to vector<1x128xf32>
    %98 = arith.addf %97, %96 : vector<1x128xf32>
    %99 = arith.divf %97, %98 : vector<1x128xf32>
    %100 = vector.extract_strided_slice %93 {offsets = [0, 128], sizes = [1, 128], strides = [1, 1]} : vector<1x512xf32> to vector<1x128xf32>
    %101 = arith.negf %100 : vector<1x128xf32>
    %102 = math.exp %101 : vector<1x128xf32>
    %cst_33 = arith.constant 1.000000e+00 : f32
    %103 = vector.broadcast %cst_33 : f32 to vector<1x128xf32>
    %104 = arith.addf %103, %102 : vector<1x128xf32>
    %105 = arith.divf %103, %104 : vector<1x128xf32>
    %106 = vector.extract_strided_slice %93 {offsets = [0, 256], sizes = [1, 128], strides = [1, 1]} : vector<1x512xf32> to vector<1x128xf32>
    %107 = vector.extract_strided_slice %93 {offsets = [0, 384], sizes = [1, 128], strides = [1, 1]} : vector<1x512xf32> to vector<1x128xf32>
    %108 = arith.mulf %99, %107 : vector<1x128xf32>
    %109 = arith.addf %106, %108 : vector<1x128xf32>
    %110 = math.tanh %109 : vector<1x128xf32>
    %cst_34 = arith.constant 1.000000e+00 : f32
    %111 = vector.broadcast %cst_34 : f32 to vector<1x128xf32>
    %112 = arith.subf %111, %105 : vector<1x128xf32>
    %113 = arith.mulf %112, %110 : vector<1x128xf32>
    %114 = arith.mulf %105, %60 : vector<1x128xf32>
    %115 = arith.addf %113, %114 : vector<1x128xf32>
    %c1 = arith.constant 1 : index
    %c0_35 = arith.constant 0 : index
    %116 = vector.load %arg11[%c1, %c0_35] : memref<8x128xf32, #tpu.memory_space<vmem>>, vector<1x128xf32>
    tpu.vector_store %arg11[%c1, %c0_35], %115 {strides = array<i32>} : memref<8x128xf32, #tpu.memory_space<vmem>>, vector<1x128xf32>,
    %117 = vector.extract_strided_slice %2 {offsets = [2, 0], sizes = [1, 384], strides = [1, 1]} : vector<8x384xf32> to vector<1x384xf32>
    %c0_36 = arith.constant 0 : index
    %c0_37 = arith.constant 0 : index
    %118 = vector.load %arg3[%c0_36, %c0_37] : memref<128x384xf32, #tpu.memory_space<vmem>>, vector<128x384xf32>
    %cst_38 = arith.constant dense<0.000000e+00> : vector<1x384xf32>
    %119 = tpu.matmul %90, %118, %cst_38 {dimension_numbers = #tpu.dot_dimension_numbers<[1], [0], [0], [1], [0, 0, 1, 1], [], []>} : vector<1x128xf32>, vector<128x384xf32>, vector<1x384xf32> -> vector<1x384xf32>
    %120 = vector.extract_strided_slice %117 {offsets = [0, 0], sizes = [1, 128], strides = [1, 1]} : vector<1x384xf32> to vector<1x128xf32>
    %121 = vector.extract_strided_slice %119 {offsets = [0, 0], sizes = [1, 128], strides = [1, 1]} : vector<1x384xf32> to vector<1x128xf32>
    %122 = arith.addf %120, %121 : vector<1x128xf32>
    %123 = arith.negf %122 : vector<1x128xf32>
    %124 = math.exp %123 : vector<1x128xf32>
    %cst_39 = arith.constant 1.000000e+00 : f32
    %125 = vector.broadcast %cst_39 : f32 to vector<1x128xf32>
    %126 = arith.addf %125, %124 : vector<1x128xf32>
    %127 = arith.divf %125, %126 : vector<1x128xf32>
    %128 = vector.extract_strided_slice %117 {offsets = [0, 128], sizes = [1, 128], strides = [1, 1]} : vector<1x384xf32> to vector<1x128xf32>
    %129 = vector.extract_strided_slice %119 {offsets = [0, 128], sizes = [1, 128], strides = [1, 1]} : vector<1x384xf32> to vector<1x128xf32>
    %130 = arith.addf %128, %129 : vector<1x128xf32>
    %131 = arith.negf %130 : vector<1x128xf32>
    %132 = math.exp %131 : vector<1x128xf32>
    %cst_40 = arith.constant 1.000000e+00 : f32
    %133 = vector.broadcast %cst_40 : f32 to vector<1x128xf32>
    %134 = arith.addf %133, %132 : vector<1x128xf32>
    %135 = arith.divf %133, %134 : vector<1x128xf32>
    %136 = vector.extract_strided_slice %117 {offsets = [0, 256], sizes = [1, 128], strides = [1, 1]} : vector<1x384xf32> to vector<1x128xf32>
    %137 = vector.extract_strided_slice %119 {offsets = [0, 256], sizes = [1, 128], strides = [1, 1]} : vector<1x384xf32> to vector<1x128xf32>
    %138 = arith.mulf %127, %137 : vector<1x128xf32>
    %139 = arith.addf %136, %138 : vector<1x128xf32>
    %140 = math.tanh %139 : vector<1x128xf32>
    %cst_41 = arith.constant 1.000000e+00 : f32
    %141 = vector.broadcast %cst_41 : f32 to vector<1x128xf32>
    %142 = arith.subf %141, %135 : vector<1x128xf32>
    %143 = arith.mulf %142, %140 : vector<1x128xf32>
    %144 = arith.mulf %135, %90 : vector<1x128xf32>
    %145 = arith.addf %143, %144 : vector<1x128xf32>
    %146 = tpu.concatenate %145, %115 in 1 : vector<1x128xf32>, vector<1x128xf32> -> vector<1x256xf32>
    %c0_42 = arith.constant 0 : index
    %c0_43 = arith.constant 0 : index
    %147 = vector.load %arg4[%c0_42, %c0_43] : memref<256x512xf32, #tpu.memory_space<vmem>>, vector<256x512xf32>
    %cst_44 = arith.constant dense<0.000000e+00> : vector<1x512xf32>
    %148 = tpu.matmul %146, %147, %cst_44 {dimension_numbers = #tpu.dot_dimension_numbers<[1], [0], [0], [1], [0, 0, 1, 1], [], []>} : vector<1x256xf32>, vector<256x512xf32>, vector<1x512xf32> -> vector<1x512xf32>
    %149 = vector.extract_strided_slice %148 {offsets = [0, 0], sizes = [1, 128], strides = [1, 1]} : vector<1x512xf32> to vector<1x128xf32>
    %150 = arith.negf %149 : vector<1x128xf32>
    %151 = math.exp %150 : vector<1x128xf32>
    %cst_45 = arith.constant 1.000000e+00 : f32
    %152 = vector.broadcast %cst_45 : f32 to vector<1x128xf32>
    %153 = arith.addf %152, %151 : vector<1x128xf32>
    %154 = arith.divf %152, %153 : vector<1x128xf32>
    %155 = vector.extract_strided_slice %148 {offsets = [0, 128], sizes = [1, 128], strides = [1, 1]} : vector<1x512xf32> to vector<1x128xf32>
    %156 = arith.negf %155 : vector<1x128xf32>
    %157 = math.exp %156 : vector<1x128xf32>
    %cst_46 = arith.constant 1.000000e+00 : f32
    %158 = vector.broadcast %cst_46 : f32 to vector<1x128xf32>
    %159 = arith.addf %158, %157 : vector<1x128xf32>
    %160 = arith.divf %158, %159 : vector<1x128xf32>
    %161 = vector.extract_strided_slice %148 {offsets = [0, 256], sizes = [1, 128], strides = [1, 1]} : vector<1x512xf32> to vector<1x128xf32>
    %162 = vector.extract_strided_slice %148 {offsets = [0, 384], sizes = [1, 128], strides = [1, 1]} : vector<1x512xf32> to vector<1x128xf32>
    %163 = arith.mulf %154, %162 : vector<1x128xf32>
    %164 = arith.addf %161, %163 : vector<1x128xf32>
    %165 = math.tanh %164 : vector<1x128xf32>
    %cst_47 = arith.constant 1.000000e+00 : f32
    %166 = vector.broadcast %cst_47 : f32 to vector<1x128xf32>
    %167 = arith.subf %166, %160 : vector<1x128xf32>
    %168 = arith.mulf %167, %165 : vector<1x128xf32>
    %169 = arith.mulf %160, %115 : vector<1x128xf32>
    %170 = arith.addf %168, %169 : vector<1x128xf32>
    %c2 = arith.constant 2 : index
    %c0_48 = arith.constant 0 : index
    %171 = vector.load %arg11[%c2, %c0_48] : memref<8x128xf32, #tpu.memory_space<vmem>>, vector<1x128xf32>
    tpu.vector_store %arg11[%c2, %c0_48], %170 {strides = array<i32>} : memref<8x128xf32, #tpu.memory_space<vmem>>, vector<1x128xf32>,
    %172 = vector.extract_strided_slice %2 {offsets = [3, 0], sizes = [1, 384], strides = [1, 1]} : vector<8x384xf32> to vector<1x384xf32>
    %c0_49 = arith.constant 0 : index
    %c0_50 = arith.constant 0 : index
    %173 = vector.load %arg3[%c0_49, %c0_50] : memref<128x384xf32, #tpu.memory_space<vmem>>, vector<128x384xf32>
    %cst_51 = arith.constant dense<0.000000e+00> : vector<1x384xf32>
    %174 = tpu.matmul %145, %173, %cst_51 {dimension_numbers = #tpu.dot_dimension_numbers<[1], [0], [0], [1], [0, 0, 1, 1], [], []>} : vector<1x128xf32>, vector<128x384xf32>, vector<1x384xf32> -> vector<1x384xf32>
    %175 = vector.extract_strided_slice %172 {offsets = [0, 0], sizes = [1, 128], strides = [1, 1]} : vector<1x384xf32> to vector<1x128xf32>
    %176 = vector.extract_strided_slice %174 {offsets = [0, 0], sizes = [1, 128], strides = [1, 1]} : vector<1x384xf32> to vector<1x128xf32>
    %177 = arith.addf %175, %176 : vector<1x128xf32>
    %178 = arith.negf %177 : vector<1x128xf32>
    %179 = math.exp %178 : vector<1x128xf32>
    %cst_52 = arith.constant 1.000000e+00 : f32
    %180 = vector.broadcast %cst_52 : f32 to vector<1x128xf32>
    %181 = arith.addf %180, %179 : vector<1x128xf32>
    %182 = arith.divf %180, %181 : vector<1x128xf32>
    %183 = vector.extract_strided_slice %172 {offsets = [0, 128], sizes = [1, 128], strides = [1, 1]} : vector<1x384xf32> to vector<1x128xf32>
    %184 = vector.extract_strided_slice %174 {offsets = [0, 128], sizes = [1, 128], strides = [1, 1]} : vector<1x384xf32> to vector<1x128xf32>
    %185 = arith.addf %183, %184 : vector<1x128xf32>
    %186 = arith.negf %185 : vector<1x128xf32>
    %187 = math.exp %186 : vector<1x128xf32>
    %cst_53 = arith.constant 1.000000e+00 : f32
    %188 = vector.broadcast %cst_53 : f32 to vector<1x128xf32>
    %189 = arith.addf %188, %187 : vector<1x128xf32>
    %190 = arith.divf %188, %189 : vector<1x128xf32>
    %191 = vector.extract_strided_slice %172 {offsets = [0, 256], sizes = [1, 128], strides = [1, 1]} : vector<1x384xf32> to vector<1x128xf32>
    %192 = vector.extract_strided_slice %174 {offsets = [0, 256], sizes = [1, 128], strides = [1, 1]} : vector<1x384xf32> to vector<1x128xf32>
    %193 = arith.mulf %182, %192 : vector<1x128xf32>
    %194 = arith.addf %191, %193 : vector<1x128xf32>
    %195 = math.tanh %194 : vector<1x128xf32>
    %cst_54 = arith.constant 1.000000e+00 : f32
    %196 = vector.broadcast %cst_54 : f32 to vector<1x128xf32>
    %197 = arith.subf %196, %190 : vector<1x128xf32>
    %198 = arith.mulf %197, %195 : vector<1x128xf32>
    %199 = arith.mulf %190, %145 : vector<1x128xf32>
    %200 = arith.addf %198, %199 : vector<1x128xf32>
    %201 = tpu.concatenate %200, %170 in 1 : vector<1x128xf32>, vector<1x128xf32> -> vector<1x256xf32>
    %c0_55 = arith.constant 0 : index
    %c0_56 = arith.constant 0 : index
    %202 = vector.load %arg4[%c0_55, %c0_56] : memref<256x512xf32, #tpu.memory_space<vmem>>, vector<256x512xf32>
    %cst_57 = arith.constant dense<0.000000e+00> : vector<1x512xf32>
    %203 = tpu.matmul %201, %202, %cst_57 {dimension_numbers = #tpu.dot_dimension_numbers<[1], [0], [0], [1], [0, 0, 1, 1], [], []>} : vector<1x256xf32>, vector<256x512xf32>, vector<1x512xf32> -> vector<1x512xf32>
    %204 = vector.extract_strided_slice %203 {offsets = [0, 0], sizes = [1, 128], strides = [1, 1]} : vector<1x512xf32> to vector<1x128xf32>
    %205 = arith.negf %204 : vector<1x128xf32>
    %206 = math.exp %205 : vector<1x128xf32>
    %cst_58 = arith.constant 1.000000e+00 : f32
    %207 = vector.broadcast %cst_58 : f32 to vector<1x128xf32>
    %208 = arith.addf %207, %206 : vector<1x128xf32>
    %209 = arith.divf %207, %208 : vector<1x128xf32>
    %210 = vector.extract_strided_slice %203 {offsets = [0, 128], sizes = [1, 128], strides = [1, 1]} : vector<1x512xf32> to vector<1x128xf32>
    %211 = arith.negf %210 : vector<1x128xf32>
    %212 = math.exp %211 : vector<1x128xf32>
    %cst_59 = arith.constant 1.000000e+00 : f32
    %213 = vector.broadcast %cst_59 : f32 to vector<1x128xf32>
    %214 = arith.addf %213, %212 : vector<1x128xf32>
    %215 = arith.divf %213, %214 : vector<1x128xf32>
    %216 = vector.extract_strided_slice %203 {offsets = [0, 256], sizes = [1, 128], strides = [1, 1]} : vector<1x512xf32> to vector<1x128xf32>
    %217 = vector.extract_strided_slice %203 {offsets = [0, 384], sizes = [1, 128], strides = [1, 1]} : vector<1x512xf32> to vector<1x128xf32>
    %218 = arith.mulf %209, %217 : vector<1x128xf32>
    %219 = arith.addf %216, %218 : vector<1x128xf32>
    %220 = math.tanh %219 : vector<1x128xf32>
    %cst_60 = arith.constant 1.000000e+00 : f32
    %221 = vector.broadcast %cst_60 : f32 to vector<1x128xf32>
    %222 = arith.subf %221, %215 : vector<1x128xf32>
    %223 = arith.mulf %222, %220 : vector<1x128xf32>
    %224 = arith.mulf %215, %170 : vector<1x128xf32>
    %225 = arith.addf %223, %224 : vector<1x128xf32>
    %c3 = arith.constant 3 : index
    %c0_61 = arith.constant 0 : index
    %226 = vector.load %arg11[%c3, %c0_61] : memref<8x128xf32, #tpu.memory_space<vmem>>, vector<1x128xf32>
    tpu.vector_store %arg11[%c3, %c0_61], %225 {strides = array<i32>} : memref<8x128xf32, #tpu.memory_space<vmem>>, vector<1x128xf32>,
    %227 = vector.extract_strided_slice %2 {offsets = [4, 0], sizes = [1, 384], strides = [1, 1]} : vector<8x384xf32> to vector<1x384xf32>
    %c0_62 = arith.constant 0 : index
    %c0_63 = arith.constant 0 : index
    %228 = vector.load %arg3[%c0_62, %c0_63] : memref<128x384xf32, #tpu.memory_space<vmem>>, vector<128x384xf32>
    %cst_64 = arith.constant dense<0.000000e+00> : vector<1x384xf32>
    %229 = tpu.matmul %200, %228, %cst_64 {dimension_numbers = #tpu.dot_dimension_numbers<[1], [0], [0], [1], [0, 0, 1, 1], [], []>} : vector<1x128xf32>, vector<128x384xf32>, vector<1x384xf32> -> vector<1x384xf32>
    %230 = vector.extract_strided_slice %227 {offsets = [0, 0], sizes = [1, 128], strides = [1, 1]} : vector<1x384xf32> to vector<1x128xf32>
    %231 = vector.extract_strided_slice %229 {offsets = [0, 0], sizes = [1, 128], strides = [1, 1]} : vector<1x384xf32> to vector<1x128xf32>
    %232 = arith.addf %230, %231 : vector<1x128xf32>
    %233 = arith.negf %232 : vector<1x128xf32>
    %234 = math.exp %233 : vector<1x128xf32>
    %cst_65 = arith.constant 1.000000e+00 : f32
    %235 = vector.broadcast %cst_65 : f32 to vector<1x128xf32>
    %236 = arith.addf %235, %234 : vector<1x128xf32>
    %237 = arith.divf %235, %236 : vector<1x128xf32>
    %238 = vector.extract_strided_slice %227 {offsets = [0, 128], sizes = [1, 128], strides = [1, 1]} : vector<1x384xf32> to vector<1x128xf32>
    %239 = vector.extract_strided_slice %229 {offsets = [0, 128], sizes = [1, 128], strides = [1, 1]} : vector<1x384xf32> to vector<1x128xf32>
    %240 = arith.addf %238, %239 : vector<1x128xf32>
    %241 = arith.negf %240 : vector<1x128xf32>
    %242 = math.exp %241 : vector<1x128xf32>
    %cst_66 = arith.constant 1.000000e+00 : f32
    %243 = vector.broadcast %cst_66 : f32 to vector<1x128xf32>
    %244 = arith.addf %243, %242 : vector<1x128xf32>
    %245 = arith.divf %243, %244 : vector<1x128xf32>
    %246 = vector.extract_strided_slice %227 {offsets = [0, 256], sizes = [1, 128], strides = [1, 1]} : vector<1x384xf32> to vector<1x128xf32>
    %247 = vector.extract_strided_slice %229 {offsets = [0, 256], sizes = [1, 128], strides = [1, 1]} : vector<1x384xf32> to vector<1x128xf32>
    %248 = arith.mulf %237, %247 : vector<1x128xf32>
    %249 = arith.addf %246, %248 : vector<1x128xf32>
    %250 = math.tanh %249 : vector<1x128xf32>
    %cst_67 = arith.constant 1.000000e+00 : f32
    %251 = vector.broadcast %cst_67 : f32 to vector<1x128xf32>
    %252 = arith.subf %251, %245 : vector<1x128xf32>
    %253 = arith.mulf %252, %250 : vector<1x128xf32>
    %254 = arith.mulf %245, %200 : vector<1x128xf32>
    %255 = arith.addf %253, %254 : vector<1x128xf32>
    %256 = tpu.concatenate %255, %225 in 1 : vector<1x128xf32>, vector<1x128xf32> -> vector<1x256xf32>
    %c0_68 = arith.constant 0 : index
    %c0_69 = arith.constant 0 : index
    %257 = vector.load %arg4[%c0_68, %c0_69] : memref<256x512xf32, #tpu.memory_space<vmem>>, vector<256x512xf32>
    %cst_70 = arith.constant dense<0.000000e+00> : vector<1x512xf32>
    %258 = tpu.matmul %256, %257, %cst_70 {dimension_numbers = #tpu.dot_dimension_numbers<[1], [0], [0], [1], [0, 0, 1, 1], [], []>} : vector<1x256xf32>, vector<256x512xf32>, vector<1x512xf32> -> vector<1x512xf32>
    %259 = vector.extract_strided_slice %258 {offsets = [0, 0], sizes = [1, 128], strides = [1, 1]} : vector<1x512xf32> to vector<1x128xf32>
    %260 = arith.negf %259 : vector<1x128xf32>
    %261 = math.exp %260 : vector<1x128xf32>
    %cst_71 = arith.constant 1.000000e+00 : f32
    %262 = vector.broadcast %cst_71 : f32 to vector<1x128xf32>
    %263 = arith.addf %262, %261 : vector<1x128xf32>
    %264 = arith.divf %262, %263 : vector<1x128xf32>
    %265 = vector.extract_strided_slice %258 {offsets = [0, 128], sizes = [1, 128], strides = [1, 1]} : vector<1x512xf32> to vector<1x128xf32>
    %266 = arith.negf %265 : vector<1x128xf32>
    %267 = math.exp %266 : vector<1x128xf32>
    %cst_72 = arith.constant 1.000000e+00 : f32
    %268 = vector.broadcast %cst_72 : f32 to vector<1x128xf32>
    %269 = arith.addf %268, %267 : vector<1x128xf32>
    %270 = arith.divf %268, %269 : vector<1x128xf32>
    %271 = vector.extract_strided_slice %258 {offsets = [0, 256], sizes = [1, 128], strides = [1, 1]} : vector<1x512xf32> to vector<1x128xf32>
    %272 = vector.extract_strided_slice %258 {offsets = [0, 384], sizes = [1, 128], strides = [1, 1]} : vector<1x512xf32> to vector<1x128xf32>
    %273 = arith.mulf %264, %272 : vector<1x128xf32>
    %274 = arith.addf %271, %273 : vector<1x128xf32>
    %275 = math.tanh %274 : vector<1x128xf32>
    %cst_73 = arith.constant 1.000000e+00 : f32
    %276 = vector.broadcast %cst_73 : f32 to vector<1x128xf32>
    %277 = arith.subf %276, %270 : vector<1x128xf32>
    %278 = arith.mulf %277, %275 : vector<1x128xf32>
    %279 = arith.mulf %270, %225 : vector<1x128xf32>
    %280 = arith.addf %278, %279 : vector<1x128xf32>
    %c4 = arith.constant 4 : index
    %c0_74 = arith.constant 0 : index
    %281 = vector.load %arg11[%c4, %c0_74] : memref<8x128xf32, #tpu.memory_space<vmem>>, vector<1x128xf32>
    tpu.vector_store %arg11[%c4, %c0_74], %280 {strides = array<i32>} : memref<8x128xf32, #tpu.memory_space<vmem>>, vector<1x128xf32>,
    %282 = vector.extract_strided_slice %2 {offsets = [5, 0], sizes = [1, 384], strides = [1, 1]} : vector<8x384xf32> to vector<1x384xf32>
    %c0_75 = arith.constant 0 : index
    %c0_76 = arith.constant 0 : index
    %283 = vector.load %arg3[%c0_75, %c0_76] : memref<128x384xf32, #tpu.memory_space<vmem>>, vector<128x384xf32>
    %cst_77 = arith.constant dense<0.000000e+00> : vector<1x384xf32>
    %284 = tpu.matmul %255, %283, %cst_77 {dimension_numbers = #tpu.dot_dimension_numbers<[1], [0], [0], [1], [0, 0, 1, 1], [], []>} : vector<1x128xf32>, vector<128x384xf32>, vector<1x384xf32> -> vector<1x384xf32>
    %285 = vector.extract_strided_slice %282 {offsets = [0, 0], sizes = [1, 128], strides = [1, 1]} : vector<1x384xf32> to vector<1x128xf32>
    %286 = vector.extract_strided_slice %284 {offsets = [0, 0], sizes = [1, 128], strides = [1, 1]} : vector<1x384xf32> to vector<1x128xf32>
    %287 = arith.addf %285, %286 : vector<1x128xf32>
    %288 = arith.negf %287 : vector<1x128xf32>
    %289 = math.exp %288 : vector<1x128xf32>
    %cst_78 = arith.constant 1.000000e+00 : f32
    %290 = vector.broadcast %cst_78 : f32 to vector<1x128xf32>
    %291 = arith.addf %290, %289 : vector<1x128xf32>
    %292 = arith.divf %290, %291 : vector<1x128xf32>
    %293 = vector.extract_strided_slice %282 {offsets = [0, 128], sizes = [1, 128], strides = [1, 1]} : vector<1x384xf32> to vector<1x128xf32>
    %294 = vector.extract_strided_slice %284 {offsets = [0, 128], sizes = [1, 128], strides = [1, 1]} : vector<1x384xf32> to vector<1x128xf32>
    %295 = arith.addf %293, %294 : vector<1x128xf32>
    %296 = arith.negf %295 : vector<1x128xf32>
    %297 = math.exp %296 : vector<1x128xf32>
    %cst_79 = arith.constant 1.000000e+00 : f32
    %298 = vector.broadcast %cst_79 : f32 to vector<1x128xf32>
    %299 = arith.addf %298, %297 : vector<1x128xf32>
    %300 = arith.divf %298, %299 : vector<1x128xf32>
    %301 = vector.extract_strided_slice %282 {offsets = [0, 256], sizes = [1, 128], strides = [1, 1]} : vector<1x384xf32> to vector<1x128xf32>
    %302 = vector.extract_strided_slice %284 {offsets = [0, 256], sizes = [1, 128], strides = [1, 1]} : vector<1x384xf32> to vector<1x128xf32>
    %303 = arith.mulf %292, %302 : vector<1x128xf32>
    %304 = arith.addf %301, %303 : vector<1x128xf32>
    %305 = math.tanh %304 : vector<1x128xf32>
    %cst_80 = arith.constant 1.000000e+00 : f32
    %306 = vector.broadcast %cst_80 : f32 to vector<1x128xf32>
    %307 = arith.subf %306, %300 : vector<1x128xf32>
    %308 = arith.mulf %307, %305 : vector<1x128xf32>
    %309 = arith.mulf %300, %255 : vector<1x128xf32>
    %310 = arith.addf %308, %309 : vector<1x128xf32>
    %311 = tpu.concatenate %310, %280 in 1 : vector<1x128xf32>, vector<1x128xf32> -> vector<1x256xf32>
    %c0_81 = arith.constant 0 : index
    %c0_82 = arith.constant 0 : index
    %312 = vector.load %arg4[%c0_81, %c0_82] : memref<256x512xf32, #tpu.memory_space<vmem>>, vector<256x512xf32>
    %cst_83 = arith.constant dense<0.000000e+00> : vector<1x512xf32>
    %313 = tpu.matmul %311, %312, %cst_83 {dimension_numbers = #tpu.dot_dimension_numbers<[1], [0], [0], [1], [0, 0, 1, 1], [], []>} : vector<1x256xf32>, vector<256x512xf32>, vector<1x512xf32> -> vector<1x512xf32>
    %314 = vector.extract_strided_slice %313 {offsets = [0, 0], sizes = [1, 128], strides = [1, 1]} : vector<1x512xf32> to vector<1x128xf32>
    %315 = arith.negf %314 : vector<1x128xf32>
    %316 = math.exp %315 : vector<1x128xf32>
    %cst_84 = arith.constant 1.000000e+00 : f32
    %317 = vector.broadcast %cst_84 : f32 to vector<1x128xf32>
    %318 = arith.addf %317, %316 : vector<1x128xf32>
    %319 = arith.divf %317, %318 : vector<1x128xf32>
    %320 = vector.extract_strided_slice %313 {offsets = [0, 128], sizes = [1, 128], strides = [1, 1]} : vector<1x512xf32> to vector<1x128xf32>
    %321 = arith.negf %320 : vector<1x128xf32>
    %322 = math.exp %321 : vector<1x128xf32>
    %cst_85 = arith.constant 1.000000e+00 : f32
    %323 = vector.broadcast %cst_85 : f32 to vector<1x128xf32>
    %324 = arith.addf %323, %322 : vector<1x128xf32>
    %325 = arith.divf %323, %324 : vector<1x128xf32>
    %326 = vector.extract_strided_slice %313 {offsets = [0, 256], sizes = [1, 128], strides = [1, 1]} : vector<1x512xf32> to vector<1x128xf32>
    %327 = vector.extract_strided_slice %313 {offsets = [0, 384], sizes = [1, 128], strides = [1, 1]} : vector<1x512xf32> to vector<1x128xf32>
    %328 = arith.mulf %319, %327 : vector<1x128xf32>
    %329 = arith.addf %326, %328 : vector<1x128xf32>
    %330 = math.tanh %329 : vector<1x128xf32>
    %cst_86 = arith.constant 1.000000e+00 : f32
    %331 = vector.broadcast %cst_86 : f32 to vector<1x128xf32>
    %332 = arith.subf %331, %325 : vector<1x128xf32>
    %333 = arith.mulf %332, %330 : vector<1x128xf32>
    %334 = arith.mulf %325, %280 : vector<1x128xf32>
    %335 = arith.addf %333, %334 : vector<1x128xf32>
    %c5 = arith.constant 5 : index
    %c0_87 = arith.constant 0 : index
    %336 = vector.load %arg11[%c5, %c0_87] : memref<8x128xf32, #tpu.memory_space<vmem>>, vector<1x128xf32>
    tpu.vector_store %arg11[%c5, %c0_87], %335 {strides = array<i32>} : memref<8x128xf32, #tpu.memory_space<vmem>>, vector<1x128xf32>,
    %337 = vector.extract_strided_slice %2 {offsets = [6, 0], sizes = [1, 384], strides = [1, 1]} : vector<8x384xf32> to vector<1x384xf32>
    %c0_88 = arith.constant 0 : index
    %c0_89 = arith.constant 0 : index
    %338 = vector.load %arg3[%c0_88, %c0_89] : memref<128x384xf32, #tpu.memory_space<vmem>>, vector<128x384xf32>
    %cst_90 = arith.constant dense<0.000000e+00> : vector<1x384xf32>
    %339 = tpu.matmul %310, %338, %cst_90 {dimension_numbers = #tpu.dot_dimension_numbers<[1], [0], [0], [1], [0, 0, 1, 1], [], []>} : vector<1x128xf32>, vector<128x384xf32>, vector<1x384xf32> -> vector<1x384xf32>
    %340 = vector.extract_strided_slice %337 {offsets = [0, 0], sizes = [1, 128], strides = [1, 1]} : vector<1x384xf32> to vector<1x128xf32>
    %341 = vector.extract_strided_slice %339 {offsets = [0, 0], sizes = [1, 128], strides = [1, 1]} : vector<1x384xf32> to vector<1x128xf32>
    %342 = arith.addf %340, %341 : vector<1x128xf32>
    %343 = arith.negf %342 : vector<1x128xf32>
    %344 = math.exp %343 : vector<1x128xf32>
    %cst_91 = arith.constant 1.000000e+00 : f32
    %345 = vector.broadcast %cst_91 : f32 to vector<1x128xf32>
    %346 = arith.addf %345, %344 : vector<1x128xf32>
    %347 = arith.divf %345, %346 : vector<1x128xf32>
    %348 = vector.extract_strided_slice %337 {offsets = [0, 128], sizes = [1, 128], strides = [1, 1]} : vector<1x384xf32> to vector<1x128xf32>
    %349 = vector.extract_strided_slice %339 {offsets = [0, 128], sizes = [1, 128], strides = [1, 1]} : vector<1x384xf32> to vector<1x128xf32>
    %350 = arith.addf %348, %349 : vector<1x128xf32>
    %351 = arith.negf %350 : vector<1x128xf32>
    %352 = math.exp %351 : vector<1x128xf32>
    %cst_92 = arith.constant 1.000000e+00 : f32
    %353 = vector.broadcast %cst_92 : f32 to vector<1x128xf32>
    %354 = arith.addf %353, %352 : vector<1x128xf32>
    %355 = arith.divf %353, %354 : vector<1x128xf32>
    %356 = vector.extract_strided_slice %337 {offsets = [0, 256], sizes = [1, 128], strides = [1, 1]} : vector<1x384xf32> to vector<1x128xf32>
    %357 = vector.extract_strided_slice %339 {offsets = [0, 256], sizes = [1, 128], strides = [1, 1]} : vector<1x384xf32> to vector<1x128xf32>
    %358 = arith.mulf %347, %357 : vector<1x128xf32>
    %359 = arith.addf %356, %358 : vector<1x128xf32>
    %360 = math.tanh %359 : vector<1x128xf32>
    %cst_93 = arith.constant 1.000000e+00 : f32
    %361 = vector.broadcast %cst_93 : f32 to vector<1x128xf32>
    %362 = arith.subf %361, %355 : vector<1x128xf32>
    %363 = arith.mulf %362, %360 : vector<1x128xf32>
    %364 = arith.mulf %355, %310 : vector<1x128xf32>
    %365 = arith.addf %363, %364 : vector<1x128xf32>
    %366 = tpu.concatenate %365, %335 in 1 : vector<1x128xf32>, vector<1x128xf32> -> vector<1x256xf32>
    %c0_94 = arith.constant 0 : index
    %c0_95 = arith.constant 0 : index
    %367 = vector.load %arg4[%c0_94, %c0_95] : memref<256x512xf32, #tpu.memory_space<vmem>>, vector<256x512xf32>
    %cst_96 = arith.constant dense<0.000000e+00> : vector<1x512xf32>
    %368 = tpu.matmul %366, %367, %cst_96 {dimension_numbers = #tpu.dot_dimension_numbers<[1], [0], [0], [1], [0, 0, 1, 1], [], []>} : vector<1x256xf32>, vector<256x512xf32>, vector<1x512xf32> -> vector<1x512xf32>
    %369 = vector.extract_strided_slice %368 {offsets = [0, 0], sizes = [1, 128], strides = [1, 1]} : vector<1x512xf32> to vector<1x128xf32>
    %370 = arith.negf %369 : vector<1x128xf32>
    %371 = math.exp %370 : vector<1x128xf32>
    %cst_97 = arith.constant 1.000000e+00 : f32
    %372 = vector.broadcast %cst_97 : f32 to vector<1x128xf32>
    %373 = arith.addf %372, %371 : vector<1x128xf32>
    %374 = arith.divf %372, %373 : vector<1x128xf32>
    %375 = vector.extract_strided_slice %368 {offsets = [0, 128], sizes = [1, 128], strides = [1, 1]} : vector<1x512xf32> to vector<1x128xf32>
    %376 = arith.negf %375 : vector<1x128xf32>
    %377 = math.exp %376 : vector<1x128xf32>
    %cst_98 = arith.constant 1.000000e+00 : f32
    %378 = vector.broadcast %cst_98 : f32 to vector<1x128xf32>
    %379 = arith.addf %378, %377 : vector<1x128xf32>
    %380 = arith.divf %378, %379 : vector<1x128xf32>
    %381 = vector.extract_strided_slice %368 {offsets = [0, 256], sizes = [1, 128], strides = [1, 1]} : vector<1x512xf32> to vector<1x128xf32>
    %382 = vector.extract_strided_slice %368 {offsets = [0, 384], sizes = [1, 128], strides = [1, 1]} : vector<1x512xf32> to vector<1x128xf32>
    %383 = arith.mulf %374, %382 : vector<1x128xf32>
    %384 = arith.addf %381, %383 : vector<1x128xf32>
    %385 = math.tanh %384 : vector<1x128xf32>
    %cst_99 = arith.constant 1.000000e+00 : f32
    %386 = vector.broadcast %cst_99 : f32 to vector<1x128xf32>
    %387 = arith.subf %386, %380 : vector<1x128xf32>
    %388 = arith.mulf %387, %385 : vector<1x128xf32>
    %389 = arith.mulf %380, %335 : vector<1x128xf32>
    %390 = arith.addf %388, %389 : vector<1x128xf32>
    %c6 = arith.constant 6 : index
    %c0_100 = arith.constant 0 : index
    %391 = vector.load %arg11[%c6, %c0_100] : memref<8x128xf32, #tpu.memory_space<vmem>>, vector<1x128xf32>
    tpu.vector_store %arg11[%c6, %c0_100], %390 {strides = array<i32>} : memref<8x128xf32, #tpu.memory_space<vmem>>, vector<1x128xf32>,
    %392 = vector.extract_strided_slice %2 {offsets = [7, 0], sizes = [1, 384], strides = [1, 1]} : vector<8x384xf32> to vector<1x384xf32>
    %c0_101 = arith.constant 0 : index
    %c0_102 = arith.constant 0 : index
    %393 = vector.load %arg3[%c0_101, %c0_102] : memref<128x384xf32, #tpu.memory_space<vmem>>, vector<128x384xf32>
    %cst_103 = arith.constant dense<0.000000e+00> : vector<1x384xf32>
    %394 = tpu.matmul %365, %393, %cst_103 {dimension_numbers = #tpu.dot_dimension_numbers<[1], [0], [0], [1], [0, 0, 1, 1], [], []>} : vector<1x128xf32>, vector<128x384xf32>, vector<1x384xf32> -> vector<1x384xf32>
    %395 = vector.extract_strided_slice %392 {offsets = [0, 0], sizes = [1, 128], strides = [1, 1]} : vector<1x384xf32> to vector<1x128xf32>
    %396 = vector.extract_strided_slice %394 {offsets = [0, 0], sizes = [1, 128], strides = [1, 1]} : vector<1x384xf32> to vector<1x128xf32>
    %397 = arith.addf %395, %396 : vector<1x128xf32>
    %398 = arith.negf %397 : vector<1x128xf32>
    %399 = math.exp %398 : vector<1x128xf32>
    %cst_104 = arith.constant 1.000000e+00 : f32
    %400 = vector.broadcast %cst_104 : f32 to vector<1x128xf32>
    %401 = arith.addf %400, %399 : vector<1x128xf32>
    %402 = arith.divf %400, %401 : vector<1x128xf32>
    %403 = vector.extract_strided_slice %392 {offsets = [0, 128], sizes = [1, 128], strides = [1, 1]} : vector<1x384xf32> to vector<1x128xf32>
    %404 = vector.extract_strided_slice %394 {offsets = [0, 128], sizes = [1, 128], strides = [1, 1]} : vector<1x384xf32> to vector<1x128xf32>
    %405 = arith.addf %403, %404 : vector<1x128xf32>
    %406 = arith.negf %405 : vector<1x128xf32>
    %407 = math.exp %406 : vector<1x128xf32>
    %cst_105 = arith.constant 1.000000e+00 : f32
    %408 = vector.broadcast %cst_105 : f32 to vector<1x128xf32>
    %409 = arith.addf %408, %407 : vector<1x128xf32>
    %410 = arith.divf %408, %409 : vector<1x128xf32>
    %411 = vector.extract_strided_slice %392 {offsets = [0, 256], sizes = [1, 128], strides = [1, 1]} : vector<1x384xf32> to vector<1x128xf32>
    %412 = vector.extract_strided_slice %394 {offsets = [0, 256], sizes = [1, 128], strides = [1, 1]} : vector<1x384xf32> to vector<1x128xf32>
    %413 = arith.mulf %402, %412 : vector<1x128xf32>
    %414 = arith.addf %411, %413 : vector<1x128xf32>
    %415 = math.tanh %414 : vector<1x128xf32>
    %cst_106 = arith.constant 1.000000e+00 : f32
    %416 = vector.broadcast %cst_106 : f32 to vector<1x128xf32>
    %417 = arith.subf %416, %410 : vector<1x128xf32>
    %418 = arith.mulf %417, %415 : vector<1x128xf32>
    %419 = arith.mulf %410, %365 : vector<1x128xf32>
    %420 = arith.addf %418, %419 : vector<1x128xf32>
    %421 = tpu.concatenate %420, %390 in 1 : vector<1x128xf32>, vector<1x128xf32> -> vector<1x256xf32>
    %c0_107 = arith.constant 0 : index
    %c0_108 = arith.constant 0 : index
    %422 = vector.load %arg4[%c0_107, %c0_108] : memref<256x512xf32, #tpu.memory_space<vmem>>, vector<256x512xf32>
    %cst_109 = arith.constant dense<0.000000e+00> : vector<1x512xf32>
    %423 = tpu.matmul %421, %422, %cst_109 {dimension_numbers = #tpu.dot_dimension_numbers<[1], [0], [0], [1], [0, 0, 1, 1], [], []>} : vector<1x256xf32>, vector<256x512xf32>, vector<1x512xf32> -> vector<1x512xf32>
    %424 = vector.extract_strided_slice %423 {offsets = [0, 0], sizes = [1, 128], strides = [1, 1]} : vector<1x512xf32> to vector<1x128xf32>
    %425 = arith.negf %424 : vector<1x128xf32>
    %426 = math.exp %425 : vector<1x128xf32>
    %cst_110 = arith.constant 1.000000e+00 : f32
    %427 = vector.broadcast %cst_110 : f32 to vector<1x128xf32>
    %428 = arith.addf %427, %426 : vector<1x128xf32>
    %429 = arith.divf %427, %428 : vector<1x128xf32>
    %430 = vector.extract_strided_slice %423 {offsets = [0, 128], sizes = [1, 128], strides = [1, 1]} : vector<1x512xf32> to vector<1x128xf32>
    %431 = arith.negf %430 : vector<1x128xf32>
    %432 = math.exp %431 : vector<1x128xf32>
    %cst_111 = arith.constant 1.000000e+00 : f32
    %433 = vector.broadcast %cst_111 : f32 to vector<1x128xf32>
    %434 = arith.addf %433, %432 : vector<1x128xf32>
    %435 = arith.divf %433, %434 : vector<1x128xf32>
    %436 = vector.extract_strided_slice %423 {offsets = [0, 256], sizes = [1, 128], strides = [1, 1]} : vector<1x512xf32> to vector<1x128xf32>
    %437 = vector.extract_strided_slice %423 {offsets = [0, 384], sizes = [1, 128], strides = [1, 1]} : vector<1x512xf32> to vector<1x128xf32>
    %438 = arith.mulf %429, %437 : vector<1x128xf32>
    %439 = arith.addf %436, %438 : vector<1x128xf32>
    %440 = math.tanh %439 : vector<1x128xf32>
    %cst_112 = arith.constant 1.000000e+00 : f32
    %441 = vector.broadcast %cst_112 : f32 to vector<1x128xf32>
    %442 = arith.subf %441, %435 : vector<1x128xf32>
    %443 = arith.mulf %442, %440 : vector<1x128xf32>
    %444 = arith.mulf %435, %390 : vector<1x128xf32>
    %445 = arith.addf %443, %444 : vector<1x128xf32>
    %c7 = arith.constant 7 : index
    %c0_113 = arith.constant 0 : index
    %446 = vector.load %arg11[%c7, %c0_113] : memref<8x128xf32, #tpu.memory_space<vmem>>, vector<1x128xf32>
    tpu.vector_store %arg11[%c7, %c0_113], %445 {strides = array<i32>} : memref<8x128xf32, #tpu.memory_space<vmem>>, vector<1x128xf32>,
    %447 = vector.extract_strided_slice %5 {offsets = [0, 0], sizes = [1, 384], strides = [1, 1]} : vector<6x384xf32> to vector<1x384xf32>
    %c0_114 = arith.constant 0 : index
    %c0_115 = arith.constant 0 : index
    %448 = vector.load %arg6[%c0_114, %c0_115] : memref<128x384xf32, #tpu.memory_space<vmem>>, vector<128x384xf32>
    %cst_116 = arith.constant dense<0.000000e+00> : vector<1x384xf32>
    %449 = tpu.matmul %420, %448, %cst_116 {dimension_numbers = #tpu.dot_dimension_numbers<[1], [0], [0], [1], [0, 0, 1, 1], [], []>} : vector<1x128xf32>, vector<128x384xf32>, vector<1x384xf32> -> vector<1x384xf32>
    %450 = vector.extract_strided_slice %447 {offsets = [0, 0], sizes = [1, 128], strides = [1, 1]} : vector<1x384xf32> to vector<1x128xf32>
    %451 = vector.extract_strided_slice %449 {offsets = [0, 0], sizes = [1, 128], strides = [1, 1]} : vector<1x384xf32> to vector<1x128xf32>
    %452 = arith.addf %450, %451 : vector<1x128xf32>
    %453 = arith.negf %452 : vector<1x128xf32>
    %454 = math.exp %453 : vector<1x128xf32>
    %cst_117 = arith.constant 1.000000e+00 : f32
    %455 = vector.broadcast %cst_117 : f32 to vector<1x128xf32>
    %456 = arith.addf %455, %454 : vector<1x128xf32>
    %457 = arith.divf %455, %456 : vector<1x128xf32>
    %458 = vector.extract_strided_slice %447 {offsets = [0, 128], sizes = [1, 128], strides = [1, 1]} : vector<1x384xf32> to vector<1x128xf32>
    %459 = vector.extract_strided_slice %449 {offsets = [0, 128], sizes = [1, 128], strides = [1, 1]} : vector<1x384xf32> to vector<1x128xf32>
    %460 = arith.addf %458, %459 : vector<1x128xf32>
    %461 = arith.negf %460 : vector<1x128xf32>
    %462 = math.exp %461 : vector<1x128xf32>
    %cst_118 = arith.constant 1.000000e+00 : f32
    %463 = vector.broadcast %cst_118 : f32 to vector<1x128xf32>
    %464 = arith.addf %463, %462 : vector<1x128xf32>
    %465 = arith.divf %463, %464 : vector<1x128xf32>
    %466 = vector.extract_strided_slice %447 {offsets = [0, 256], sizes = [1, 128], strides = [1, 1]} : vector<1x384xf32> to vector<1x128xf32>
    %467 = vector.extract_strided_slice %449 {offsets = [0, 256], sizes = [1, 128], strides = [1, 1]} : vector<1x384xf32> to vector<1x128xf32>
    %468 = arith.mulf %457, %467 : vector<1x128xf32>
    %469 = arith.addf %466, %468 : vector<1x128xf32>
    %470 = math.tanh %469 : vector<1x128xf32>
    %cst_119 = arith.constant 1.000000e+00 : f32
    %471 = vector.broadcast %cst_119 : f32 to vector<1x128xf32>
    %472 = arith.subf %471, %465 : vector<1x128xf32>
    %473 = arith.mulf %472, %470 : vector<1x128xf32>
    %474 = arith.mulf %465, %420 : vector<1x128xf32>
    %475 = arith.addf %473, %474 : vector<1x128xf32>
    %476 = tpu.concatenate %475, %445 in 1 : vector<1x128xf32>, vector<1x128xf32> -> vector<1x256xf32>
    %c0_120 = arith.constant 0 : index
    %c0_121 = arith.constant 0 : index
    %477 = vector.load %arg7[%c0_120, %c0_121] : memref<256x512xf32, #tpu.memory_space<vmem>>, vector<256x512xf32>
    %cst_122 = arith.constant dense<0.000000e+00> : vector<1x512xf32>
    %478 = tpu.matmul %476, %477, %cst_122 {dimension_numbers = #tpu.dot_dimension_numbers<[1], [0], [0], [1], [0, 0, 1, 1], [], []>} : vector<1x256xf32>, vector<256x512xf32>, vector<1x512xf32> -> vector<1x512xf32>
    %479 = vector.extract_strided_slice %478 {offsets = [0, 0], sizes = [1, 128], strides = [1, 1]} : vector<1x512xf32> to vector<1x128xf32>
    %480 = arith.negf %479 : vector<1x128xf32>
    %481 = math.exp %480 : vector<1x128xf32>
    %cst_123 = arith.constant 1.000000e+00 : f32
    %482 = vector.broadcast %cst_123 : f32 to vector<1x128xf32>
    %483 = arith.addf %482, %481 : vector<1x128xf32>
    %484 = arith.divf %482, %483 : vector<1x128xf32>
    %485 = vector.extract_strided_slice %478 {offsets = [0, 128], sizes = [1, 128], strides = [1, 1]} : vector<1x512xf32> to vector<1x128xf32>
    %486 = arith.negf %485 : vector<1x128xf32>
    %487 = math.exp %486 : vector<1x128xf32>
    %cst_124 = arith.constant 1.000000e+00 : f32
    %488 = vector.broadcast %cst_124 : f32 to vector<1x128xf32>
    %489 = arith.addf %488, %487 : vector<1x128xf32>
    %490 = arith.divf %488, %489 : vector<1x128xf32>
    %491 = vector.extract_strided_slice %478 {offsets = [0, 256], sizes = [1, 128], strides = [1, 1]} : vector<1x512xf32> to vector<1x128xf32>
    %492 = vector.extract_strided_slice %478 {offsets = [0, 384], sizes = [1, 128], strides = [1, 1]} : vector<1x512xf32> to vector<1x128xf32>
    %493 = arith.mulf %484, %492 : vector<1x128xf32>
    %494 = arith.addf %491, %493 : vector<1x128xf32>
    %495 = math.tanh %494 : vector<1x128xf32>
    %cst_125 = arith.constant 1.000000e+00 : f32
    %496 = vector.broadcast %cst_125 : f32 to vector<1x128xf32>
    %497 = arith.subf %496, %490 : vector<1x128xf32>
    %498 = arith.mulf %497, %495 : vector<1x128xf32>
    %499 = arith.mulf %490, %445 : vector<1x128xf32>
    %500 = arith.addf %498, %499 : vector<1x128xf32>
    %c0_126 = arith.constant 0 : index
    %c0_127 = arith.constant 0 : index
    %501 = vector.load %arg12[%c0_126, %c0_127] : memref<6x128xf32, #tpu.memory_space<vmem>>, vector<1x128xf32>
    tpu.vector_store %arg12[%c0_126, %c0_127], %500 {strides = array<i32>} : memref<6x128xf32, #tpu.memory_space<vmem>>, vector<1x128xf32>,
    %502 = vector.extract_strided_slice %5 {offsets = [1, 0], sizes = [1, 384], strides = [1, 1]} : vector<6x384xf32> to vector<1x384xf32>
    %c0_128 = arith.constant 0 : index
    %c0_129 = arith.constant 0 : index
    %503 = vector.load %arg6[%c0_128, %c0_129] : memref<128x384xf32, #tpu.memory_space<vmem>>, vector<128x384xf32>
    %cst_130 = arith.constant dense<0.000000e+00> : vector<1x384xf32>
    %504 = tpu.matmul %475, %503, %cst_130 {dimension_numbers = #tpu.dot_dimension_numbers<[1], [0], [0], [1], [0, 0, 1, 1], [], []>} : vector<1x128xf32>, vector<128x384xf32>, vector<1x384xf32> -> vector<1x384xf32>
    %505 = vector.extract_strided_slice %502 {offsets = [0, 0], sizes = [1, 128], strides = [1, 1]} : vector<1x384xf32> to vector<1x128xf32>
    %506 = vector.extract_strided_slice %504 {offsets = [0, 0], sizes = [1, 128], strides = [1, 1]} : vector<1x384xf32> to vector<1x128xf32>
    %507 = arith.addf %505, %506 : vector<1x128xf32>
    %508 = arith.negf %507 : vector<1x128xf32>
    %509 = math.exp %508 : vector<1x128xf32>
    %cst_131 = arith.constant 1.000000e+00 : f32
    %510 = vector.broadcast %cst_131 : f32 to vector<1x128xf32>
    %511 = arith.addf %510, %509 : vector<1x128xf32>
    %512 = arith.divf %510, %511 : vector<1x128xf32>
    %513 = vector.extract_strided_slice %502 {offsets = [0, 128], sizes = [1, 128], strides = [1, 1]} : vector<1x384xf32> to vector<1x128xf32>
    %514 = vector.extract_strided_slice %504 {offsets = [0, 128], sizes = [1, 128], strides = [1, 1]} : vector<1x384xf32> to vector<1x128xf32>
    %515 = arith.addf %513, %514 : vector<1x128xf32>
    %516 = arith.negf %515 : vector<1x128xf32>
    %517 = math.exp %516 : vector<1x128xf32>
    %cst_132 = arith.constant 1.000000e+00 : f32
    %518 = vector.broadcast %cst_132 : f32 to vector<1x128xf32>
    %519 = arith.addf %518, %517 : vector<1x128xf32>
    %520 = arith.divf %518, %519 : vector<1x128xf32>
    %521 = vector.extract_strided_slice %502 {offsets = [0, 256], sizes = [1, 128], strides = [1, 1]} : vector<1x384xf32> to vector<1x128xf32>
    %522 = vector.extract_strided_slice %504 {offsets = [0, 256], sizes = [1, 128], strides = [1, 1]} : vector<1x384xf32> to vector<1x128xf32>
    %523 = arith.mulf %512, %522 : vector<1x128xf32>
    %524 = arith.addf %521, %523 : vector<1x128xf32>
    %525 = math.tanh %524 : vector<1x128xf32>
    %cst_133 = arith.constant 1.000000e+00 : f32
    %526 = vector.broadcast %cst_133 : f32 to vector<1x128xf32>
    %527 = arith.subf %526, %520 : vector<1x128xf32>
    %528 = arith.mulf %527, %525 : vector<1x128xf32>
    %529 = arith.mulf %520, %475 : vector<1x128xf32>
    %530 = arith.addf %528, %529 : vector<1x128xf32>
    %531 = tpu.concatenate %530, %500 in 1 : vector<1x128xf32>, vector<1x128xf32> -> vector<1x256xf32>
    %c0_134 = arith.constant 0 : index
    %c0_135 = arith.constant 0 : index
    %532 = vector.load %arg7[%c0_134, %c0_135] : memref<256x512xf32, #tpu.memory_space<vmem>>, vector<256x512xf32>
    %cst_136 = arith.constant dense<0.000000e+00> : vector<1x512xf32>
    %533 = tpu.matmul %531, %532, %cst_136 {dimension_numbers = #tpu.dot_dimension_numbers<[1], [0], [0], [1], [0, 0, 1, 1], [], []>} : vector<1x256xf32>, vector<256x512xf32>, vector<1x512xf32> -> vector<1x512xf32>
    %534 = vector.extract_strided_slice %533 {offsets = [0, 0], sizes = [1, 128], strides = [1, 1]} : vector<1x512xf32> to vector<1x128xf32>
    %535 = arith.negf %534 : vector<1x128xf32>
    %536 = math.exp %535 : vector<1x128xf32>
    %cst_137 = arith.constant 1.000000e+00 : f32
    %537 = vector.broadcast %cst_137 : f32 to vector<1x128xf32>
    %538 = arith.addf %537, %536 : vector<1x128xf32>
    %539 = arith.divf %537, %538 : vector<1x128xf32>
    %540 = vector.extract_strided_slice %533 {offsets = [0, 128], sizes = [1, 128], strides = [1, 1]} : vector<1x512xf32> to vector<1x128xf32>
    %541 = arith.negf %540 : vector<1x128xf32>
    %542 = math.exp %541 : vector<1x128xf32>
    %cst_138 = arith.constant 1.000000e+00 : f32
    %543 = vector.broadcast %cst_138 : f32 to vector<1x128xf32>
    %544 = arith.addf %543, %542 : vector<1x128xf32>
    %545 = arith.divf %543, %544 : vector<1x128xf32>
    %546 = vector.extract_strided_slice %533 {offsets = [0, 256], sizes = [1, 128], strides = [1, 1]} : vector<1x512xf32> to vector<1x128xf32>
    %547 = vector.extract_strided_slice %533 {offsets = [0, 384], sizes = [1, 128], strides = [1, 1]} : vector<1x512xf32> to vector<1x128xf32>
    %548 = arith.mulf %539, %547 : vector<1x128xf32>
    %549 = arith.addf %546, %548 : vector<1x128xf32>
    %550 = math.tanh %549 : vector<1x128xf32>
    %cst_139 = arith.constant 1.000000e+00 : f32
    %551 = vector.broadcast %cst_139 : f32 to vector<1x128xf32>
    %552 = arith.subf %551, %545 : vector<1x128xf32>
    %553 = arith.mulf %552, %550 : vector<1x128xf32>
    %554 = arith.mulf %545, %500 : vector<1x128xf32>
    %555 = arith.addf %553, %554 : vector<1x128xf32>
    %c1_140 = arith.constant 1 : index
    %c0_141 = arith.constant 0 : index
    %556 = vector.load %arg12[%c1_140, %c0_141] : memref<6x128xf32, #tpu.memory_space<vmem>>, vector<1x128xf32>
    tpu.vector_store %arg12[%c1_140, %c0_141], %555 {strides = array<i32>} : memref<6x128xf32, #tpu.memory_space<vmem>>, vector<1x128xf32>,
    %557 = vector.extract_strided_slice %5 {offsets = [2, 0], sizes = [1, 384], strides = [1, 1]} : vector<6x384xf32> to vector<1x384xf32>
    %c0_142 = arith.constant 0 : index
    %c0_143 = arith.constant 0 : index
    %558 = vector.load %arg6[%c0_142, %c0_143] : memref<128x384xf32, #tpu.memory_space<vmem>>, vector<128x384xf32>
    %cst_144 = arith.constant dense<0.000000e+00> : vector<1x384xf32>
    %559 = tpu.matmul %530, %558, %cst_144 {dimension_numbers = #tpu.dot_dimension_numbers<[1], [0], [0], [1], [0, 0, 1, 1], [], []>} : vector<1x128xf32>, vector<128x384xf32>, vector<1x384xf32> -> vector<1x384xf32>
    %560 = vector.extract_strided_slice %557 {offsets = [0, 0], sizes = [1, 128], strides = [1, 1]} : vector<1x384xf32> to vector<1x128xf32>
    %561 = vector.extract_strided_slice %559 {offsets = [0, 0], sizes = [1, 128], strides = [1, 1]} : vector<1x384xf32> to vector<1x128xf32>
    %562 = arith.addf %560, %561 : vector<1x128xf32>
    %563 = arith.negf %562 : vector<1x128xf32>
    %564 = math.exp %563 : vector<1x128xf32>
    %cst_145 = arith.constant 1.000000e+00 : f32
    %565 = vector.broadcast %cst_145 : f32 to vector<1x128xf32>
    %566 = arith.addf %565, %564 : vector<1x128xf32>
    %567 = arith.divf %565, %566 : vector<1x128xf32>
    %568 = vector.extract_strided_slice %557 {offsets = [0, 128], sizes = [1, 128], strides = [1, 1]} : vector<1x384xf32> to vector<1x128xf32>
    %569 = vector.extract_strided_slice %559 {offsets = [0, 128], sizes = [1, 128], strides = [1, 1]} : vector<1x384xf32> to vector<1x128xf32>
    %570 = arith.addf %568, %569 : vector<1x128xf32>
    %571 = arith.negf %570 : vector<1x128xf32>
    %572 = math.exp %571 : vector<1x128xf32>
    %cst_146 = arith.constant 1.000000e+00 : f32
    %573 = vector.broadcast %cst_146 : f32 to vector<1x128xf32>
    %574 = arith.addf %573, %572 : vector<1x128xf32>
    %575 = arith.divf %573, %574 : vector<1x128xf32>
    %576 = vector.extract_strided_slice %557 {offsets = [0, 256], sizes = [1, 128], strides = [1, 1]} : vector<1x384xf32> to vector<1x128xf32>
    %577 = vector.extract_strided_slice %559 {offsets = [0, 256], sizes = [1, 128], strides = [1, 1]} : vector<1x384xf32> to vector<1x128xf32>
    %578 = arith.mulf %567, %577 : vector<1x128xf32>
    %579 = arith.addf %576, %578 : vector<1x128xf32>
    %580 = math.tanh %579 : vector<1x128xf32>
    %cst_147 = arith.constant 1.000000e+00 : f32
    %581 = vector.broadcast %cst_147 : f32 to vector<1x128xf32>
    %582 = arith.subf %581, %575 : vector<1x128xf32>
    %583 = arith.mulf %582, %580 : vector<1x128xf32>
    %584 = arith.mulf %575, %530 : vector<1x128xf32>
    %585 = arith.addf %583, %584 : vector<1x128xf32>
    %586 = tpu.concatenate %585, %555 in 1 : vector<1x128xf32>, vector<1x128xf32> -> vector<1x256xf32>
    %c0_148 = arith.constant 0 : index
    %c0_149 = arith.constant 0 : index
    %587 = vector.load %arg7[%c0_148, %c0_149] : memref<256x512xf32, #tpu.memory_space<vmem>>, vector<256x512xf32>
    %cst_150 = arith.constant dense<0.000000e+00> : vector<1x512xf32>
    %588 = tpu.matmul %586, %587, %cst_150 {dimension_numbers = #tpu.dot_dimension_numbers<[1], [0], [0], [1], [0, 0, 1, 1], [], []>} : vector<1x256xf32>, vector<256x512xf32>, vector<1x512xf32> -> vector<1x512xf32>
    %589 = vector.extract_strided_slice %588 {offsets = [0, 0], sizes = [1, 128], strides = [1, 1]} : vector<1x512xf32> to vector<1x128xf32>
    %590 = arith.negf %589 : vector<1x128xf32>
    %591 = math.exp %590 : vector<1x128xf32>
    %cst_151 = arith.constant 1.000000e+00 : f32
    %592 = vector.broadcast %cst_151 : f32 to vector<1x128xf32>
    %593 = arith.addf %592, %591 : vector<1x128xf32>
    %594 = arith.divf %592, %593 : vector<1x128xf32>
    %595 = vector.extract_strided_slice %588 {offsets = [0, 128], sizes = [1, 128], strides = [1, 1]} : vector<1x512xf32> to vector<1x128xf32>
    %596 = arith.negf %595 : vector<1x128xf32>
    %597 = math.exp %596 : vector<1x128xf32>
    %cst_152 = arith.constant 1.000000e+00 : f32
    %598 = vector.broadcast %cst_152 : f32 to vector<1x128xf32>
    %599 = arith.addf %598, %597 : vector<1x128xf32>
    %600 = arith.divf %598, %599 : vector<1x128xf32>
    %601 = vector.extract_strided_slice %588 {offsets = [0, 256], sizes = [1, 128], strides = [1, 1]} : vector<1x512xf32> to vector<1x128xf32>
    %602 = vector.extract_strided_slice %588 {offsets = [0, 384], sizes = [1, 128], strides = [1, 1]} : vector<1x512xf32> to vector<1x128xf32>
    %603 = arith.mulf %594, %602 : vector<1x128xf32>
    %604 = arith.addf %601, %603 : vector<1x128xf32>
    %605 = math.tanh %604 : vector<1x128xf32>
    %cst_153 = arith.constant 1.000000e+00 : f32
    %606 = vector.broadcast %cst_153 : f32 to vector<1x128xf32>
    %607 = arith.subf %606, %600 : vector<1x128xf32>
    %608 = arith.mulf %607, %605 : vector<1x128xf32>
    %609 = arith.mulf %600, %555 : vector<1x128xf32>
    %610 = arith.addf %608, %609 : vector<1x128xf32>
    %c2_154 = arith.constant 2 : index
    %c0_155 = arith.constant 0 : index
    %611 = vector.load %arg12[%c2_154, %c0_155] : memref<6x128xf32, #tpu.memory_space<vmem>>, vector<1x128xf32>
    tpu.vector_store %arg12[%c2_154, %c0_155], %610 {strides = array<i32>} : memref<6x128xf32, #tpu.memory_space<vmem>>, vector<1x128xf32>,
    %612 = vector.extract_strided_slice %5 {offsets = [3, 0], sizes = [1, 384], strides = [1, 1]} : vector<6x384xf32> to vector<1x384xf32>
    %c0_156 = arith.constant 0 : index
    %c0_157 = arith.constant 0 : index
    %613 = vector.load %arg6[%c0_156, %c0_157] : memref<128x384xf32, #tpu.memory_space<vmem>>, vector<128x384xf32>
    %cst_158 = arith.constant dense<0.000000e+00> : vector<1x384xf32>
    %614 = tpu.matmul %585, %613, %cst_158 {dimension_numbers = #tpu.dot_dimension_numbers<[1], [0], [0], [1], [0, 0, 1, 1], [], []>} : vector<1x128xf32>, vector<128x384xf32>, vector<1x384xf32> -> vector<1x384xf32>
    %615 = vector.extract_strided_slice %612 {offsets = [0, 0], sizes = [1, 128], strides = [1, 1]} : vector<1x384xf32> to vector<1x128xf32>
    %616 = vector.extract_strided_slice %614 {offsets = [0, 0], sizes = [1, 128], strides = [1, 1]} : vector<1x384xf32> to vector<1x128xf32>
    %617 = arith.addf %615, %616 : vector<1x128xf32>
    %618 = arith.negf %617 : vector<1x128xf32>
    %619 = math.exp %618 : vector<1x128xf32>
    %cst_159 = arith.constant 1.000000e+00 : f32
    %620 = vector.broadcast %cst_159 : f32 to vector<1x128xf32>
    %621 = arith.addf %620, %619 : vector<1x128xf32>
    %622 = arith.divf %620, %621 : vector<1x128xf32>
    %623 = vector.extract_strided_slice %612 {offsets = [0, 128], sizes = [1, 128], strides = [1, 1]} : vector<1x384xf32> to vector<1x128xf32>
    %624 = vector.extract_strided_slice %614 {offsets = [0, 128], sizes = [1, 128], strides = [1, 1]} : vector<1x384xf32> to vector<1x128xf32>
    %625 = arith.addf %623, %624 : vector<1x128xf32>
    %626 = arith.negf %625 : vector<1x128xf32>
    %627 = math.exp %626 : vector<1x128xf32>
    %cst_160 = arith.constant 1.000000e+00 : f32
    %628 = vector.broadcast %cst_160 : f32 to vector<1x128xf32>
    %629 = arith.addf %628, %627 : vector<1x128xf32>
    %630 = arith.divf %628, %629 : vector<1x128xf32>
    %631 = vector.extract_strided_slice %612 {offsets = [0, 256], sizes = [1, 128], strides = [1, 1]} : vector<1x384xf32> to vector<1x128xf32>
    %632 = vector.extract_strided_slice %614 {offsets = [0, 256], sizes = [1, 128], strides = [1, 1]} : vector<1x384xf32> to vector<1x128xf32>
    %633 = arith.mulf %622, %632 : vector<1x128xf32>
    %634 = arith.addf %631, %633 : vector<1x128xf32>
    %635 = math.tanh %634 : vector<1x128xf32>
    %cst_161 = arith.constant 1.000000e+00 : f32
    %636 = vector.broadcast %cst_161 : f32 to vector<1x128xf32>
    %637 = arith.subf %636, %630 : vector<1x128xf32>
    %638 = arith.mulf %637, %635 : vector<1x128xf32>
    %639 = arith.mulf %630, %585 : vector<1x128xf32>
    %640 = arith.addf %638, %639 : vector<1x128xf32>
    %641 = tpu.concatenate %640, %610 in 1 : vector<1x128xf32>, vector<1x128xf32> -> vector<1x256xf32>
    %c0_162 = arith.constant 0 : index
    %c0_163 = arith.constant 0 : index
    %642 = vector.load %arg7[%c0_162, %c0_163] : memref<256x512xf32, #tpu.memory_space<vmem>>, vector<256x512xf32>
    %cst_164 = arith.constant dense<0.000000e+00> : vector<1x512xf32>
    %643 = tpu.matmul %641, %642, %cst_164 {dimension_numbers = #tpu.dot_dimension_numbers<[1], [0], [0], [1], [0, 0, 1, 1], [], []>} : vector<1x256xf32>, vector<256x512xf32>, vector<1x512xf32> -> vector<1x512xf32>
    %644 = vector.extract_strided_slice %643 {offsets = [0, 0], sizes = [1, 128], strides = [1, 1]} : vector<1x512xf32> to vector<1x128xf32>
    %645 = arith.negf %644 : vector<1x128xf32>
    %646 = math.exp %645 : vector<1x128xf32>
    %cst_165 = arith.constant 1.000000e+00 : f32
    %647 = vector.broadcast %cst_165 : f32 to vector<1x128xf32>
    %648 = arith.addf %647, %646 : vector<1x128xf32>
    %649 = arith.divf %647, %648 : vector<1x128xf32>
    %650 = vector.extract_strided_slice %643 {offsets = [0, 128], sizes = [1, 128], strides = [1, 1]} : vector<1x512xf32> to vector<1x128xf32>
    %651 = arith.negf %650 : vector<1x128xf32>
    %652 = math.exp %651 : vector<1x128xf32>
    %cst_166 = arith.constant 1.000000e+00 : f32
    %653 = vector.broadcast %cst_166 : f32 to vector<1x128xf32>
    %654 = arith.addf %653, %652 : vector<1x128xf32>
    %655 = arith.divf %653, %654 : vector<1x128xf32>
    %656 = vector.extract_strided_slice %643 {offsets = [0, 256], sizes = [1, 128], strides = [1, 1]} : vector<1x512xf32> to vector<1x128xf32>
    %657 = vector.extract_strided_slice %643 {offsets = [0, 384], sizes = [1, 128], strides = [1, 1]} : vector<1x512xf32> to vector<1x128xf32>
    %658 = arith.mulf %649, %657 : vector<1x128xf32>
    %659 = arith.addf %656, %658 : vector<1x128xf32>
    %660 = math.tanh %659 : vector<1x128xf32>
    %cst_167 = arith.constant 1.000000e+00 : f32
    %661 = vector.broadcast %cst_167 : f32 to vector<1x128xf32>
    %662 = arith.subf %661, %655 : vector<1x128xf32>
    %663 = arith.mulf %662, %660 : vector<1x128xf32>
    %664 = arith.mulf %655, %610 : vector<1x128xf32>
    %665 = arith.addf %663, %664 : vector<1x128xf32>
    %c3_168 = arith.constant 3 : index
    %c0_169 = arith.constant 0 : index
    %666 = vector.load %arg12[%c3_168, %c0_169] : memref<6x128xf32, #tpu.memory_space<vmem>>, vector<1x128xf32>
    tpu.vector_store %arg12[%c3_168, %c0_169], %665 {strides = array<i32>} : memref<6x128xf32, #tpu.memory_space<vmem>>, vector<1x128xf32>,
    %667 = vector.extract_strided_slice %5 {offsets = [4, 0], sizes = [1, 384], strides = [1, 1]} : vector<6x384xf32> to vector<1x384xf32>
    %c0_170 = arith.constant 0 : index
    %c0_171 = arith.constant 0 : index
    %668 = vector.load %arg6[%c0_170, %c0_171] : memref<128x384xf32, #tpu.memory_space<vmem>>, vector<128x384xf32>
    %cst_172 = arith.constant dense<0.000000e+00> : vector<1x384xf32>
    %669 = tpu.matmul %640, %668, %cst_172 {dimension_numbers = #tpu.dot_dimension_numbers<[1], [0], [0], [1], [0, 0, 1, 1], [], []>} : vector<1x128xf32>, vector<128x384xf32>, vector<1x384xf32> -> vector<1x384xf32>
    %670 = vector.extract_strided_slice %667 {offsets = [0, 0], sizes = [1, 128], strides = [1, 1]} : vector<1x384xf32> to vector<1x128xf32>
    %671 = vector.extract_strided_slice %669 {offsets = [0, 0], sizes = [1, 128], strides = [1, 1]} : vector<1x384xf32> to vector<1x128xf32>
    %672 = arith.addf %670, %671 : vector<1x128xf32>
    %673 = arith.negf %672 : vector<1x128xf32>
    %674 = math.exp %673 : vector<1x128xf32>
    %cst_173 = arith.constant 1.000000e+00 : f32
    %675 = vector.broadcast %cst_173 : f32 to vector<1x128xf32>
    %676 = arith.addf %675, %674 : vector<1x128xf32>
    %677 = arith.divf %675, %676 : vector<1x128xf32>
    %678 = vector.extract_strided_slice %667 {offsets = [0, 128], sizes = [1, 128], strides = [1, 1]} : vector<1x384xf32> to vector<1x128xf32>
    %679 = vector.extract_strided_slice %669 {offsets = [0, 128], sizes = [1, 128], strides = [1, 1]} : vector<1x384xf32> to vector<1x128xf32>
    %680 = arith.addf %678, %679 : vector<1x128xf32>
    %681 = arith.negf %680 : vector<1x128xf32>
    %682 = math.exp %681 : vector<1x128xf32>
    %cst_174 = arith.constant 1.000000e+00 : f32
    %683 = vector.broadcast %cst_174 : f32 to vector<1x128xf32>
    %684 = arith.addf %683, %682 : vector<1x128xf32>
    %685 = arith.divf %683, %684 : vector<1x128xf32>
    %686 = vector.extract_strided_slice %667 {offsets = [0, 256], sizes = [1, 128], strides = [1, 1]} : vector<1x384xf32> to vector<1x128xf32>
    %687 = vector.extract_strided_slice %669 {offsets = [0, 256], sizes = [1, 128], strides = [1, 1]} : vector<1x384xf32> to vector<1x128xf32>
    %688 = arith.mulf %677, %687 : vector<1x128xf32>
    %689 = arith.addf %686, %688 : vector<1x128xf32>
    %690 = math.tanh %689 : vector<1x128xf32>
    %cst_175 = arith.constant 1.000000e+00 : f32
    %691 = vector.broadcast %cst_175 : f32 to vector<1x128xf32>
    %692 = arith.subf %691, %685 : vector<1x128xf32>
    %693 = arith.mulf %692, %690 : vector<1x128xf32>
    %694 = arith.mulf %685, %640 : vector<1x128xf32>
    %695 = arith.addf %693, %694 : vector<1x128xf32>
    %696 = tpu.concatenate %695, %665 in 1 : vector<1x128xf32>, vector<1x128xf32> -> vector<1x256xf32>
    %c0_176 = arith.constant 0 : index
    %c0_177 = arith.constant 0 : index
    %697 = vector.load %arg7[%c0_176, %c0_177] : memref<256x512xf32, #tpu.memory_space<vmem>>, vector<256x512xf32>
    %cst_178 = arith.constant dense<0.000000e+00> : vector<1x512xf32>
    %698 = tpu.matmul %696, %697, %cst_178 {dimension_numbers = #tpu.dot_dimension_numbers<[1], [0], [0], [1], [0, 0, 1, 1], [], []>} : vector<1x256xf32>, vector<256x512xf32>, vector<1x512xf32> -> vector<1x512xf32>
    %699 = vector.extract_strided_slice %698 {offsets = [0, 0], sizes = [1, 128], strides = [1, 1]} : vector<1x512xf32> to vector<1x128xf32>
    %700 = arith.negf %699 : vector<1x128xf32>
    %701 = math.exp %700 : vector<1x128xf32>
    %cst_179 = arith.constant 1.000000e+00 : f32
    %702 = vector.broadcast %cst_179 : f32 to vector<1x128xf32>
    %703 = arith.addf %702, %701 : vector<1x128xf32>
    %704 = arith.divf %702, %703 : vector<1x128xf32>
    %705 = vector.extract_strided_slice %698 {offsets = [0, 128], sizes = [1, 128], strides = [1, 1]} : vector<1x512xf32> to vector<1x128xf32>
    %706 = arith.negf %705 : vector<1x128xf32>
    %707 = math.exp %706 : vector<1x128xf32>
    %cst_180 = arith.constant 1.000000e+00 : f32
    %708 = vector.broadcast %cst_180 : f32 to vector<1x128xf32>
    %709 = arith.addf %708, %707 : vector<1x128xf32>
    %710 = arith.divf %708, %709 : vector<1x128xf32>
    %711 = vector.extract_strided_slice %698 {offsets = [0, 256], sizes = [1, 128], strides = [1, 1]} : vector<1x512xf32> to vector<1x128xf32>
    %712 = vector.extract_strided_slice %698 {offsets = [0, 384], sizes = [1, 128], strides = [1, 1]} : vector<1x512xf32> to vector<1x128xf32>
    %713 = arith.mulf %704, %712 : vector<1x128xf32>
    %714 = arith.addf %711, %713 : vector<1x128xf32>
    %715 = math.tanh %714 : vector<1x128xf32>
    %cst_181 = arith.constant 1.000000e+00 : f32
    %716 = vector.broadcast %cst_181 : f32 to vector<1x128xf32>
    %717 = arith.subf %716, %710 : vector<1x128xf32>
    %718 = arith.mulf %717, %715 : vector<1x128xf32>
    %719 = arith.mulf %710, %665 : vector<1x128xf32>
    %720 = arith.addf %718, %719 : vector<1x128xf32>
    %c4_182 = arith.constant 4 : index
    %c0_183 = arith.constant 0 : index
    %721 = vector.load %arg12[%c4_182, %c0_183] : memref<6x128xf32, #tpu.memory_space<vmem>>, vector<1x128xf32>
    tpu.vector_store %arg12[%c4_182, %c0_183], %720 {strides = array<i32>} : memref<6x128xf32, #tpu.memory_space<vmem>>, vector<1x128xf32>,
    %722 = vector.extract_strided_slice %5 {offsets = [5, 0], sizes = [1, 384], strides = [1, 1]} : vector<6x384xf32> to vector<1x384xf32>
    %c0_184 = arith.constant 0 : index
    %c0_185 = arith.constant 0 : index
    %723 = vector.load %arg6[%c0_184, %c0_185] : memref<128x384xf32, #tpu.memory_space<vmem>>, vector<128x384xf32>
    %cst_186 = arith.constant dense<0.000000e+00> : vector<1x384xf32>
    %724 = tpu.matmul %695, %723, %cst_186 {dimension_numbers = #tpu.dot_dimension_numbers<[1], [0], [0], [1], [0, 0, 1, 1], [], []>} : vector<1x128xf32>, vector<128x384xf32>, vector<1x384xf32> -> vector<1x384xf32>
    %725 = vector.extract_strided_slice %722 {offsets = [0, 0], sizes = [1, 128], strides = [1, 1]} : vector<1x384xf32> to vector<1x128xf32>
    %726 = vector.extract_strided_slice %724 {offsets = [0, 0], sizes = [1, 128], strides = [1, 1]} : vector<1x384xf32> to vector<1x128xf32>
    %727 = arith.addf %725, %726 : vector<1x128xf32>
    %728 = arith.negf %727 : vector<1x128xf32>
    %729 = math.exp %728 : vector<1x128xf32>
    %cst_187 = arith.constant 1.000000e+00 : f32
    %730 = vector.broadcast %cst_187 : f32 to vector<1x128xf32>
    %731 = arith.addf %730, %729 : vector<1x128xf32>
    %732 = arith.divf %730, %731 : vector<1x128xf32>
    %733 = vector.extract_strided_slice %722 {offsets = [0, 128], sizes = [1, 128], strides = [1, 1]} : vector<1x384xf32> to vector<1x128xf32>
    %734 = vector.extract_strided_slice %724 {offsets = [0, 128], sizes = [1, 128], strides = [1, 1]} : vector<1x384xf32> to vector<1x128xf32>
    %735 = arith.addf %733, %734 : vector<1x128xf32>
    %736 = arith.negf %735 : vector<1x128xf32>
    %737 = math.exp %736 : vector<1x128xf32>
    %cst_188 = arith.constant 1.000000e+00 : f32
    %738 = vector.broadcast %cst_188 : f32 to vector<1x128xf32>
    %739 = arith.addf %738, %737 : vector<1x128xf32>
    %740 = arith.divf %738, %739 : vector<1x128xf32>
    %741 = vector.extract_strided_slice %722 {offsets = [0, 256], sizes = [1, 128], strides = [1, 1]} : vector<1x384xf32> to vector<1x128xf32>
    %742 = vector.extract_strided_slice %724 {offsets = [0, 256], sizes = [1, 128], strides = [1, 1]} : vector<1x384xf32> to vector<1x128xf32>
    %743 = arith.mulf %732, %742 : vector<1x128xf32>
    %744 = arith.addf %741, %743 : vector<1x128xf32>
    %745 = math.tanh %744 : vector<1x128xf32>
    %cst_189 = arith.constant 1.000000e+00 : f32
    %746 = vector.broadcast %cst_189 : f32 to vector<1x128xf32>
    %747 = arith.subf %746, %740 : vector<1x128xf32>
    %748 = arith.mulf %747, %745 : vector<1x128xf32>
    %749 = arith.mulf %740, %695 : vector<1x128xf32>
    %750 = arith.addf %748, %749 : vector<1x128xf32>
    %751 = tpu.concatenate %750, %720 in 1 : vector<1x128xf32>, vector<1x128xf32> -> vector<1x256xf32>
    %c0_190 = arith.constant 0 : index
    %c0_191 = arith.constant 0 : index
    %752 = vector.load %arg7[%c0_190, %c0_191] : memref<256x512xf32, #tpu.memory_space<vmem>>, vector<256x512xf32>
    %cst_192 = arith.constant dense<0.000000e+00> : vector<1x512xf32>
    %753 = tpu.matmul %751, %752, %cst_192 {dimension_numbers = #tpu.dot_dimension_numbers<[1], [0], [0], [1], [0, 0, 1, 1], [], []>} : vector<1x256xf32>, vector<256x512xf32>, vector<1x512xf32> -> vector<1x512xf32>
    %754 = vector.extract_strided_slice %753 {offsets = [0, 0], sizes = [1, 128], strides = [1, 1]} : vector<1x512xf32> to vector<1x128xf32>
    %755 = arith.negf %754 : vector<1x128xf32>
    %756 = math.exp %755 : vector<1x128xf32>
    %cst_193 = arith.constant 1.000000e+00 : f32
    %757 = vector.broadcast %cst_193 : f32 to vector<1x128xf32>
    %758 = arith.addf %757, %756 : vector<1x128xf32>
    %759 = arith.divf %757, %758 : vector<1x128xf32>
    %760 = vector.extract_strided_slice %753 {offsets = [0, 128], sizes = [1, 128], strides = [1, 1]} : vector<1x512xf32> to vector<1x128xf32>
    %761 = arith.negf %760 : vector<1x128xf32>
    %762 = math.exp %761 : vector<1x128xf32>
    %cst_194 = arith.constant 1.000000e+00 : f32
    %763 = vector.broadcast %cst_194 : f32 to vector<1x128xf32>
    %764 = arith.addf %763, %762 : vector<1x128xf32>
    %765 = arith.divf %763, %764 : vector<1x128xf32>
    %766 = vector.extract_strided_slice %753 {offsets = [0, 256], sizes = [1, 128], strides = [1, 1]} : vector<1x512xf32> to vector<1x128xf32>
    %767 = vector.extract_strided_slice %753 {offsets = [0, 384], sizes = [1, 128], strides = [1, 1]} : vector<1x512xf32> to vector<1x128xf32>
    %768 = arith.mulf %759, %767 : vector<1x128xf32>
    %769 = arith.addf %766, %768 : vector<1x128xf32>
    %770 = math.tanh %769 : vector<1x128xf32>
    %cst_195 = arith.constant 1.000000e+00 : f32
    %771 = vector.broadcast %cst_195 : f32 to vector<1x128xf32>
    %772 = arith.subf %771, %765 : vector<1x128xf32>
    %773 = arith.mulf %772, %770 : vector<1x128xf32>
    %774 = arith.mulf %765, %720 : vector<1x128xf32>
    %775 = arith.addf %773, %774 : vector<1x128xf32>
    %c5_196 = arith.constant 5 : index
    %c0_197 = arith.constant 0 : index
    %776 = vector.load %arg12[%c5_196, %c0_197] : memref<6x128xf32, #tpu.memory_space<vmem>>, vector<1x128xf32>
    tpu.vector_store %arg12[%c5_196, %c0_197], %775 {strides = array<i32>} : memref<6x128xf32, #tpu.memory_space<vmem>>, vector<1x128xf32>,
    %c0_198 = arith.constant 0 : index
    %c0_199 = arith.constant 0 : index
    %777 = vector.load %arg11[%c0_198, %c0_199] : memref<8x128xf32, #tpu.memory_space<vmem>>, vector<8x128xf32>
    %c0_200 = arith.constant 0 : index
    %c0_201 = arith.constant 0 : index
    %778 = vector.load %arg12[%c0_200, %c0_201] : memref<6x128xf32, #tpu.memory_space<vmem>>, vector<6x128xf32>
    %cst_202 = arith.constant dense<0.000000e+00> : vector<6x8xf32>
    %779 = tpu.matmul %778, %777, %cst_202 {dimension_numbers = #tpu.dot_dimension_numbers<[1], [1], [0], [0], [0, 0, 1, 0], [], []>} : vector<6x128xf32>, vector<8x128xf32>, vector<6x8xf32> -> vector<6x8xf32>
    %cst_203 = arith.constant dense<0xFF800000> : vector<6xf32>
    %780 = vector.multi_reduction <maximumf>, %779, %cst_203 [1] : vector<6x8xf32> to vector<6xf32>
    %781 = vector.shape_cast %780 : vector<6xf32> to vector<6x1xf32>
    %782 = vector.broadcast %781 : vector<6x1xf32> to vector<6x8xf32>
    %783 = arith.subf %779, %782 : vector<6x8xf32>
    %784 = math.exp %783 : vector<6x8xf32>
    %cst_204 = arith.constant dense<0.000000e+00> : vector<6xf32>
    %785 = vector.multi_reduction <add>, %784, %cst_204 [1] : vector<6x8xf32> to vector<6xf32>
    %786 = vector.shape_cast %785 : vector<6xf32> to vector<6x1xf32>
    %787 = vector.broadcast %786 : vector<6x1xf32> to vector<6x8xf32>
    %788 = arith.divf %784, %787 : vector<6x8xf32>
    %cst_205 = arith.constant dense<0.000000e+00> : vector<6x128xf32>
    %789 = tpu.matmul %788, %777, %cst_205 {dimension_numbers = #tpu.dot_dimension_numbers<[1], [0], [0], [1], [0, 0, 1, 1], [], []>} : vector<6x8xf32>, vector<8x128xf32>, vector<6x128xf32> -> vector<6x128xf32>
    %790 = tpu.concatenate %778, %789 in 1 : vector<6x128xf32>, vector<6x128xf32> -> vector<6x256xf32>
    %c0_206 = arith.constant 0 : index
    %c0_207 = arith.constant 0 : index
    %791 = vector.load %arg8[%c0_206, %c0_207] : memref<256x256xf32, #tpu.memory_space<vmem>>, vector<256x256xf32>
    %cst_208 = arith.constant dense<0.000000e+00> : vector<6x256xf32>
    %792 = tpu.matmul %790, %791, %cst_208 {dimension_numbers = #tpu.dot_dimension_numbers<[1], [0], [0], [1], [0, 0, 1, 1], [], []>} : vector<6x256xf32>, vector<256x256xf32>, vector<6x256xf32> -> vector<6x256xf32>
    %c0_209 = arith.constant 0 : index
    %c0_210 = arith.constant 0 : index
    %793 = vector.load %arg9[%c0_209, %c0_210] : memref<1x256xf32, #tpu.memory_space<vmem>>, vector<1x256xf32>
    %794 = vector.broadcast %793 : vector<1x256xf32> to vector<6x256xf32>
    %795 = arith.addf %792, %794 : vector<6x256xf32>
    %c0_211 = arith.constant 0 : index
    %c0_212 = arith.constant 0 : index
    %796 = vector.load %arg10[%c0_211, %c0_212] : memref<6x256xf32, #tpu.memory_space<vmem>>, vector<6x256xf32>
    tpu.vector_store %arg10[%c0_211, %c0_212], %795 {strides = array<i32>} : memref<6x256xf32, #tpu.memory_space<vmem>>, vector<6x256xf32>,
    return
  }
}

</mosaic_0001>

<bundles_post_ra>
// kernel: seq2seq_forward.1
= control target key start
LH: loop header
LB: loop body
LE: loop exit
PB: predicated region body
PF: predicated region fallthrough
CT: control target
= control target key end

     0   :  { %15 = vsyncpa [#allocation5], 0  ;;  %s15284_s0 = inlined_call_operand.vmem [shape: f32[8,128], index: 0, kind: input, shape index: {}]   ;;  %s15285_s1 = inlined_call_operand.vmem [shape: f32[6,128], index: 1, kind: input, shape index: {}]   ;;  %s15286_s2 = inlined_call_operand.hbm [shape: f32[128,384], index: 2, kind: input, shape index: {}]   ;;  %s15287_s3 = inlined_call_operand.hbm [shape: f32[128,384], index: 3, kind: input, shape index: {}]   ;;  %s15288_s4 = inlined_call_operand.hbm [shape: f32[256,512], index: 4, kind: input, shape index: {}]   ;;  %s15289_s5 = inlined_call_operand.hbm [shape: f32[128,384], index: 5, kind: input, shape index: {}]   ;;  %s15290_s6 = inlined_call_operand.hbm [shape: f32[128,384], index: 6, kind: input, shape index: {}]   ;;  %s15291_s7 = inlined_call_operand.hbm [shape: f32[256,512], index: 7, kind: input, shape index: {}]   ;;  %s15292_s8 = inlined_call_operand.hbm [shape: f32[256,256], index: 8, kind: input, shape index: {}]   ;;  %s15293_s9 = inlined_call_operand.vmem [shape: f32[1,256], index: 9, kind: input, shape index: {}]   ;;  %s15294_s10 = inlined_call_operand.hbm [shape: f32[6,256], index: 10, kind: output, shape index: {}]  }
   0x1   :  { %16 = vsyncpa [#allocation8], 0 }
   0x2   :  { %17 = vsyncpa [#allocation11], 0 }
   0x3   :  { %18 = vsyncpa [#allocation14], 0 }
   0x4   :  { %19 = vsyncpa [#allocation6], 0  ;;  %s12196_s13 = smov [#allocation7]   ;;  %s12197_s15 = smov [#allocation10]  }
   0x5   :  { %s41_s14 = sshll.u32 %s12196_s13, 4  ;;  %s65_s16 = sshll.u32 %s12197_s15, 4  ;;  %s42_s14 = int_to_ptr.vmem [resolvable:$true] %s41_s14  ;;  %s12268_s16 = int_to_ptr.vmem [resolvable:$true] %s65_s16 }
   0x6   :  { %s12010_s19 = scalar_lea.hbm %s15287_s3, 6144 }
   0x7   :  { %p12011_p0 = scmp.ne.s32.totalorder %s15287_s3, %s12010_s19  ;;  %p12014_p1 = scmp.lt.u32.totalorder %s12010_s19, %s15287_s3 }
   0x9   :  { %p12016_p2 = pnand %p12014_p1, %p12011_p0 }
   0xb   :  { %12019 = shalt.err (!%p12016_p2)
}
   0xc   :  { %s12020_s24 = scalar_lea.vmem %s42_s14, 6144  ;;  %p12025_p4 = scmp.lt.s32.totalorder %s42_s14, %s42_s14 }
   0xd   :  { %p12021_p3 = scmp.ne.s32.totalorder %s42_s14, %s12020_s24  ;;  %p12026_p5 = scmp.lt.s32.totalorder %s12020_s24, %s12020_s24 }
   0xf   :  { %p12027_p6 = por %p12026_p5, %p12025_p4 }
  0x11   :  { %p12028_p7 = pnand %p12027_p6, %p12021_p3 }
  0x13   :  { %12031 = shalt.err (!%p12028_p7)
}
  0x14   :  { %s12198_s25 = smov 384   ;;  %s12199_s26 = smov 24  }
  0x15   :  { %47 = dma.hbm_to_vmem [thread:$0]  %s15287_s3, 6144, %s42_s14, [#allocation8], %s12198_s25, %s12198_s25, %s12199_s26  }
  0x16   :  { %s12032_s11 = scalar_lea.hbm %s15289_s5, 6144 }
  0x17   :  { %p12033_p8 = scmp.ne.s32.totalorder %s15289_s5, %s12032_s11  ;;  %p12036_p9 = scmp.lt.u32.totalorder %s12032_s11, %s15289_s5 }
  0x19   :  { %p12038_p10 = pnand %p12036_p9, %p12033_p8 }
  0x1b   :  { %12041 = shalt.err (!%p12038_p10)
}
  0x1c   :  { %s12042_s18 = scalar_lea.vmem %s12268_s16, 6144  ;;  %p12047_p12 = scmp.lt.s32.totalorder %s12268_s16, %s12268_s16 }
  0x1d   :  { %p12043_p11 = scmp.ne.s32.totalorder %s12268_s16, %s12042_s18  ;;  %p12048_p13 = scmp.lt.s32.totalorder %s12042_s18, %s12042_s18 }
  0x1f   :  { %p12049_p0 = por %p12048_p13, %p12047_p12 }
  0x21   :  { %p12050_p1 = pnand %p12049_p0, %p12043_p11 }
  0x23   :  { %12053 = shalt.err (!%p12050_p1)
}
  0x24   :  { %71 = dma.hbm_to_vmem [thread:$0]  %s15289_s5, 6144, %s12268_s16, [#allocation11], %s12198_s25, %s12198_s25, %s12199_s26  }
  0x25   :  { %s12200_s19 = smov [#allocation13]   ;;  %s12201_s21 = smov [#allocation4]  }
  0x26   :  { %s89_s20 = sshll.u32 %s12200_s19, 4  ;;  %s29_s22 = sshll.u32 %s12201_s21, 4  ;;  %s90_s20 = int_to_ptr.vmem [resolvable:$true] %s89_s20  ;;  %s12305_s22 = int_to_ptr.vmem [resolvable:$true] %s29_s22 }
  0x27   :  { %s12054_s27 = scalar_lea.hbm %s15291_s7, 16384 }
  0x28   :  { %p12055_p2 = scmp.ne.s32.totalorder %s15291_s7, %s12054_s27  ;;  %p12058_p3 = scmp.lt.u32.totalorder %s12054_s27, %s15291_s7 }
  0x2a   :  { %p12060_p4 = pnand %p12058_p3, %p12055_p2 }
  0x2c   :  { %12063 = shalt.err (!%p12060_p4)
}
  0x2d   :  { %s12064_s5 = scalar_lea.vmem %s90_s20, 16384  ;;  %p12069_p6 = scmp.lt.s32.totalorder %s90_s20, %s90_s20 }
  0x2e   :  { %p12065_p5 = scmp.ne.s32.totalorder %s90_s20, %s12064_s5  ;;  %p12070_p7 = scmp.lt.s32.totalorder %s12064_s5, %s12064_s5 }
  0x30   :  { %p12071_p8 = por %p12070_p7, %p12069_p6 }
  0x32   :  { %p12072_p9 = pnand %p12071_p8, %p12065_p5 }
  0x34   :  { %12075 = shalt.err (!%p12072_p9)
}
  0x35   :  { %s12202_s16 = smov 512   ;;  %s12203_s12 = smov 32  }
  0x36   :  { %95 = dma.hbm_to_vmem [thread:$0]  %s15291_s7, 16384, %s90_s20, [#allocation14], %s12202_s16, %s12202_s16, %s12203_s12  }
  0x37   :  { %s12076_s3 = scalar_lea.hbm %s15286_s2, 6144 }
  0x38   :  { %p12077_p10 = scmp.ne.s32.totalorder %s15286_s2, %s12076_s3  ;;  %p12080_p11 = scmp.lt.u32.totalorder %s12076_s3, %s15286_s2 }
  0x3a   :  { %p12082_p12 = pnand %p12080_p11, %p12077_p10 }
  0x3c   :  { %12085 = shalt.err (!%p12082_p12)
}
  0x3d   :  { %s12086_s24 = scalar_lea.vmem %s12305_s22, 6144  ;;  %p12091_p0 = scmp.lt.s32.totalorder %s12305_s22, %s12305_s22 }
  0x3e   :  { %p12087_p13 = scmp.ne.s32.totalorder %s12305_s22, %s12086_s24  ;;  %p12092_p1 = scmp.lt.s32.totalorder %s12086_s24, %s12086_s24 }
  0x40   :  { %p12093_p2 = por %p12092_p1, %p12091_p0 }
  0x42   :  { %p12094_p3 = pnand %p12093_p2, %p12087_p13 }
  0x44   :  { %12097 = shalt.err (!%p12094_p3)
}
  0x45   :  { %35 = dma.hbm_to_vmem [thread:$0]  %s15286_s2, 6144, %s12305_s22, [#allocation5], %s12198_s25, %s12198_s25, %s12199_s26  }
  0x46   :  { %s12204_s27 = smov [#allocation9]   ;;  %s12205_s29 = smov [#allocation12]  }
  0x47   :  { %s53_s28 = sshll.u32 %s12204_s27, 4  ;;  %s77_s30 = sshll.u32 %s12205_s29, 4  ;;  %s54_s28 = int_to_ptr.vmem [resolvable:$true] %s53_s28  ;;  %s12342_s30 = int_to_ptr.vmem [resolvable:$true] %s77_s30 }
  0x48   :  { %s12098_s13 = scalar_lea.hbm %s15288_s4, 16384 }
  0x49   :  { %p12099_p4 = scmp.ne.s32.totalorder %s15288_s4, %s12098_s13  ;;  %p12102_p5 = scmp.lt.u32.totalorder %s12098_s13, %s15288_s4 }
  0x4b   :  { %p12104_p6 = pnand %p12102_p5, %p12099_p4 }
  0x4d   :  { %12107 = shalt.err (!%p12104_p6)
}
  0x4e   :  { %s12108_s2 = scalar_lea.vmem %s54_s28, 16384  ;;  %p12113_p8 = scmp.lt.s32.totalorder %s54_s28, %s54_s28 }
  0x4f   :  { %p12109_p7 = scmp.ne.s32.totalorder %s54_s28, %s12108_s2  ;;  %p12114_p9 = scmp.lt.s32.totalorder %s12108_s2, %s12108_s2 }
  0x51   :  { %p12115_p10 = por %p12114_p9, %p12113_p8 }
  0x53   :  { %p12116_p11 = pnand %p12115_p10, %p12109_p7 }
  0x55   :  { %12119 = shalt.err (!%p12116_p11)
}
  0x56   :  { %59 = dma.hbm_to_vmem [thread:$0]  %s15288_s4, 16384, %s54_s28, [#allocation8], %s12202_s16, %s12202_s16, %s12203_s12  }
  0x57   :  { %s12120_s23 = scalar_lea.hbm %s15290_s6, 6144 }
  0x58   :  { %p12121_p12 = scmp.ne.s32.totalorder %s15290_s6, %s12120_s23  ;;  %p12124_p13 = scmp.lt.u32.totalorder %s12120_s23, %s15290_s6 }
  0x5a   :  { %p12126_p0 = pnand %p12124_p13, %p12121_p12 }
  0x5c   :  { %12129 = shalt.err (!%p12126_p0)
}
  0x5d   :  { %s12130_s29 = scalar_lea.vmem %s12342_s30, 6144  ;;  %p12135_p2 = scmp.lt.s32.totalorder %s12342_s30, %s12342_s30 }
  0x5e   :  { %p12131_p1 = scmp.ne.s32.totalorder %s12342_s30, %s12130_s29  ;;  %p12136_p3 = scmp.lt.s32.totalorder %s12130_s29, %s12130_s29 }
  0x60   :  { %p12137_p4 = por %p12136_p3, %p12135_p2 }
  0x62   :  { %p12138_p5 = pnand %p12137_p4, %p12131_p1 }
  0x64   :  { %12141 = shalt.err (!%p12138_p5)
}
  0x65   :  { %83 = dma.hbm_to_vmem [thread:$0]  %s15290_s6, 6144, %s12342_s30, [#allocation11], %s12198_s25, %s12198_s25, %s12199_s26  }
  0x66   :  { %s12206_s12 = smov [#allocation15]   ;;  %s12142_s13 = scalar_lea.hbm %s15292_s8, 8192 }
  0x67   :  { %s101_s28 = sshll.u32 %s12206_s12, 4  ;;  %p12143_p6 = scmp.ne.s32.totalorder %s15292_s8, %s12142_s13  ;;  %s102_s28 = int_to_ptr.vmem [resolvable:$true] %s101_s28 }
  0x68   :  { %p12146_p7 = scmp.lt.u32.totalorder %s12142_s13, %s15292_s8 }
  0x6a   :  { %p12148_p8 = pnand %p12146_p7, %p12143_p6 }
  0x6c   :  { %12151 = shalt.err (!%p12148_p8)
}
  0x6d   :  { %s12152_s2 = scalar_lea.vmem %s102_s28, 8192  ;;  %p12157_p10 = scmp.lt.s32.totalorder %s102_s28, %s102_s28 }
  0x6e   :  { %p12153_p9 = scmp.ne.s32.totalorder %s102_s28, %s12152_s2  ;;  %p12158_p11 = scmp.lt.s32.totalorder %s12152_s2, %s12152_s2 }
  0x70   :  { %p12159_p12 = por %p12158_p11, %p12157_p10 }
  0x72   :  { %p12160_p13 = pnand %p12159_p12, %p12153_p9 }
  0x74   :  { %12163 = shalt.err (!%p12160_p13)
}
  0x75   :  { %s12207_s6 = smov 256   ;;  %s12208_s25 = smov 16  }
  0x76   :  { %107 = dma.hbm_to_vmem [thread:$0]  %s15292_s8, 8192, %s102_s28, [#allocation14], %s12207_s6, %s12207_s6, %s12208_s25  }
  0x77   :  { %12186 = dma.done.wait [#allocation5], 6144  }
  0x78   :  { %12187 = vsyncadd [#allocation5], 4294961152 }
  0x79   :  { %12188 = dma.done.wait [#allocation8], 22528  }
  0x7a   :  { %12189 = vsyncadd [#allocation8], 4294944768 }
  0x7b   :  { %12190 = dma.done.wait [#allocation11], 12288  }
  0x7c   :  { %12191 = vsyncadd [#allocation11], 4294955008 }
  0x7d   :  { %12192 = dma.done.wait [#allocation14], 24576  }
  0x7e   :  { %12193 = vsyncadd [#allocation14], 4294942720  ;;  %v15295_v0 = vmov 0.0   ;;  %v133_v1 = vld [vmem:[#allocation4 + $0x8] sm:$0xff]  ;;  %v136_v2 = vld [vmem:[#allocation4 + $0x20] sm:$0xff]  ;;  %vm12211_vm0 = vmmov 0  }
  0x7f   :  { %244 = vmatprep.mubr.f32.mxu1 %v15295_v0  ;;  %434 = vmatprep.mubr.f32.mxu0 %v15295_v0  ;;  %v323_v3 = vld [vmem:[#allocation10 + $0x8] sm:$0xff]  ;;  %v8957_v4 = vpack.c.bf16 %v136_v2, %v133_v1  ;;  %v326_v5 = vld [vmem:[#allocation10 + $0x20] sm:$0xff]  ;;  %v135_v7 = vld [vmem:[#allocation4 + $0x18] sm:$0xff]  ;;  %vm7801_vm1 = vcmask 62464   ;;  %vm7813_vm2 = vcmask 64512   ;;  %s12212_s21 = smov [#allocation16]  }
  0x80   :  { %v132_v6 = vld [vmem:[#allocation4] sm:$0xff]  ;;  %v9013_v8 = vpack.c.bf16 %v326_v5, %v323_v3  ;;  %v325_v11 = vld [vmem:[#allocation10 + $0x18] sm:$0xff]  ;;  %v142_v14 = vld [vmem:[#allocation4 + $0x50] sm:$0xff]  ;;  %s8042_s23 = sshll.u32 %s12212_s21, 4  ;;  %s8043_s23 = int_to_ptr.vmem [resolvable:$true] %s8042_s23 }
  0x81   :  { %v8959_v9 = vpack.c.bf16 %v135_v7, %v132_v6  ;;  %v322_v10 = vld [vmem:[#allocation10] sm:$0xff]  ;;  %v139_v12 = vld [vmem:[#allocation4 + $0x38] sm:$0xff]  ;;  %8958 = vmatprep.subr.bf16.mxu1 %v8957_v4  ;;  %v332_v16 = vld [vmem:[#allocation10 + $0x50] sm:$0xff]  ;;  %s12164_s24 = scalar_lea.vmem %s8043_s23, 256  ;;  %p12169_p1 = scmp.lt.s32.totalorder %s8043_s23, %s8043_s23 }
  0x82   :  { %v9015_v13 = vpack.c.bf16 %v325_v11, %v322_v10  ;;  %v329_v15 = vld [vmem:[#allocation10 + $0x38] sm:$0xff]  ;;  %9014 = vmatprep.subr.bf16.mxu0 %v9013_v8  ;;  %v8961_v17 = vpack.c.bf16 %v142_v14, %v139_v12  ;;  %v138_v19 = vld [vmem:[#allocation4 + $0x30] sm:$0xff]  ;;  %v141_v20 = vld [vmem:[#allocation4 + $0x48] sm:$0xff]  ;;  %p12165_p0 = scmp.ne.s32.totalorder %s8043_s23, %s12164_s24  ;;  %p12170_p2 = scmp.lt.s32.totalorder %s12164_s24, %s12164_s24 }
  0x83   :  { %8960 = vmatpush1.bf16.msra.mxu1 %v8959_v9  ;;  %v9017_v18 = vpack.c.bf16 %v332_v16, %v329_v15  ;;  %v328_v21 = vld [vmem:[#allocation10 + $0x30] sm:$0xff]  ;;  %v8963_v22 = vpack.c.bf16 %v141_v20, %v138_v19  ;;  %v331_v23 = vld [vmem:[#allocation10 + $0x48] sm:$0xff]  ;;  %v148_v25 = vld [vmem:[#allocation4 + $0x80] sm:$0xff] }
  0x84   :  { %9016 = vmatpush1.bf16.msra.mxu0 %v9015_v13  ;;  %v145_v24 = vld [vmem:[#allocation4 + $0x68] sm:$0xff]  ;;  %8962 = vmatprep.subr.bf16.mxu1 %v8961_v17  ;;  %v9019_v26 = vpack.c.bf16 %v331_v23, %v328_v21  ;;  %v338_v29 = vld [vmem:[#allocation10 + $0x80] sm:$0xff]  ;;  %v147_v32 = vld [vmem:[#allocation4 + $0x78] sm:$0xff]  ;;  %p12171_p3 = por %p12170_p2, %p12169_p1 }
  0x85   :  { %9018 = vmatprep.subr.bf16.mxu0 %v9017_v18  ;;  %v8965_v27 = vpack.c.bf16 %v148_v25, %v145_v24  ;;  %v335_v28 = vld [vmem:[#allocation10 + $0x68] sm:$0xff]  ;;  %v144_v30 = vld [vmem:[#allocation4 + $0x60] sm:$0xff]  ;;  %v337_v34 = vld [vmem:[#allocation10 + $0x78] sm:$0xff] }
  0x86   :  { %v9021_v31 = vpack.c.bf16 %v338_v29, %v335_v28  ;;  %v334_v33 = vld [vmem:[#allocation10 + $0x60] sm:$0xff]  ;;  %v8967_v35 = vpack.c.bf16 %v147_v32, %v144_v30  ;;  %v151_v36 = vld [vmem:[#allocation4 + $0x98] sm:$0xff]  ;;  %v154_v37 = vld [vmem:[#allocation4 + $0xb0] sm:$0xff]  ;;  %p12172_p4 = pnand %p12171_p3, %p12165_p0 }
  0x87   :  { %8964 = vmatpush1.bf16.msra.mxu1 %v8963_v22  ;;  %v341_v38 = vld [vmem:[#allocation10 + $0x98] sm:$0xff]  ;;  %v9023_v39 = vpack.c.bf16 %v337_v34, %v334_v33  ;;  %v8969_v40 = vpack.c.bf16 %v154_v37, %v151_v36  ;;  %v344_v41 = vld [vmem:[#allocation10 + $0xb0] sm:$0xff]  ;;  %v153_v43 = vld [vmem:[#allocation4 + $0xa8] sm:$0xff] }
  0x88   :  { %9020 = vmatpush1.bf16.msra.mxu0 %v9019_v26  ;;  %8966 = vmatprep.subr.bf16.mxu1 %v8965_v27  ;;  %v150_v42 = vld [vmem:[#allocation4 + $0x90] sm:$0xff]  ;;  %v9025_v44 = vpack.c.bf16 %v344_v41, %v341_v38  ;;  %v343_v46 = vld [vmem:[#allocation10 + $0xa8] sm:$0xff]  ;;  %v160_v48 = vld [vmem:[#allocation4 + $0xe0] sm:$0xff] }
  0x89   :  { %9022 = vmatprep.subr.bf16.mxu0 %v9021_v31  ;;  %v340_v45 = vld [vmem:[#allocation10 + $0x90] sm:$0xff]  ;;  %v157_v47 = vld [vmem:[#allocation4 + $0xc8] sm:$0xff]  ;;  %v350_v50 = vld [vmem:[#allocation10 + $0xe0] sm:$0xff]  ;;  %v8971_v51 = vpack.c.bf16 %v153_v43, %v150_v42 }
  0x8a   :  { %v347_v49 = vld [vmem:[#allocation10 + $0xc8] sm:$0xff]  ;;  %v9027_v52 = vpack.c.bf16 %v343_v46, %v340_v45  ;;  %v8973_v53 = vpack.c.bf16 %v160_v48, %v157_v47  ;;  %v156_v54 = vld [vmem:[#allocation4 + $0xc0] sm:$0xff]  ;;  %v159_v55 = vld [vmem:[#allocation4 + $0xd8] sm:$0xff]  ;;  %v15297_v45 = vmov 0.0|0.0  }
  0x8b   :  { %8968 = vmatpush1.bf16.msra.mxu1 %v8967_v35  ;;  %v346_v56 = vld [vmem:[#allocation10 + $0xc0] sm:$0xff]  ;;  %v9029_v57 = vpack.c.bf16 %v350_v50, %v347_v49  ;;  %v349_v58 = vld [vmem:[#allocation10 + $0xd8] sm:$0xff]  ;;  %v166_v60 = vld [vmem:[#allocation4 + $0x110] sm:$0xff]  ;;  %v8975_v63 = vpack.c.bf16 %v159_v55, %v156_v54 }
  0x8c   :  { %9024 = vmatpush1.bf16.msra.mxu0 %v9023_v39  ;;  %8970 = vmatprep.subr.bf16.mxu1 %v8969_v40  ;;  %v163_v59 = vld [vmem:[#allocation4 + $0xf8] sm:$0xff]  ;;  %v356_v62 = vld [vmem:[#allocation10 + $0x110] sm:$0xff]  ;;  %v9031_v1 = vpack.c.bf16 %v349_v58, %v346_v56  ;;  %v165_v4 = vld [vmem:[#allocation4 + $0x108] sm:$0xff] }
  0x8d   :  { %9026 = vmatprep.subr.bf16.mxu0 %v9025_v44  ;;  %v353_v61 = vld [vmem:[#allocation10 + $0xf8] sm:$0xff]  ;;  %v8977_v2 = vpack.c.bf16 %v166_v60, %v163_v59  ;;  %v162_v3 = vld [vmem:[#allocation4 + $0xf0] sm:$0xff]  ;;  %v355_v7 = vld [vmem:[#allocation10 + $0x108] sm:$0xff] }
  0x8e   :  { %v352_v5 = vld [vmem:[#allocation10 + $0xf0] sm:$0xff]  ;;  %v9033_v6 = vpack.c.bf16 %v356_v62, %v353_v61  ;;  %v169_v8 = vld [vmem:[#allocation4 + $0x128] sm:$0xff]  ;;  %v172_v9 = vld [vmem:[#allocation4 + $0x140] sm:$0xff]  ;;  %v8979_v12 = vpack.c.bf16 %v165_v4, %v162_v3 }
  0x8f   :  { %8972 = vmatpush1.bf16.msra.mxu1 %v8971_v51  ;;  %v359_v10 = vld [vmem:[#allocation10 + $0x128] sm:$0xff]  ;;  %v362_v11 = vld [vmem:[#allocation10 + $0x140] sm:$0xff]  ;;  %v9035_v13 = vpack.c.bf16 %v355_v7, %v352_v5  ;;  %v8981_v14 = vpack.c.bf16 %v172_v9, %v169_v8  ;;  %v171_v16 = vld [vmem:[#allocation4 + $0x138] sm:$0xff] }
  0x90   :  { %9028 = vmatpush1.bf16.msra.mxu0 %v9027_v52  ;;  %8974 = vmatprep.subr.bf16.mxu1 %v8973_v53  ;;  %v168_v15 = vld [vmem:[#allocation4 + $0x120] sm:$0xff]  ;;  %v9037_v18 = vpack.c.bf16 %v362_v11, %v359_v10  ;;  %v361_v19 = vld [vmem:[#allocation10 + $0x138] sm:$0xff]  ;;  %v178_v21 = vld [vmem:[#allocation4 + $0x170] sm:$0xff] }
  0x91   :  { %9030 = vmatprep.subr.bf16.mxu0 %v9029_v57  ;;  %v358_v17 = vld [vmem:[#allocation10 + $0x120] sm:$0xff]  ;;  %v175_v20 = vld [vmem:[#allocation4 + $0x158] sm:$0xff]  ;;  %v368_v23 = vld [vmem:[#allocation10 + $0x170] sm:$0xff]  ;;  %v8983_v24 = vpack.c.bf16 %v171_v16, %v168_v15 }
  0x92   :  { %v365_v22 = vld [vmem:[#allocation10 + $0x158] sm:$0xff]  ;;  %v9039_v25 = vpack.c.bf16 %v361_v19, %v358_v17  ;;  %v8985_v26 = vpack.c.bf16 %v178_v21, %v175_v20  ;;  %v174_v27 = vld [vmem:[#allocation4 + $0x150] sm:$0xff]  ;;  %v177_v28 = vld [vmem:[#allocation4 + $0x168] sm:$0xff] }
  0x93   :  { %8976 = vmatpush1.bf16.msra.mxu1 %v8975_v63  ;;  %v9041_v29 = vpack.c.bf16 %v368_v23, %v365_v22  ;;  %v364_v30 = vld [vmem:[#allocation10 + $0x150] sm:$0xff]  ;;  %v367_v31 = vld [vmem:[#allocation10 + $0x168] sm:$0xff]  ;;  %v515_v33 = vld [vmem:[#allocation7 + $0x20] sm:$0xff]  ;;  %v8987_v34 = vpack.c.bf16 %v177_v28, %v174_v27 }
  0x94   :  { %9032 = vmatpush1.bf16.msra.mxu0 %v9031_v1  ;;  %8978 = vmatprep.subr.bf16.mxu1 %v8977_v2  ;;  %v512_v32 = vld [vmem:[#allocation7 + $0x8] sm:$0xff]  ;;  %v9043_v35 = vpack.c.bf16 %v367_v31, %v364_v30  ;;  %v134_v36 = vld [vmem:[#allocation4 + $0x10] sm:$0xff]  ;;  %v511_v39 = vld [vmem:[#allocation7] sm:$0xff] }
  0x95   :  { %9034 = vmatprep.subr.bf16.mxu0 %v9033_v6  ;;  %v137_v37 = vld [vmem:[#allocation4 + $0x28] sm:$0xff]  ;;  %v12393_v38 = vpack.c.bf16 %v515_v33, %v512_v32  ;;  %v514_v40 = vld [vmem:[#allocation7 + $0x18] sm:$0xff]  ;;  %v521_v42 = vld [vmem:[#allocation7 + $0x50] sm:$0xff] }
  0x96   :  { %v518_v41 = vld [vmem:[#allocation7 + $0x38] sm:$0xff]  ;;  %v12398_v43 = vld [vmem:[%s15284_s0] sm:$0xff]  ;;  %v8990_v44 = vpack.c.bf16 %v137_v37, %v134_v36  ;;  %v12406_v47 = vpack.c.bf16 %v514_v40, %v511_v39  ;;  %v140_v48 = vld [vmem:[#allocation4 + $0x40] sm:$0xff] }
  0x97   :  { %8980 = vmatpush1.bf16.msra.mxu1 %v8979_v12  ;;  %v12404_v46 = vld [vmem:[%s15285_s1] sm:$0x3f]  ;;  %v143_v49 = vld [vmem:[#allocation4 + $0x58] sm:$0xff]  ;;  %v12409_v50 = vpack.c.bf16 %v521_v42, %v518_v41  ;;  %v520_v52 = vld [vmem:[#allocation7 + $0x48] sm:$0xff] }
  0x98   :  { %9036 = vmatpush1.bf16.msra.mxu0 %v9035_v13  ;;  %8982 = vmatprep.subr.bf16.mxu1 %v8981_v14  ;;  %v517_v51 = vld [vmem:[#allocation7 + $0x30] sm:$0xff]  ;;  %v524_v53 = vld [vmem:[#allocation7 + $0x68] sm:$0xff]  ;;  %v527_v54 = vld [vmem:[#allocation7 + $0x80] sm:$0xff]  ;;  %v8993_v55 = vpack.c.bf16 %v143_v49, %v140_v48 }
  0x99   :  { %9038 = vmatprep.subr.bf16.mxu0 %v9037_v18  ;;  %v12415_v56 = vpack.c.bf16 %v520_v52, %v517_v51  ;;  %v146_v57 = vld [vmem:[#allocation4 + $0x70] sm:$0xff]  ;;  %v149_v58 = vld [vmem:[#allocation4 + $0x88] sm:$0xff]  ;;  %v12418_v59 = vpack.c.bf16 %v527_v54, %v524_v53  ;;  %v523_v60 = vld [vmem:[#allocation7 + $0x60] sm:$0xff] }
  0x9a   :  { %v526_v61 = vld [vmem:[#allocation7 + $0x78] sm:$0xff]  ;;  %v533_v63 = vld [vmem:[#allocation7 + $0xb0] sm:$0xff]  ;;  %v8996_v1 = vpack.c.bf16 %v149_v58, %v146_v57  ;;  %v152_v3 = vld [vmem:[#allocation4 + $0xa0] sm:$0xff] }
  0x9b   :  { %8984 = vmatpush1.bf16.msra.mxu1 %v8983_v24  ;;  %v530_v62 = vld [vmem:[#allocation7 + $0x98] sm:$0xff]  ;;  %v12425_v2 = vpack.c.bf16 %v526_v61, %v523_v60  ;;  %v529_v6 = vld [vmem:[#allocation7 + $0x90] sm:$0xff]  ;;  %v532_v7 = vld [vmem:[#allocation7 + $0xa8] sm:$0xff] }
  0x9c   :  { %9040 = vmatpush1.bf16.msra.mxu0 %v9039_v25  ;;  %8986 = vmatprep.subr.bf16.mxu1 %v8985_v26  ;;  %v155_v4 = vld [vmem:[#allocation4 + $0xb8] sm:$0xff]  ;;  %v12428_v5 = vpack.c.bf16 %v533_v63, %v530_v62  ;;  %v536_v8 = vld [vmem:[#allocation7 + $0xc8] sm:$0xff]  ;;  %v539_v9 = vld [vmem:[#allocation7 + $0xe0] sm:$0xff]  ;;  %v12432_v11 = vpack.c.bf16 %v532_v7, %v529_v6 }
  0x9d   :  { %9042 = vmatprep.subr.bf16.mxu0 %v9041_v29  ;;  %v8999_v10 = vpack.c.bf16 %v155_v4, %v152_v3  ;;  %v158_v12 = vld [vmem:[#allocation4 + $0xd0] sm:$0xff]  ;;  %v161_v13 = vld [vmem:[#allocation4 + $0xe8] sm:$0xff]  ;;  %v12435_v14 = vpack.c.bf16 %v539_v9, %v536_v8  ;;  %v535_v15 = vld [vmem:[#allocation7 + $0xc0] sm:$0xff] }
  0x9e   :  { %v538_v16 = vld [vmem:[#allocation7 + $0xd8] sm:$0xff]  ;;  %v545_v18 = vld [vmem:[#allocation7 + $0x110] sm:$0xff]  ;;  %v9002_v19 = vpack.c.bf16 %v161_v13, %v158_v12  ;;  %v164_v21 = vld [vmem:[#allocation4 + $0x100] sm:$0xff] }
  0x9f   :  { %8988 = vmatpush1.bf16.msra.mxu1 %v8987_v34  ;;  %v542_v17 = vld [vmem:[#allocation7 + $0xf8] sm:$0xff]  ;;  %v12439_v20 = vpack.c.bf16 %v538_v16, %v535_v15  ;;  %v541_v24 = vld [vmem:[#allocation7 + $0xf0] sm:$0xff]  ;;  %v544_v25 = vld [vmem:[#allocation7 + $0x108] sm:$0xff] }
  0xa0   :  { %9044 = vmatpush1.bf16.msra.mxu0 %v9043_v35  ;;  %8989 = vmatprep.subr.bf16.mxu1 %v15297_v45  ;;  %v167_v22 = vld [vmem:[#allocation4 + $0x118] sm:$0xff]  ;;  %v12442_v23 = vpack.c.bf16 %v545_v18, %v542_v17  ;;  %v548_v26 = vld [vmem:[#allocation7 + $0x128] sm:$0xff]  ;;  %v551_v27 = vld [vmem:[#allocation7 + $0x140] sm:$0xff]  ;;  %v12446_v29 = vpack.c.bf16 %v544_v25, %v541_v24 }
  0xa1   :  { %9070 = vmatprep.subr.bf16.mxu0 %v12393_v38  ;;  %v9005_v28 = vpack.c.bf16 %v167_v22, %v164_v21  ;;  %v170_v30 = vld [vmem:[#allocation4 + $0x130] sm:$0xff]  ;;  %v173_v31 = vld [vmem:[#allocation4 + $0x148] sm:$0xff]  ;;  %v12449_v32 = vpack.c.bf16 %v551_v27, %v548_v26  ;;  %v547_v33 = vld [vmem:[#allocation7 + $0x120] sm:$0xff] }
  0xa2   :  { %245 = vmatmul.mubr.f32.vlgmr.msra.gmra.mrb[0].mxu1 %v12398_v43  ;;  %v550_v34 = vld [vmem:[#allocation7 + $0x138] sm:$0xff]  ;;  %v557_v36 = vld [vmem:[#allocation7 + $0x170] sm:$0xff]  ;;  %v9008_v37 = vpack.c.bf16 %v173_v31, %v170_v30  ;;  %v176_v40 = vld [vmem:[#allocation4 + $0x160] sm:$0xff] }
  0xa3   :  { %8991 = vmatpush3.bf16.msra.mxu1 %v8990_v44  ;;  %435 = vmatmul.mubr.f32.vlgmr.msra.gmra.mrb[0].mxu0 %v12404_v46  ;;  %v554_v35 = vld [vmem:[#allocation7 + $0x158] sm:$0xff]  ;;  %v12453_v39 = vpack.c.bf16 %v550_v34, %v547_v33  ;;  %v553_v44 = vld [vmem:[#allocation7 + $0x150] sm:$0xff]  ;;  %v556_v48 = vld [vmem:[#allocation7 + $0x168] sm:$0xff] }
  0xa4   :  { %9072 = vmatpush1.bf16.msra.mxu0 %v12406_v47  ;;  %8992 = vmatprep.subr.bf16.mxu1 %v15297_v45  ;;  %v179_v41 = vld [vmem:[#allocation4 + $0x178] sm:$0xff]  ;;  %v12456_v42 = vpack.c.bf16 %v557_v36, %v554_v35  ;;  %v12460_v51 = vpack.c.bf16 %v556_v48, %v553_v44  ;;  %v324_v52 = vld [vmem:[#allocation10 + $0x10] sm:$0xff]  ;;  %v327_v53 = vld [vmem:[#allocation10 + $0x28] sm:$0xff] }
  0xa5   :  { %9074 = vmatprep.subr.bf16.mxu0 %v12409_v50  ;;  %8419 = vmatprep.mubr.msk.f32.mxu1 %vm12211_vm0, %v15295_v0  ;;  %v9011_v49 = vpack.c.bf16 %v179_v41, %v176_v40  ;;  %v9046_v54 = vpack.c.bf16 %v327_v53, %v324_v52  ;;  %v333_v57 = vld [vmem:[#allocation10 + $0x58] sm:$0xff]  ;;  %v336_v60 = vld [vmem:[#allocation10 + $0x70] sm:$0xff]  ;;  %v339_v61 = vld [vmem:[#allocation10 + $0x88] sm:$0xff] }
  0xa6   :  { %623 = vmatprep.mubr.f32.mxu0 %v15295_v0  ;;  %v9052_v62 = vpack.c.bf16 %v339_v61, %v336_v60  ;;  %v342_v63 = vld [vmem:[#allocation10 + $0xa0] sm:$0xff]  ;;  %v348_v3 = vld [vmem:[#allocation10 + $0xd0] sm:$0xff]  ;;  %v351_v4 = vld [vmem:[#allocation10 + $0xe8] sm:$0xff] }
  0xa7   :  { %8994 = vmatpush3.bf16.msra.mxu1 %v8993_v55  ;;  %v330_v55 = vld [vmem:[#allocation10 + $0x40] sm:$0xff]  ;;  %v9058_v6 = vpack.c.bf16 %v351_v4, %v348_v3  ;;  %v357_v8 = vld [vmem:[#allocation10 + $0x118] sm:$0xff]  ;;  %v363_v12 = vld [vmem:[#allocation10 + $0x148] sm:$0xff] }
  0xa8   :  { %9076 = vmatpush1.bf16.msra.mxu0 %v12415_v56  ;;  %8995 = vmatprep.subr.bf16.mxu1 %v15297_v45  ;;  %v9049_v58 = vpack.c.bf16 %v333_v57, %v330_v55  ;;  %v354_v7 = vld [vmem:[#allocation10 + $0x100] sm:$0xff]  ;;  %v369_v16 = vld [vmem:[#allocation10 + $0x178] sm:$0xff]  ;;  %v513_v18 = vld [vmem:[#allocation7 + $0x10] sm:$0xff] }
  0xa9   :  { %9078 = vmatprep.subr.bf16.mxu0 %v12418_v59  ;;  %v9061_v9 = vpack.c.bf16 %v357_v8, %v354_v7  ;;  %v366_v15 = vld [vmem:[#allocation10 + $0x160] sm:$0xff]  ;;  %v522_v24 = vld [vmem:[#allocation7 + $0x58] sm:$0xff]  ;;  %v525_v26 = vld [vmem:[#allocation7 + $0x70] sm:$0xff] }
  0xaa   :  { %v9067_v17 = vpack.c.bf16 %v369_v16, %v366_v15  ;;  %v519_v22 = vld [vmem:[#allocation7 + $0x40] sm:$0xff]  ;;  %v528_v27 = vld [vmem:[#allocation7 + $0x88] sm:$0xff]  ;;  %v534_v31 = vld [vmem:[#allocation7 + $0xb8] sm:$0xff] }
  0xab   :  { %8997 = vmatpush3.bf16.msra.mxu1 %v8996_v1  ;;  %v345_v1 = vld [vmem:[#allocation10 + $0xb8] sm:$0xff]  ;;  %v12482_v25 = vpack.c.bf16 %v522_v24, %v519_v22  ;;  %v531_v30 = vld [vmem:[#allocation7 + $0xa0] sm:$0xff]  ;;  %v537_v33 = vld [vmem:[#allocation7 + $0xd0] sm:$0xff] }
  0xac   :  { %9080 = vmatpush1.bf16.msra.mxu0 %v12425_v2  ;;  %8998 = vmatprep.subr.bf16.mxu1 %v15297_v45  ;;  %v540_v34 = vld [vmem:[#allocation7 + $0xe8] sm:$0xff]  ;;  %v543_v36 = vld [vmem:[#allocation7 + $0x100] sm:$0xff]  ;;  %v549_v41 = vld [vmem:[#allocation7 + $0x130] sm:$0xff] }
  0xad   :  { %9082 = vmatprep.subr.bf16.mxu0 %v12428_v5  ;;  %v12496_v35 = vpack.c.bf16 %v540_v34, %v537_v33  ;;  %v552_v44 = vld [vmem:[#allocation7 + $0x148] sm:$0xff]  ;;  %v558_v52 = vld [vmem:[#allocation7 + $0x178] sm:$0xff]  ;;  %v721_v61 = vld [vmem:[#allocation9] sm:$0xff] }
  0xae   :  { %v12504_v48 = vpack.c.bf16 %v552_v44, %v549_v41  ;;  %v726_v55 = vld [vmem:[#allocation9 + $0x28] sm:$0xff]  ;;  %v724_v57 = vld [vmem:[#allocation9 + $0x18] sm:$0xff]  ;;  %v727_v3 = vld [vmem:[#allocation9 + $0x30] sm:$0xff] }
  0xaf   :  { %9000 = vmatpush3.bf16.msra.mxu1 %v8999_v10  ;;  %v360_v10 = vld [vmem:[#allocation10 + $0x130] sm:$0xff]  ;;  %v728_v60 = vld [vmem:[#allocation9 + $0x38] sm:$0xff]  ;;  %v734_v7 = vld [vmem:[#allocation9 + $0x68] sm:$0xff] }
  0xb0   :  { %9084 = vmatpush1.bf16.msra.mxu0 %v12432_v11  ;;  %9001 = vmatprep.subr.bf16.mxu1 %v15297_v45  ;;  %v9064_v13 = vpack.c.bf16 %v363_v12, %v360_v10  ;;  %v732_v8 = vld [vmem:[#allocation9 + $0x58] sm:$0xff]  ;;  %v729_v12 = vld [vmem:[#allocation9 + $0x40] sm:$0xff]  ;;  %v738_v22 = vld [vmem:[#allocation9 + $0x88] sm:$0xff] }
  0xb1   :  { %9086 = vmatprep.subr.bf16.mxu0 %v12435_v14  ;;  %v736_v10 = vld [vmem:[#allocation9 + $0x78] sm:$0xff]  ;;  %v742_v24 = vld [vmem:[#allocation9 + $0xa8] sm:$0xff]  ;;  %v741_v33 = vld [vmem:[#allocation9 + $0xa0] sm:$0xff] }
  0xb2   :  { %v12528_v15 = vpack.c.bf16 %v736_v10, %v732_v8  ;;  %v743_v41 = vld [vmem:[#allocation9 + $0xb0] sm:$0xff]  ;;  %v754_v8 = vld [vmem:[#allocation9 + $0x108] sm:$0xff] }
  0xb3   :  { %9003 = vmatpush3.bf16.msra.mxu1 %v9002_v19  ;;  %v516_v19 = vld [vmem:[#allocation7 + $0x28] sm:$0xff] }
  0xb4   :  { %9088 = vmatpush1.bf16.msra.mxu0 %v12439_v20  ;;  %9004 = vmatprep.subr.bf16.mxu1 %v15297_v45  ;;  %v12477_v21 = vpack.c.bf16 %v516_v19, %v513_v18  ;;  %v735_v18 = vld [vmem:[#allocation9 + $0x70] sm:$0xff]  ;;  %v758_v10 = vld [vmem:[#allocation9 + $0x128] sm:$0xff] }
  0xb5   :  { %9090 = vmatprep.subr.bf16.mxu0 %v12442_v23 }
  0xb7   :  { %9006 = vmatpush3.bf16.msra.mxu1 %v9005_v28  ;;  %v12488_v28 = vpack.c.bf16 %v528_v27, %v525_v26  ;;  %v740_v26 = vld [vmem:[#allocation9 + $0x98] sm:$0xff]  ;;  %v12538_v27 = vpack.c.bf16 %v742_v24, %v738_v22  ;;  %v757_v22 = vld [vmem:[#allocation9 + $0x120] sm:$0xff] }
  0xb8   :  { %9092 = vmatpush1.bf16.msra.mxu0 %v12446_v29  ;;  %9007 = vmatprep.subr.bf16.mxu1 %v15297_v45 }
  0xb9   :  { %9094 = vmatprep.subr.bf16.mxu0 %v12449_v32 }
  0xbb   :  { %9009 = vmatpush3.bf16.msra.mxu1 %v9008_v37  ;;  %v546_v37 = vld [vmem:[#allocation7 + $0x118] sm:$0xff] }
  0xbc   :  { %9096 = vmatpush1.bf16.msra.mxu0 %v12453_v39  ;;  %9010 = vmatprep.subr.bf16.mxu1 %v15297_v45  ;;  %v12500_v40 = vpack.c.bf16 %v546_v37, %v543_v36  ;;  %v739_v37 = vld [vmem:[#allocation9 + $0x90] sm:$0xff] }
  0xbd   :  { %9098 = vmatprep.subr.bf16.mxu0 %v12456_v42  ;;  %v12545_v44 = vpack.c.bf16 %v743_v41, %v739_v37  ;;  %v766_v41 = vld [vmem:[#allocation9 + $0x168] sm:$0xff] }
  0xbf   :  { %9012 = vmatpush3.bf16.msra.mxu1 %v9011_v49  ;;  %v555_v49 = vld [vmem:[#allocation7 + $0x160] sm:$0xff] }
  0xc0   :  { %9100 = vmatpush1.bf16.msra.mxu0 %v12460_v51  ;;  %9045 = vmatprep.subr.bf16.mxu1 %v15297_v45  ;;  %v12508_v53 = vpack.c.bf16 %v558_v52, %v555_v49  ;;  %v746_v49 = vld [vmem:[#allocation9 + $0xc8] sm:$0xff] }
  0xc1   :  { %v750_v52 = vld [vmem:[#allocation9 + $0xe8] sm:$0xff] }
  0xc2   :  { %8420 = vmatmul.mubr.f32.vlgmr.msra.gmra.mrb[2].mxu1 %v12398_v43  ;;  %v9055_v43 = vpack.c.bf16 %v345_v1, %v342_v63  ;;  %v12516_v63 = vpack.c.bf16 %v728_v60, %v724_v57  ;;  %v752_v57 = vld [vmem:[#allocation9 + $0xf8] sm:$0xff]  ;;  %v745_v60 = vld [vmem:[#allocation9 + $0xc0] sm:$0xff] }
  0xc3   :  { %624 = vmatmul.mubr.f32.vlgmr.msra.gmra.mrb[2].mxu0 %v15295_v0  ;;  %9047 = vmatpush3.bf16.msra.mxu1 %v9046_v54  ;;  %v722_v54 = vld [vmem:[#allocation9 + $0x8] sm:$0xff] }
  0xc4   :  { %9048 = vmatprep.subr.bf16.mxu1 %v15297_v45  ;;  %8454 = vmatprep.mubr.msk.f32.mxu1 %vm12211_vm0, %v15295_v0 }
  0xc5   :  { %913 = vmatprep.mubr.f32.mxu0 %v15295_v0 }
  0xc7   :  { %9050 = vmatpush3.bf16.msra.mxu1 %v9049_v58  ;;  %v12514_v58 = vpack.c.bf16 %v726_v55, %v722_v54  ;;  %v748_v54 = vld [vmem:[#allocation9 + $0xd8] sm:$0xff]  ;;  %v12550_v55 = vpack.c.bf16 %v750_v52, %v746_v49 }
  0xc8   :  { %9051 = vmatprep.subr.bf16.mxu1 %v15297_v45  ;;  %v764_v49 = vld [vmem:[#allocation9 + $0x158] sm:$0xff] }
  0xc9   :  { %9126 = vmatprep.subr.bf16.mxu0 %v12514_v58  ;;  %v768_v52 = vld [vmem:[#allocation9 + $0x178] sm:$0xff] }
  0xcb   :  { %9053 = vmatpush3.bf16.msra.mxu1 %v9052_v62  ;;  %v725_v62 = vld [vmem:[#allocation9 + $0x20] sm:$0xff] }
  0xcc   :  { %9054 = vmatprep.subr.bf16.mxu1 %v15297_v45  ;;  %v12518_v1 = vpack.c.bf16 %v725_v62, %v721_v61  ;;  %v749_v61 = vld [vmem:[#allocation9 + $0xe0] sm:$0xff]  ;;  %v12552_v62 = vpack.c.bf16 %v752_v57, %v748_v54  ;;  %v12575_v57 = vpack.c.bf16 %v768_v52, %v764_v49  ;;  %v771_v49 = vld [vmem:[#allocation9 + $0x190] sm:$0xff] }
  0xcd   :  { %v775_v52 = vld [vmem:[#allocation9 + $0x1b0] sm:$0xff] }
  0xce   :  { %9128 = vmatpush1.bf16.msra.mxu0 %v12518_v1  ;;  %15635 = vst [vmem:[#allocation24_spill] sm:$0xff] %v12575_v57 }
  0xcf   :  { %9056 = vmatpush3.bf16.msra.mxu1 %v9055_v43  ;;  %v723_v43 = vld [vmem:[#allocation9 + $0x10] sm:$0xff] }
  0xd0   :  { %9057 = vmatprep.subr.bf16.mxu1 %v15297_v45  ;;  %v12521_v4 = vpack.c.bf16 %v727_v3, %v723_v43  ;;  %v12554_v43 = vpack.c.bf16 %v749_v61, %v745_v60  ;;  %v747_v3 = vld [vmem:[#allocation9 + $0xd0] sm:$0xff]  ;;  %v761_v60 = vld [vmem:[#allocation9 + $0x140] sm:$0xff] }
  0xd1   :  { %v765_v61 = vld [vmem:[#allocation9 + $0x160] sm:$0xff] }
  0xd3   :  { %9059 = vmatpush3.bf16.msra.mxu1 %v9058_v6  ;;  %v730_v6 = vld [vmem:[#allocation9 + $0x48] sm:$0xff] }
  0xd4   :  { %9060 = vmatprep.subr.bf16.mxu1 %v15297_v45 }
  0xd7   :  { %9062 = vmatpush3.bf16.msra.mxu1 %v9061_v9  ;;  %v12526_v9 = vpack.c.bf16 %v734_v7, %v730_v6  ;;  %v751_v6 = vld [vmem:[#allocation9 + $0xf0] sm:$0xff] }
  0xd8   :  { %9063 = vmatprep.subr.bf16.mxu1 %v15297_v45  ;;  %v12557_v7 = vpack.c.bf16 %v751_v6, %v747_v3  ;;  %v763_v3 = vld [vmem:[#allocation9 + $0x150] sm:$0xff]  ;;  %v12578_v6 = vpack.c.bf16 %v765_v61, %v761_v60  ;;  %v778_v61 = vld [vmem:[#allocation9 + $0x1c8] sm:$0xff] }
  0xd9   :  { %9130 = vmatprep.subr.bf16.mxu0 %v12526_v9 }
  0xda   :  { %15636 = vst [vmem:[#allocation25_spill] sm:$0xff] %v12578_v6 }
  0xdb   :  { %9065 = vmatpush3.bf16.msra.mxu1 %v9064_v13  ;;  %v733_v13 = vld [vmem:[#allocation9 + $0x60] sm:$0xff] }
  0xdc   :  { %9066 = vmatprep.subr.bf16.mxu1 %v15297_v45  ;;  %v12530_v16 = vpack.c.bf16 %v733_v13, %v729_v12  ;;  %v756_v12 = vld [vmem:[#allocation9 + $0x118] sm:$0xff]  ;;  %v12562_v13 = vpack.c.bf16 %v758_v10, %v754_v8  ;;  %v767_v8 = vld [vmem:[#allocation9 + $0x170] sm:$0xff]  ;;  %v770_v10 = vld [vmem:[#allocation9 + $0x188] sm:$0xff] }
  0xde   :  { %9132 = vmatpush1.bf16.msra.mxu0 %v12530_v16 }
  0xdf   :  { %9068 = vmatpush3.bf16.msra.mxu1 %v9067_v17  ;;  %v731_v17 = vld [vmem:[#allocation9 + $0x50] sm:$0xff]  ;;  %9134 = vmatprep.subr.bf16.mxu0 %v12538_v27 }
  0xe0   :  { %9101 = vmatprep.subr.bf16.mxu1 %v15297_v45  ;;  %v12533_v19 = vpack.c.bf16 %v735_v18, %v731_v17  ;;  %v760_v17 = vld [vmem:[#allocation9 + $0x138] sm:$0xff]  ;;  %v753_v18 = vld [vmem:[#allocation9 + $0x100] sm:$0xff] }
  0xe1   :  { %v12564_v24 = vpack.c.bf16 %v760_v17, %v756_v12  ;;  %v774_v12 = vld [vmem:[#allocation9 + $0x1a8] sm:$0xff]  ;;  %v12582_v17 = vpack.c.bf16 %v767_v8, %v763_v3  ;;  %v12593_v3 = vpack.c.bf16 %v775_v52, %v771_v49  ;;  %v789_v52 = vld [vmem:[#allocation9 + $0x220] sm:$0xff] }
  0xe2   :  { %8455 = vmatmul.mubr.f32.vlgmr.msra.gmra.mrb[4].mxu1 %v12404_v46  ;;  %v12492_v46 = vpack.c.bf16 %v534_v31, %v531_v30  ;;  %v744_v30 = vld [vmem:[#allocation9 + $0xb8] sm:$0xff]  ;;  %v737_v31 = vld [vmem:[#allocation9 + $0x80] sm:$0xff] }
  0xe3   :  { %9103 = vmatpush3.bf16.msra.mxu1 %v12477_v21  ;;  %8489 = vmatprep.mubr.msk.f32.mxu1 %vm12211_vm0, %v15295_v0  ;;  %v12540_v34 = vpack.c.bf16 %v744_v30, %v740_v26  ;;  %v12542_v36 = vpack.c.bf16 %v741_v33, %v737_v31  ;;  %v12566_v26 = vpack.c.bf16 %v757_v22, %v753_v18  ;;  %v755_v30 = vld [vmem:[#allocation9 + $0x110] sm:$0xff]  ;;  %v762_v33 = vld [vmem:[#allocation9 + $0x148] sm:$0xff]  ;;  %v772_v22 = vld [vmem:[#allocation9 + $0x198] sm:$0xff] }
  0xe4   :  { %9104 = vmatprep.subr.bf16.mxu1 %v15297_v45  ;;  %v759_v31 = vld [vmem:[#allocation9 + $0x130] sm:$0xff]  ;;  %v12573_v54 = vpack.c.bf16 %v766_v41, %v762_v33  ;;  %15637 = vst [vmem:[#allocation26_spill] sm:$0xff] %v12582_v17  ;;  %v12584_v18 = vpack.c.bf16 %v774_v12, %v770_v10  ;;  %v773_v41 = vld [vmem:[#allocation9 + $0x1a0] sm:$0xff]  ;;  %15641 = vst [vmem:[#allocation30_spill] sm:$0xff] %v12593_v3 }
  0xe5   :  { %9136 = vmatpush1.bf16.msra.mxu0 %v12542_v36  ;;  %v12569_v37 = vpack.c.bf16 %v759_v31, %v755_v30  ;;  %v776_v30 = vld [vmem:[#allocation9 + $0x1b8] sm:$0xff]  ;;  %v769_v31 = vld [vmem:[#allocation9 + $0x180] sm:$0xff] }
  0xe6   :  { %9138 = vmatprep.subr.bf16.mxu0 %v12550_v55  ;;  %15634 = vst [vmem:[#allocation23_spill] sm:$0xff] %v12573_v54  ;;  %15638 = vst [vmem:[#allocation27_spill] sm:$0xff] %v12584_v18  ;;  %v12586_v33 = vpack.c.bf16 %v776_v30, %v772_v22  ;;  %v12589_v60 = vpack.c.bf16 %v773_v41, %v769_v31  ;;  %v784_v10 = vld [vmem:[#allocation9 + $0x1f8] sm:$0xff]  ;;  %v777_v12 = vld [vmem:[#allocation9 + $0x1c0] sm:$0xff] }
  0xe7   :  { %9106 = vmatpush3.bf16.msra.mxu1 %v12482_v25  ;;  %15633 = vst [vmem:[#allocation22_spill] sm:$0xff] %v12569_v37  ;;  %v781_v22 = vld [vmem:[#allocation9 + $0x1e0] sm:$0xff]  ;;  %v779_v31 = vld [vmem:[#allocation9 + $0x1d0] sm:$0xff] }
  0xe8   :  { %9107 = vmatprep.subr.bf16.mxu1 %v15297_v45  ;;  %15639 = vst [vmem:[#allocation28_spill] sm:$0xff] %v12586_v33  ;;  %15640 = vst [vmem:[#allocation29_spill] sm:$0xff] %v12589_v60  ;;  %v783_v41 = vld [vmem:[#allocation9 + $0x1f0] sm:$0xff] }
  0xe9   :  { %9140 = vmatpush1.bf16.msra.mxu0 %v12554_v43 }
  0xea   :  { %9142 = vmatprep.subr.bf16.mxu0 %v12562_v13 }
  0xeb   :  { %9109 = vmatpush3.bf16.msra.mxu1 %v12488_v28 }
  0xec   :  { %9110 = vmatprep.subr.bf16.mxu1 %v15297_v45 }
  0xed   :  { %9144 = vmatpush1.bf16.msra.mxu0 %v12566_v26 }
  0xee   :  { %9146 = vmatprep.subr.bf16.mxu0 %v12573_v54  ;;  %v788_v54 = vld [vmem:[#allocation9 + $0x218] sm:$0xff] }
  0xef   :  { %9112 = vmatpush3.bf16.msra.mxu1 %v12492_v46 }
  0xf0   :  { %9113 = vmatprep.subr.bf16.mxu1 %v15297_v45 }
  0xf1   :  { %9148 = vmatpush1.bf16.msra.mxu0 %v12578_v6  ;;  %v786_v6 = vld [vmem:[#allocation9 + $0x208] sm:$0xff] }
  0xf2   :  { %9150 = vmatprep.subr.bf16.mxu0 %v12584_v18  ;;  %v12601_v18 = vpack.c.bf16 %v781_v22, %v777_v12  ;;  %v796_v12 = vld [vmem:[#allocation9 + $0x258] sm:$0xff] }
  0xf3   :  { %9115 = vmatpush3.bf16.msra.mxu1 %v12496_v35  ;;  %v800_v22 = vld [vmem:[#allocation9 + $0x278] sm:$0xff] }
  0xf4   :  { %9116 = vmatprep.subr.bf16.mxu1 %v15297_v45  ;;  %15644 = vst [vmem:[#allocation33_spill] sm:$0xff] %v12601_v18 }
  0xf5   :  { %9152 = vmatpush1.bf16.msra.mxu0 %v12589_v60  ;;  %v798_v60 = vld [vmem:[#allocation9 + $0x268] sm:$0xff] }
  0xf7   :  { %9118 = vmatpush3.bf16.msra.mxu1 %v12500_v40 }
  0xf8   :  { %9119 = vmatprep.subr.bf16.mxu1 %v15297_v45 }
  0xfb   :  { %9121 = vmatpush3.bf16.msra.mxu1 %v12504_v48 }
  0xfc   :  { %9122 = vmatprep.subr.bf16.mxu1 %v15297_v45  ;;  %v780_v45 = vld [vmem:[#allocation9 + $0x1d8] sm:$0xff] }
  0xfd   :  { %v12598_v30 = vpack.c.bf16 %v784_v10, %v780_v45  ;;  %v785_v45 = vld [vmem:[#allocation9 + $0x200] sm:$0xff] }
  0xff   :  { %9124 = vmatpush3.bf16.msra.mxu1 %v12508_v53  ;;  %15643 = vst [vmem:[#allocation32_spill] sm:$0xff] %v12598_v30 }
 0x100   :  { %9190 = vmatprep.subr.bf16.mxu1 %v12516_v63 }
 0x102   :  { %8490 = vmatmul.mubr.f32.vlgmr.msra.gmra.mrb[6].mxu1 %v15295_v0 }
 0x103   :  { %984 = vmatprep.mubr.f32.mxu1 %v15295_v0  ;;  %9192 = vmatpush1.bf16.msra.mxu1 %v12521_v4  ;;  %v782_v0 = vld [vmem:[#allocation9 + $0x1e8] sm:$0xff] }
 0x104   :  { %9194 = vmatprep.subr.bf16.mxu1 %v12528_v15  ;;  %v12595_v8 = vpack.c.bf16 %v782_v0, %v778_v61  ;;  %v12605_v0 = vpack.c.bf16 %v783_v41, %v779_v31  ;;  %v787_v61 = vld [vmem:[#allocation9 + $0x210] sm:$0xff]  ;;  %v793_v31 = vld [vmem:[#allocation9 + $0x240] sm:$0xff]  ;;  %v12622_v41 = vpack.c.bf16 %v800_v22, %v796_v12 }
 0x105   :  { %v803_v12 = vld [vmem:[#allocation9 + $0x290] sm:$0xff] }
 0x106   :  { %15642 = vst [vmem:[#allocation31_spill] sm:$0xff] %v12595_v8  ;;  %9154 = vmatprep.subr.bf16.mxu0 %v12595_v8  ;;  %15645 = vst [vmem:[#allocation34_spill] sm:$0xff] %v12605_v0  ;;  %v802_v8 = vld [vmem:[#allocation9 + $0x288] sm:$0xff] }
 0x107   :  { %9196 = vmatpush1.bf16.msra.mxu1 %v12533_v19  ;;  %9156 = vmatpush1.bf16.msra.mxu0 %v12601_v18  ;;  %v806_v18 = vld [vmem:[#allocation9 + $0x2a8] sm:$0xff] }
 0x108   :  { %9198 = vmatprep.subr.bf16.mxu1 %v12540_v34 }
 0x10b   :  { %9200 = vmatpush1.bf16.msra.mxu1 %v12545_v44 }
 0x10c   :  { %9202 = vmatprep.subr.bf16.mxu1 %v12552_v62 }
 0x10f   :  { %9204 = vmatpush1.bf16.msra.mxu1 %v12557_v7 }
 0x110   :  { %9206 = vmatprep.subr.bf16.mxu1 %v12564_v24 }
 0x113   :  { %9208 = vmatpush1.bf16.msra.mxu1 %v12569_v37  ;;  %v792_v37 = vld [vmem:[#allocation9 + $0x238] sm:$0xff] }
 0x114   :  { %9210 = vmatprep.subr.bf16.mxu1 %v12575_v57  ;;  %v790_v57 = vld [vmem:[#allocation9 + $0x228] sm:$0xff]  ;;  %v12610_v10 = vpack.c.bf16 %v792_v37, %v788_v54  ;;  %v797_v37 = vld [vmem:[#allocation9 + $0x260] sm:$0xff]  ;;  %v795_v54 = vld [vmem:[#allocation9 + $0x250] sm:$0xff] }
 0x115   :  { %v12607_v49 = vpack.c.bf16 %v790_v57, %v786_v6 }
 0x116   :  { %15647 = vst [vmem:[#allocation36_spill] sm:$0xff] %v12610_v10 }
 0x117   :  { %9212 = vmatpush1.bf16.msra.mxu1 %v12582_v17  ;;  %15646 = vst [vmem:[#allocation35_spill] sm:$0xff] %v12607_v49  ;;  %v794_v17 = vld [vmem:[#allocation9 + $0x248] sm:$0xff]  ;;  %9158 = vmatprep.subr.bf16.mxu0 %v12607_v49 }
 0x118   :  { %9214 = vmatprep.subr.bf16.mxu1 %v12586_v33  ;;  %v791_v33 = vld [vmem:[#allocation9 + $0x230] sm:$0xff]  ;;  %v12619_v6 = vpack.c.bf16 %v798_v60, %v794_v17  ;;  %v801_v60 = vld [vmem:[#allocation9 + $0x280] sm:$0xff]  ;;  %v810_v49 = vld [vmem:[#allocation9 + $0x2c8] sm:$0xff] }
 0x119   :  { %v12617_v57 = vpack.c.bf16 %v791_v33, %v787_v61  ;;  %v12631_v33 = vpack.c.bf16 %v806_v18, %v802_v8  ;;  %v805_v61 = vld [vmem:[#allocation9 + $0x2a0] sm:$0xff] }
 0x11b   :  { %9216 = vmatpush1.bf16.msra.mxu1 %v12593_v3  ;;  %v12613_v3 = vpack.c.bf16 %v789_v52, %v785_v45  ;;  %15649 = vst [vmem:[#allocation38_spill] sm:$0xff] %v12617_v57  ;;  %v804_v45 = vld [vmem:[#allocation9 + $0x298] sm:$0xff]  ;;  %15651 = vst [vmem:[#allocation40_spill] sm:$0xff] %v12631_v33 }
 0x11c   :  { %9218 = vmatprep.subr.bf16.mxu1 %v12598_v30  ;;  %v799_v30 = vld [vmem:[#allocation9 + $0x270] sm:$0xff]  ;;  %v808_v52 = vld [vmem:[#allocation9 + $0x2b8] sm:$0xff] }
 0x11d   :  { %15648 = vst [vmem:[#allocation37_spill] sm:$0xff] %v12613_v3  ;;  %9160 = vmatpush1.bf16.msra.mxu0 %v12613_v3  ;;  %v12629_v17 = vpack.c.bf16 %v799_v30, %v795_v54  ;;  %v12634_v22 = vpack.c.bf16 %v808_v52, %v804_v45  ;;  %v814_v3 = vld [vmem:[#allocation9 + $0x2e8] sm:$0xff]  ;;  %v809_v54 = vld [vmem:[#allocation9 + $0x2c0] sm:$0xff]  ;;  %v811_v52 = vld [vmem:[#allocation9 + $0x2d0] sm:$0xff] }
 0x11e   :  { %9162 = vmatprep.subr.bf16.mxu0 %v12619_v6  ;;  %v12643_v8 = vpack.c.bf16 %v814_v3, %v810_v49  ;;  %v813_v45 = vld [vmem:[#allocation9 + $0x2e0] sm:$0xff]  ;;  %v818_v49 = vld [vmem:[#allocation9 + $0x308] sm:$0xff] }
 0x11f   :  { %9220 = vmatpush1.bf16.msra.mxu1 %v12605_v0  ;;  %v12625_v0 = vpack.c.bf16 %v797_v37, %v793_v31  ;;  %15650 = vst [vmem:[#allocation39_spill] sm:$0xff] %v12629_v17  ;;  %15652 = vst [vmem:[#allocation41_spill] sm:$0xff] %v12634_v22  ;;  %v812_v31 = vld [vmem:[#allocation9 + $0x2d8] sm:$0xff] }
 0x120   :  { %9222 = vmatprep.subr.bf16.mxu1 %v12610_v10  ;;  %v807_v10 = vld [vmem:[#allocation9 + $0x2b0] sm:$0xff]  ;;  %v816_v37 = vld [vmem:[#allocation9 + $0x2f8] sm:$0xff]  ;;  %15655 = vst [vmem:[#allocation44_spill] sm:$0xff] %v12643_v8 }
 0x121   :  { %9164 = vmatpush1.bf16.msra.mxu0 %v12625_v0  ;;  %v12641_v18 = vpack.c.bf16 %v807_v10, %v803_v12  ;;  %v12646_v30 = vpack.c.bf16 %v816_v37, %v812_v31  ;;  %v815_v10 = vld [vmem:[#allocation9 + $0x2f0] sm:$0xff]  ;;  %v820_v12 = vld [vmem:[#allocation9 + $0x318] sm:$0xff] }
 0x122   :  { %9166 = vmatprep.subr.bf16.mxu0 %v12631_v33  ;;  %v12654_v3 = vpack.c.bf16 %v815_v10, %v811_v52  ;;  %v824_v37 = vld [vmem:[#allocation9 + $0x338] sm:$0xff]  ;;  %v826_v10 = vld [vmem:[#allocation9 + $0x348] sm:$0xff] }
 0x123   :  { %9224 = vmatpush1.bf16.msra.mxu1 %v12617_v57  ;;  %v12637_v57 = vpack.c.bf16 %v805_v61, %v801_v60  ;;  %15654 = vst [vmem:[#allocation43_spill] sm:$0xff] %v12641_v18  ;;  %15656 = vst [vmem:[#allocation45_spill] sm:$0xff] %v12646_v30  ;;  %v12652_v60 = vpack.c.bf16 %v813_v45, %v809_v54  ;;  %v822_v61 = vld [vmem:[#allocation9 + $0x328] sm:$0xff]  ;;  %v819_v54 = vld [vmem:[#allocation9 + $0x310] sm:$0xff] }
 0x124   :  { %9226 = vmatprep.subr.bf16.mxu1 %v12622_v41  ;;  %15658 = vst [vmem:[#allocation47_spill] sm:$0xff] %v12654_v3  ;;  %v12658_v31 = vpack.c.bf16 %v822_v61, %v818_v49  ;;  %v823_v45 = vld [vmem:[#allocation9 + $0x330] sm:$0xff]  ;;  %v830_v49 = vld [vmem:[#allocation9 + $0x368] sm:$0xff]  ;;  %v828_v61 = vld [vmem:[#allocation9 + $0x358] sm:$0xff] }
 0x125   :  { %15653 = vst [vmem:[#allocation42_spill] sm:$0xff] %v12637_v57  ;;  %9168 = vmatpush1.bf16.msra.mxu0 %v12637_v57  ;;  %15657 = vst [vmem:[#allocation46_spill] sm:$0xff] %v12652_v60  ;;  %v12660_v57 = vpack.c.bf16 %v824_v37, %v820_v12  ;;  %v12665_v52 = vpack.c.bf16 %v823_v45, %v819_v54  ;;  %v832_v12 = vld [vmem:[#allocation9 + $0x378] sm:$0xff]  ;;  %v827_v54 = vld [vmem:[#allocation9 + $0x350] sm:$0xff] }
 0x126   :  { %9170 = vmatprep.subr.bf16.mxu0 %v12643_v8  ;;  %15659 = vst [vmem:[#allocation48_spill] sm:$0xff] %v12658_v31  ;;  %v817_v8 = vld [vmem:[#allocation9 + $0x300] sm:$0xff]  ;;  %v12672_v37 = vpack.c.bf16 %v832_v12, %v828_v61  ;;  %v831_v45 = vld [vmem:[#allocation9 + $0x370] sm:$0xff]  ;;  %v840_v33 = vld [vmem:[#allocation9 + $0x3b8] sm:$0xff] }
 0x127   :  { %9228 = vmatpush1.bf16.msra.mxu1 %v12629_v17  ;;  %15660 = vst [vmem:[#allocation49_spill] sm:$0xff] %v12660_v57  ;;  %15662 = vst [vmem:[#allocation51_spill] sm:$0xff] %v12665_v52  ;;  %v833_v61 = vld [vmem:[#allocation9 + $0x380] sm:$0xff] }
 0x128   :  { %9230 = vmatprep.subr.bf16.mxu1 %v12634_v22  ;;  %15664 = vst [vmem:[#allocation53_spill] sm:$0xff] %v12672_v37  ;;  %v836_v22 = vld [vmem:[#allocation9 + $0x398] sm:$0xff]  ;;  %v837_v12 = vld [vmem:[#allocation9 + $0x3a0] sm:$0xff] }
 0x129   :  { %9172 = vmatpush1.bf16.msra.mxu0 %v12652_v60 }
 0x12a   :  { %9174 = vmatprep.subr.bf16.mxu0 %v12658_v31  ;;  %v834_v31 = vld [vmem:[#allocation9 + $0x388] sm:$0xff] }
 0x12b   :  { %9232 = vmatpush1.bf16.msra.mxu1 %v12641_v18  ;;  %v821_v18 = vld [vmem:[#allocation9 + $0x320] sm:$0xff] }
 0x12c   :  { %9234 = vmatprep.subr.bf16.mxu1 %v12646_v30  ;;  %v12662_v30 = vpack.c.bf16 %v821_v18, %v817_v8  ;;  %v825_v18 = vld [vmem:[#allocation9 + $0x340] sm:$0xff] }
 0x12d   :  { %v829_v8 = vld [vmem:[#allocation9 + $0x360] sm:$0xff] }
 0x12e   :  { %15661 = vst [vmem:[#allocation50_spill] sm:$0xff] %v12662_v30  ;;  %9176 = vmatpush1.bf16.msra.mxu0 %v12662_v30  ;;  %v12674_v60 = vpack.c.bf16 %v829_v8, %v825_v18  ;;  %v12677_v30 = vpack.c.bf16 %v831_v45, %v827_v54  ;;  %v835_v18 = vld [vmem:[#allocation9 + $0x390] sm:$0xff]  ;;  %v12686_v8 = vpack.c.bf16 %v837_v12, %v833_v61  ;;  %v842_v45 = vld [vmem:[#allocation9 + $0x3c8] sm:$0xff] }
 0x12f   :  { %9236 = vmatpush1.bf16.msra.mxu1 %v12654_v3  ;;  %v12670_v3 = vpack.c.bf16 %v830_v49, %v826_v10  ;;  %v12683_v49 = vpack.c.bf16 %v840_v33, %v836_v22  ;;  %v839_v54 = vld [vmem:[#allocation9 + $0x3b0] sm:$0xff]  ;;  %v844_v33 = vld [vmem:[#allocation9 + $0x3d8] sm:$0xff] }
 0x130   :  { %9238 = vmatprep.subr.bf16.mxu1 %v12660_v57  ;;  %15665 = vst [vmem:[#allocation54_spill] sm:$0xff] %v12674_v60  ;;  %15666 = vst [vmem:[#allocation55_spill] sm:$0xff] %v12677_v30  ;;  %v838_v57 = vld [vmem:[#allocation9 + $0x3a8] sm:$0xff]  ;;  %v848_v22 = vld [vmem:[#allocation9 + $0x3f8] sm:$0xff] }
 0x131   :  { %15663 = vst [vmem:[#allocation52_spill] sm:$0xff] %v12670_v3  ;;  %9178 = vmatprep.subr.bf16.mxu0 %v12670_v3  ;;  %v12681_v10 = vpack.c.bf16 %v838_v57, %v834_v31  ;;  %15668 = vst [vmem:[#allocation57_spill] sm:$0xff] %v12683_v49  ;;  %v846_v3 = vld [vmem:[#allocation9 + $0x3e8] sm:$0xff]  ;;  %v841_v31 = vld [vmem:[#allocation9 + $0x3c0] sm:$0xff] }
 0x132   :  { %9180 = vmatpush1.bf16.msra.mxu0 %v12674_v60  ;;  %15669 = vst [vmem:[#allocation58_spill] sm:$0xff] %v12686_v8  ;;  %v12692_v57 = vpack.c.bf16 %v846_v3, %v842_v45  ;;  %v12694_v60 = vpack.c.bf16 %v848_v22, %v844_v33  ;;  %v847_v61 = vld [vmem:[#allocation9 + $0x3f0] sm:$0xff]  ;;  %v15675_v3 = vmov 0.0|0.0  }
 0x133   :  { %9240 = vmatpush1.bf16.msra.mxu1 %v12665_v52  ;;  %15667 = vst [vmem:[#allocation56_spill] sm:$0xff] %v12681_v10  ;;  %9182 = vmatprep.subr.bf16.mxu0 %v12681_v10  ;;  %v845_v52 = vld [vmem:[#allocation9 + $0x3e0] sm:$0xff] }
 0x134   :  { %9242 = vmatprep.subr.bf16.mxu1 %v12672_v37  ;;  %v12690_v37 = vpack.c.bf16 %v839_v54, %v835_v18  ;;  %15671 = vst [vmem:[#allocation60_spill] sm:$0xff] %v12692_v57  ;;  %15672 = vst [vmem:[#allocation61_spill] sm:$0xff] %v12694_v60  ;;  %v12697_v12 = vpack.c.bf16 %v845_v52, %v841_v31 }
 0x136   :  { %15670 = vst [vmem:[#allocation59_spill] sm:$0xff] %v12690_v37  ;;  %9184 = vmatpush1.bf16.msra.mxu0 %v12686_v8  ;;  %15673 = vst [vmem:[#allocation62_spill] sm:$0xff] %v12697_v12 }
 0x137   :  { %9244 = vmatpush1.bf16.msra.mxu1 %v12677_v30  ;;  %v843_v30 = vld [vmem:[#allocation9 + $0x3d0] sm:$0xff]  ;;  %9186 = vmatprep.subr.bf16.mxu0 %v12692_v57 }
 0x138   :  { %9246 = vmatprep.subr.bf16.mxu1 %v12683_v49  ;;  %v12701_v18 = vpack.c.bf16 %v847_v61, %v843_v30 }
 0x13a   :  { %15674 = vst [vmem:[#allocation63_spill] sm:$0xff] %v12701_v18  ;;  %9188 = vmatpush1.bf16.msra.mxu0 %v12697_v12 }
 0x13b   :  { %9248 = vmatpush1.bf16.msra.mxu1 %v12690_v37  ;;  %9254 = vmatprep.subr.bf16.mxu0 %v12393_v38 }
 0x13c   :  { %9250 = vmatprep.subr.bf16.mxu1 %v12694_v60 }
 0x13f   :  { %9252 = vmatpush1.bf16.msra.mxu1 %v12701_v18 }
 0x140   :  { %9285 = vmatprep.subr.bf16.mxu1 %v15675_v3 }
 0x175   :  { %v12708_v54 = vpop.f32.mrb[0].mxu1 }
 0x176   :  { %15676 = vst [vmem:[#allocation64_spill] sm:$0xff] %v12708_v54  ;;  %v12710_v52 = vpop.f32.mrb[1].mxu1  ;;  %v12712_v45 = vpop.f32.mrb[0].mxu0 }
 0x177   :  { %15677 = vst [vmem:[#allocation65_spill] sm:$0xff] %v12712_v45  ;;  %v12714_v33 = vpop.f32.mrb[1].mxu0 }
 0x178   :  { %15678 = vst [vmem:[#allocation66_spill] sm:$0xff] %v12714_v33 }
 0x195   :  { %v12716_v30 = vpop.f32.mrb[2].mxu1 }
 0x196   :  { %v625_v22 = vpop.f32.mrb[2].mxu0  ;;  %v8421_v31 = vpop.f32.mrb[3].mxu1 }
 0x197   :  { %v700_v61 = vadd.f32 %v625_v22, %v12708_v54  ;;  %v627_v12 = vpop.f32.mrb[3].mxu0 }
 0x198   :  { %v707_v18 = vadd.f32 %v627_v12, %v12710_v52 }
 0x199   :  { %v8054_v60 = vmul.f32 -1.442695, %v700_v61 }
 0x19a   :  { %v8055_v37 = vmul.f32 -1.442695, %v707_v18 }
 0x19b   :  { %11726 = vpow2.f32 %v8054_v60 }
 0x19c   :  { %11728 = vpow2.f32 %v8055_v37 }
 0x1a5   :  { %v11727_v8 = vpop.eup %11726 }
 0x1a6   :  { %v704_v45 = vadd.f32 1.0, %v11727_v8  ;;  %v11729_v33 = vpop.eup %11728 }
 0x1a7   :  { %v711_v49 = vadd.f32 1.0, %v11729_v33 }
 0x1a8   :  { %11730 = vrcp.f32 %v704_v45 }
 0x1a9   :  { %11732 = vrcp.f32 %v711_v49 }
 0x1b2   :  { %v11731_v10 = vpop.eup %11730 }
 0x1b3   :  { %v11733_v12 = vpop.eup %11732 }
 0x1b4   :  { %v719_v60 = vmul.f32 0.0, %v11733_v12 }
 0x1b5   :  { %v12720_v38 = vpop.f32.mrb[4].mxu1 }
 0x1b6   :  { %15679 = vst [vmem:[#allocation67_spill] sm:$0xff] %v12720_v38  ;;  %v8456_v57 = vpop.f32.mrb[5].mxu1  ;;  %v717_v38 = vsub.f32 1.0, %v11733_v12 }
 0x1d5   :  { %v696_v17 = vpop.f32.mrb[6].mxu1 }
 0x1d6   :  { %v714_v31 = vmul.f32 %v11731_v10, %v696_v17  ;;  %v8491_v22 = vpop.f32.mrb[7].mxu1  ;;  %v15680_v17 = vmov 0.0  }
 0x1d8   :  { %v715_v54 = vadd.f32 %v714_v31, %v12716_v30 }
 0x1da   :  { %11734 = vtanh.f32 %v715_v54 }
 0x1e4   :  { %v11735_v61 = vpop.eup %11734 }
 0x1e5   :  { %v718_v57 = vmul.f32 %v11735_v61, %v717_v38 }
 0x1e7   :  { %v12723_v18 = vadd.f32 %v719_v60, %v718_v57 }
 0x1e9   :  { %914 = vmatmul.mubr.f32.vlgmr.msra.gmra.mrb[4].mxu0 %v12723_v18  ;;  %985 = vmatmul.mubr.f32.vlgmr.msra.gmra.mrb[8].mxu1 %v12723_v18 }
 0x1ea   :  { %9256 = vmatpush1.bf16.msra.mxu0 %v12406_v47  ;;  %9287 = vmatpush3.bf16.msra.mxu1 %v12477_v21  ;;  %v15681_v47 = vld [vmem:[#allocation22_spill] sm:$0xff]  ;;  %v15696_v21 = vld [vmem:[#allocation37_spill] sm:$0xff] }
 0x1eb   :  { %9258 = vmatprep.subr.bf16.mxu0 %v12409_v50  ;;  %9288 = vmatprep.subr.bf16.mxu1 %v15675_v3  ;;  %v15682_v50 = vld [vmem:[#allocation23_spill] sm:$0xff] }
 0x1ec   :  { %1123 = vmatprep.mubr.f32.mxu0 %v15680_v17  ;;  %8524 = vmatprep.mubr.msk.f32.mxu1 %vm12211_vm0, %v15680_v17 }
 0x1ee   :  { %9260 = vmatpush1.bf16.msra.mxu0 %v12415_v56  ;;  %9290 = vmatpush3.bf16.msra.mxu1 %v12482_v25  ;;  %v15683_v56 = vld [vmem:[#allocation24_spill] sm:$0xff]  ;;  %v15697_v25 = vld [vmem:[#allocation38_spill] sm:$0xff] }
 0x1ef   :  { %9262 = vmatprep.subr.bf16.mxu0 %v12418_v59  ;;  %9291 = vmatprep.subr.bf16.mxu1 %v15675_v3  ;;  %v15684_v59 = vld [vmem:[#allocation25_spill] sm:$0xff] }
 0x1f2   :  { %9264 = vmatpush1.bf16.msra.mxu0 %v12425_v2  ;;  %9293 = vmatpush3.bf16.msra.mxu1 %v12488_v28  ;;  %v15685_v2 = vld [vmem:[#allocation26_spill] sm:$0xff]  ;;  %v15698_v28 = vld [vmem:[#allocation39_spill] sm:$0xff] }
 0x1f3   :  { %9266 = vmatprep.subr.bf16.mxu0 %v12428_v5  ;;  %9294 = vmatprep.subr.bf16.mxu1 %v15675_v3  ;;  %v15686_v5 = vld [vmem:[#allocation27_spill] sm:$0xff] }
 0x1f6   :  { %9268 = vmatpush1.bf16.msra.mxu0 %v12432_v11  ;;  %9296 = vmatpush3.bf16.msra.mxu1 %v12492_v46  ;;  %v15687_v11 = vld [vmem:[#allocation28_spill] sm:$0xff] }
 0x1f7   :  { %9270 = vmatprep.subr.bf16.mxu0 %v12435_v14  ;;  %9297 = vmatprep.subr.bf16.mxu1 %v15675_v3  ;;  %v15688_v14 = vld [vmem:[#allocation29_spill] sm:$0xff]  ;;  %v15699_v46 = vld [vmem:[#allocation40_spill] sm:$0xff] }
 0x1fa   :  { %9272 = vmatpush1.bf16.msra.mxu0 %v12439_v20  ;;  %9299 = vmatpush3.bf16.msra.mxu1 %v12496_v35  ;;  %v15689_v20 = vld [vmem:[#allocation30_spill] sm:$0xff]  ;;  %v15700_v35 = vld [vmem:[#allocation41_spill] sm:$0xff] }
 0x1fb   :  { %9274 = vmatprep.subr.bf16.mxu0 %v12442_v23  ;;  %9300 = vmatprep.subr.bf16.mxu1 %v15675_v3  ;;  %v15690_v23 = vld [vmem:[#allocation31_spill] sm:$0xff] }
 0x1fe   :  { %9276 = vmatpush1.bf16.msra.mxu0 %v12446_v29  ;;  %9302 = vmatpush3.bf16.msra.mxu1 %v12500_v40  ;;  %v15691_v29 = vld [vmem:[#allocation32_spill] sm:$0xff]  ;;  %v15701_v40 = vld [vmem:[#allocation42_spill] sm:$0xff] }
 0x1ff   :  { %9278 = vmatprep.subr.bf16.mxu0 %v12449_v32  ;;  %9303 = vmatprep.subr.bf16.mxu1 %v15675_v3  ;;  %v15692_v32 = vld [vmem:[#allocation33_spill] sm:$0xff] }
 0x202   :  { %9280 = vmatpush1.bf16.msra.mxu0 %v12453_v39  ;;  %9305 = vmatpush3.bf16.msra.mxu1 %v12504_v48  ;;  %v15693_v39 = vld [vmem:[#allocation34_spill] sm:$0xff]  ;;  %v15702_v48 = vld [vmem:[#allocation43_spill] sm:$0xff] }
 0x203   :  { %9282 = vmatprep.subr.bf16.mxu0 %v12456_v42  ;;  %9306 = vmatprep.subr.bf16.mxu1 %v15675_v3  ;;  %v15694_v42 = vld [vmem:[#allocation35_spill] sm:$0xff] }
 0x206   :  { %9284 = vmatpush1.bf16.msra.mxu0 %v12460_v51  ;;  %9308 = vmatpush3.bf16.msra.mxu1 %v12508_v53  ;;  %v15695_v51 = vld [vmem:[#allocation36_spill] sm:$0xff] }
 0x207   :  { %9310 = vmatprep.subr.bf16.mxu0 %v12514_v58  ;;  %9374 = vmatprep.subr.bf16.mxu1 %v12516_v63  ;;  %v15703_v53 = vld [vmem:[#allocation44_spill] sm:$0xff]  ;;  %v15704_v58 = vld [vmem:[#allocation45_spill] sm:$0xff]  ;;  %v15705_v63 = vld [vmem:[#allocation46_spill] sm:$0xff] }
 0x209   :  { %1124 = vmatmul.mubr.f32.vlgmr.msra.gmra.mrb[6].mxu0 %v12723_v18  ;;  %8525 = vmatmul.mubr.f32.vlgmr.msra.gmra.mrb[10].mxu1 %v12723_v18 }
 0x20a   :  { %9312 = vmatpush1.bf16.msra.mxu0 %v12518_v1  ;;  %9376 = vmatpush1.bf16.msra.mxu1 %v12521_v4  ;;  %v15706_v1 = vld [vmem:[#allocation47_spill] sm:$0xff]  ;;  %v15707_v4 = vld [vmem:[#allocation48_spill] sm:$0xff] }
 0x20b   :  { %9314 = vmatprep.subr.bf16.mxu0 %v12526_v9  ;;  %9378 = vmatprep.subr.bf16.mxu1 %v12528_v15  ;;  %v15708_v9 = vld [vmem:[#allocation49_spill] sm:$0xff]  ;;  %v15709_v15 = vld [vmem:[#allocation50_spill] sm:$0xff] }
 0x20e   :  { %9316 = vmatpush1.bf16.msra.mxu0 %v12530_v16  ;;  %9380 = vmatpush1.bf16.msra.mxu1 %v12533_v19  ;;  %v15710_v16 = vld [vmem:[#allocation51_spill] sm:$0xff]  ;;  %v15711_v19 = vld [vmem:[#allocation52_spill] sm:$0xff] }
 0x20f   :  { %9318 = vmatprep.subr.bf16.mxu0 %v12538_v27  ;;  %9382 = vmatprep.subr.bf16.mxu1 %v12540_v34  ;;  %v15712_v27 = vld [vmem:[#allocation53_spill] sm:$0xff]  ;;  %v15713_v34 = vld [vmem:[#allocation54_spill] sm:$0xff] }
 0x212   :  { %9320 = vmatpush1.bf16.msra.mxu0 %v12542_v36  ;;  %9384 = vmatpush1.bf16.msra.mxu1 %v12545_v44  ;;  %v15714_v36 = vld [vmem:[#allocation55_spill] sm:$0xff]  ;;  %v15715_v44 = vld [vmem:[#allocation56_spill] sm:$0xff] }
 0x213   :  { %9322 = vmatprep.subr.bf16.mxu0 %v12550_v55  ;;  %9386 = vmatprep.subr.bf16.mxu1 %v12552_v62  ;;  %v15716_v55 = vld [vmem:[#allocation57_spill] sm:$0xff]  ;;  %v15717_v62 = vld [vmem:[#allocation58_spill] sm:$0xff] }
 0x216   :  { %9324 = vmatpush1.bf16.msra.mxu0 %v12554_v43  ;;  %9388 = vmatpush1.bf16.msra.mxu1 %v12557_v7  ;;  %v15718_v43 = vld [vmem:[#allocation59_spill] sm:$0xff]  ;;  %v15719_v7 = vld [vmem:[#allocation60_spill] sm:$0xff] }
 0x217   :  { %9326 = vmatprep.subr.bf16.mxu0 %v12562_v13  ;;  %9390 = vmatprep.subr.bf16.mxu1 %v12564_v24  ;;  %v15720_v13 = vld [vmem:[#allocation61_spill] sm:$0xff]  ;;  %v15721_v24 = vld [vmem:[#allocation62_spill] sm:$0xff] }
 0x21a   :  { %9328 = vmatpush1.bf16.msra.mxu0 %v12566_v26  ;;  %9392 = vmatpush1.bf16.msra.mxu1 %v15681_v47  ;;  %v15722_v26 = vld [vmem:[#allocation63_spill] sm:$0xff] }
 0x21b   :  { %9330 = vmatprep.subr.bf16.mxu0 %v15682_v50  ;;  %9394 = vmatprep.subr.bf16.mxu1 %v15683_v56 }
 0x21e   :  { %9332 = vmatpush1.bf16.msra.mxu0 %v15684_v59  ;;  %9396 = vmatpush1.bf16.msra.mxu1 %v15685_v2 }
 0x21f   :  { %9334 = vmatprep.subr.bf16.mxu0 %v15686_v5  ;;  %9398 = vmatprep.subr.bf16.mxu1 %v15687_v11  ;;  %v15723_v5 = vld [vmem:[#allocation64_spill] sm:$0xff] }
 0x222   :  { %9336 = vmatpush1.bf16.msra.mxu0 %v15688_v14  ;;  %9400 = vmatpush1.bf16.msra.mxu1 %v15689_v20 }
 0x223   :  { %9338 = vmatprep.subr.bf16.mxu0 %v15690_v23  ;;  %9402 = vmatprep.subr.bf16.mxu1 %v15691_v29 }
 0x226   :  { %9340 = vmatpush1.bf16.msra.mxu0 %v15692_v32  ;;  %9404 = vmatpush1.bf16.msra.mxu1 %v15693_v39 }
 0x227   :  { %9342 = vmatprep.subr.bf16.mxu0 %v15694_v42  ;;  %9406 = vmatprep.subr.bf16.mxu1 %v15695_v51 }
 0x22a   :  { %9344 = vmatpush1.bf16.msra.mxu0 %v15696_v21  ;;  %9408 = vmatpush1.bf16.msra.mxu1 %v15697_v25 }
 0x22b   :  { %9346 = vmatprep.subr.bf16.mxu0 %v12619_v6  ;;  %9410 = vmatprep.subr.bf16.mxu1 %v12622_v41  ;;  %v1534_v6 = vld [vmem:[#allocation7 + $0x20] sm:$0xff] }
 0x22e   :  { %9348 = vmatpush1.bf16.msra.mxu0 %v12625_v0  ;;  %9412 = vmatpush1.bf16.msra.mxu1 %v15698_v28  ;;  %v1531_v0 = vld [vmem:[#allocation7 + $0x8] sm:$0xff] }
 0x22f   :  { %9350 = vmatprep.subr.bf16.mxu0 %v15699_v46  ;;  %9414 = vmatprep.subr.bf16.mxu1 %v15700_v35  ;;  %v12827_v41 = vpack.c.bf16 %v1534_v6, %v1531_v0  ;;  %v1539_v6 = vld [vmem:[#allocation7 + $0x48] sm:$0xff] }
 0x232   :  { %9352 = vmatpush1.bf16.msra.mxu0 %v15701_v40  ;;  %9416 = vmatpush1.bf16.msra.mxu1 %v15702_v48 }
 0x233   :  { %9354 = vmatprep.subr.bf16.mxu0 %v15703_v53  ;;  %9418 = vmatprep.subr.bf16.mxu1 %v15704_v58 }
 0x236   :  { %9356 = vmatpush1.bf16.msra.mxu0 %v15705_v63  ;;  %9420 = vmatpush1.bf16.msra.mxu1 %v15706_v1  ;;  %v1229_v63 = vrot.slane %v12723_v18, 7 }
 0x237   :  { %9358 = vmatprep.subr.bf16.mxu0 %v15707_v4  ;;  %9422 = vmatprep.subr.bf16.mxu1 %v15708_v9 }
 0x23a   :  { %9360 = vmatpush1.bf16.msra.mxu0 %v15709_v15  ;;  %9424 = vmatpush1.bf16.msra.mxu1 %v15710_v16 }
 0x23b   :  { %9362 = vmatprep.subr.bf16.mxu0 %v15711_v19  ;;  %9426 = vmatprep.subr.bf16.mxu1 %v15712_v27  ;;  %v1530_v27 = vld [vmem:[#allocation7] sm:$0xff] }
 0x23e   :  { %9364 = vmatpush1.bf16.msra.mxu0 %v15713_v34  ;;  %9428 = vmatpush1.bf16.msra.mxu1 %v15714_v36  ;;  %v1533_v36 = vld [vmem:[#allocation7 + $0x18] sm:$0xff] }
 0x23f   :  { %9366 = vmatprep.subr.bf16.mxu0 %v15715_v44  ;;  %9430 = vmatprep.subr.bf16.mxu1 %v15716_v55  ;;  %v1532_v44 = vld [vmem:[#allocation7 + $0x10] sm:$0xff]  ;;  %v1535_v55 = vld [vmem:[#allocation7 + $0x28] sm:$0xff] }
 0x240   :  { %v12842_v18 = vpack.c.bf16 %v1535_v55, %v1532_v44  ;;  %v1571_v44 = vld [vmem:[#allocation7 + $0x148] sm:$0xff]  ;;  %v1573_v55 = vld [vmem:[#allocation7 + $0x158] sm:$0xff] }
 0x242   :  { %9368 = vmatpush1.bf16.msra.mxu0 %v15717_v62  ;;  %9432 = vmatpush1.bf16.msra.mxu1 %v15718_v43  ;;  %v1537_v62 = vld [vmem:[#allocation7 + $0x38] sm:$0xff]  ;;  %v1540_v43 = vld [vmem:[#allocation7 + $0x50] sm:$0xff] }
 0x243   :  { %9370 = vmatprep.subr.bf16.mxu0 %v15719_v7  ;;  %9434 = vmatprep.subr.bf16.mxu1 %v15720_v13  ;;  %v12840_v13 = vpack.c.bf16 %v1533_v36, %v1530_v27  ;;  %v12847_v0 = vpack.c.bf16 %v1540_v43, %v1537_v62  ;;  %v1568_v36 = vld [vmem:[#allocation7 + $0x130] sm:$0xff] }
 0x244   :  { %v1576_v62 = vld [vmem:[#allocation7 + $0x170] sm:$0xff] }
 0x246   :  { %9372 = vmatpush1.bf16.msra.mxu0 %v15721_v24  ;;  %9436 = vmatpush1.bf16.msra.mxu1 %v15722_v26  ;;  %v1536_v24 = vld [vmem:[#allocation7 + $0x30] sm:$0xff] }
 0x247   :  { %9469 = vmatprep.subr.bf16.mxu1 %v15675_v3  ;;  %9438 = vmatprep.subr.bf16.mxu0 %v12827_v41 }
 0x2bc   :  { %v915_v37 = vpop.f32.mrb[4].mxu0  ;;  %v986_v10 = vpop.f32.mrb[8].mxu1 }
 0x2bd   :  { %v8056_v49 = vmul.f32 -1.442695, %v915_v37  ;;  %v917_v8 = vpop.f32.mrb[5].mxu0  ;;  %v988_v54 = vpop.f32.mrb[9].mxu1  ;;  %v1538_v37 = vld [vmem:[#allocation7 + $0x40] sm:$0xff] }
 0x2be   :  { %v8057_v45 = vmul.f32 -1.442695, %v917_v8  ;;  %v1546_v8 = vld [vmem:[#allocation7 + $0x80] sm:$0xff] }
 0x2bf   :  { %11736 = vpow2.f32 %v8056_v49  ;;  %v1543_v49 = vld [vmem:[#allocation7 + $0x68] sm:$0xff] }
 0x2c0   :  { %11738 = vpow2.f32 %v8057_v45 }
 0x2c9   :  { %v11737_v33 = vpop.eup %11736 }
 0x2ca   :  { %v994_v38 = vadd.f32 1.0, %v11737_v33  ;;  %v11739_v31 = vpop.eup %11738  ;;  %v1542_v33 = vld [vmem:[#allocation7 + $0x60] sm:$0xff] }
 0x2cb   :  { %v1000_v22 = vadd.f32 1.0, %v11739_v31  ;;  %v1545_v31 = vld [vmem:[#allocation7 + $0x78] sm:$0xff] }
 0x2cc   :  { %11740 = vrcp.f32 %v994_v38  ;;  %v12859_v38 = vpack.c.bf16 %v1546_v8, %v1543_v49  ;;  %v1574_v49 = vld [vmem:[#allocation7 + $0x160] sm:$0xff]  ;;  %v1577_v8 = vld [vmem:[#allocation7 + $0x178] sm:$0xff] }
 0x2cd   :  { %11742 = vrcp.f32 %v1000_v22  ;;  %v1544_v22 = vld [vmem:[#allocation7 + $0x70] sm:$0xff] }
 0x2d6   :  { %v11741_v12 = vpop.eup %11740 }
 0x2d7   :  { %v1003_v61 = vmul.f32 %v11741_v12, %v988_v54  ;;  %v11743_v20 = vpop.eup %11742  ;;  %v12853_v54 = vpack.c.bf16 %v1539_v6, %v1536_v24  ;;  %v1547_v12 = vld [vmem:[#allocation7 + $0x88] sm:$0xff]  ;;  %v12908_v24 = vpack.c.bf16 %v1571_v44, %v1568_v36  ;;  %v1572_v6 = vld [vmem:[#allocation7 + $0x150] sm:$0xff]  ;;  %v1772_v44 = vld [vmem:[#allocation9 + $0x98] sm:$0xff] }
 0x2d8   :  { %v1006_v32 = vsub.f32 1.0, %v11743_v20  ;;  %v1008_v51 = vmul.f32 0.0, %v11743_v20  ;;  %v1558_v20 = vld [vmem:[#allocation7 + $0xe0] sm:$0xff]  ;;  %v1774_v36 = vld [vmem:[#allocation9 + $0xa8] sm:$0xff] }
 0x2d9   :  { %v1004_v57 = vadd.f32 %v1003_v61, %v986_v10  ;;  %v1541_v10 = vld [vmem:[#allocation7 + $0x58] sm:$0xff] }
 0x2da   :  { %v12855_v45 = vpack.c.bf16 %v1541_v10, %v1538_v37  ;;  %v1549_v61 = vld [vmem:[#allocation7 + $0x98] sm:$0xff]  ;;  %v12912_v37 = vpack.c.bf16 %v1576_v62, %v1573_v55  ;;  %v1575_v10 = vld [vmem:[#allocation7 + $0x168] sm:$0xff] }
 0x2db   :  { %11744 = vtanh.f32 %v1004_v57  ;;  %v1552_v57 = vld [vmem:[#allocation7 + $0xb0] sm:$0xff]  ;;  %v1776_v62 = vld [vmem:[#allocation9 + $0xb8] sm:$0xff] }
 0x2dc   :  { %v1125_v60 = vpop.f32.mrb[6].mxu0  ;;  %v1196_v47 = vpop.f32.mrb[10].mxu1 }
 0x2dd   :  { %v1201_v50 = vrot.slane %v1125_v60, 7  ;;  %v1127_v56 = vpop.f32.mrb[7].mxu0  ;;  %v8526_v59 = vpop.f32.mrb[11].mxu1  ;;  %v1221_v53 = vrot.slane %v1196_v47, 7  ;;  %v12866_v60 = vpack.c.bf16 %v1545_v31, %v1542_v33  ;;  %v12868_v47 = vpack.c.bf16 %v1547_v12, %v1544_v22  ;;  %v1754_v22 = vld [vmem:[#allocation9 + $0x8] sm:$0xff] }
 0x2de   :  { %v1211_v2 = vrot.slane %v1127_v56, 7  ;;  %v12872_v56 = vpack.c.bf16 %v1552_v57, %v1549_v61  ;;  %v1551_v59 = vld [vmem:[#allocation7 + $0xa8] sm:$0xff]  ;;  %v12916_v33 = vpack.c.bf16 %v1575_v10, %v1572_v6  ;;  %v12918_v31 = vpack.c.bf16 %v1577_v8, %v1574_v49  ;;  %v1756_v61 = vld [vmem:[#allocation9 + $0x18] sm:$0xff]  ;;  %v1769_v6 = vld [vmem:[#allocation9 + $0x80] sm:$0xff] }
 0x2df   :  { %v1203_v11 = vadd.f32 %v1201_v50, %v15723_v5  ;;  %v1548_v50 = vld [vmem:[#allocation7 + $0x90] sm:$0xff]  ;;  %v1758_v12 = vld [vmem:[#allocation9 + $0x28] sm:$0xff]  ;;  %v1773_v10 = vld [vmem:[#allocation9 + $0xa0] sm:$0xff]  ;;  %v12952_v49 = vpack.c.bf16 %v1776_v62, %v1772_v44 }
 0x2e0   :  { %v1213_v14 = vadd.f32 %v1211_v2, %v12710_v52  ;;  %v1550_v2 = vld [vmem:[#allocation7 + $0xa0] sm:$0xff]  ;;  %v12926_v57 = vpack.c.bf16 %v1758_v12, %v1754_v22  ;;  %v12954_v8 = vpack.c.bf16 %v1773_v10, %v1769_v6  ;;  %v1771_v22 = vld [vmem:[#allocation9 + $0x90] sm:$0xff]  ;;  %v1792_v62 = vld [vmem:[#allocation9 + $0x138] sm:$0xff] }
 0x2e1   :  { %v8058_v23 = vmul.f32 -1.442695, %v1203_v11  ;;  %v1553_v11 = vld [vmem:[#allocation7 + $0xb8] sm:$0xff]  ;;  %v1775_v12 = vld [vmem:[#allocation9 + $0xb0] sm:$0xff]  ;;  %v1785_v6 = vld [vmem:[#allocation9 + $0x100] sm:$0xff] }
 0x2e2   :  { %v8059_v29 = vmul.f32 -1.442695, %v1213_v14  ;;  %v1555_v14 = vld [vmem:[#allocation7 + $0xc8] sm:$0xff]  ;;  %v1789_v10 = vld [vmem:[#allocation9 + $0x120] sm:$0xff] }
 0x2e3   :  { %11746 = vpow2.f32 %v8058_v23  ;;  %v12876_v23 = vpack.c.bf16 %v1551_v59, %v1548_v50  ;;  %v1760_v50 = vld [vmem:[#allocation9 + $0x38] sm:$0xff]  ;;  %v1753_v59 = vld [vmem:[#allocation9] sm:$0xff] }
 0x2e4   :  { %11748 = vpow2.f32 %v8059_v29  ;;  %v12878_v29 = vpack.c.bf16 %v1553_v11, %v1550_v2  ;;  %v1757_v2 = vld [vmem:[#allocation9 + $0x20] sm:$0xff]  ;;  %v12928_v11 = vpack.c.bf16 %v1760_v50, %v1756_v61  ;;  %v12957_v61 = vpack.c.bf16 %v1775_v12, %v1771_v22  ;;  %v1778_v50 = vld [vmem:[#allocation9 + $0xc8] sm:$0xff] }
 0x2e5   :  { %v11745_v39 = vpop.eup %11744  ;;  %v12978_v12 = vpack.c.bf16 %v1789_v10, %v1785_v6  ;;  %v1795_v6 = vld [vmem:[#allocation9 + $0x150] sm:$0xff] }
 0x2e6   :  { %v1007_v42 = vmul.f32 %v11745_v39, %v1006_v32  ;;  %v1554_v32 = vld [vmem:[#allocation7 + $0xc0] sm:$0xff]  ;;  %v12882_v39 = vpack.c.bf16 %v1558_v20, %v1555_v14  ;;  %v12930_v14 = vpack.c.bf16 %v1757_v2, %v1753_v59  ;;  %v1755_v20 = vld [vmem:[#allocation9 + $0x10] sm:$0xff]  ;;  %v1782_v59 = vld [vmem:[#allocation9 + $0xe8] sm:$0xff] }
 0x2e7   :  { %v1780_v2 = vld [vmem:[#allocation9 + $0xd8] sm:$0xff]  ;;  %15727 = vst [vmem:[#allocation25_spill] sm:$0xff] %v12978_v12  ;;  %v1799_v10 = vld [vmem:[#allocation9 + $0x170] sm:$0xff] }
 0x2e8   :  { %v12832_v21 = vadd.f32 %v1008_v51, %v1007_v42  ;;  %v1557_v42 = vld [vmem:[#allocation7 + $0xd8] sm:$0xff]  ;;  %v1556_v51 = vld [vmem:[#allocation7 + $0xd0] sm:$0xff] }
 0x2ea   :  { %1010 = vst [vmem:[#allocation2] sm:$0x1] %v12832_v21  ;;  %v1234_v25 = vrot.slane %v12832_v21, 7 }
 0x2ec   :  { %v1365_v28 = vrot.slane %v1234_v25, 1  ;;  %v1559_v25 = vld [vmem:[#allocation7 + $0xe8] sm:$0xff] }
 0x2ed   :  { %v11747_v46 = vpop.eup %11746 }
 0x2ee   :  { %v11749_v35 = vpop.eup %11748  ;;  %v1207_v40 = vadd.f32 1.0, %v11747_v46  ;;  %1432 = vmatprep.mubr.f32.mxu0 %v1365_v28  ;;  %1503 = vmatprep.mubr.f32.mxu1 %v1365_v28  ;;  %v1561_v28 = vld [vmem:[#allocation7 + $0xf8] sm:$0xff]  ;;  %v1564_v46 = vld [vmem:[#allocation7 + $0x110] sm:$0xff] }
 0x2ef   :  { %v1217_v48 = vadd.f32 1.0, %v11749_v35  ;;  %v12886_v35 = vpack.c.bf16 %v1557_v42, %v1554_v32  ;;  %v1759_v32 = vld [vmem:[#allocation9 + $0x30] sm:$0xff] }
 0x2f0   :  { %11750 = vrcp.f32 %v1207_v40  ;;  %v12888_v40 = vpack.c.bf16 %v1559_v25, %v1556_v51  ;;  %v12933_v42 = vpack.c.bf16 %v1759_v32, %v1755_v20  ;;  %v1766_v51 = vld [vmem:[#allocation9 + $0x68] sm:$0xff]  ;;  %v1764_v25 = vld [vmem:[#allocation9 + $0x58] sm:$0xff]  ;;  %v12962_v20 = vpack.c.bf16 %v1782_v59, %v1778_v50  ;;  %v1787_v50 = vld [vmem:[#allocation9 + $0x110] sm:$0xff] }
 0x2f1   :  { %11752 = vrcp.f32 %v1217_v48  ;;  %v1560_v48 = vld [vmem:[#allocation7 + $0xf0] sm:$0xff]  ;;  %v1784_v32 = vld [vmem:[#allocation9 + $0xf8] sm:$0xff] }
 0x2f2   :  { %v1791_v59 = vld [vmem:[#allocation9 + $0x130] sm:$0xff] }
 0x2fa   :  { %v11751_v58 = vpop.eup %11750 }
 0x2fb   :  { %v11753_v1 = vpop.eup %11752  ;;  %v1223_v4 = vmul.f32 %v11751_v58, %v1221_v53  ;;  %v12892_v53 = vpack.c.bf16 %v1564_v46, %v1561_v28  ;;  %v1563_v58 = vld [vmem:[#allocation7 + $0x108] sm:$0xff]  ;;  %v1768_v46 = vld [vmem:[#allocation9 + $0x78] sm:$0xff] }
 0x2fc   :  { %v1231_v9 = vmul.f32 %v11753_v1, %v1229_v63  ;;  %v1226_v16 = vsub.f32 1.0, %v11753_v1  ;;  %v1562_v63 = vld [vmem:[#allocation7 + $0x100] sm:$0xff]  ;;  %v1565_v1 = vld [vmem:[#allocation7 + $0x118] sm:$0xff] }
 0x2fd   :  { %v1224_v15 = vadd.f32 %v1223_v4, %v12716_v30  ;;  %v1567_v4 = vld [vmem:[#allocation7 + $0x128] sm:$0xff] }
 0x2ff   :  { %11754 = vtanh.f32 %v1224_v15  ;;  %v12896_v15 = vpack.c.bf16 %v1563_v58, %v1560_v48  ;;  %v1761_v48 = vld [vmem:[#allocation9 + $0x40] sm:$0xff] }
 0x300   :  { %v1765_v58 = vld [vmem:[#allocation9 + $0x60] sm:$0xff] }
 0x309   :  { %v11755_v19 = vpop.eup %11754 }
 0x30a   :  { %v1227_v34 = vmul.f32 %v11755_v19, %v1226_v16  ;;  %v12898_v16 = vpack.c.bf16 %v1565_v1, %v1562_v63  ;;  %v1566_v19 = vld [vmem:[#allocation7 + $0x120] sm:$0xff]  ;;  %v12940_v63 = vpack.c.bf16 %v1768_v46, %v1764_v25  ;;  %v12942_v1 = vpack.c.bf16 %v1765_v58, %v1761_v48  ;;  %v1779_v48 = vld [vmem:[#allocation9 + $0xd0] sm:$0xff] }
 0x30b   :  { %v12964_v25 = vpack.c.bf16 %v1784_v32, %v1780_v2  ;;  %v1783_v58 = vld [vmem:[#allocation9 + $0xf0] sm:$0xff]  ;;  %v12981_v2 = vpack.c.bf16 %v1791_v59, %v1787_v50  ;;  %v1794_v32 = vld [vmem:[#allocation9 + $0x148] sm:$0xff]  ;;  %v12993_v50 = vpack.c.bf16 %v1799_v10, %v1795_v6 }
 0x30c   :  { %v12838_v7 = vadd.f32 %v1231_v9, %v1227_v34  ;;  %v1570_v9 = vld [vmem:[#allocation7 + $0x140] sm:$0xff]  ;;  %v1569_v34 = vld [vmem:[#allocation7 + $0x138] sm:$0xff]  ;;  %v1802_v59 = vld [vmem:[#allocation9 + $0x188] sm:$0xff] }
 0x30d   :  { %v12902_v27 = vpack.c.bf16 %v1570_v9, %v1567_v4  ;;  %v12906_v43 = vpack.c.bf16 %v1569_v34, %v1566_v19  ;;  %v1763_v4 = vld [vmem:[#allocation9 + $0x50] sm:$0xff]  ;;  %v1770_v34 = vld [vmem:[#allocation9 + $0x88] sm:$0xff]  ;;  %15728 = vst [vmem:[#allocation26_spill] sm:$0xff] %v12981_v2  ;;  %15732 = vst [vmem:[#allocation30_spill] sm:$0xff] %v12993_v50 }
 0x30e   :  { %v12845_v26 = vrot.slane %v12838_v7, 1  ;;  %v1767_v9 = vld [vmem:[#allocation9 + $0x70] sm:$0xff]  ;;  %v12950_v55 = vpack.c.bf16 %v1774_v36, %v1770_v34  ;;  %v1790_v34 = vld [vmem:[#allocation9 + $0x128] sm:$0xff]  ;;  %v1788_v36 = vld [vmem:[#allocation9 + $0x118] sm:$0xff] }
 0x30f   :  { %v12945_v19 = vpack.c.bf16 %v1767_v9, %v1763_v4  ;;  %v12969_v4 = vpack.c.bf16 %v1783_v58, %v1779_v48  ;;  %v1786_v9 = vld [vmem:[#allocation9 + $0x108] sm:$0xff]  ;;  %v12976_v22 = vpack.c.bf16 %v1792_v62, %v1788_v36  ;;  %v1800_v58 = vld [vmem:[#allocation9 + $0x178] sm:$0xff]  ;;  %v1803_v6 = vld [vmem:[#allocation9 + $0x190] sm:$0xff] }
 0x310   :  { %1433 = vmatmul.mubr.f32.vlgmr.msra.gmra.mrb[8].mxu0 %v12845_v26  ;;  %1504 = vmatmul.mubr.f32.vlgmr.msra.gmra.mrb[12].mxu1 %v12845_v26  ;;  %v12974_v44 = vpack.c.bf16 %v1790_v34, %v1786_v9  ;;  %v1793_v9 = vld [vmem:[#allocation9 + $0x140] sm:$0xff]  ;;  %v1807_v10 = vld [vmem:[#allocation9 + $0x1b0] sm:$0xff] }
 0x311   :  { %9440 = vmatpush1.bf16.msra.mxu0 %v12840_v13  ;;  %9471 = vmatpush3.bf16.msra.mxu1 %v12842_v18  ;;  %15724 = vst [vmem:[#allocation22_spill] sm:$0xff] %v12969_v4  ;;  %15726 = vst [vmem:[#allocation24_spill] sm:$0xff] %v12976_v22  ;;  %v1797_v34 = vld [vmem:[#allocation9 + $0x160] sm:$0xff] }
 0x312   :  { %9442 = vmatprep.subr.bf16.mxu0 %v12847_v0  ;;  %9472 = vmatprep.subr.bf16.mxu1 %v15675_v3  ;;  %15725 = vst [vmem:[#allocation23_spill] sm:$0xff] %v12974_v44  ;;  %v12990_v62 = vpack.c.bf16 %v1797_v34, %v1793_v9  ;;  %v1805_v9 = vld [vmem:[#allocation9 + $0x1a0] sm:$0xff] }
 0x313   :  { %1642 = vmatprep.mubr.f32.mxu0 %v15680_v17  ;;  %8559 = vmatprep.mubr.msk.f32.mxu1 %vm12211_vm0, %v15680_v17 }
 0x314   :  { %15731 = vst [vmem:[#allocation29_spill] sm:$0xff] %v12990_v62 }
 0x315   :  { %9444 = vmatpush1.bf16.msra.mxu0 %v12853_v54  ;;  %9474 = vmatpush3.bf16.msra.mxu1 %v12855_v45 }
 0x316   :  { %9446 = vmatprep.subr.bf16.mxu0 %v12859_v38  ;;  %9475 = vmatprep.subr.bf16.mxu1 %v15675_v3 }
 0x319   :  { %9448 = vmatpush1.bf16.msra.mxu0 %v12866_v60  ;;  %9477 = vmatpush3.bf16.msra.mxu1 %v12868_v47 }
 0x31a   :  { %9450 = vmatprep.subr.bf16.mxu0 %v12872_v56  ;;  %9478 = vmatprep.subr.bf16.mxu1 %v15675_v3 }
 0x31d   :  { %9452 = vmatpush1.bf16.msra.mxu0 %v12876_v23  ;;  %9480 = vmatpush3.bf16.msra.mxu1 %v12878_v29 }
 0x31e   :  { %9454 = vmatprep.subr.bf16.mxu0 %v12882_v39  ;;  %9481 = vmatprep.subr.bf16.mxu1 %v15675_v3 }
 0x321   :  { %9456 = vmatpush1.bf16.msra.mxu0 %v12886_v35  ;;  %9483 = vmatpush3.bf16.msra.mxu1 %v12888_v40 }
 0x322   :  { %9458 = vmatprep.subr.bf16.mxu0 %v12892_v53  ;;  %9484 = vmatprep.subr.bf16.mxu1 %v15675_v3 }
 0x325   :  { %9460 = vmatpush1.bf16.msra.mxu0 %v12896_v15  ;;  %9486 = vmatpush3.bf16.msra.mxu1 %v12898_v16 }
 0x326   :  { %9462 = vmatprep.subr.bf16.mxu0 %v12902_v27  ;;  %9487 = vmatprep.subr.bf16.mxu1 %v15675_v3 }
 0x329   :  { %9464 = vmatpush1.bf16.msra.mxu0 %v12906_v43  ;;  %9489 = vmatpush3.bf16.msra.mxu1 %v12908_v24 }
 0x32a   :  { %9466 = vmatprep.subr.bf16.mxu0 %v12912_v37  ;;  %9490 = vmatprep.subr.bf16.mxu1 %v15675_v3 }
 0x32d   :  { %9468 = vmatpush1.bf16.msra.mxu0 %v12916_v33  ;;  %9492 = vmatpush3.bf16.msra.mxu1 %v12918_v31 }
 0x32e   :  { %9494 = vmatprep.subr.bf16.mxu0 %v12926_v57  ;;  %9558 = vmatprep.subr.bf16.mxu1 %v12928_v11 }
 0x330   :  { %1643 = vmatmul.mubr.f32.vlgmr.msra.gmra.mrb[10].mxu0 %v12845_v26  ;;  %8560 = vmatmul.mubr.f32.vlgmr.msra.gmra.mrb[14].mxu1 %v12845_v26  ;;  %v1762_v26 = vld [vmem:[#allocation9 + $0x48] sm:$0xff] }
 0x331   :  { %9496 = vmatpush1.bf16.msra.mxu0 %v12930_v14  ;;  %9560 = vmatpush1.bf16.msra.mxu1 %v12933_v42  ;;  %v12938_v28 = vpack.c.bf16 %v1766_v51, %v1762_v26  ;;  %v1777_v26 = vld [vmem:[#allocation9 + $0xc0] sm:$0xff] }
 0x332   :  { %9562 = vmatprep.subr.bf16.mxu1 %v12940_v63  ;;  %v1781_v51 = vld [vmem:[#allocation9 + $0xe0] sm:$0xff] }
 0x333   :  { %9498 = vmatprep.subr.bf16.mxu0 %v12938_v28  ;;  %v12966_v46 = vpack.c.bf16 %v1781_v51, %v1777_v26  ;;  %v1798_v26 = vld [vmem:[#allocation9 + $0x168] sm:$0xff]  ;;  %v1796_v51 = vld [vmem:[#allocation9 + $0x158] sm:$0xff] }
 0x334   :  { %v12986_v48 = vpack.c.bf16 %v1798_v26, %v1794_v32  ;;  %v12988_v36 = vpack.c.bf16 %v1800_v58, %v1796_v51  ;;  %v1806_v32 = vld [vmem:[#allocation9 + $0x1a8] sm:$0xff]  ;;  %v1804_v26 = vld [vmem:[#allocation9 + $0x198] sm:$0xff]  ;;  %v1801_v58 = vld [vmem:[#allocation9 + $0x180] sm:$0xff] }
 0x335   :  { %9500 = vmatpush1.bf16.msra.mxu0 %v12942_v1  ;;  %9564 = vmatpush1.bf16.msra.mxu1 %v12945_v19  ;;  %v1808_v51 = vld [vmem:[#allocation9 + $0x1b8] sm:$0xff] }
 0x336   :  { %9502 = vmatprep.subr.bf16.mxu0 %v12950_v55  ;;  %9566 = vmatprep.subr.bf16.mxu1 %v12952_v49  ;;  %15729 = vst [vmem:[#allocation27_spill] sm:$0xff] %v12986_v48  ;;  %15730 = vst [vmem:[#allocation28_spill] sm:$0xff] %v12988_v36  ;;  %v13000_v34 = vpack.c.bf16 %v1808_v51, %v1804_v26  ;;  %v1816_v26 = vld [vmem:[#allocation9 + $0x1f8] sm:$0xff]  ;;  %v1809_v51 = vld [vmem:[#allocation9 + $0x1c0] sm:$0xff] }
 0x338   :  { %15734 = vst [vmem:[#allocation32_spill] sm:$0xff] %v13000_v34 }
 0x339   :  { %9504 = vmatpush1.bf16.msra.mxu0 %v12954_v8  ;;  %9568 = vmatpush1.bf16.msra.mxu1 %v12957_v61 }
 0x33a   :  { %9506 = vmatprep.subr.bf16.mxu0 %v12962_v20  ;;  %9570 = vmatprep.subr.bf16.mxu1 %v12964_v25 }
 0x33d   :  { %9508 = vmatpush1.bf16.msra.mxu0 %v12966_v46  ;;  %9572 = vmatpush1.bf16.msra.mxu1 %v12969_v4 }
 0x33e   :  { %9510 = vmatprep.subr.bf16.mxu0 %v12974_v44  ;;  %9574 = vmatprep.subr.bf16.mxu1 %v12976_v22  ;;  %v1860_v22 = vld [vmem:[#allocation9 + $0x358] sm:$0xff] }
 0x341   :  { %9512 = vmatpush1.bf16.msra.mxu0 %v12978_v12  ;;  %9576 = vmatpush1.bf16.msra.mxu1 %v12981_v2  ;;  %v12998_v2 = vpack.c.bf16 %v1806_v32, %v1802_v59  ;;  %v13002_v12 = vpack.c.bf16 %v1805_v9, %v1801_v58  ;;  %v1814_v59 = vld [vmem:[#allocation9 + $0x1e8] sm:$0xff]  ;;  %v1812_v32 = vld [vmem:[#allocation9 + $0x1d8] sm:$0xff]  ;;  %v1813_v58 = vld [vmem:[#allocation9 + $0x1e0] sm:$0xff] }
 0x342   :  { %9514 = vmatprep.subr.bf16.mxu0 %v12986_v48  ;;  %9578 = vmatprep.subr.bf16.mxu1 %v12988_v36  ;;  %v13005_v36 = vpack.c.bf16 %v1807_v10, %v1803_v6  ;;  %v13012_v9 = vpack.c.bf16 %v1816_v26, %v1812_v32  ;;  %v13014_v48 = vpack.c.bf16 %v1813_v58, %v1809_v51  ;;  %v1811_v6 = vld [vmem:[#allocation9 + $0x1d0] sm:$0xff]  ;;  %v1824_v32 = vld [vmem:[#allocation9 + $0x238] sm:$0xff]  ;;  %v1817_v26 = vld [vmem:[#allocation9 + $0x200] sm:$0xff] }
 0x343   :  { %15733 = vst [vmem:[#allocation31_spill] sm:$0xff] %v12998_v2  ;;  %15735 = vst [vmem:[#allocation33_spill] sm:$0xff] %v13002_v12  ;;  %v1815_v10 = vld [vmem:[#allocation9 + $0x1f0] sm:$0xff]  ;;  %v1821_v51 = vld [vmem:[#allocation9 + $0x220] sm:$0xff] }
 0x344   :  { %15736 = vst [vmem:[#allocation34_spill] sm:$0xff] %v13005_v36  ;;  %15738 = vst [vmem:[#allocation36_spill] sm:$0xff] %v13012_v9 }
 0x345   :  { %9516 = vmatpush1.bf16.msra.mxu0 %v12990_v62  ;;  %9580 = vmatpush1.bf16.msra.mxu1 %v12993_v50  ;;  %v1810_v50 = vld [vmem:[#allocation9 + $0x1c8] sm:$0xff]  ;;  %15739 = vst [vmem:[#allocation37_spill] sm:$0xff] %v13014_v48 }
 0x346   :  { %9518 = vmatprep.subr.bf16.mxu0 %v12998_v2  ;;  %9582 = vmatprep.subr.bf16.mxu1 %v13000_v34  ;;  %v13010_v62 = vpack.c.bf16 %v1814_v59, %v1810_v50  ;;  %v13017_v34 = vpack.c.bf16 %v1815_v10, %v1811_v6  ;;  %v1822_v50 = vld [vmem:[#allocation9 + $0x228] sm:$0xff]  ;;  %v1820_v59 = vld [vmem:[#allocation9 + $0x218] sm:$0xff]  ;;  %v13026_v2 = vpack.c.bf16 %v1821_v51, %v1817_v26  ;;  %v1819_v6 = vld [vmem:[#allocation9 + $0x210] sm:$0xff] }
 0x347   :  { %v13024_v58 = vpack.c.bf16 %v1824_v32, %v1820_v59  ;;  %v1823_v10 = vld [vmem:[#allocation9 + $0x230] sm:$0xff]  ;;  %v1832_v59 = vld [vmem:[#allocation9 + $0x278] sm:$0xff]  ;;  %v1825_v32 = vld [vmem:[#allocation9 + $0x240] sm:$0xff] }
 0x348   :  { %15737 = vst [vmem:[#allocation35_spill] sm:$0xff] %v13010_v62  ;;  %15740 = vst [vmem:[#allocation38_spill] sm:$0xff] %v13017_v34  ;;  %v1829_v26 = vld [vmem:[#allocation9 + $0x260] sm:$0xff] }
 0x349   :  { %9520 = vmatpush1.bf16.msra.mxu0 %v13002_v12  ;;  %9584 = vmatpush1.bf16.msra.mxu1 %v13005_v36  ;;  %v1818_v36 = vld [vmem:[#allocation9 + $0x208] sm:$0xff]  ;;  %15742 = vst [vmem:[#allocation40_spill] sm:$0xff] %v13024_v58  ;;  %15743 = vst [vmem:[#allocation41_spill] sm:$0xff] %v13026_v2 }
 0x34a   :  { %9522 = vmatprep.subr.bf16.mxu0 %v13010_v62  ;;  %9586 = vmatprep.subr.bf16.mxu1 %v13012_v9  ;;  %v13022_v12 = vpack.c.bf16 %v1822_v50, %v1818_v36  ;;  %v13029_v9 = vpack.c.bf16 %v1823_v10, %v1819_v6  ;;  %v1830_v36 = vld [vmem:[#allocation9 + $0x268] sm:$0xff]  ;;  %v1828_v50 = vld [vmem:[#allocation9 + $0x258] sm:$0xff]  ;;  %v13038_v62 = vpack.c.bf16 %v1829_v26, %v1825_v32  ;;  %v1827_v6 = vld [vmem:[#allocation9 + $0x250] sm:$0xff] }
 0x34b   :  { %v13036_v51 = vpack.c.bf16 %v1832_v59, %v1828_v50  ;;  %v1831_v10 = vld [vmem:[#allocation9 + $0x270] sm:$0xff]  ;;  %v1840_v50 = vld [vmem:[#allocation9 + $0x2b8] sm:$0xff]  ;;  %v1833_v59 = vld [vmem:[#allocation9 + $0x280] sm:$0xff] }
 0x34c   :  { %15741 = vst [vmem:[#allocation39_spill] sm:$0xff] %v13022_v12  ;;  %15744 = vst [vmem:[#allocation42_spill] sm:$0xff] %v13029_v9  ;;  %v1837_v32 = vld [vmem:[#allocation9 + $0x2a0] sm:$0xff] }
 0x34d   :  { %9524 = vmatpush1.bf16.msra.mxu0 %v13014_v48  ;;  %9588 = vmatpush1.bf16.msra.mxu1 %v13017_v34  ;;  %v1826_v34 = vld [vmem:[#allocation9 + $0x248] sm:$0xff]  ;;  %15746 = vst [vmem:[#allocation44_spill] sm:$0xff] %v13036_v51  ;;  %15747 = vst [vmem:[#allocation45_spill] sm:$0xff] %v13038_v62 }
 0x34e   :  { %9526 = vmatprep.subr.bf16.mxu0 %v13022_v12  ;;  %9590 = vmatprep.subr.bf16.mxu1 %v13024_v58  ;;  %v13034_v48 = vpack.c.bf16 %v1830_v36, %v1826_v34  ;;  %v13041_v58 = vpack.c.bf16 %v1831_v10, %v1827_v6  ;;  %v1838_v34 = vld [vmem:[#allocation9 + $0x2a8] sm:$0xff]  ;;  %v1836_v36 = vld [vmem:[#allocation9 + $0x298] sm:$0xff]  ;;  %v13050_v12 = vpack.c.bf16 %v1837_v32, %v1833_v59  ;;  %v1835_v6 = vld [vmem:[#allocation9 + $0x290] sm:$0xff] }
 0x34f   :  { %v13048_v26 = vpack.c.bf16 %v1840_v50, %v1836_v36  ;;  %v1839_v10 = vld [vmem:[#allocation9 + $0x2b0] sm:$0xff]  ;;  %v1848_v36 = vld [vmem:[#allocation9 + $0x2f8] sm:$0xff]  ;;  %v1841_v50 = vld [vmem:[#allocation9 + $0x2c0] sm:$0xff] }
 0x350   :  { %15745 = vst [vmem:[#allocation43_spill] sm:$0xff] %v13034_v48  ;;  %15748 = vst [vmem:[#allocation46_spill] sm:$0xff] %v13041_v58  ;;  %v1845_v59 = vld [vmem:[#allocation9 + $0x2e0] sm:$0xff] }
 0x351   :  { %9528 = vmatpush1.bf16.msra.mxu0 %v13026_v2  ;;  %9592 = vmatpush1.bf16.msra.mxu1 %v13029_v9  ;;  %v1834_v9 = vld [vmem:[#allocation9 + $0x288] sm:$0xff]  ;;  %15750 = vst [vmem:[#allocation48_spill] sm:$0xff] %v13048_v26  ;;  %15751 = vst [vmem:[#allocation49_spill] sm:$0xff] %v13050_v12 }
 0x352   :  { %9530 = vmatprep.subr.bf16.mxu0 %v13034_v48  ;;  %9594 = vmatprep.subr.bf16.mxu1 %v13036_v51  ;;  %v13046_v2 = vpack.c.bf16 %v1838_v34, %v1834_v9  ;;  %v13053_v51 = vpack.c.bf16 %v1839_v10, %v1835_v6  ;;  %v1846_v9 = vld [vmem:[#allocation9 + $0x2e8] sm:$0xff]  ;;  %v1844_v34 = vld [vmem:[#allocation9 + $0x2d8] sm:$0xff]  ;;  %v13062_v48 = vpack.c.bf16 %v1845_v59, %v1841_v50  ;;  %v1843_v6 = vld [vmem:[#allocation9 + $0x2d0] sm:$0xff] }
 0x353   :  { %v13060_v32 = vpack.c.bf16 %v1848_v36, %v1844_v34  ;;  %v1847_v10 = vld [vmem:[#allocation9 + $0x2f0] sm:$0xff]  ;;  %v1856_v34 = vld [vmem:[#allocation9 + $0x338] sm:$0xff]  ;;  %v1849_v36 = vld [vmem:[#allocation9 + $0x300] sm:$0xff] }
 0x354   :  { %15749 = vst [vmem:[#allocation47_spill] sm:$0xff] %v13046_v2  ;;  %15752 = vst [vmem:[#allocation50_spill] sm:$0xff] %v13053_v51  ;;  %v1853_v50 = vld [vmem:[#allocation9 + $0x320] sm:$0xff] }
 0x355   :  { %9532 = vmatpush1.bf16.msra.mxu0 %v13038_v62  ;;  %9596 = vmatpush1.bf16.msra.mxu1 %v13041_v58  ;;  %v1842_v58 = vld [vmem:[#allocation9 + $0x2c8] sm:$0xff]  ;;  %15754 = vst [vmem:[#allocation52_spill] sm:$0xff] %v13060_v32  ;;  %15755 = vst [vmem:[#allocation53_spill] sm:$0xff] %v13062_v48 }
 0x356   :  { %9534 = vmatprep.subr.bf16.mxu0 %v13046_v2  ;;  %9598 = vmatprep.subr.bf16.mxu1 %v13048_v26  ;;  %v13058_v62 = vpack.c.bf16 %v1846_v9, %v1842_v58  ;;  %v13065_v26 = vpack.c.bf16 %v1847_v10, %v1843_v6  ;;  %v1854_v58 = vld [vmem:[#allocation9 + $0x328] sm:$0xff]  ;;  %v1852_v9 = vld [vmem:[#allocation9 + $0x318] sm:$0xff]  ;;  %v13074_v2 = vpack.c.bf16 %v1853_v50, %v1849_v36  ;;  %v1851_v6 = vld [vmem:[#allocation9 + $0x310] sm:$0xff] }
 0x357   :  { %v13072_v59 = vpack.c.bf16 %v1856_v34, %v1852_v9  ;;  %v1855_v10 = vld [vmem:[#allocation9 + $0x330] sm:$0xff]  ;;  %v1857_v9 = vld [vmem:[#allocation9 + $0x340] sm:$0xff] }
 0x358   :  { %15753 = vst [vmem:[#allocation51_spill] sm:$0xff] %v13058_v62  ;;  %15756 = vst [vmem:[#allocation54_spill] sm:$0xff] %v13065_v26  ;;  %v1861_v34 = vld [vmem:[#allocation9 + $0x360] sm:$0xff] }
 0x359   :  { %9536 = vmatpush1.bf16.msra.mxu0 %v13050_v12  ;;  %9600 = vmatpush1.bf16.msra.mxu1 %v13053_v51  ;;  %v1850_v51 = vld [vmem:[#allocation9 + $0x308] sm:$0xff]  ;;  %15758 = vst [vmem:[#allocation56_spill] sm:$0xff] %v13072_v59  ;;  %15759 = vst [vmem:[#allocation57_spill] sm:$0xff] %v13074_v2  ;;  %v13086_v50 = vpack.c.bf16 %v1861_v34, %v1857_v9  ;;  %v1867_v9 = vld [vmem:[#allocation9 + $0x390] sm:$0xff] }
 0x35a   :  { %9538 = vmatprep.subr.bf16.mxu0 %v13058_v62  ;;  %9602 = vmatprep.subr.bf16.mxu1 %v13060_v32  ;;  %v13070_v12 = vpack.c.bf16 %v1854_v58, %v1850_v51  ;;  %v13077_v32 = vpack.c.bf16 %v1855_v10, %v1851_v6  ;;  %v1862_v62 = vld [vmem:[#allocation9 + $0x368] sm:$0xff]  ;;  %v1864_v58 = vld [vmem:[#allocation9 + $0x378] sm:$0xff]  ;;  %v1859_v6 = vld [vmem:[#allocation9 + $0x350] sm:$0xff] }
 0x35b   :  { %v13084_v36 = vpack.c.bf16 %v1864_v58, %v1860_v22  ;;  %15763 = vst [vmem:[#allocation61_spill] sm:$0xff] %v13086_v50  ;;  %v1863_v10 = vld [vmem:[#allocation9 + $0x370] sm:$0xff]  ;;  %v1865_v22 = vld [vmem:[#allocation9 + $0x380] sm:$0xff] }
 0x35c   :  { %15757 = vst [vmem:[#allocation55_spill] sm:$0xff] %v13070_v12  ;;  %15760 = vst [vmem:[#allocation58_spill] sm:$0xff] %v13077_v32  ;;  %v1869_v58 = vld [vmem:[#allocation9 + $0x3a0] sm:$0xff] }
 0x35d   :  { %9540 = vmatpush1.bf16.msra.mxu0 %v13062_v48  ;;  %9604 = vmatpush1.bf16.msra.mxu1 %v13065_v26  ;;  %v1858_v48 = vld [vmem:[#allocation9 + $0x348] sm:$0xff]  ;;  %15762 = vst [vmem:[#allocation60_spill] sm:$0xff] %v13084_v36  ;;  %v13089_v26 = vpack.c.bf16 %v1863_v10, %v1859_v6  ;;  %v13097_v34 = vpack.c.bf16 %v1869_v58, %v1865_v22  ;;  %v1877_v22 = vld [vmem:[#allocation9 + $0x3e0] sm:$0xff]  ;;  %v1875_v58 = vld [vmem:[#allocation9 + $0x3d0] sm:$0xff] }
 0x35e   :  { %9542 = vmatprep.subr.bf16.mxu0 %v13070_v12  ;;  %9606 = vmatprep.subr.bf16.mxu1 %v13072_v59  ;;  %v13081_v51 = vpack.c.bf16 %v1862_v62, %v1858_v48  ;;  %v1866_v12 = vld [vmem:[#allocation9 + $0x388] sm:$0xff]  ;;  %v1872_v48 = vld [vmem:[#allocation9 + $0x3b8] sm:$0xff] }
 0x35f   :  { %v1870_v59 = vld [vmem:[#allocation9 + $0x3a8] sm:$0xff]  ;;  %15766 = vst [vmem:[#allocation64_spill] sm:$0xff] %v13097_v34 }
 0x360   :  { %15761 = vst [vmem:[#allocation59_spill] sm:$0xff] %v13081_v51  ;;  %v13092_v62 = vpack.c.bf16 %v1870_v59, %v1866_v12  ;;  %v1878_v6 = vld [vmem:[#allocation9 + $0x3e8] sm:$0xff]  ;;  %v1880_v59 = vld [vmem:[#allocation9 + $0x3f8] sm:$0xff] }
 0x361   :  { %9544 = vmatpush1.bf16.msra.mxu0 %v13074_v2  ;;  %9608 = vmatpush1.bf16.msra.mxu1 %v13077_v32  ;;  %v1868_v2 = vld [vmem:[#allocation9 + $0x398] sm:$0xff]  ;;  %v1871_v32 = vld [vmem:[#allocation9 + $0x3b0] sm:$0xff] }
 0x362   :  { %9546 = vmatprep.subr.bf16.mxu0 %v13081_v51  ;;  %9610 = vmatprep.subr.bf16.mxu1 %v13084_v36  ;;  %15764 = vst [vmem:[#allocation62_spill] sm:$0xff] %v13092_v62  ;;  %v13094_v44 = vpack.c.bf16 %v1872_v48, %v1868_v2  ;;  %v1874_v51 = vld [vmem:[#allocation9 + $0x3c8] sm:$0xff]  ;;  %v13101_v10 = vpack.c.bf16 %v1871_v32, %v1867_v9  ;;  %v1876_v2 = vld [vmem:[#allocation9 + $0x3d8] sm:$0xff]  ;;  %v1873_v48 = vld [vmem:[#allocation9 + $0x3c0] sm:$0xff] }
 0x363   :  { %v13103_v12 = vpack.c.bf16 %v1878_v6, %v1874_v51  ;;  %v13106_v36 = vpack.c.bf16 %v1880_v59, %v1876_v2  ;;  %v13109_v4 = vpack.c.bf16 %v1877_v22, %v1873_v48 }
 0x364   :  { %15765 = vst [vmem:[#allocation63_spill] sm:$0xff] %v13094_v44  ;;  %15767 = vst [vmem:[#allocation68_spill] sm:$0xff] %v13101_v10 }
 0x365   :  { %9548 = vmatpush1.bf16.msra.mxu0 %v13086_v50  ;;  %9612 = vmatpush1.bf16.msra.mxu1 %v13089_v26  ;;  %15768 = vst [vmem:[#allocation69_spill] sm:$0xff] %v13103_v12  ;;  %15769 = vst [vmem:[#allocation70_spill] sm:$0xff] %v13106_v36  ;;  %v1879_v50 = vld [vmem:[#allocation9 + $0x3f0] sm:$0xff] }
 0x366   :  { %9550 = vmatprep.subr.bf16.mxu0 %v13092_v62  ;;  %9614 = vmatprep.subr.bf16.mxu1 %v13094_v44  ;;  %15770 = vst [vmem:[#allocation71_spill] sm:$0xff] %v13109_v4  ;;  %v13113_v32 = vpack.c.bf16 %v1879_v50, %v1875_v58 }
 0x368   :  { %15771 = vst [vmem:[#allocation72_spill] sm:$0xff] %v13113_v32 }
 0x369   :  { %9552 = vmatpush1.bf16.msra.mxu0 %v13097_v34  ;;  %9616 = vmatpush1.bf16.msra.mxu1 %v13101_v10 }
 0x36a   :  { %9554 = vmatprep.subr.bf16.mxu0 %v13103_v12  ;;  %9618 = vmatprep.subr.bf16.mxu1 %v13106_v36 }
 0x36d   :  { %9556 = vmatpush1.bf16.msra.mxu0 %v13109_v4  ;;  %9620 = vmatpush1.bf16.msra.mxu1 %v13113_v32 }
 0x36e   :  { %9622 = vmatprep.subr.bf16.mxu0 %v12827_v41  ;;  %9653 = vmatprep.subr.bf16.mxu1 %v15675_v3 }
 0x3e3   :  { %v1434_v51 = vpop.f32.mrb[8].mxu0  ;;  %v1505_v9 = vpop.f32.mrb[12].mxu1 }
 0x3e4   :  { %v8060_v6 = vmul.f32 -1.442695, %v1434_v51  ;;  %v1436_v2 = vpop.f32.mrb[9].mxu0  ;;  %v1507_v59 = vpop.f32.mrb[13].mxu1 }
 0x3e5   :  { %v8061_v48 = vmul.f32 -1.442695, %v1436_v2 }
 0x3e6   :  { %11756 = vpow2.f32 %v8060_v6 }
 0x3e7   :  { %11758 = vpow2.f32 %v8061_v48 }
 0x3f0   :  { %v11757_v50 = vpop.eup %11756 }
 0x3f1   :  { %v1513_v22 = vadd.f32 1.0, %v11757_v50  ;;  %v11759_v58 = vpop.eup %11758 }
 0x3f2   :  { %v1519_v36 = vadd.f32 1.0, %v11759_v58 }
 0x3f3   :  { %11760 = vrcp.f32 %v1513_v22 }
 0x3f4   :  { %11762 = vrcp.f32 %v1519_v36 }
 0x3fd   :  { %v11761_v4 = vpop.eup %11760 }
 0x3fe   :  { %v1522_v32 = vmul.f32 %v11761_v4, %v1507_v59  ;;  %v11763_v48 = vpop.eup %11762 }
 0x3ff   :  { %v1525_v58 = vsub.f32 1.0, %v11763_v48 }
 0x400   :  { %v1523_v12 = vadd.f32 %v1522_v32, %v1505_v9 }
 0x402   :  { %11764 = vtanh.f32 %v1523_v12  ;;  %v1527_v12 = vmul.f32 %v11763_v48, %v12832_v21 }
 0x403   :  { %v1644_v41 = vpop.f32.mrb[10].mxu0  ;;  %v1715_v10 = vpop.f32.mrb[14].mxu1 }
 0x404   :  { %v1720_v34 = vrot.slane %v1644_v41, 6  ;;  %v1646_v44 = vpop.f32.mrb[11].mxu0  ;;  %v8561_v51 = vpop.f32.mrb[15].mxu1 }
 0x405   :  { %v1730_v62 = vrot.slane %v1646_v44, 6  ;;  %v1740_v51 = vrot.slane %v1715_v10, 6  ;;  %v15811_v10 = vld [vmem:[#allocation61_spill] sm:$0xff] }
 0x406   :  { %v1722_v6 = vadd.f32 %v1720_v34, %v15723_v5 }
 0x407   :  { %v1732_v2 = vadd.f32 %v1730_v62, %v12710_v52 }
 0x408   :  { %v8062_v50 = vmul.f32 -1.442695, %v1722_v6 }
 0x409   :  { %v8063_v22 = vmul.f32 -1.442695, %v1732_v2  ;;  %v1747_v2 = vrot.slane %v12838_v7, 7  ;;  %v15772_v7 = vld [vmem:[#allocation22_spill] sm:$0xff] }
 0x40a   :  { %11766 = vpow2.f32 %v8062_v50 }
 0x40b   :  { %11768 = vpow2.f32 %v8063_v22 }
 0x40c   :  { %v11765_v36 = vpop.eup %11764 }
 0x40d   :  { %v1526_v4 = vmul.f32 %v11765_v36, %v1525_v58 }
 0x40f   :  { %v13123_v32 = vadd.f32 %v1527_v12, %v1526_v4 }
 0x411   :  { %1529 = vst [vmem:[#allocation2 + $0x1] sm:$0x1] %v13123_v32  ;;  %v1752_v44 = vrot.slane %v13123_v32, 6 }
 0x413   :  { %v1883_v9 = vrot.slane %v1752_v44, 2 }
 0x414   :  { %v11767_v34 = vpop.eup %11766 }
 0x415   :  { %v11769_v59 = vpop.eup %11768  ;;  %v1726_v62 = vadd.f32 1.0, %v11767_v34  ;;  %1950 = vmatprep.mubr.f32.mxu0 %v1883_v9  ;;  %2021 = vmatprep.mubr.f32.mxu1 %v1883_v9  ;;  %v15812_v9 = vld [vmem:[#allocation62_spill] sm:$0xff]  ;;  %v15813_v34 = vld [vmem:[#allocation63_spill] sm:$0xff] }
 0x416   :  { %v1736_v41 = vadd.f32 1.0, %v11769_v59  ;;  %v15814_v59 = vld [vmem:[#allocation64_spill] sm:$0xff] }
 0x417   :  { %11770 = vrcp.f32 %v1726_v62  ;;  %v15815_v62 = vld [vmem:[#allocation68_spill] sm:$0xff] }
 0x418   :  { %11772 = vrcp.f32 %v1736_v41  ;;  %v15816_v41 = vld [vmem:[#allocation69_spill] sm:$0xff] }
 0x421   :  { %v11771_v6 = vpop.eup %11770 }
 0x422   :  { %v11773_v21 = vpop.eup %11772  ;;  %v1742_v48 = vmul.f32 %v11771_v6, %v1740_v51  ;;  %v15817_v51 = vld [vmem:[#allocation70_spill] sm:$0xff]  ;;  %v15818_v6 = vld [vmem:[#allocation71_spill] sm:$0xff] }
 0x423   :  { %v1749_v50 = vmul.f32 %v11773_v21, %v1747_v2  ;;  %v1745_v58 = vsub.f32 1.0, %v11773_v21  ;;  %v15819_v2 = vld [vmem:[#allocation72_spill] sm:$0xff]  ;;  %v2567_v21 = vld [vmem:[#allocation7 + $0x8] sm:$0xff] }
 0x424   :  { %v1743_v22 = vadd.f32 %v1742_v48, %v12716_v30 }
 0x426   :  { %11774 = vtanh.f32 %v1743_v22 }
 0x430   :  { %v11775_v36 = vpop.eup %11774 }
 0x431   :  { %v1746_v4 = vmul.f32 %v11775_v36, %v1745_v58 }
 0x433   :  { %v13129_v12 = vadd.f32 %v1749_v50, %v1746_v4 }
 0x435   :  { %v1882_v44 = vrot.slane %v13129_v12, 2 }
 0x437   :  { %1951 = vmatmul.mubr.f32.vlgmr.msra.gmra.mrb[12].mxu0 %v1882_v44  ;;  %2022 = vmatmul.mubr.f32.vlgmr.msra.gmra.mrb[16].mxu1 %v1882_v44 }
 0x438   :  { %9624 = vmatpush1.bf16.msra.mxu0 %v12840_v13  ;;  %9655 = vmatpush3.bf16.msra.mxu1 %v12842_v18  ;;  %v15773_v13 = vld [vmem:[#allocation23_spill] sm:$0xff]  ;;  %v15774_v18 = vld [vmem:[#allocation24_spill] sm:$0xff] }
 0x439   :  { %9626 = vmatprep.subr.bf16.mxu0 %v12847_v0  ;;  %9656 = vmatprep.subr.bf16.mxu1 %v15675_v3  ;;  %v15775_v0 = vld [vmem:[#allocation25_spill] sm:$0xff] }
 0x43a   :  { %2160 = vmatprep.mubr.f32.mxu0 %v15680_v17  ;;  %8594 = vmatprep.mubr.msk.f32.mxu1 %vm12211_vm0, %v15680_v17 }
 0x43c   :  { %9628 = vmatpush1.bf16.msra.mxu0 %v12853_v54  ;;  %9658 = vmatpush3.bf16.msra.mxu1 %v12855_v45  ;;  %v15776_v54 = vld [vmem:[#allocation26_spill] sm:$0xff]  ;;  %v15777_v45 = vld [vmem:[#allocation27_spill] sm:$0xff] }
 0x43d   :  { %9630 = vmatprep.subr.bf16.mxu0 %v12859_v38  ;;  %9659 = vmatprep.subr.bf16.mxu1 %v15675_v3  ;;  %v15778_v38 = vld [vmem:[#allocation28_spill] sm:$0xff] }
 0x440   :  { %9632 = vmatpush1.bf16.msra.mxu0 %v12866_v60  ;;  %9661 = vmatpush3.bf16.msra.mxu1 %v12868_v47  ;;  %v15779_v60 = vld [vmem:[#allocation29_spill] sm:$0xff]  ;;  %v15780_v47 = vld [vmem:[#allocation30_spill] sm:$0xff] }
 0x441   :  { %9634 = vmatprep.subr.bf16.mxu0 %v12872_v56  ;;  %9662 = vmatprep.subr.bf16.mxu1 %v15675_v3  ;;  %v15781_v56 = vld [vmem:[#allocation31_spill] sm:$0xff] }
 0x444   :  { %9636 = vmatpush1.bf16.msra.mxu0 %v12876_v23  ;;  %9664 = vmatpush3.bf16.msra.mxu1 %v12878_v29  ;;  %v15782_v23 = vld [vmem:[#allocation32_spill] sm:$0xff]  ;;  %v15783_v29 = vld [vmem:[#allocation33_spill] sm:$0xff] }
 0x445   :  { %9638 = vmatprep.subr.bf16.mxu0 %v12882_v39  ;;  %9665 = vmatprep.subr.bf16.mxu1 %v15675_v3  ;;  %v15784_v39 = vld [vmem:[#allocation34_spill] sm:$0xff] }
 0x448   :  { %9640 = vmatpush1.bf16.msra.mxu0 %v12886_v35  ;;  %9667 = vmatpush3.bf16.msra.mxu1 %v12888_v40  ;;  %v15785_v35 = vld [vmem:[#allocation35_spill] sm:$0xff]  ;;  %v15786_v40 = vld [vmem:[#allocation36_spill] sm:$0xff] }
 0x449   :  { %9642 = vmatprep.subr.bf16.mxu0 %v12892_v53  ;;  %9668 = vmatprep.subr.bf16.mxu1 %v15675_v3  ;;  %v15787_v53 = vld [vmem:[#allocation37_spill] sm:$0xff] }
 0x44c   :  { %9644 = vmatpush1.bf16.msra.mxu0 %v12896_v15  ;;  %9670 = vmatpush3.bf16.msra.mxu1 %v12898_v16  ;;  %v15788_v15 = vld [vmem:[#allocation38_spill] sm:$0xff]  ;;  %v15789_v16 = vld [vmem:[#allocation39_spill] sm:$0xff] }
 0x44d   :  { %9646 = vmatprep.subr.bf16.mxu0 %v12902_v27  ;;  %9671 = vmatprep.subr.bf16.mxu1 %v15675_v3  ;;  %v15790_v27 = vld [vmem:[#allocation40_spill] sm:$0xff] }
 0x450   :  { %9648 = vmatpush1.bf16.msra.mxu0 %v12906_v43  ;;  %9673 = vmatpush3.bf16.msra.mxu1 %v12908_v24  ;;  %v15791_v43 = vld [vmem:[#allocation41_spill] sm:$0xff]  ;;  %v15792_v24 = vld [vmem:[#allocation42_spill] sm:$0xff] }
 0x451   :  { %9650 = vmatprep.subr.bf16.mxu0 %v12912_v37  ;;  %9674 = vmatprep.subr.bf16.mxu1 %v15675_v3  ;;  %v15793_v37 = vld [vmem:[#allocation43_spill] sm:$0xff] }
 0x454   :  { %9652 = vmatpush1.bf16.msra.mxu0 %v12916_v33  ;;  %9676 = vmatpush3.bf16.msra.mxu1 %v12918_v31  ;;  %v15794_v33 = vld [vmem:[#allocation44_spill] sm:$0xff]  ;;  %v15795_v31 = vld [vmem:[#allocation45_spill] sm:$0xff] }
 0x455   :  { %9678 = vmatprep.subr.bf16.mxu0 %v12926_v57  ;;  %9742 = vmatprep.subr.bf16.mxu1 %v12928_v11  ;;  %v15796_v57 = vld [vmem:[#allocation46_spill] sm:$0xff]  ;;  %v15797_v11 = vld [vmem:[#allocation47_spill] sm:$0xff] }
 0x457   :  { %2161 = vmatmul.mubr.f32.vlgmr.msra.gmra.mrb[14].mxu0 %v1882_v44  ;;  %8595 = vmatmul.mubr.f32.vlgmr.msra.gmra.mrb[18].mxu1 %v1882_v44 }
 0x458   :  { %9680 = vmatpush1.bf16.msra.mxu0 %v12930_v14  ;;  %9744 = vmatpush1.bf16.msra.mxu1 %v12933_v42  ;;  %v15798_v14 = vld [vmem:[#allocation48_spill] sm:$0xff]  ;;  %v15799_v42 = vld [vmem:[#allocation49_spill] sm:$0xff] }
 0x459   :  { %9682 = vmatprep.subr.bf16.mxu0 %v12938_v28  ;;  %9746 = vmatprep.subr.bf16.mxu1 %v12940_v63  ;;  %v15800_v28 = vld [vmem:[#allocation50_spill] sm:$0xff]  ;;  %v15801_v63 = vld [vmem:[#allocation51_spill] sm:$0xff] }
 0x45c   :  { %9684 = vmatpush1.bf16.msra.mxu0 %v12942_v1  ;;  %9748 = vmatpush1.bf16.msra.mxu1 %v12945_v19  ;;  %v15802_v1 = vld [vmem:[#allocation52_spill] sm:$0xff]  ;;  %v15803_v19 = vld [vmem:[#allocation53_spill] sm:$0xff] }
 0x45d   :  { %9686 = vmatprep.subr.bf16.mxu0 %v12950_v55  ;;  %9750 = vmatprep.subr.bf16.mxu1 %v12952_v49  ;;  %v15804_v55 = vld [vmem:[#allocation54_spill] sm:$0xff]  ;;  %v15805_v49 = vld [vmem:[#allocation55_spill] sm:$0xff] }
 0x460   :  { %9688 = vmatpush1.bf16.msra.mxu0 %v12954_v8  ;;  %9752 = vmatpush1.bf16.msra.mxu1 %v12957_v61  ;;  %v15806_v8 = vld [vmem:[#allocation56_spill] sm:$0xff]  ;;  %v15807_v61 = vld [vmem:[#allocation57_spill] sm:$0xff] }
 0x461   :  { %9690 = vmatprep.subr.bf16.mxu0 %v12962_v20  ;;  %9754 = vmatprep.subr.bf16.mxu1 %v12964_v25  ;;  %v15808_v20 = vld [vmem:[#allocation58_spill] sm:$0xff]  ;;  %v15809_v25 = vld [vmem:[#allocation59_spill] sm:$0xff] }
 0x464   :  { %9692 = vmatpush1.bf16.msra.mxu0 %v12966_v46  ;;  %9756 = vmatpush1.bf16.msra.mxu1 %v15772_v7  ;;  %v15810_v46 = vld [vmem:[#allocation60_spill] sm:$0xff] }
 0x465   :  { %9694 = vmatprep.subr.bf16.mxu0 %v15773_v13  ;;  %9758 = vmatprep.subr.bf16.mxu1 %v15774_v18 }
 0x468   :  { %9696 = vmatpush1.bf16.msra.mxu0 %v15775_v0  ;;  %9760 = vmatpush1.bf16.msra.mxu1 %v15776_v54 }
 0x469   :  { %9698 = vmatprep.subr.bf16.mxu0 %v15777_v45  ;;  %9762 = vmatprep.subr.bf16.mxu1 %v15778_v38 }
 0x46c   :  { %9700 = vmatpush1.bf16.msra.mxu0 %v15779_v60  ;;  %9764 = vmatpush1.bf16.msra.mxu1 %v15780_v47 }
 0x46d   :  { %9702 = vmatprep.subr.bf16.mxu0 %v15781_v56  ;;  %9766 = vmatprep.subr.bf16.mxu1 %v15782_v23 }
 0x470   :  { %9704 = vmatpush1.bf16.msra.mxu0 %v15783_v29  ;;  %9768 = vmatpush1.bf16.msra.mxu1 %v15784_v39 }
 0x471   :  { %9706 = vmatprep.subr.bf16.mxu0 %v15785_v35  ;;  %9770 = vmatprep.subr.bf16.mxu1 %v15786_v40 }
 0x474   :  { %9708 = vmatpush1.bf16.msra.mxu0 %v15787_v53  ;;  %9772 = vmatpush1.bf16.msra.mxu1 %v15788_v15 }
 0x475   :  { %9710 = vmatprep.subr.bf16.mxu0 %v15789_v16  ;;  %9774 = vmatprep.subr.bf16.mxu1 %v15790_v27 }
 0x478   :  { %9712 = vmatpush1.bf16.msra.mxu0 %v15791_v43  ;;  %9776 = vmatpush1.bf16.msra.mxu1 %v15792_v24 }
 0x479   :  { %9714 = vmatprep.subr.bf16.mxu0 %v15793_v37  ;;  %9778 = vmatprep.subr.bf16.mxu1 %v15794_v33 }
 0x47c   :  { %9716 = vmatpush1.bf16.msra.mxu0 %v15795_v31  ;;  %9780 = vmatpush1.bf16.msra.mxu1 %v15796_v57 }
 0x47d   :  { %9718 = vmatprep.subr.bf16.mxu0 %v15797_v11  ;;  %9782 = vmatprep.subr.bf16.mxu1 %v15798_v14 }
 0x480   :  { %9720 = vmatpush1.bf16.msra.mxu0 %v15799_v42  ;;  %9784 = vmatpush1.bf16.msra.mxu1 %v15800_v28 }
 0x481   :  { %9722 = vmatprep.subr.bf16.mxu0 %v15801_v63  ;;  %9786 = vmatprep.subr.bf16.mxu1 %v15802_v1 }
 0x484   :  { %9724 = vmatpush1.bf16.msra.mxu0 %v15803_v19  ;;  %9788 = vmatpush1.bf16.msra.mxu1 %v15804_v55  ;;  %v2265_v19 = vrot.slane %v13129_v12, 7 }
 0x485   :  { %9726 = vmatprep.subr.bf16.mxu0 %v15805_v49  ;;  %9790 = vmatprep.subr.bf16.mxu1 %v15806_v8 }
 0x488   :  { %9728 = vmatpush1.bf16.msra.mxu0 %v15807_v61  ;;  %9792 = vmatpush1.bf16.msra.mxu1 %v15808_v20 }
 0x489   :  { %9730 = vmatprep.subr.bf16.mxu0 %v15809_v25  ;;  %9794 = vmatprep.subr.bf16.mxu1 %v15810_v46  ;;  %v2566_v25 = vld [vmem:[#allocation7] sm:$0xff] }
 0x48c   :  { %9732 = vmatpush1.bf16.msra.mxu0 %v15811_v10  ;;  %9796 = vmatpush1.bf16.msra.mxu1 %v13089_v26  ;;  %v2570_v26 = vld [vmem:[#allocation7 + $0x20] sm:$0xff]  ;;  %v2569_v10 = vld [vmem:[#allocation7 + $0x18] sm:$0xff] }
 0x48d   :  { %9734 = vmatprep.subr.bf16.mxu0 %v15812_v9  ;;  %9798 = vmatprep.subr.bf16.mxu1 %v15813_v34  ;;  %v13230_v48 = vpack.c.bf16 %v2570_v26, %v2567_v21  ;;  %v2568_v9 = vld [vmem:[#allocation7 + $0x10] sm:$0xff]  ;;  %v2571_v34 = vld [vmem:[#allocation7 + $0x28] sm:$0xff] }
 0x48e   :  { %v13246_v12 = vpack.c.bf16 %v2571_v34, %v2568_v9  ;;  %v2575_v26 = vld [vmem:[#allocation7 + $0x48] sm:$0xff]  ;;  %v2609_v34 = vld [vmem:[#allocation7 + $0x158] sm:$0xff] }
 0x48f   :  { %v2607_v9 = vld [vmem:[#allocation7 + $0x148] sm:$0xff] }
 0x490   :  { %9736 = vmatpush1.bf16.msra.mxu0 %v15814_v59  ;;  %9800 = vmatpush1.bf16.msra.mxu1 %v15815_v62  ;;  %v2573_v59 = vld [vmem:[#allocation7 + $0x38] sm:$0xff]  ;;  %v2576_v62 = vld [vmem:[#allocation7 + $0x50] sm:$0xff] }
 0x491   :  { %9738 = vmatprep.subr.bf16.mxu0 %v15816_v41  ;;  %9802 = vmatprep.subr.bf16.mxu1 %v15817_v51  ;;  %v13244_v51 = vpack.c.bf16 %v2569_v10, %v2566_v25  ;;  %v13251_v21 = vpack.c.bf16 %v2576_v62, %v2573_v59  ;;  %v2604_v10 = vld [vmem:[#allocation7 + $0x130] sm:$0xff] }
 0x492   :  { %v2612_v59 = vld [vmem:[#allocation7 + $0x170] sm:$0xff] }
 0x494   :  { %9740 = vmatpush1.bf16.msra.mxu0 %v15818_v6  ;;  %9804 = vmatpush1.bf16.msra.mxu1 %v15819_v2  ;;  %v2572_v6 = vld [vmem:[#allocation7 + $0x30] sm:$0xff] }
 0x495   :  { %9837 = vmatprep.subr.bf16.mxu1 %v15675_v3  ;;  %9806 = vmatprep.subr.bf16.mxu0 %v13230_v48 }
 0x50a   :  { %v1952_v50 = vpop.f32.mrb[12].mxu0  ;;  %v2023_v22 = vpop.f32.mrb[16].mxu1 }
 0x50b   :  { %v8064_v58 = vmul.f32 -1.442695, %v1952_v50  ;;  %v1954_v36 = vpop.f32.mrb[13].mxu0  ;;  %v2025_v4 = vpop.f32.mrb[17].mxu1  ;;  %v2574_v50 = vld [vmem:[#allocation7 + $0x40] sm:$0xff] }
 0x50c   :  { %v8065_v44 = vmul.f32 -1.442695, %v1954_v36  ;;  %v2582_v36 = vld [vmem:[#allocation7 + $0x80] sm:$0xff] }
 0x50d   :  { %11776 = vpow2.f32 %v8064_v58  ;;  %v2579_v58 = vld [vmem:[#allocation7 + $0x68] sm:$0xff] }
 0x50e   :  { %11778 = vpow2.f32 %v8065_v44 }
 0x517   :  { %v11777_v7 = vpop.eup %11776 }
 0x518   :  { %v2031_v13 = vadd.f32 1.0, %v11777_v7  ;;  %v11779_v18 = vpop.eup %11778  ;;  %v2578_v7 = vld [vmem:[#allocation7 + $0x60] sm:$0xff] }
 0x519   :  { %v2037_v0 = vadd.f32 1.0, %v11779_v18  ;;  %v2581_v18 = vld [vmem:[#allocation7 + $0x78] sm:$0xff] }
 0x51a   :  { %11780 = vrcp.f32 %v2031_v13  ;;  %v13263_v13 = vpack.c.bf16 %v2582_v36, %v2579_v58  ;;  %v2610_v58 = vld [vmem:[#allocation7 + $0x160] sm:$0xff]  ;;  %v2613_v36 = vld [vmem:[#allocation7 + $0x178] sm:$0xff] }
 0x51b   :  { %11782 = vrcp.f32 %v2037_v0  ;;  %v2580_v0 = vld [vmem:[#allocation7 + $0x70] sm:$0xff] }
 0x524   :  { %v11781_v54 = vpop.eup %11780 }
 0x525   :  { %v2040_v45 = vmul.f32 %v11781_v54, %v2025_v4  ;;  %v11783_v53 = vpop.eup %11782  ;;  %v13257_v4 = vpack.c.bf16 %v2575_v26, %v2572_v6  ;;  %v2583_v54 = vld [vmem:[#allocation7 + $0x88] sm:$0xff]  ;;  %v13312_v6 = vpack.c.bf16 %v2607_v9, %v2604_v10  ;;  %v2608_v26 = vld [vmem:[#allocation7 + $0x150] sm:$0xff]  ;;  %v2808_v9 = vld [vmem:[#allocation9 + $0x98] sm:$0xff] }
 0x526   :  { %v2043_v27 = vsub.f32 1.0, %v11783_v53  ;;  %v2045_v37 = vmul.f32 %v11783_v53, %v13123_v32  ;;  %v2594_v53 = vld [vmem:[#allocation7 + $0xe0] sm:$0xff]  ;;  %v2810_v10 = vld [vmem:[#allocation9 + $0xa8] sm:$0xff] }
 0x527   :  { %v2041_v38 = vadd.f32 %v2040_v45, %v2023_v22  ;;  %v2577_v22 = vld [vmem:[#allocation7 + $0x58] sm:$0xff] }
 0x528   :  { %v13259_v44 = vpack.c.bf16 %v2577_v22, %v2574_v50  ;;  %v2585_v45 = vld [vmem:[#allocation7 + $0x98] sm:$0xff]  ;;  %v13316_v50 = vpack.c.bf16 %v2612_v59, %v2609_v34  ;;  %v2611_v22 = vld [vmem:[#allocation7 + $0x168] sm:$0xff] }
 0x529   :  { %11784 = vtanh.f32 %v2041_v38  ;;  %v2588_v38 = vld [vmem:[#allocation7 + $0xb0] sm:$0xff]  ;;  %v2812_v59 = vld [vmem:[#allocation9 + $0xb8] sm:$0xff] }
 0x52a   :  { %v2162_v60 = vpop.f32.mrb[14].mxu0  ;;  %v2233_v47 = vpop.f32.mrb[18].mxu1 }
 0x52b   :  { %v2238_v56 = vrot.slane %v2162_v60, 5  ;;  %v2164_v23 = vpop.f32.mrb[15].mxu0  ;;  %v8596_v29 = vpop.f32.mrb[19].mxu1  ;;  %v2258_v63 = vrot.slane %v2233_v47, 5  ;;  %v13270_v60 = vpack.c.bf16 %v2581_v18, %v2578_v7  ;;  %v13272_v47 = vpack.c.bf16 %v2583_v54, %v2580_v0  ;;  %v2790_v0 = vld [vmem:[#allocation9 + $0x8] sm:$0xff] }
 0x52c   :  { %v2248_v39 = vrot.slane %v2164_v23, 5  ;;  %v13276_v23 = vpack.c.bf16 %v2588_v38, %v2585_v45  ;;  %v2587_v29 = vld [vmem:[#allocation7 + $0xa8] sm:$0xff]  ;;  %v13320_v7 = vpack.c.bf16 %v2611_v22, %v2608_v26  ;;  %v13322_v18 = vpack.c.bf16 %v2613_v36, %v2610_v58  ;;  %v2792_v45 = vld [vmem:[#allocation9 + $0x18] sm:$0xff]  ;;  %v2805_v26 = vld [vmem:[#allocation9 + $0x80] sm:$0xff] }
 0x52d   :  { %v2240_v35 = vadd.f32 %v2238_v56, %v15723_v5  ;;  %v2584_v56 = vld [vmem:[#allocation7 + $0x90] sm:$0xff]  ;;  %v2794_v54 = vld [vmem:[#allocation9 + $0x28] sm:$0xff]  ;;  %v2809_v22 = vld [vmem:[#allocation9 + $0xa0] sm:$0xff]  ;;  %v13356_v58 = vpack.c.bf16 %v2812_v59, %v2808_v9 }
 0x52e   :  { %v2250_v40 = vadd.f32 %v2248_v39, %v12710_v52  ;;  %v2586_v39 = vld [vmem:[#allocation7 + $0xa0] sm:$0xff]  ;;  %v13330_v38 = vpack.c.bf16 %v2794_v54, %v2790_v0  ;;  %v13358_v36 = vpack.c.bf16 %v2809_v22, %v2805_v26  ;;  %v2807_v0 = vld [vmem:[#allocation9 + $0x90] sm:$0xff]  ;;  %v2828_v59 = vld [vmem:[#allocation9 + $0x138] sm:$0xff] }
 0x52f   :  { %v8066_v15 = vmul.f32 -1.442695, %v2240_v35  ;;  %v2589_v35 = vld [vmem:[#allocation7 + $0xb8] sm:$0xff]  ;;  %v2811_v54 = vld [vmem:[#allocation9 + $0xb0] sm:$0xff]  ;;  %v2821_v26 = vld [vmem:[#allocation9 + $0x100] sm:$0xff] }
 0x530   :  { %v8067_v16 = vmul.f32 -1.442695, %v2250_v40  ;;  %v2591_v40 = vld [vmem:[#allocation7 + $0xc8] sm:$0xff]  ;;  %v2825_v22 = vld [vmem:[#allocation9 + $0x120] sm:$0xff] }
 0x531   :  { %11786 = vpow2.f32 %v8066_v15  ;;  %v13280_v15 = vpack.c.bf16 %v2587_v29, %v2584_v56  ;;  %v2796_v56 = vld [vmem:[#allocation9 + $0x38] sm:$0xff]  ;;  %v2789_v29 = vld [vmem:[#allocation9] sm:$0xff] }
 0x532   :  { %11788 = vpow2.f32 %v8067_v16  ;;  %v13282_v16 = vpack.c.bf16 %v2589_v35, %v2586_v39  ;;  %v2793_v39 = vld [vmem:[#allocation9 + $0x20] sm:$0xff]  ;;  %v13332_v35 = vpack.c.bf16 %v2796_v56, %v2792_v45  ;;  %v13361_v45 = vpack.c.bf16 %v2811_v54, %v2807_v0  ;;  %v2814_v56 = vld [vmem:[#allocation9 + $0xc8] sm:$0xff] }
 0x533   :  { %v11785_v43 = vpop.eup %11784  ;;  %v13382_v54 = vpack.c.bf16 %v2825_v22, %v2821_v26  ;;  %v2831_v26 = vld [vmem:[#allocation9 + $0x150] sm:$0xff] }
 0x534   :  { %v2044_v24 = vmul.f32 %v11785_v43, %v2043_v27  ;;  %v2590_v27 = vld [vmem:[#allocation7 + $0xc0] sm:$0xff]  ;;  %v13286_v43 = vpack.c.bf16 %v2594_v53, %v2591_v40  ;;  %v13334_v40 = vpack.c.bf16 %v2793_v39, %v2789_v29  ;;  %v2791_v53 = vld [vmem:[#allocation9 + $0x10] sm:$0xff]  ;;  %v2818_v29 = vld [vmem:[#allocation9 + $0xe8] sm:$0xff] }
 0x535   :  { %v2816_v39 = vld [vmem:[#allocation9 + $0xd8] sm:$0xff]  ;;  %15823 = vst [vmem:[#allocation25_spill] sm:$0xff] %v13382_v54  ;;  %v2835_v22 = vld [vmem:[#allocation9 + $0x170] sm:$0xff] }
 0x536   :  { %v13236_v33 = vadd.f32 %v2045_v37, %v2044_v24  ;;  %v2593_v24 = vld [vmem:[#allocation7 + $0xd8] sm:$0xff]  ;;  %v2592_v37 = vld [vmem:[#allocation7 + $0xd0] sm:$0xff] }
 0x538   :  { %2047 = vst [vmem:[#allocation2 + $0x2] sm:$0x1] %v13236_v33  ;;  %v2270_v31 = vrot.slane %v13236_v33, 5 }
 0x53a   :  { %v2401_v57 = vrot.slane %v2270_v31, 3  ;;  %v2595_v31 = vld [vmem:[#allocation7 + $0xe8] sm:$0xff] }
 0x53b   :  { %v11787_v11 = vpop.eup %11786 }
 0x53c   :  { %v11789_v14 = vpop.eup %11788  ;;  %v2244_v42 = vadd.f32 1.0, %v11787_v11  ;;  %2468 = vmatprep.mubr.f32.mxu0 %v2401_v57  ;;  %2539 = vmatprep.mubr.f32.mxu1 %v2401_v57  ;;  %v2597_v57 = vld [vmem:[#allocation7 + $0xf8] sm:$0xff]  ;;  %v2600_v11 = vld [vmem:[#allocation7 + $0x110] sm:$0xff] }
 0x53d   :  { %v2254_v28 = vadd.f32 1.0, %v11789_v14  ;;  %v13290_v14 = vpack.c.bf16 %v2593_v24, %v2590_v27  ;;  %v2795_v27 = vld [vmem:[#allocation9 + $0x30] sm:$0xff] }
 0x53e   :  { %11790 = vrcp.f32 %v2244_v42  ;;  %v13292_v42 = vpack.c.bf16 %v2595_v31, %v2592_v37  ;;  %v13337_v24 = vpack.c.bf16 %v2795_v27, %v2791_v53  ;;  %v2802_v37 = vld [vmem:[#allocation9 + $0x68] sm:$0xff]  ;;  %v2800_v31 = vld [vmem:[#allocation9 + $0x58] sm:$0xff]  ;;  %v13366_v53 = vpack.c.bf16 %v2818_v29, %v2814_v56  ;;  %v2823_v56 = vld [vmem:[#allocation9 + $0x110] sm:$0xff] }
 0x53f   :  { %11792 = vrcp.f32 %v2254_v28  ;;  %v2596_v28 = vld [vmem:[#allocation7 + $0xf0] sm:$0xff]  ;;  %v2820_v27 = vld [vmem:[#allocation9 + $0xf8] sm:$0xff] }
 0x540   :  { %v2827_v29 = vld [vmem:[#allocation9 + $0x130] sm:$0xff] }
 0x548   :  { %v11791_v1 = vpop.eup %11790 }
 0x549   :  { %v11793_v32 = vpop.eup %11792  ;;  %v2260_v55 = vmul.f32 %v11791_v1, %v2258_v63  ;;  %v13296_v63 = vpack.c.bf16 %v2600_v11, %v2597_v57  ;;  %v2599_v1 = vld [vmem:[#allocation7 + $0x108] sm:$0xff]  ;;  %v2804_v11 = vld [vmem:[#allocation9 + $0x78] sm:$0xff] }
 0x54a   :  { %v2267_v49 = vmul.f32 %v11793_v32, %v2265_v19  ;;  %v2263_v61 = vsub.f32 1.0, %v11793_v32  ;;  %v2598_v19 = vld [vmem:[#allocation7 + $0x100] sm:$0xff]  ;;  %v2601_v32 = vld [vmem:[#allocation7 + $0x118] sm:$0xff] }
 0x54b   :  { %v2261_v8 = vadd.f32 %v2260_v55, %v12716_v30  ;;  %v2603_v55 = vld [vmem:[#allocation7 + $0x128] sm:$0xff] }
 0x54d   :  { %11794 = vtanh.f32 %v2261_v8  ;;  %v13300_v8 = vpack.c.bf16 %v2599_v1, %v2596_v28  ;;  %v2797_v28 = vld [vmem:[#allocation9 + $0x40] sm:$0xff] }
 0x54e   :  { %v2801_v1 = vld [vmem:[#allocation9 + $0x60] sm:$0xff] }
 0x557   :  { %v11795_v20 = vpop.eup %11794 }
 0x558   :  { %v2264_v46 = vmul.f32 %v11795_v20, %v2263_v61  ;;  %v13302_v61 = vpack.c.bf16 %v2601_v32, %v2598_v19  ;;  %v2602_v20 = vld [vmem:[#allocation7 + $0x120] sm:$0xff]  ;;  %v13344_v19 = vpack.c.bf16 %v2804_v11, %v2800_v31  ;;  %v13346_v32 = vpack.c.bf16 %v2801_v1, %v2797_v28  ;;  %v2815_v28 = vld [vmem:[#allocation9 + $0xd0] sm:$0xff] }
 0x559   :  { %v13368_v31 = vpack.c.bf16 %v2820_v27, %v2816_v39  ;;  %v2819_v1 = vld [vmem:[#allocation9 + $0xf0] sm:$0xff]  ;;  %v13385_v39 = vpack.c.bf16 %v2827_v29, %v2823_v56  ;;  %v2830_v27 = vld [vmem:[#allocation9 + $0x148] sm:$0xff]  ;;  %v13397_v56 = vpack.c.bf16 %v2835_v22, %v2831_v26 }
 0x55a   :  { %v13242_v41 = vadd.f32 %v2267_v49, %v2264_v46  ;;  %v2606_v49 = vld [vmem:[#allocation7 + $0x140] sm:$0xff]  ;;  %v2605_v46 = vld [vmem:[#allocation7 + $0x138] sm:$0xff]  ;;  %v2838_v29 = vld [vmem:[#allocation9 + $0x188] sm:$0xff] }
 0x55b   :  { %v13306_v25 = vpack.c.bf16 %v2606_v49, %v2603_v55  ;;  %v13310_v62 = vpack.c.bf16 %v2605_v46, %v2602_v20  ;;  %v2799_v55 = vld [vmem:[#allocation9 + $0x50] sm:$0xff]  ;;  %v2806_v46 = vld [vmem:[#allocation9 + $0x88] sm:$0xff]  ;;  %15824 = vst [vmem:[#allocation26_spill] sm:$0xff] %v13385_v39  ;;  %15828 = vst [vmem:[#allocation30_spill] sm:$0xff] %v13397_v56 }
 0x55c   :  { %v13249_v2 = vrot.slane %v13242_v41, 3  ;;  %v2803_v49 = vld [vmem:[#allocation9 + $0x70] sm:$0xff]  ;;  %v13354_v34 = vpack.c.bf16 %v2810_v10, %v2806_v46  ;;  %v2826_v46 = vld [vmem:[#allocation9 + $0x128] sm:$0xff]  ;;  %v2824_v10 = vld [vmem:[#allocation9 + $0x118] sm:$0xff] }
 0x55d   :  { %v13349_v20 = vpack.c.bf16 %v2803_v49, %v2799_v55  ;;  %v13373_v55 = vpack.c.bf16 %v2819_v1, %v2815_v28  ;;  %v2822_v49 = vld [vmem:[#allocation9 + $0x108] sm:$0xff]  ;;  %v13380_v0 = vpack.c.bf16 %v2828_v59, %v2824_v10  ;;  %v2836_v1 = vld [vmem:[#allocation9 + $0x178] sm:$0xff]  ;;  %v2839_v26 = vld [vmem:[#allocation9 + $0x190] sm:$0xff] }
 0x55e   :  { %2469 = vmatmul.mubr.f32.vlgmr.msra.gmra.mrb[16].mxu0 %v13249_v2  ;;  %2540 = vmatmul.mubr.f32.vlgmr.msra.gmra.mrb[20].mxu1 %v13249_v2  ;;  %v13378_v9 = vpack.c.bf16 %v2826_v46, %v2822_v49  ;;  %v2829_v49 = vld [vmem:[#allocation9 + $0x140] sm:$0xff]  ;;  %v2843_v22 = vld [vmem:[#allocation9 + $0x1b0] sm:$0xff] }
 0x55f   :  { %9808 = vmatpush1.bf16.msra.mxu0 %v13244_v51  ;;  %9839 = vmatpush3.bf16.msra.mxu1 %v13246_v12  ;;  %15820 = vst [vmem:[#allocation22_spill] sm:$0xff] %v13373_v55  ;;  %15822 = vst [vmem:[#allocation24_spill] sm:$0xff] %v13380_v0  ;;  %v2833_v46 = vld [vmem:[#allocation9 + $0x160] sm:$0xff] }
 0x560   :  { %9810 = vmatprep.subr.bf16.mxu0 %v13251_v21  ;;  %9840 = vmatprep.subr.bf16.mxu1 %v15675_v3  ;;  %15821 = vst [vmem:[#allocation23_spill] sm:$0xff] %v13378_v9  ;;  %v13394_v59 = vpack.c.bf16 %v2833_v46, %v2829_v49  ;;  %v2841_v49 = vld [vmem:[#allocation9 + $0x1a0] sm:$0xff] }
 0x561   :  { %2678 = vmatprep.mubr.f32.mxu0 %v15680_v17  ;;  %8629 = vmatprep.mubr.msk.f32.mxu1 %vm12211_vm0, %v15680_v17 }
 0x562   :  { %15827 = vst [vmem:[#allocation29_spill] sm:$0xff] %v13394_v59 }
 0x563   :  { %9812 = vmatpush1.bf16.msra.mxu0 %v13257_v4  ;;  %9842 = vmatpush3.bf16.msra.mxu1 %v13259_v44 }
 0x564   :  { %9814 = vmatprep.subr.bf16.mxu0 %v13263_v13  ;;  %9843 = vmatprep.subr.bf16.mxu1 %v15675_v3 }
 0x567   :  { %9816 = vmatpush1.bf16.msra.mxu0 %v13270_v60  ;;  %9845 = vmatpush3.bf16.msra.mxu1 %v13272_v47 }
 0x568   :  { %9818 = vmatprep.subr.bf16.mxu0 %v13276_v23  ;;  %9846 = vmatprep.subr.bf16.mxu1 %v15675_v3 }
 0x56b   :  { %9820 = vmatpush1.bf16.msra.mxu0 %v13280_v15  ;;  %9848 = vmatpush3.bf16.msra.mxu1 %v13282_v16 }
 0x56c   :  { %9822 = vmatprep.subr.bf16.mxu0 %v13286_v43  ;;  %9849 = vmatprep.subr.bf16.mxu1 %v15675_v3 }
 0x56f   :  { %9824 = vmatpush1.bf16.msra.mxu0 %v13290_v14  ;;  %9851 = vmatpush3.bf16.msra.mxu1 %v13292_v42 }
 0x570   :  { %9826 = vmatprep.subr.bf16.mxu0 %v13296_v63  ;;  %9852 = vmatprep.subr.bf16.mxu1 %v15675_v3 }
 0x573   :  { %9828 = vmatpush1.bf16.msra.mxu0 %v13300_v8  ;;  %9854 = vmatpush3.bf16.msra.mxu1 %v13302_v61 }
 0x574   :  { %9830 = vmatprep.subr.bf16.mxu0 %v13306_v25  ;;  %9855 = vmatprep.subr.bf16.mxu1 %v15675_v3 }
 0x577   :  { %9832 = vmatpush1.bf16.msra.mxu0 %v13310_v62  ;;  %9857 = vmatpush3.bf16.msra.mxu1 %v13312_v6 }
 0x578   :  { %9834 = vmatprep.subr.bf16.mxu0 %v13316_v50  ;;  %9858 = vmatprep.subr.bf16.mxu1 %v15675_v3 }
 0x57b   :  { %9836 = vmatpush1.bf16.msra.mxu0 %v13320_v7  ;;  %9860 = vmatpush3.bf16.msra.mxu1 %v13322_v18 }
 0x57c   :  { %9862 = vmatprep.subr.bf16.mxu0 %v13330_v38  ;;  %9926 = vmatprep.subr.bf16.mxu1 %v13332_v35 }
 0x57e   :  { %2679 = vmatmul.mubr.f32.vlgmr.msra.gmra.mrb[18].mxu0 %v13249_v2  ;;  %8630 = vmatmul.mubr.f32.vlgmr.msra.gmra.mrb[22].mxu1 %v13249_v2  ;;  %v2798_v2 = vld [vmem:[#allocation9 + $0x48] sm:$0xff] }
 0x57f   :  { %9864 = vmatpush1.bf16.msra.mxu0 %v13334_v40  ;;  %9928 = vmatpush1.bf16.msra.mxu1 %v13337_v24  ;;  %v13342_v57 = vpack.c.bf16 %v2802_v37, %v2798_v2  ;;  %v2813_v2 = vld [vmem:[#allocation9 + $0xc0] sm:$0xff] }
 0x580   :  { %9930 = vmatprep.subr.bf16.mxu1 %v13344_v19  ;;  %v2817_v37 = vld [vmem:[#allocation9 + $0xe0] sm:$0xff] }
 0x581   :  { %9866 = vmatprep.subr.bf16.mxu0 %v13342_v57  ;;  %v13370_v11 = vpack.c.bf16 %v2817_v37, %v2813_v2  ;;  %v2834_v2 = vld [vmem:[#allocation9 + $0x168] sm:$0xff]  ;;  %v2832_v37 = vld [vmem:[#allocation9 + $0x158] sm:$0xff] }
 0x582   :  { %v13390_v28 = vpack.c.bf16 %v2834_v2, %v2830_v27  ;;  %v13392_v10 = vpack.c.bf16 %v2836_v1, %v2832_v37  ;;  %v2842_v27 = vld [vmem:[#allocation9 + $0x1a8] sm:$0xff]  ;;  %v2840_v2 = vld [vmem:[#allocation9 + $0x198] sm:$0xff]  ;;  %v2837_v1 = vld [vmem:[#allocation9 + $0x180] sm:$0xff] }
 0x583   :  { %9868 = vmatpush1.bf16.msra.mxu0 %v13346_v32  ;;  %9932 = vmatpush1.bf16.msra.mxu1 %v13349_v20  ;;  %v2844_v37 = vld [vmem:[#allocation9 + $0x1b8] sm:$0xff] }
 0x584   :  { %9870 = vmatprep.subr.bf16.mxu0 %v13354_v34  ;;  %9934 = vmatprep.subr.bf16.mxu1 %v13356_v58  ;;  %15825 = vst [vmem:[#allocation27_spill] sm:$0xff] %v13390_v28  ;;  %15826 = vst [vmem:[#allocation28_spill] sm:$0xff] %v13392_v10  ;;  %v13404_v46 = vpack.c.bf16 %v2844_v37, %v2840_v2  ;;  %v2852_v2 = vld [vmem:[#allocation9 + $0x1f8] sm:$0xff]  ;;  %v2845_v37 = vld [vmem:[#allocation9 + $0x1c0] sm:$0xff] }
 0x586   :  { %15830 = vst [vmem:[#allocation32_spill] sm:$0xff] %v13404_v46 }
 0x587   :  { %9872 = vmatpush1.bf16.msra.mxu0 %v13358_v36  ;;  %9936 = vmatpush1.bf16.msra.mxu1 %v13361_v45 }
 0x588   :  { %9874 = vmatprep.subr.bf16.mxu0 %v13366_v53  ;;  %9938 = vmatprep.subr.bf16.mxu1 %v13368_v31 }
 0x58b   :  { %9876 = vmatpush1.bf16.msra.mxu0 %v13370_v11  ;;  %9940 = vmatpush1.bf16.msra.mxu1 %v13373_v55 }
 0x58c   :  { %9878 = vmatprep.subr.bf16.mxu0 %v13378_v9  ;;  %9942 = vmatprep.subr.bf16.mxu1 %v13380_v0  ;;  %v2896_v0 = vld [vmem:[#allocation9 + $0x358] sm:$0xff] }
 0x58f   :  { %9880 = vmatpush1.bf16.msra.mxu0 %v13382_v54  ;;  %9944 = vmatpush1.bf16.msra.mxu1 %v13385_v39  ;;  %v13402_v39 = vpack.c.bf16 %v2842_v27, %v2838_v29  ;;  %v13406_v54 = vpack.c.bf16 %v2841_v49, %v2837_v1  ;;  %v2850_v29 = vld [vmem:[#allocation9 + $0x1e8] sm:$0xff]  ;;  %v2848_v27 = vld [vmem:[#allocation9 + $0x1d8] sm:$0xff]  ;;  %v2849_v1 = vld [vmem:[#allocation9 + $0x1e0] sm:$0xff] }
 0x590   :  { %9882 = vmatprep.subr.bf16.mxu0 %v13390_v28  ;;  %9946 = vmatprep.subr.bf16.mxu1 %v13392_v10  ;;  %v13409_v10 = vpack.c.bf16 %v2843_v22, %v2839_v26  ;;  %v13416_v49 = vpack.c.bf16 %v2852_v2, %v2848_v27  ;;  %v13418_v28 = vpack.c.bf16 %v2849_v1, %v2845_v37  ;;  %v2847_v26 = vld [vmem:[#allocation9 + $0x1d0] sm:$0xff]  ;;  %v2860_v27 = vld [vmem:[#allocation9 + $0x238] sm:$0xff]  ;;  %v2853_v2 = vld [vmem:[#allocation9 + $0x200] sm:$0xff] }
 0x591   :  { %15829 = vst [vmem:[#allocation31_spill] sm:$0xff] %v13402_v39  ;;  %15831 = vst [vmem:[#allocation33_spill] sm:$0xff] %v13406_v54  ;;  %v2851_v22 = vld [vmem:[#allocation9 + $0x1f0] sm:$0xff]  ;;  %v2857_v37 = vld [vmem:[#allocation9 + $0x220] sm:$0xff] }
 0x592   :  { %15832 = vst [vmem:[#allocation34_spill] sm:$0xff] %v13409_v10  ;;  %15834 = vst [vmem:[#allocation36_spill] sm:$0xff] %v13416_v49 }
 0x593   :  { %9884 = vmatpush1.bf16.msra.mxu0 %v13394_v59  ;;  %9948 = vmatpush1.bf16.msra.mxu1 %v13397_v56  ;;  %v2846_v56 = vld [vmem:[#allocation9 + $0x1c8] sm:$0xff]  ;;  %15835 = vst [vmem:[#allocation37_spill] sm:$0xff] %v13418_v28 }
 0x594   :  { %9886 = vmatprep.subr.bf16.mxu0 %v13402_v39  ;;  %9950 = vmatprep.subr.bf16.mxu1 %v13404_v46  ;;  %v13414_v59 = vpack.c.bf16 %v2850_v29, %v2846_v56  ;;  %v13421_v46 = vpack.c.bf16 %v2851_v22, %v2847_v26  ;;  %v2858_v56 = vld [vmem:[#allocation9 + $0x228] sm:$0xff]  ;;  %v2856_v29 = vld [vmem:[#allocation9 + $0x218] sm:$0xff]  ;;  %v13430_v39 = vpack.c.bf16 %v2857_v37, %v2853_v2  ;;  %v2855_v26 = vld [vmem:[#allocation9 + $0x210] sm:$0xff] }
 0x595   :  { %v13428_v1 = vpack.c.bf16 %v2860_v27, %v2856_v29  ;;  %v2859_v22 = vld [vmem:[#allocation9 + $0x230] sm:$0xff]  ;;  %v2868_v29 = vld [vmem:[#allocation9 + $0x278] sm:$0xff]  ;;  %v2861_v27 = vld [vmem:[#allocation9 + $0x240] sm:$0xff] }
 0x596   :  { %15833 = vst [vmem:[#allocation35_spill] sm:$0xff] %v13414_v59  ;;  %15836 = vst [vmem:[#allocation38_spill] sm:$0xff] %v13421_v46  ;;  %v2865_v2 = vld [vmem:[#allocation9 + $0x260] sm:$0xff] }
 0x597   :  { %9888 = vmatpush1.bf16.msra.mxu0 %v13406_v54  ;;  %9952 = vmatpush1.bf16.msra.mxu1 %v13409_v10  ;;  %v2854_v10 = vld [vmem:[#allocation9 + $0x208] sm:$0xff]  ;;  %15838 = vst [vmem:[#allocation40_spill] sm:$0xff] %v13428_v1  ;;  %15839 = vst [vmem:[#allocation41_spill] sm:$0xff] %v13430_v39 }
 0x598   :  { %9890 = vmatprep.subr.bf16.mxu0 %v13414_v59  ;;  %9954 = vmatprep.subr.bf16.mxu1 %v13416_v49  ;;  %v13426_v54 = vpack.c.bf16 %v2858_v56, %v2854_v10  ;;  %v13433_v49 = vpack.c.bf16 %v2859_v22, %v2855_v26  ;;  %v2866_v10 = vld [vmem:[#allocation9 + $0x268] sm:$0xff]  ;;  %v2864_v56 = vld [vmem:[#allocation9 + $0x258] sm:$0xff]  ;;  %v13442_v59 = vpack.c.bf16 %v2865_v2, %v2861_v27  ;;  %v2863_v26 = vld [vmem:[#allocation9 + $0x250] sm:$0xff] }
 0x599   :  { %v13440_v37 = vpack.c.bf16 %v2868_v29, %v2864_v56  ;;  %v2867_v22 = vld [vmem:[#allocation9 + $0x270] sm:$0xff]  ;;  %v2876_v56 = vld [vmem:[#allocation9 + $0x2b8] sm:$0xff]  ;;  %v2869_v29 = vld [vmem:[#allocation9 + $0x280] sm:$0xff] }
 0x59a   :  { %15837 = vst [vmem:[#allocation39_spill] sm:$0xff] %v13426_v54  ;;  %15840 = vst [vmem:[#allocation42_spill] sm:$0xff] %v13433_v49  ;;  %v2873_v27 = vld [vmem:[#allocation9 + $0x2a0] sm:$0xff] }
 0x59b   :  { %9892 = vmatpush1.bf16.msra.mxu0 %v13418_v28  ;;  %9956 = vmatpush1.bf16.msra.mxu1 %v13421_v46  ;;  %v2862_v46 = vld [vmem:[#allocation9 + $0x248] sm:$0xff]  ;;  %15842 = vst [vmem:[#allocation44_spill] sm:$0xff] %v13440_v37  ;;  %15843 = vst [vmem:[#allocation45_spill] sm:$0xff] %v13442_v59 }
 0x59c   :  { %9894 = vmatprep.subr.bf16.mxu0 %v13426_v54  ;;  %9958 = vmatprep.subr.bf16.mxu1 %v13428_v1  ;;  %v13438_v28 = vpack.c.bf16 %v2866_v10, %v2862_v46  ;;  %v13445_v1 = vpack.c.bf16 %v2867_v22, %v2863_v26  ;;  %v2874_v46 = vld [vmem:[#allocation9 + $0x2a8] sm:$0xff]  ;;  %v2872_v10 = vld [vmem:[#allocation9 + $0x298] sm:$0xff]  ;;  %v13454_v54 = vpack.c.bf16 %v2873_v27, %v2869_v29  ;;  %v2871_v26 = vld [vmem:[#allocation9 + $0x290] sm:$0xff] }
 0x59d   :  { %v13452_v2 = vpack.c.bf16 %v2876_v56, %v2872_v10  ;;  %v2875_v22 = vld [vmem:[#allocation9 + $0x2b0] sm:$0xff]  ;;  %v2884_v10 = vld [vmem:[#allocation9 + $0x2f8] sm:$0xff]  ;;  %v2877_v56 = vld [vmem:[#allocation9 + $0x2c0] sm:$0xff] }
 0x59e   :  { %15841 = vst [vmem:[#allocation43_spill] sm:$0xff] %v13438_v28  ;;  %15844 = vst [vmem:[#allocation46_spill] sm:$0xff] %v13445_v1  ;;  %v2881_v29 = vld [vmem:[#allocation9 + $0x2e0] sm:$0xff] }
 0x59f   :  { %9896 = vmatpush1.bf16.msra.mxu0 %v13430_v39  ;;  %9960 = vmatpush1.bf16.msra.mxu1 %v13433_v49  ;;  %v2870_v49 = vld [vmem:[#allocation9 + $0x288] sm:$0xff]  ;;  %15846 = vst [vmem:[#allocation48_spill] sm:$0xff] %v13452_v2  ;;  %15847 = vst [vmem:[#allocation49_spill] sm:$0xff] %v13454_v54 }
 0x5a0   :  { %9898 = vmatprep.subr.bf16.mxu0 %v13438_v28  ;;  %9962 = vmatprep.subr.bf16.mxu1 %v13440_v37  ;;  %v13450_v39 = vpack.c.bf16 %v2874_v46, %v2870_v49  ;;  %v13457_v37 = vpack.c.bf16 %v2875_v22, %v2871_v26  ;;  %v2882_v49 = vld [vmem:[#allocation9 + $0x2e8] sm:$0xff]  ;;  %v2880_v46 = vld [vmem:[#allocation9 + $0x2d8] sm:$0xff]  ;;  %v13466_v28 = vpack.c.bf16 %v2881_v29, %v2877_v56  ;;  %v2879_v26 = vld [vmem:[#allocation9 + $0x2d0] sm:$0xff] }
 0x5a1   :  { %v13464_v27 = vpack.c.bf16 %v2884_v10, %v2880_v46  ;;  %v2883_v22 = vld [vmem:[#allocation9 + $0x2f0] sm:$0xff]  ;;  %v2892_v46 = vld [vmem:[#allocation9 + $0x338] sm:$0xff]  ;;  %v2885_v10 = vld [vmem:[#allocation9 + $0x300] sm:$0xff] }
 0x5a2   :  { %15845 = vst [vmem:[#allocation47_spill] sm:$0xff] %v13450_v39  ;;  %15848 = vst [vmem:[#allocation50_spill] sm:$0xff] %v13457_v37  ;;  %v2889_v56 = vld [vmem:[#allocation9 + $0x320] sm:$0xff] }
 0x5a3   :  { %9900 = vmatpush1.bf16.msra.mxu0 %v13442_v59  ;;  %9964 = vmatpush1.bf16.msra.mxu1 %v13445_v1  ;;  %v2878_v1 = vld [vmem:[#allocation9 + $0x2c8] sm:$0xff]  ;;  %15850 = vst [vmem:[#allocation52_spill] sm:$0xff] %v13464_v27  ;;  %15851 = vst [vmem:[#allocation53_spill] sm:$0xff] %v13466_v28 }
 0x5a4   :  { %9902 = vmatprep.subr.bf16.mxu0 %v13450_v39  ;;  %9966 = vmatprep.subr.bf16.mxu1 %v13452_v2  ;;  %v13462_v59 = vpack.c.bf16 %v2882_v49, %v2878_v1  ;;  %v13469_v2 = vpack.c.bf16 %v2883_v22, %v2879_v26  ;;  %v2890_v1 = vld [vmem:[#allocation9 + $0x328] sm:$0xff]  ;;  %v2888_v49 = vld [vmem:[#allocation9 + $0x318] sm:$0xff]  ;;  %v13478_v39 = vpack.c.bf16 %v2889_v56, %v2885_v10  ;;  %v2887_v26 = vld [vmem:[#allocation9 + $0x310] sm:$0xff] }
 0x5a5   :  { %v13476_v29 = vpack.c.bf16 %v2892_v46, %v2888_v49  ;;  %v2891_v22 = vld [vmem:[#allocation9 + $0x330] sm:$0xff]  ;;  %v2893_v49 = vld [vmem:[#allocation9 + $0x340] sm:$0xff] }
 0x5a6   :  { %15849 = vst [vmem:[#allocation51_spill] sm:$0xff] %v13462_v59  ;;  %15852 = vst [vmem:[#allocation54_spill] sm:$0xff] %v13469_v2  ;;  %v2897_v46 = vld [vmem:[#allocation9 + $0x360] sm:$0xff] }
 0x5a7   :  { %9904 = vmatpush1.bf16.msra.mxu0 %v13454_v54  ;;  %9968 = vmatpush1.bf16.msra.mxu1 %v13457_v37  ;;  %v2886_v37 = vld [vmem:[#allocation9 + $0x308] sm:$0xff]  ;;  %15854 = vst [vmem:[#allocation56_spill] sm:$0xff] %v13476_v29  ;;  %15855 = vst [vmem:[#allocation57_spill] sm:$0xff] %v13478_v39  ;;  %v13490_v56 = vpack.c.bf16 %v2897_v46, %v2893_v49  ;;  %v2903_v49 = vld [vmem:[#allocation9 + $0x390] sm:$0xff] }
 0x5a8   :  { %9906 = vmatprep.subr.bf16.mxu0 %v13462_v59  ;;  %9970 = vmatprep.subr.bf16.mxu1 %v13464_v27  ;;  %v13474_v54 = vpack.c.bf16 %v2890_v1, %v2886_v37  ;;  %v13481_v27 = vpack.c.bf16 %v2891_v22, %v2887_v26  ;;  %v2898_v59 = vld [vmem:[#allocation9 + $0x368] sm:$0xff]  ;;  %v2900_v1 = vld [vmem:[#allocation9 + $0x378] sm:$0xff]  ;;  %v2895_v26 = vld [vmem:[#allocation9 + $0x350] sm:$0xff] }
 0x5a9   :  { %v13488_v10 = vpack.c.bf16 %v2900_v1, %v2896_v0  ;;  %15859 = vst [vmem:[#allocation61_spill] sm:$0xff] %v13490_v56  ;;  %v2899_v22 = vld [vmem:[#allocation9 + $0x370] sm:$0xff]  ;;  %v2901_v0 = vld [vmem:[#allocation9 + $0x380] sm:$0xff] }
 0x5aa   :  { %15853 = vst [vmem:[#allocation55_spill] sm:$0xff] %v13474_v54  ;;  %15856 = vst [vmem:[#allocation58_spill] sm:$0xff] %v13481_v27  ;;  %v2905_v1 = vld [vmem:[#allocation9 + $0x3a0] sm:$0xff] }
 0x5ab   :  { %9908 = vmatpush1.bf16.msra.mxu0 %v13466_v28  ;;  %9972 = vmatpush1.bf16.msra.mxu1 %v13469_v2  ;;  %v2894_v28 = vld [vmem:[#allocation9 + $0x348] sm:$0xff]  ;;  %15858 = vst [vmem:[#allocation60_spill] sm:$0xff] %v13488_v10  ;;  %v13493_v2 = vpack.c.bf16 %v2899_v22, %v2895_v26  ;;  %v13501_v46 = vpack.c.bf16 %v2905_v1, %v2901_v0  ;;  %v2913_v0 = vld [vmem:[#allocation9 + $0x3e0] sm:$0xff]  ;;  %v2911_v1 = vld [vmem:[#allocation9 + $0x3d0] sm:$0xff] }
 0x5ac   :  { %9910 = vmatprep.subr.bf16.mxu0 %v13474_v54  ;;  %9974 = vmatprep.subr.bf16.mxu1 %v13476_v29  ;;  %v13485_v37 = vpack.c.bf16 %v2898_v59, %v2894_v28  ;;  %v2902_v54 = vld [vmem:[#allocation9 + $0x388] sm:$0xff]  ;;  %v2908_v28 = vld [vmem:[#allocation9 + $0x3b8] sm:$0xff] }
 0x5ad   :  { %v2906_v29 = vld [vmem:[#allocation9 + $0x3a8] sm:$0xff]  ;;  %15862 = vst [vmem:[#allocation64_spill] sm:$0xff] %v13501_v46 }
 0x5ae   :  { %15857 = vst [vmem:[#allocation59_spill] sm:$0xff] %v13485_v37  ;;  %v13496_v59 = vpack.c.bf16 %v2906_v29, %v2902_v54  ;;  %v2914_v26 = vld [vmem:[#allocation9 + $0x3e8] sm:$0xff]  ;;  %v2916_v29 = vld [vmem:[#allocation9 + $0x3f8] sm:$0xff] }
 0x5af   :  { %9912 = vmatpush1.bf16.msra.mxu0 %v13478_v39  ;;  %9976 = vmatpush1.bf16.msra.mxu1 %v13481_v27  ;;  %v2904_v39 = vld [vmem:[#allocation9 + $0x398] sm:$0xff]  ;;  %v2907_v27 = vld [vmem:[#allocation9 + $0x3b0] sm:$0xff] }
 0x5b0   :  { %9914 = vmatprep.subr.bf16.mxu0 %v13485_v37  ;;  %9978 = vmatprep.subr.bf16.mxu1 %v13488_v10  ;;  %15860 = vst [vmem:[#allocation62_spill] sm:$0xff] %v13496_v59  ;;  %v13498_v9 = vpack.c.bf16 %v2908_v28, %v2904_v39  ;;  %v2910_v37 = vld [vmem:[#allocation9 + $0x3c8] sm:$0xff]  ;;  %v13505_v22 = vpack.c.bf16 %v2907_v27, %v2903_v49  ;;  %v2912_v39 = vld [vmem:[#allocation9 + $0x3d8] sm:$0xff]  ;;  %v2909_v28 = vld [vmem:[#allocation9 + $0x3c0] sm:$0xff] }
 0x5b1   :  { %v13507_v54 = vpack.c.bf16 %v2914_v26, %v2910_v37  ;;  %v13510_v10 = vpack.c.bf16 %v2916_v29, %v2912_v39  ;;  %v13513_v55 = vpack.c.bf16 %v2913_v0, %v2909_v28 }
 0x5b2   :  { %15861 = vst [vmem:[#allocation63_spill] sm:$0xff] %v13498_v9  ;;  %15863 = vst [vmem:[#allocation68_spill] sm:$0xff] %v13505_v22 }
 0x5b3   :  { %9916 = vmatpush1.bf16.msra.mxu0 %v13490_v56  ;;  %9980 = vmatpush1.bf16.msra.mxu1 %v13493_v2  ;;  %15864 = vst [vmem:[#allocation69_spill] sm:$0xff] %v13507_v54  ;;  %15865 = vst [vmem:[#allocation70_spill] sm:$0xff] %v13510_v10  ;;  %v2915_v56 = vld [vmem:[#allocation9 + $0x3f0] sm:$0xff] }
 0x5b4   :  { %9918 = vmatprep.subr.bf16.mxu0 %v13496_v59  ;;  %9982 = vmatprep.subr.bf16.mxu1 %v13498_v9  ;;  %15866 = vst [vmem:[#allocation71_spill] sm:$0xff] %v13513_v55  ;;  %v13517_v27 = vpack.c.bf16 %v2915_v56, %v2911_v1 }
 0x5b6   :  { %15867 = vst [vmem:[#allocation72_spill] sm:$0xff] %v13517_v27 }
 0x5b7   :  { %9920 = vmatpush1.bf16.msra.mxu0 %v13501_v46  ;;  %9984 = vmatpush1.bf16.msra.mxu1 %v13505_v22 }
 0x5b8   :  { %9922 = vmatprep.subr.bf16.mxu0 %v13507_v54  ;;  %9986 = vmatprep.subr.bf16.mxu1 %v13510_v10 }
 0x5bb   :  { %9924 = vmatpush1.bf16.msra.mxu0 %v13513_v55  ;;  %9988 = vmatpush1.bf16.msra.mxu1 %v13517_v27 }
 0x5bc   :  { %9990 = vmatprep.subr.bf16.mxu0 %v13230_v48  ;;  %10021 = vmatprep.subr.bf16.mxu1 %v15675_v3 }
 0x631   :  { %v2470_v37 = vpop.f32.mrb[16].mxu0  ;;  %v2541_v49 = vpop.f32.mrb[20].mxu1 }
 0x632   :  { %v8068_v26 = vmul.f32 -1.442695, %v2470_v37  ;;  %v2472_v39 = vpop.f32.mrb[17].mxu0  ;;  %v2543_v29 = vpop.f32.mrb[21].mxu1 }
 0x633   :  { %v8069_v28 = vmul.f32 -1.442695, %v2472_v39 }
 0x634   :  { %11796 = vpow2.f32 %v8068_v26 }
 0x635   :  { %11798 = vpow2.f32 %v8069_v28 }
 0x63e   :  { %v11797_v56 = vpop.eup %11796 }
 0x63f   :  { %v2549_v0 = vadd.f32 1.0, %v11797_v56  ;;  %v11799_v1 = vpop.eup %11798 }
 0x640   :  { %v2555_v10 = vadd.f32 1.0, %v11799_v1 }
 0x641   :  { %11800 = vrcp.f32 %v2549_v0 }
 0x642   :  { %11802 = vrcp.f32 %v2555_v10 }
 0x64b   :  { %v11801_v55 = vpop.eup %11800 }
 0x64c   :  { %v2558_v27 = vmul.f32 %v11801_v55, %v2543_v29  ;;  %v11803_v28 = vpop.eup %11802 }
 0x64d   :  { %v2561_v1 = vsub.f32 1.0, %v11803_v28 }
 0x64e   :  { %v2559_v54 = vadd.f32 %v2558_v27, %v2541_v49 }
 0x650   :  { %11804 = vtanh.f32 %v2559_v54  ;;  %v2563_v54 = vmul.f32 %v11803_v28, %v13236_v33 }
 0x651   :  { %v2680_v48 = vpop.f32.mrb[18].mxu0  ;;  %v2751_v22 = vpop.f32.mrb[22].mxu1 }
 0x652   :  { %v2756_v46 = vrot.slane %v2680_v48, 4  ;;  %v2682_v9 = vpop.f32.mrb[19].mxu0  ;;  %v8631_v37 = vpop.f32.mrb[23].mxu1 }
 0x653   :  { %v2766_v59 = vrot.slane %v2682_v9, 4  ;;  %v2776_v37 = vrot.slane %v2751_v22, 4  ;;  %v15907_v22 = vld [vmem:[#allocation61_spill] sm:$0xff] }
 0x654   :  { %v2758_v26 = vadd.f32 %v2756_v46, %v15723_v5 }
 0x655   :  { %v2768_v39 = vadd.f32 %v2766_v59, %v12710_v52 }
 0x656   :  { %v8070_v56 = vmul.f32 -1.442695, %v2758_v26 }
 0x657   :  { %v8071_v0 = vmul.f32 -1.442695, %v2768_v39  ;;  %v2783_v39 = vrot.slane %v13242_v41, 7  ;;  %v15868_v41 = vld [vmem:[#allocation22_spill] sm:$0xff] }
 0x658   :  { %11806 = vpow2.f32 %v8070_v56 }
 0x659   :  { %11808 = vpow2.f32 %v8071_v0 }
 0x65a   :  { %v11805_v10 = vpop.eup %11804 }
 0x65b   :  { %v2562_v55 = vmul.f32 %v11805_v10, %v2561_v1 }
 0x65d   :  { %v13527_v27 = vadd.f32 %v2563_v54, %v2562_v55 }
 0x65f   :  { %2565 = vst [vmem:[#allocation2 + $0x3] sm:$0x1] %v13527_v27  ;;  %v2788_v9 = vrot.slane %v13527_v27, 4 }
 0x661   :  { %v2919_v49 = vrot.slane %v2788_v9, 4 }
 0x662   :  { %v11807_v46 = vpop.eup %11806 }
 0x663   :  { %v11809_v29 = vpop.eup %11808  ;;  %v2762_v59 = vadd.f32 1.0, %v11807_v46  ;;  %2986 = vmatprep.mubr.f32.mxu0 %v2919_v49  ;;  %3057 = vmatprep.mubr.f32.mxu1 %v2919_v49  ;;  %v15908_v49 = vld [vmem:[#allocation62_spill] sm:$0xff]  ;;  %v15909_v46 = vld [vmem:[#allocation63_spill] sm:$0xff] }
 0x664   :  { %v2772_v48 = vadd.f32 1.0, %v11809_v29  ;;  %v15910_v29 = vld [vmem:[#allocation64_spill] sm:$0xff] }
 0x665   :  { %11810 = vrcp.f32 %v2762_v59  ;;  %v15911_v59 = vld [vmem:[#allocation68_spill] sm:$0xff] }
 0x666   :  { %11812 = vrcp.f32 %v2772_v48  ;;  %v15912_v48 = vld [vmem:[#allocation69_spill] sm:$0xff] }
 0x66f   :  { %v11811_v26 = vpop.eup %11810 }
 0x670   :  { %v11813_v33 = vpop.eup %11812  ;;  %v2778_v28 = vmul.f32 %v11811_v26, %v2776_v37  ;;  %v15913_v37 = vld [vmem:[#allocation70_spill] sm:$0xff]  ;;  %v15914_v26 = vld [vmem:[#allocation71_spill] sm:$0xff] }
 0x671   :  { %v2785_v56 = vmul.f32 %v11813_v33, %v2783_v39  ;;  %v2781_v1 = vsub.f32 1.0, %v11813_v33  ;;  %v15915_v39 = vld [vmem:[#allocation72_spill] sm:$0xff]  ;;  %v3603_v33 = vld [vmem:[#allocation7 + $0x8] sm:$0xff] }
 0x672   :  { %v2779_v0 = vadd.f32 %v2778_v28, %v12716_v30 }
 0x674   :  { %11814 = vtanh.f32 %v2779_v0 }
 0x67e   :  { %v11815_v10 = vpop.eup %11814 }
 0x67f   :  { %v2782_v55 = vmul.f32 %v11815_v10, %v2781_v1 }
 0x681   :  { %v13533_v54 = vadd.f32 %v2785_v56, %v2782_v55 }
 0x683   :  { %v2918_v9 = vrot.slane %v13533_v54, 4 }
 0x685   :  { %2987 = vmatmul.mubr.f32.vlgmr.msra.gmra.mrb[20].mxu0 %v2918_v9  ;;  %3058 = vmatmul.mubr.f32.vlgmr.msra.gmra.mrb[24].mxu1 %v2918_v9 }
 0x686   :  { %9992 = vmatpush1.bf16.msra.mxu0 %v13244_v51  ;;  %10023 = vmatpush3.bf16.msra.mxu1 %v13246_v12  ;;  %v15869_v51 = vld [vmem:[#allocation23_spill] sm:$0xff]  ;;  %v15870_v12 = vld [vmem:[#allocation24_spill] sm:$0xff] }
 0x687   :  { %9994 = vmatprep.subr.bf16.mxu0 %v13251_v21  ;;  %10024 = vmatprep.subr.bf16.mxu1 %v15675_v3  ;;  %v15871_v21 = vld [vmem:[#allocation25_spill] sm:$0xff] }
 0x688   :  { %3196 = vmatprep.mubr.f32.mxu0 %v15680_v17  ;;  %8664 = vmatprep.mubr.msk.f32.mxu1 %vm12211_vm0, %v15680_v17 }
 0x68a   :  { %9996 = vmatpush1.bf16.msra.mxu0 %v13257_v4  ;;  %10026 = vmatpush3.bf16.msra.mxu1 %v13259_v44  ;;  %v15872_v4 = vld [vmem:[#allocation26_spill] sm:$0xff]  ;;  %v15873_v44 = vld [vmem:[#allocation27_spill] sm:$0xff] }
 0x68b   :  { %9998 = vmatprep.subr.bf16.mxu0 %v13263_v13  ;;  %10027 = vmatprep.subr.bf16.mxu1 %v15675_v3  ;;  %v15874_v13 = vld [vmem:[#allocation28_spill] sm:$0xff] }
 0x68e   :  { %10000 = vmatpush1.bf16.msra.mxu0 %v13270_v60  ;;  %10029 = vmatpush3.bf16.msra.mxu1 %v13272_v47  ;;  %v15875_v60 = vld [vmem:[#allocation29_spill] sm:$0xff]  ;;  %v15876_v47 = vld [vmem:[#allocation30_spill] sm:$0xff] }
 0x68f   :  { %10002 = vmatprep.subr.bf16.mxu0 %v13276_v23  ;;  %10030 = vmatprep.subr.bf16.mxu1 %v15675_v3  ;;  %v15877_v23 = vld [vmem:[#allocation31_spill] sm:$0xff] }
 0x692   :  { %10004 = vmatpush1.bf16.msra.mxu0 %v13280_v15  ;;  %10032 = vmatpush3.bf16.msra.mxu1 %v13282_v16  ;;  %v15878_v15 = vld [vmem:[#allocation32_spill] sm:$0xff]  ;;  %v15879_v16 = vld [vmem:[#allocation33_spill] sm:$0xff] }
 0x693   :  { %10006 = vmatprep.subr.bf16.mxu0 %v13286_v43  ;;  %10033 = vmatprep.subr.bf16.mxu1 %v15675_v3  ;;  %v15880_v43 = vld [vmem:[#allocation34_spill] sm:$0xff] }
 0x696   :  { %10008 = vmatpush1.bf16.msra.mxu0 %v13290_v14  ;;  %10035 = vmatpush3.bf16.msra.mxu1 %v13292_v42  ;;  %v15881_v14 = vld [vmem:[#allocation35_spill] sm:$0xff]  ;;  %v15882_v42 = vld [vmem:[#allocation36_spill] sm:$0xff] }
 0x697   :  { %10010 = vmatprep.subr.bf16.mxu0 %v13296_v63  ;;  %10036 = vmatprep.subr.bf16.mxu1 %v15675_v3  ;;  %v15883_v63 = vld [vmem:[#allocation37_spill] sm:$0xff] }
 0x69a   :  { %10012 = vmatpush1.bf16.msra.mxu0 %v13300_v8  ;;  %10038 = vmatpush3.bf16.msra.mxu1 %v13302_v61  ;;  %v15884_v8 = vld [vmem:[#allocation38_spill] sm:$0xff]  ;;  %v15885_v61 = vld [vmem:[#allocation39_spill] sm:$0xff] }
 0x69b   :  { %10014 = vmatprep.subr.bf16.mxu0 %v13306_v25  ;;  %10039 = vmatprep.subr.bf16.mxu1 %v15675_v3  ;;  %v15886_v25 = vld [vmem:[#allocation40_spill] sm:$0xff] }
 0x69e   :  { %10016 = vmatpush1.bf16.msra.mxu0 %v13310_v62  ;;  %10041 = vmatpush3.bf16.msra.mxu1 %v13312_v6  ;;  %v15887_v62 = vld [vmem:[#allocation41_spill] sm:$0xff]  ;;  %v15888_v6 = vld [vmem:[#allocation42_spill] sm:$0xff] }
 0x69f   :  { %10018 = vmatprep.subr.bf16.mxu0 %v13316_v50  ;;  %10042 = vmatprep.subr.bf16.mxu1 %v15675_v3  ;;  %v15889_v50 = vld [vmem:[#allocation43_spill] sm:$0xff] }
 0x6a2   :  { %10020 = vmatpush1.bf16.msra.mxu0 %v13320_v7  ;;  %10044 = vmatpush3.bf16.msra.mxu1 %v13322_v18  ;;  %v15890_v7 = vld [vmem:[#allocation44_spill] sm:$0xff]  ;;  %v15891_v18 = vld [vmem:[#allocation45_spill] sm:$0xff] }
 0x6a3   :  { %10046 = vmatprep.subr.bf16.mxu0 %v13330_v38  ;;  %10110 = vmatprep.subr.bf16.mxu1 %v13332_v35  ;;  %v15892_v38 = vld [vmem:[#allocation46_spill] sm:$0xff]  ;;  %v15893_v35 = vld [vmem:[#allocation47_spill] sm:$0xff] }
 0x6a5   :  { %3197 = vmatmul.mubr.f32.vlgmr.msra.gmra.mrb[22].mxu0 %v2918_v9  ;;  %8665 = vmatmul.mubr.f32.vlgmr.msra.gmra.mrb[26].mxu1 %v2918_v9 }
 0x6a6   :  { %10048 = vmatpush1.bf16.msra.mxu0 %v13334_v40  ;;  %10112 = vmatpush1.bf16.msra.mxu1 %v13337_v24  ;;  %v15894_v40 = vld [vmem:[#allocation48_spill] sm:$0xff]  ;;  %v15895_v24 = vld [vmem:[#allocation49_spill] sm:$0xff] }
 0x6a7   :  { %10050 = vmatprep.subr.bf16.mxu0 %v13342_v57  ;;  %10114 = vmatprep.subr.bf16.mxu1 %v13344_v19  ;;  %v15896_v57 = vld [vmem:[#allocation50_spill] sm:$0xff]  ;;  %v15897_v19 = vld [vmem:[#allocation51_spill] sm:$0xff] }
 0x6aa   :  { %10052 = vmatpush1.bf16.msra.mxu0 %v13346_v32  ;;  %10116 = vmatpush1.bf16.msra.mxu1 %v13349_v20  ;;  %v15898_v32 = vld [vmem:[#allocation52_spill] sm:$0xff]  ;;  %v15899_v20 = vld [vmem:[#allocation53_spill] sm:$0xff] }
 0x6ab   :  { %10054 = vmatprep.subr.bf16.mxu0 %v13354_v34  ;;  %10118 = vmatprep.subr.bf16.mxu1 %v13356_v58  ;;  %v15900_v34 = vld [vmem:[#allocation54_spill] sm:$0xff]  ;;  %v15901_v58 = vld [vmem:[#allocation55_spill] sm:$0xff] }
 0x6ae   :  { %10056 = vmatpush1.bf16.msra.mxu0 %v13358_v36  ;;  %10120 = vmatpush1.bf16.msra.mxu1 %v13361_v45  ;;  %v15902_v36 = vld [vmem:[#allocation56_spill] sm:$0xff]  ;;  %v15903_v45 = vld [vmem:[#allocation57_spill] sm:$0xff] }
 0x6af   :  { %10058 = vmatprep.subr.bf16.mxu0 %v13366_v53  ;;  %10122 = vmatprep.subr.bf16.mxu1 %v13368_v31  ;;  %v15904_v53 = vld [vmem:[#allocation58_spill] sm:$0xff]  ;;  %v15905_v31 = vld [vmem:[#allocation59_spill] sm:$0xff] }
 0x6b2   :  { %10060 = vmatpush1.bf16.msra.mxu0 %v13370_v11  ;;  %10124 = vmatpush1.bf16.msra.mxu1 %v15868_v41  ;;  %v15906_v11 = vld [vmem:[#allocation60_spill] sm:$0xff] }
 0x6b3   :  { %10062 = vmatprep.subr.bf16.mxu0 %v15869_v51  ;;  %10126 = vmatprep.subr.bf16.mxu1 %v15870_v12 }
 0x6b6   :  { %10064 = vmatpush1.bf16.msra.mxu0 %v15871_v21  ;;  %10128 = vmatpush1.bf16.msra.mxu1 %v15872_v4 }
 0x6b7   :  { %10066 = vmatprep.subr.bf16.mxu0 %v15873_v44  ;;  %10130 = vmatprep.subr.bf16.mxu1 %v15874_v13 }
 0x6ba   :  { %10068 = vmatpush1.bf16.msra.mxu0 %v15875_v60  ;;  %10132 = vmatpush1.bf16.msra.mxu1 %v15876_v47 }
 0x6bb   :  { %10070 = vmatprep.subr.bf16.mxu0 %v15877_v23  ;;  %10134 = vmatprep.subr.bf16.mxu1 %v15878_v15 }
 0x6be   :  { %10072 = vmatpush1.bf16.msra.mxu0 %v15879_v16  ;;  %10136 = vmatpush1.bf16.msra.mxu1 %v15880_v43 }
 0x6bf   :  { %10074 = vmatprep.subr.bf16.mxu0 %v15881_v14  ;;  %10138 = vmatprep.subr.bf16.mxu1 %v15882_v42 }
 0x6c2   :  { %10076 = vmatpush1.bf16.msra.mxu0 %v15883_v63  ;;  %10140 = vmatpush1.bf16.msra.mxu1 %v15884_v8 }
 0x6c3   :  { %10078 = vmatprep.subr.bf16.mxu0 %v15885_v61  ;;  %10142 = vmatprep.subr.bf16.mxu1 %v15886_v25 }
 0x6c6   :  { %10080 = vmatpush1.bf16.msra.mxu0 %v15887_v62  ;;  %10144 = vmatpush1.bf16.msra.mxu1 %v15888_v6 }
 0x6c7   :  { %10082 = vmatprep.subr.bf16.mxu0 %v15889_v50  ;;  %10146 = vmatprep.subr.bf16.mxu1 %v15890_v7 }
 0x6ca   :  { %10084 = vmatpush1.bf16.msra.mxu0 %v15891_v18  ;;  %10148 = vmatpush1.bf16.msra.mxu1 %v15892_v38 }
 0x6cb   :  { %10086 = vmatprep.subr.bf16.mxu0 %v15893_v35  ;;  %10150 = vmatprep.subr.bf16.mxu1 %v15894_v40 }
 0x6ce   :  { %10088 = vmatpush1.bf16.msra.mxu0 %v15895_v24  ;;  %10152 = vmatpush1.bf16.msra.mxu1 %v15896_v57 }
 0x6cf   :  { %10090 = vmatprep.subr.bf16.mxu0 %v15897_v19  ;;  %10154 = vmatprep.subr.bf16.mxu1 %v15898_v32 }
 0x6d2   :  { %10092 = vmatpush1.bf16.msra.mxu0 %v15899_v20  ;;  %10156 = vmatpush1.bf16.msra.mxu1 %v15900_v34  ;;  %v3301_v20 = vrot.slane %v13533_v54, 7 }
 0x6d3   :  { %10094 = vmatprep.subr.bf16.mxu0 %v15901_v58  ;;  %10158 = vmatprep.subr.bf16.mxu1 %v15902_v36 }
 0x6d6   :  { %10096 = vmatpush1.bf16.msra.mxu0 %v15903_v45  ;;  %10160 = vmatpush1.bf16.msra.mxu1 %v15904_v53 }
 0x6d7   :  { %10098 = vmatprep.subr.bf16.mxu0 %v15905_v31  ;;  %10162 = vmatprep.subr.bf16.mxu1 %v15906_v11  ;;  %v3602_v31 = vld [vmem:[#allocation7] sm:$0xff] }
 0x6da   :  { %10100 = vmatpush1.bf16.msra.mxu0 %v15907_v22  ;;  %10164 = vmatpush1.bf16.msra.mxu1 %v13493_v2  ;;  %v3606_v2 = vld [vmem:[#allocation7 + $0x20] sm:$0xff]  ;;  %v3605_v22 = vld [vmem:[#allocation7 + $0x18] sm:$0xff] }
 0x6db   :  { %10102 = vmatprep.subr.bf16.mxu0 %v15908_v49  ;;  %10166 = vmatprep.subr.bf16.mxu1 %v15909_v46  ;;  %v13634_v28 = vpack.c.bf16 %v3606_v2, %v3603_v33  ;;  %v3604_v49 = vld [vmem:[#allocation7 + $0x10] sm:$0xff]  ;;  %v3607_v46 = vld [vmem:[#allocation7 + $0x28] sm:$0xff] }
 0x6dc   :  { %v13650_v54 = vpack.c.bf16 %v3607_v46, %v3604_v49  ;;  %v3611_v2 = vld [vmem:[#allocation7 + $0x48] sm:$0xff]  ;;  %v3645_v46 = vld [vmem:[#allocation7 + $0x158] sm:$0xff] }
 0x6dd   :  { %v3643_v49 = vld [vmem:[#allocation7 + $0x148] sm:$0xff] }
 0x6de   :  { %10104 = vmatpush1.bf16.msra.mxu0 %v15910_v29  ;;  %10168 = vmatpush1.bf16.msra.mxu1 %v15911_v59  ;;  %v3609_v29 = vld [vmem:[#allocation7 + $0x38] sm:$0xff]  ;;  %v3612_v59 = vld [vmem:[#allocation7 + $0x50] sm:$0xff] }
 0x6df   :  { %10106 = vmatprep.subr.bf16.mxu0 %v15912_v48  ;;  %10170 = vmatprep.subr.bf16.mxu1 %v15913_v37  ;;  %v13648_v37 = vpack.c.bf16 %v3605_v22, %v3602_v31  ;;  %v13655_v33 = vpack.c.bf16 %v3612_v59, %v3609_v29  ;;  %v3640_v22 = vld [vmem:[#allocation7 + $0x130] sm:$0xff] }
 0x6e0   :  { %v3648_v29 = vld [vmem:[#allocation7 + $0x170] sm:$0xff] }
 0x6e2   :  { %10108 = vmatpush1.bf16.msra.mxu0 %v15914_v26  ;;  %10172 = vmatpush1.bf16.msra.mxu1 %v15915_v39  ;;  %v3608_v26 = vld [vmem:[#allocation7 + $0x30] sm:$0xff] }
 0x6e3   :  { %10205 = vmatprep.subr.bf16.mxu1 %v15675_v3  ;;  %10174 = vmatprep.subr.bf16.mxu0 %v13634_v28 }
 0x758   :  { %v2988_v56 = vpop.f32.mrb[20].mxu0  ;;  %v3059_v0 = vpop.f32.mrb[24].mxu1 }
 0x759   :  { %v8072_v1 = vmul.f32 -1.442695, %v2988_v56  ;;  %v2990_v10 = vpop.f32.mrb[21].mxu0  ;;  %v3061_v55 = vpop.f32.mrb[25].mxu1  ;;  %v3610_v56 = vld [vmem:[#allocation7 + $0x40] sm:$0xff] }
 0x75a   :  { %v8073_v9 = vmul.f32 -1.442695, %v2990_v10  ;;  %v3618_v10 = vld [vmem:[#allocation7 + $0x80] sm:$0xff] }
 0x75b   :  { %11816 = vpow2.f32 %v8072_v1  ;;  %v3615_v1 = vld [vmem:[#allocation7 + $0x68] sm:$0xff] }
 0x75c   :  { %11818 = vpow2.f32 %v8073_v9 }
 0x765   :  { %v11817_v41 = vpop.eup %11816 }
 0x766   :  { %v3067_v51 = vadd.f32 1.0, %v11817_v41  ;;  %v11819_v12 = vpop.eup %11818  ;;  %v3614_v41 = vld [vmem:[#allocation7 + $0x60] sm:$0xff] }
 0x767   :  { %v3073_v21 = vadd.f32 1.0, %v11819_v12  ;;  %v3617_v12 = vld [vmem:[#allocation7 + $0x78] sm:$0xff] }
 0x768   :  { %11820 = vrcp.f32 %v3067_v51  ;;  %v13667_v51 = vpack.c.bf16 %v3618_v10, %v3615_v1  ;;  %v3646_v1 = vld [vmem:[#allocation7 + $0x160] sm:$0xff]  ;;  %v3649_v10 = vld [vmem:[#allocation7 + $0x178] sm:$0xff] }
 0x769   :  { %11822 = vrcp.f32 %v3073_v21  ;;  %v3616_v21 = vld [vmem:[#allocation7 + $0x70] sm:$0xff] }
 0x772   :  { %v11821_v4 = vpop.eup %11820 }
 0x773   :  { %v3076_v44 = vmul.f32 %v11821_v4, %v3061_v55  ;;  %v11823_v63 = vpop.eup %11822  ;;  %v13661_v55 = vpack.c.bf16 %v3611_v2, %v3608_v26  ;;  %v3619_v4 = vld [vmem:[#allocation7 + $0x88] sm:$0xff]  ;;  %v13716_v26 = vpack.c.bf16 %v3643_v49, %v3640_v22  ;;  %v3644_v2 = vld [vmem:[#allocation7 + $0x150] sm:$0xff]  ;;  %v3844_v49 = vld [vmem:[#allocation9 + $0x98] sm:$0xff] }
 0x774   :  { %v3079_v25 = vsub.f32 1.0, %v11823_v63  ;;  %v3081_v50 = vmul.f32 %v11823_v63, %v13527_v27  ;;  %v3630_v63 = vld [vmem:[#allocation7 + $0xe0] sm:$0xff]  ;;  %v3846_v22 = vld [vmem:[#allocation9 + $0xa8] sm:$0xff] }
 0x775   :  { %v3077_v13 = vadd.f32 %v3076_v44, %v3059_v0  ;;  %v3613_v0 = vld [vmem:[#allocation7 + $0x58] sm:$0xff] }
 0x776   :  { %v13663_v9 = vpack.c.bf16 %v3613_v0, %v3610_v56  ;;  %v3621_v44 = vld [vmem:[#allocation7 + $0x98] sm:$0xff]  ;;  %v13720_v56 = vpack.c.bf16 %v3648_v29, %v3645_v46  ;;  %v3647_v0 = vld [vmem:[#allocation7 + $0x168] sm:$0xff] }
 0x777   :  { %11824 = vtanh.f32 %v3077_v13  ;;  %v3624_v13 = vld [vmem:[#allocation7 + $0xb0] sm:$0xff]  ;;  %v3848_v29 = vld [vmem:[#allocation9 + $0xb8] sm:$0xff] }
 0x778   :  { %v3198_v60 = vpop.f32.mrb[22].mxu0  ;;  %v3269_v47 = vpop.f32.mrb[26].mxu1 }
 0x779   :  { %v3274_v23 = vrot.slane %v3198_v60, 3  ;;  %v3200_v15 = vpop.f32.mrb[23].mxu0  ;;  %v8666_v16 = vpop.f32.mrb[27].mxu1  ;;  %v3294_v19 = vrot.slane %v3269_v47, 3  ;;  %v13674_v60 = vpack.c.bf16 %v3617_v12, %v3614_v41  ;;  %v13676_v47 = vpack.c.bf16 %v3619_v4, %v3616_v21  ;;  %v3826_v21 = vld [vmem:[#allocation9 + $0x8] sm:$0xff] }
 0x77a   :  { %v3284_v43 = vrot.slane %v3200_v15, 3  ;;  %v13680_v15 = vpack.c.bf16 %v3624_v13, %v3621_v44  ;;  %v3623_v16 = vld [vmem:[#allocation7 + $0xa8] sm:$0xff]  ;;  %v13724_v41 = vpack.c.bf16 %v3647_v0, %v3644_v2  ;;  %v13726_v12 = vpack.c.bf16 %v3649_v10, %v3646_v1  ;;  %v3828_v44 = vld [vmem:[#allocation9 + $0x18] sm:$0xff]  ;;  %v3841_v2 = vld [vmem:[#allocation9 + $0x80] sm:$0xff] }
 0x77b   :  { %v3276_v14 = vadd.f32 %v3274_v23, %v15723_v5  ;;  %v3620_v23 = vld [vmem:[#allocation7 + $0x90] sm:$0xff]  ;;  %v3830_v4 = vld [vmem:[#allocation9 + $0x28] sm:$0xff]  ;;  %v3845_v0 = vld [vmem:[#allocation9 + $0xa0] sm:$0xff]  ;;  %v13760_v1 = vpack.c.bf16 %v3848_v29, %v3844_v49 }
 0x77c   :  { %v3286_v42 = vadd.f32 %v3284_v43, %v12710_v52  ;;  %v3622_v43 = vld [vmem:[#allocation7 + $0xa0] sm:$0xff]  ;;  %v13734_v13 = vpack.c.bf16 %v3830_v4, %v3826_v21  ;;  %v13762_v10 = vpack.c.bf16 %v3845_v0, %v3841_v2  ;;  %v3843_v21 = vld [vmem:[#allocation9 + $0x90] sm:$0xff]  ;;  %v3864_v29 = vld [vmem:[#allocation9 + $0x138] sm:$0xff] }
 0x77d   :  { %v8074_v8 = vmul.f32 -1.442695, %v3276_v14  ;;  %v3625_v14 = vld [vmem:[#allocation7 + $0xb8] sm:$0xff]  ;;  %v3847_v4 = vld [vmem:[#allocation9 + $0xb0] sm:$0xff]  ;;  %v3857_v2 = vld [vmem:[#allocation9 + $0x100] sm:$0xff] }
 0x77e   :  { %v8075_v61 = vmul.f32 -1.442695, %v3286_v42  ;;  %v3627_v42 = vld [vmem:[#allocation7 + $0xc8] sm:$0xff]  ;;  %v3861_v0 = vld [vmem:[#allocation9 + $0x120] sm:$0xff] }
 0x77f   :  { %11826 = vpow2.f32 %v8074_v8  ;;  %v13684_v8 = vpack.c.bf16 %v3623_v16, %v3620_v23  ;;  %v3832_v23 = vld [vmem:[#allocation9 + $0x38] sm:$0xff]  ;;  %v3825_v16 = vld [vmem:[#allocation9] sm:$0xff] }
 0x780   :  { %11828 = vpow2.f32 %v8075_v61  ;;  %v13686_v61 = vpack.c.bf16 %v3625_v14, %v3622_v43  ;;  %v3829_v43 = vld [vmem:[#allocation9 + $0x20] sm:$0xff]  ;;  %v13736_v14 = vpack.c.bf16 %v3832_v23, %v3828_v44  ;;  %v13765_v44 = vpack.c.bf16 %v3847_v4, %v3843_v21  ;;  %v3850_v23 = vld [vmem:[#allocation9 + $0xc8] sm:$0xff] }
 0x781   :  { %v11825_v62 = vpop.eup %11824  ;;  %v13786_v4 = vpack.c.bf16 %v3861_v0, %v3857_v2  ;;  %v3867_v2 = vld [vmem:[#allocation9 + $0x150] sm:$0xff] }
 0x782   :  { %v3080_v6 = vmul.f32 %v11825_v62, %v3079_v25  ;;  %v3626_v25 = vld [vmem:[#allocation7 + $0xc0] sm:$0xff]  ;;  %v13690_v62 = vpack.c.bf16 %v3630_v63, %v3627_v42  ;;  %v13738_v42 = vpack.c.bf16 %v3829_v43, %v3825_v16  ;;  %v3827_v63 = vld [vmem:[#allocation9 + $0x10] sm:$0xff]  ;;  %v3854_v16 = vld [vmem:[#allocation9 + $0xe8] sm:$0xff] }
 0x783   :  { %v3852_v43 = vld [vmem:[#allocation9 + $0xd8] sm:$0xff]  ;;  %15919 = vst [vmem:[#allocation25_spill] sm:$0xff] %v13786_v4  ;;  %v3871_v0 = vld [vmem:[#allocation9 + $0x170] sm:$0xff] }
 0x784   :  { %v13640_v7 = vadd.f32 %v3081_v50, %v3080_v6  ;;  %v3629_v6 = vld [vmem:[#allocation7 + $0xd8] sm:$0xff]  ;;  %v3628_v50 = vld [vmem:[#allocation7 + $0xd0] sm:$0xff] }
 0x786   :  { %3083 = vst [vmem:[#allocation2 + $0x4] sm:$0x1] %v13640_v7  ;;  %v3306_v18 = vrot.slane %v13640_v7, 3 }
 0x788   :  { %v3437_v38 = vrot.slane %v3306_v18, 5  ;;  %v3631_v18 = vld [vmem:[#allocation7 + $0xe8] sm:$0xff] }
 0x789   :  { %v11827_v35 = vpop.eup %11826 }
 0x78a   :  { %v11829_v40 = vpop.eup %11828  ;;  %v3280_v24 = vadd.f32 1.0, %v11827_v35  ;;  %3504 = vmatprep.mubr.f32.mxu0 %v3437_v38  ;;  %3575 = vmatprep.mubr.f32.mxu1 %v3437_v38  ;;  %v3633_v38 = vld [vmem:[#allocation7 + $0xf8] sm:$0xff]  ;;  %v3636_v35 = vld [vmem:[#allocation7 + $0x110] sm:$0xff] }
 0x78b   :  { %v3290_v57 = vadd.f32 1.0, %v11829_v40  ;;  %v13694_v40 = vpack.c.bf16 %v3629_v6, %v3626_v25  ;;  %v3831_v25 = vld [vmem:[#allocation9 + $0x30] sm:$0xff] }
 0x78c   :  { %11830 = vrcp.f32 %v3280_v24  ;;  %v13696_v24 = vpack.c.bf16 %v3631_v18, %v3628_v50  ;;  %v13741_v6 = vpack.c.bf16 %v3831_v25, %v3827_v63  ;;  %v3838_v50 = vld [vmem:[#allocation9 + $0x68] sm:$0xff]  ;;  %v3836_v18 = vld [vmem:[#allocation9 + $0x58] sm:$0xff]  ;;  %v13770_v63 = vpack.c.bf16 %v3854_v16, %v3850_v23  ;;  %v3859_v23 = vld [vmem:[#allocation9 + $0x110] sm:$0xff] }
 0x78d   :  { %11832 = vrcp.f32 %v3290_v57  ;;  %v3632_v57 = vld [vmem:[#allocation7 + $0xf0] sm:$0xff]  ;;  %v3856_v25 = vld [vmem:[#allocation9 + $0xf8] sm:$0xff] }
 0x78e   :  { %v3863_v16 = vld [vmem:[#allocation9 + $0x130] sm:$0xff] }
 0x796   :  { %v11831_v32 = vpop.eup %11830 }
 0x797   :  { %v11833_v27 = vpop.eup %11832  ;;  %v3296_v34 = vmul.f32 %v11831_v32, %v3294_v19  ;;  %v13700_v19 = vpack.c.bf16 %v3636_v35, %v3633_v38  ;;  %v3635_v32 = vld [vmem:[#allocation7 + $0x108] sm:$0xff]  ;;  %v3840_v35 = vld [vmem:[#allocation9 + $0x78] sm:$0xff] }
 0x798   :  { %v3303_v58 = vmul.f32 %v11833_v27, %v3301_v20  ;;  %v3299_v45 = vsub.f32 1.0, %v11833_v27  ;;  %v3634_v20 = vld [vmem:[#allocation7 + $0x100] sm:$0xff]  ;;  %v3637_v27 = vld [vmem:[#allocation7 + $0x118] sm:$0xff] }
 0x799   :  { %v3297_v36 = vadd.f32 %v3296_v34, %v12716_v30  ;;  %v3639_v34 = vld [vmem:[#allocation7 + $0x128] sm:$0xff] }
 0x79b   :  { %11834 = vtanh.f32 %v3297_v36  ;;  %v13704_v36 = vpack.c.bf16 %v3635_v32, %v3632_v57  ;;  %v3833_v57 = vld [vmem:[#allocation9 + $0x40] sm:$0xff] }
 0x79c   :  { %v3837_v32 = vld [vmem:[#allocation9 + $0x60] sm:$0xff] }
 0x7a5   :  { %v11835_v53 = vpop.eup %11834 }
 0x7a6   :  { %v3300_v11 = vmul.f32 %v11835_v53, %v3299_v45  ;;  %v13706_v45 = vpack.c.bf16 %v3637_v27, %v3634_v20  ;;  %v3638_v53 = vld [vmem:[#allocation7 + $0x120] sm:$0xff]  ;;  %v13748_v20 = vpack.c.bf16 %v3840_v35, %v3836_v18  ;;  %v13750_v27 = vpack.c.bf16 %v3837_v32, %v3833_v57  ;;  %v3851_v57 = vld [vmem:[#allocation9 + $0xd0] sm:$0xff] }
 0x7a7   :  { %v13772_v18 = vpack.c.bf16 %v3856_v25, %v3852_v43  ;;  %v3855_v32 = vld [vmem:[#allocation9 + $0xf0] sm:$0xff]  ;;  %v13789_v43 = vpack.c.bf16 %v3863_v16, %v3859_v23  ;;  %v3866_v25 = vld [vmem:[#allocation9 + $0x148] sm:$0xff]  ;;  %v13801_v23 = vpack.c.bf16 %v3871_v0, %v3867_v2 }
 0x7a8   :  { %v13646_v48 = vadd.f32 %v3303_v58, %v3300_v11  ;;  %v3642_v58 = vld [vmem:[#allocation7 + $0x140] sm:$0xff]  ;;  %v3641_v11 = vld [vmem:[#allocation7 + $0x138] sm:$0xff]  ;;  %v3874_v16 = vld [vmem:[#allocation9 + $0x188] sm:$0xff] }
 0x7a9   :  { %v13710_v31 = vpack.c.bf16 %v3642_v58, %v3639_v34  ;;  %v13714_v59 = vpack.c.bf16 %v3641_v11, %v3638_v53  ;;  %v3835_v34 = vld [vmem:[#allocation9 + $0x50] sm:$0xff]  ;;  %v3842_v11 = vld [vmem:[#allocation9 + $0x88] sm:$0xff]  ;;  %15920 = vst [vmem:[#allocation26_spill] sm:$0xff] %v13789_v43  ;;  %15924 = vst [vmem:[#allocation30_spill] sm:$0xff] %v13801_v23 }
 0x7aa   :  { %v13653_v39 = vrot.slane %v13646_v48, 5  ;;  %v3839_v58 = vld [vmem:[#allocation9 + $0x70] sm:$0xff]  ;;  %v13758_v46 = vpack.c.bf16 %v3846_v22, %v3842_v11  ;;  %v3862_v11 = vld [vmem:[#allocation9 + $0x128] sm:$0xff]  ;;  %v3860_v22 = vld [vmem:[#allocation9 + $0x118] sm:$0xff] }
 0x7ab   :  { %v13753_v53 = vpack.c.bf16 %v3839_v58, %v3835_v34  ;;  %v13777_v34 = vpack.c.bf16 %v3855_v32, %v3851_v57  ;;  %v3858_v58 = vld [vmem:[#allocation9 + $0x108] sm:$0xff]  ;;  %v13784_v21 = vpack.c.bf16 %v3864_v29, %v3860_v22  ;;  %v3872_v32 = vld [vmem:[#allocation9 + $0x178] sm:$0xff]  ;;  %v3875_v2 = vld [vmem:[#allocation9 + $0x190] sm:$0xff] }
 0x7ac   :  { %3505 = vmatmul.mubr.f32.vlgmr.msra.gmra.mrb[24].mxu0 %v13653_v39  ;;  %3576 = vmatmul.mubr.f32.vlgmr.msra.gmra.mrb[28].mxu1 %v13653_v39  ;;  %v13782_v49 = vpack.c.bf16 %v3862_v11, %v3858_v58  ;;  %v3865_v58 = vld [vmem:[#allocation9 + $0x140] sm:$0xff]  ;;  %v3879_v0 = vld [vmem:[#allocation9 + $0x1b0] sm:$0xff] }
 0x7ad   :  { %10176 = vmatpush1.bf16.msra.mxu0 %v13648_v37  ;;  %10207 = vmatpush3.bf16.msra.mxu1 %v13650_v54  ;;  %15916 = vst [vmem:[#allocation22_spill] sm:$0xff] %v13777_v34  ;;  %15918 = vst [vmem:[#allocation24_spill] sm:$0xff] %v13784_v21  ;;  %v3869_v11 = vld [vmem:[#allocation9 + $0x160] sm:$0xff] }
 0x7ae   :  { %10178 = vmatprep.subr.bf16.mxu0 %v13655_v33  ;;  %10208 = vmatprep.subr.bf16.mxu1 %v15675_v3  ;;  %15917 = vst [vmem:[#allocation23_spill] sm:$0xff] %v13782_v49  ;;  %v13798_v29 = vpack.c.bf16 %v3869_v11, %v3865_v58  ;;  %v3877_v58 = vld [vmem:[#allocation9 + $0x1a0] sm:$0xff] }
 0x7af   :  { %3714 = vmatprep.mubr.f32.mxu0 %v15680_v17  ;;  %8699 = vmatprep.mubr.msk.f32.mxu1 %vm12211_vm0, %v15680_v17 }
 0x7b0   :  { %15923 = vst [vmem:[#allocation29_spill] sm:$0xff] %v13798_v29 }
 0x7b1   :  { %10180 = vmatpush1.bf16.msra.mxu0 %v13661_v55  ;;  %10210 = vmatpush3.bf16.msra.mxu1 %v13663_v9 }
 0x7b2   :  { %10182 = vmatprep.subr.bf16.mxu0 %v13667_v51  ;;  %10211 = vmatprep.subr.bf16.mxu1 %v15675_v3 }
 0x7b5   :  { %10184 = vmatpush1.bf16.msra.mxu0 %v13674_v60  ;;  %10213 = vmatpush3.bf16.msra.mxu1 %v13676_v47 }
 0x7b6   :  { %10186 = vmatprep.subr.bf16.mxu0 %v13680_v15  ;;  %10214 = vmatprep.subr.bf16.mxu1 %v15675_v3 }
 0x7b9   :  { %10188 = vmatpush1.bf16.msra.mxu0 %v13684_v8  ;;  %10216 = vmatpush3.bf16.msra.mxu1 %v13686_v61 }
 0x7ba   :  { %10190 = vmatprep.subr.bf16.mxu0 %v13690_v62  ;;  %10217 = vmatprep.subr.bf16.mxu1 %v15675_v3 }
 0x7bd   :  { %10192 = vmatpush1.bf16.msra.mxu0 %v13694_v40  ;;  %10219 = vmatpush3.bf16.msra.mxu1 %v13696_v24 }
 0x7be   :  { %10194 = vmatprep.subr.bf16.mxu0 %v13700_v19  ;;  %10220 = vmatprep.subr.bf16.mxu1 %v15675_v3 }
 0x7c1   :  { %10196 = vmatpush1.bf16.msra.mxu0 %v13704_v36  ;;  %10222 = vmatpush3.bf16.msra.mxu1 %v13706_v45 }
 0x7c2   :  { %10198 = vmatprep.subr.bf16.mxu0 %v13710_v31  ;;  %10223 = vmatprep.subr.bf16.mxu1 %v15675_v3 }
 0x7c5   :  { %10200 = vmatpush1.bf16.msra.mxu0 %v13714_v59  ;;  %10225 = vmatpush3.bf16.msra.mxu1 %v13716_v26 }
 0x7c6   :  { %10202 = vmatprep.subr.bf16.mxu0 %v13720_v56  ;;  %10226 = vmatprep.subr.bf16.mxu1 %v15675_v3 }
 0x7c9   :  { %10204 = vmatpush1.bf16.msra.mxu0 %v13724_v41  ;;  %10228 = vmatpush3.bf16.msra.mxu1 %v13726_v12 }
 0x7ca   :  { %10230 = vmatprep.subr.bf16.mxu0 %v13734_v13  ;;  %10294 = vmatprep.subr.bf16.mxu1 %v13736_v14 }
 0x7cc   :  { %3715 = vmatmul.mubr.f32.vlgmr.msra.gmra.mrb[26].mxu0 %v13653_v39  ;;  %8700 = vmatmul.mubr.f32.vlgmr.msra.gmra.mrb[30].mxu1 %v13653_v39  ;;  %v3834_v39 = vld [vmem:[#allocation9 + $0x48] sm:$0xff] }
 0x7cd   :  { %10232 = vmatpush1.bf16.msra.mxu0 %v13738_v42  ;;  %10296 = vmatpush1.bf16.msra.mxu1 %v13741_v6  ;;  %v13746_v38 = vpack.c.bf16 %v3838_v50, %v3834_v39  ;;  %v3849_v39 = vld [vmem:[#allocation9 + $0xc0] sm:$0xff] }
 0x7ce   :  { %10298 = vmatprep.subr.bf16.mxu1 %v13748_v20  ;;  %v3853_v50 = vld [vmem:[#allocation9 + $0xe0] sm:$0xff] }
 0x7cf   :  { %10234 = vmatprep.subr.bf16.mxu0 %v13746_v38  ;;  %v13774_v35 = vpack.c.bf16 %v3853_v50, %v3849_v39  ;;  %v3870_v39 = vld [vmem:[#allocation9 + $0x168] sm:$0xff]  ;;  %v3868_v50 = vld [vmem:[#allocation9 + $0x158] sm:$0xff] }
 0x7d0   :  { %v13794_v57 = vpack.c.bf16 %v3870_v39, %v3866_v25  ;;  %v13796_v22 = vpack.c.bf16 %v3872_v32, %v3868_v50  ;;  %v3878_v25 = vld [vmem:[#allocation9 + $0x1a8] sm:$0xff]  ;;  %v3876_v39 = vld [vmem:[#allocation9 + $0x198] sm:$0xff]  ;;  %v3873_v32 = vld [vmem:[#allocation9 + $0x180] sm:$0xff] }
 0x7d1   :  { %10236 = vmatpush1.bf16.msra.mxu0 %v13750_v27  ;;  %10300 = vmatpush1.bf16.msra.mxu1 %v13753_v53  ;;  %v3880_v50 = vld [vmem:[#allocation9 + $0x1b8] sm:$0xff] }
 0x7d2   :  { %10238 = vmatprep.subr.bf16.mxu0 %v13758_v46  ;;  %10302 = vmatprep.subr.bf16.mxu1 %v13760_v1  ;;  %15921 = vst [vmem:[#allocation27_spill] sm:$0xff] %v13794_v57  ;;  %15922 = vst [vmem:[#allocation28_spill] sm:$0xff] %v13796_v22  ;;  %v13808_v11 = vpack.c.bf16 %v3880_v50, %v3876_v39  ;;  %v3888_v39 = vld [vmem:[#allocation9 + $0x1f8] sm:$0xff]  ;;  %v3881_v50 = vld [vmem:[#allocation9 + $0x1c0] sm:$0xff] }
 0x7d4   :  { %15926 = vst [vmem:[#allocation32_spill] sm:$0xff] %v13808_v11 }
 0x7d5   :  { %10240 = vmatpush1.bf16.msra.mxu0 %v13762_v10  ;;  %10304 = vmatpush1.bf16.msra.mxu1 %v13765_v44 }
 0x7d6   :  { %10242 = vmatprep.subr.bf16.mxu0 %v13770_v63  ;;  %10306 = vmatprep.subr.bf16.mxu1 %v13772_v18 }
 0x7d9   :  { %10244 = vmatpush1.bf16.msra.mxu0 %v13774_v35  ;;  %10308 = vmatpush1.bf16.msra.mxu1 %v13777_v34 }
 0x7da   :  { %10246 = vmatprep.subr.bf16.mxu0 %v13782_v49  ;;  %10310 = vmatprep.subr.bf16.mxu1 %v13784_v21  ;;  %v3932_v21 = vld [vmem:[#allocation9 + $0x358] sm:$0xff] }
 0x7dd   :  { %10248 = vmatpush1.bf16.msra.mxu0 %v13786_v4  ;;  %10312 = vmatpush1.bf16.msra.mxu1 %v13789_v43  ;;  %v13806_v43 = vpack.c.bf16 %v3878_v25, %v3874_v16  ;;  %v13810_v4 = vpack.c.bf16 %v3877_v58, %v3873_v32  ;;  %v3886_v16 = vld [vmem:[#allocation9 + $0x1e8] sm:$0xff]  ;;  %v3884_v25 = vld [vmem:[#allocation9 + $0x1d8] sm:$0xff]  ;;  %v3885_v32 = vld [vmem:[#allocation9 + $0x1e0] sm:$0xff] }
 0x7de   :  { %10250 = vmatprep.subr.bf16.mxu0 %v13794_v57  ;;  %10314 = vmatprep.subr.bf16.mxu1 %v13796_v22  ;;  %v13813_v22 = vpack.c.bf16 %v3879_v0, %v3875_v2  ;;  %v13820_v58 = vpack.c.bf16 %v3888_v39, %v3884_v25  ;;  %v13822_v57 = vpack.c.bf16 %v3885_v32, %v3881_v50  ;;  %v3883_v2 = vld [vmem:[#allocation9 + $0x1d0] sm:$0xff]  ;;  %v3896_v25 = vld [vmem:[#allocation9 + $0x238] sm:$0xff]  ;;  %v3889_v39 = vld [vmem:[#allocation9 + $0x200] sm:$0xff] }
 0x7df   :  { %15925 = vst [vmem:[#allocation31_spill] sm:$0xff] %v13806_v43  ;;  %15927 = vst [vmem:[#allocation33_spill] sm:$0xff] %v13810_v4  ;;  %v3887_v0 = vld [vmem:[#allocation9 + $0x1f0] sm:$0xff]  ;;  %v3893_v50 = vld [vmem:[#allocation9 + $0x220] sm:$0xff] }
 0x7e0   :  { %15928 = vst [vmem:[#allocation34_spill] sm:$0xff] %v13813_v22  ;;  %15930 = vst [vmem:[#allocation36_spill] sm:$0xff] %v13820_v58 }
 0x7e1   :  { %10252 = vmatpush1.bf16.msra.mxu0 %v13798_v29  ;;  %10316 = vmatpush1.bf16.msra.mxu1 %v13801_v23  ;;  %v3882_v23 = vld [vmem:[#allocation9 + $0x1c8] sm:$0xff]  ;;  %15931 = vst [vmem:[#allocation37_spill] sm:$0xff] %v13822_v57 }
 0x7e2   :  { %10254 = vmatprep.subr.bf16.mxu0 %v13806_v43  ;;  %10318 = vmatprep.subr.bf16.mxu1 %v13808_v11  ;;  %v13818_v29 = vpack.c.bf16 %v3886_v16, %v3882_v23  ;;  %v13825_v11 = vpack.c.bf16 %v3887_v0, %v3883_v2  ;;  %v3894_v23 = vld [vmem:[#allocation9 + $0x228] sm:$0xff]  ;;  %v3892_v16 = vld [vmem:[#allocation9 + $0x218] sm:$0xff]  ;;  %v13834_v43 = vpack.c.bf16 %v3893_v50, %v3889_v39  ;;  %v3891_v2 = vld [vmem:[#allocation9 + $0x210] sm:$0xff] }
 0x7e3   :  { %v13832_v32 = vpack.c.bf16 %v3896_v25, %v3892_v16  ;;  %v3895_v0 = vld [vmem:[#allocation9 + $0x230] sm:$0xff]  ;;  %v3904_v16 = vld [vmem:[#allocation9 + $0x278] sm:$0xff]  ;;  %v3897_v25 = vld [vmem:[#allocation9 + $0x240] sm:$0xff] }
 0x7e4   :  { %15929 = vst [vmem:[#allocation35_spill] sm:$0xff] %v13818_v29  ;;  %15932 = vst [vmem:[#allocation38_spill] sm:$0xff] %v13825_v11  ;;  %v3901_v39 = vld [vmem:[#allocation9 + $0x260] sm:$0xff] }
 0x7e5   :  { %10256 = vmatpush1.bf16.msra.mxu0 %v13810_v4  ;;  %10320 = vmatpush1.bf16.msra.mxu1 %v13813_v22  ;;  %v3890_v22 = vld [vmem:[#allocation9 + $0x208] sm:$0xff]  ;;  %15934 = vst [vmem:[#allocation40_spill] sm:$0xff] %v13832_v32  ;;  %15935 = vst [vmem:[#allocation41_spill] sm:$0xff] %v13834_v43 }
 0x7e6   :  { %10258 = vmatprep.subr.bf16.mxu0 %v13818_v29  ;;  %10322 = vmatprep.subr.bf16.mxu1 %v13820_v58  ;;  %v13830_v4 = vpack.c.bf16 %v3894_v23, %v3890_v22  ;;  %v13837_v58 = vpack.c.bf16 %v3895_v0, %v3891_v2  ;;  %v3902_v22 = vld [vmem:[#allocation9 + $0x268] sm:$0xff]  ;;  %v3900_v23 = vld [vmem:[#allocation9 + $0x258] sm:$0xff]  ;;  %v13846_v29 = vpack.c.bf16 %v3901_v39, %v3897_v25  ;;  %v3899_v2 = vld [vmem:[#allocation9 + $0x250] sm:$0xff] }
 0x7e7   :  { %v13844_v50 = vpack.c.bf16 %v3904_v16, %v3900_v23  ;;  %v3903_v0 = vld [vmem:[#allocation9 + $0x270] sm:$0xff]  ;;  %v3912_v23 = vld [vmem:[#allocation9 + $0x2b8] sm:$0xff]  ;;  %v3905_v16 = vld [vmem:[#allocation9 + $0x280] sm:$0xff] }
 0x7e8   :  { %15933 = vst [vmem:[#allocation39_spill] sm:$0xff] %v13830_v4  ;;  %15936 = vst [vmem:[#allocation42_spill] sm:$0xff] %v13837_v58  ;;  %v3909_v25 = vld [vmem:[#allocation9 + $0x2a0] sm:$0xff] }
 0x7e9   :  { %10260 = vmatpush1.bf16.msra.mxu0 %v13822_v57  ;;  %10324 = vmatpush1.bf16.msra.mxu1 %v13825_v11  ;;  %v3898_v11 = vld [vmem:[#allocation9 + $0x248] sm:$0xff]  ;;  %15938 = vst [vmem:[#allocation44_spill] sm:$0xff] %v13844_v50  ;;  %15939 = vst [vmem:[#allocation45_spill] sm:$0xff] %v13846_v29 }
 0x7ea   :  { %10262 = vmatprep.subr.bf16.mxu0 %v13830_v4  ;;  %10326 = vmatprep.subr.bf16.mxu1 %v13832_v32  ;;  %v13842_v57 = vpack.c.bf16 %v3902_v22, %v3898_v11  ;;  %v13849_v32 = vpack.c.bf16 %v3903_v0, %v3899_v2  ;;  %v3910_v11 = vld [vmem:[#allocation9 + $0x2a8] sm:$0xff]  ;;  %v3908_v22 = vld [vmem:[#allocation9 + $0x298] sm:$0xff]  ;;  %v13858_v4 = vpack.c.bf16 %v3909_v25, %v3905_v16  ;;  %v3907_v2 = vld [vmem:[#allocation9 + $0x290] sm:$0xff] }
 0x7eb   :  { %v13856_v39 = vpack.c.bf16 %v3912_v23, %v3908_v22  ;;  %v3911_v0 = vld [vmem:[#allocation9 + $0x2b0] sm:$0xff]  ;;  %v3920_v22 = vld [vmem:[#allocation9 + $0x2f8] sm:$0xff]  ;;  %v3913_v23 = vld [vmem:[#allocation9 + $0x2c0] sm:$0xff] }
 0x7ec   :  { %15937 = vst [vmem:[#allocation43_spill] sm:$0xff] %v13842_v57  ;;  %15940 = vst [vmem:[#allocation46_spill] sm:$0xff] %v13849_v32  ;;  %v3917_v16 = vld [vmem:[#allocation9 + $0x2e0] sm:$0xff] }
 0x7ed   :  { %10264 = vmatpush1.bf16.msra.mxu0 %v13834_v43  ;;  %10328 = vmatpush1.bf16.msra.mxu1 %v13837_v58  ;;  %v3906_v58 = vld [vmem:[#allocation9 + $0x288] sm:$0xff]  ;;  %15942 = vst [vmem:[#allocation48_spill] sm:$0xff] %v13856_v39  ;;  %15943 = vst [vmem:[#allocation49_spill] sm:$0xff] %v13858_v4 }
 0x7ee   :  { %10266 = vmatprep.subr.bf16.mxu0 %v13842_v57  ;;  %10330 = vmatprep.subr.bf16.mxu1 %v13844_v50  ;;  %v13854_v43 = vpack.c.bf16 %v3910_v11, %v3906_v58  ;;  %v13861_v50 = vpack.c.bf16 %v3911_v0, %v3907_v2  ;;  %v3918_v58 = vld [vmem:[#allocation9 + $0x2e8] sm:$0xff]  ;;  %v3916_v11 = vld [vmem:[#allocation9 + $0x2d8] sm:$0xff]  ;;  %v13870_v57 = vpack.c.bf16 %v3917_v16, %v3913_v23  ;;  %v3915_v2 = vld [vmem:[#allocation9 + $0x2d0] sm:$0xff] }
 0x7ef   :  { %v13868_v25 = vpack.c.bf16 %v3920_v22, %v3916_v11  ;;  %v3919_v0 = vld [vmem:[#allocation9 + $0x2f0] sm:$0xff]  ;;  %v3928_v11 = vld [vmem:[#allocation9 + $0x338] sm:$0xff]  ;;  %v3921_v22 = vld [vmem:[#allocation9 + $0x300] sm:$0xff] }
 0x7f0   :  { %15941 = vst [vmem:[#allocation47_spill] sm:$0xff] %v13854_v43  ;;  %15944 = vst [vmem:[#allocation50_spill] sm:$0xff] %v13861_v50  ;;  %v3925_v23 = vld [vmem:[#allocation9 + $0x320] sm:$0xff] }
 0x7f1   :  { %10268 = vmatpush1.bf16.msra.mxu0 %v13846_v29  ;;  %10332 = vmatpush1.bf16.msra.mxu1 %v13849_v32  ;;  %v3914_v32 = vld [vmem:[#allocation9 + $0x2c8] sm:$0xff]  ;;  %15946 = vst [vmem:[#allocation52_spill] sm:$0xff] %v13868_v25  ;;  %15947 = vst [vmem:[#allocation53_spill] sm:$0xff] %v13870_v57 }
 0x7f2   :  { %10270 = vmatprep.subr.bf16.mxu0 %v13854_v43  ;;  %10334 = vmatprep.subr.bf16.mxu1 %v13856_v39  ;;  %v13866_v29 = vpack.c.bf16 %v3918_v58, %v3914_v32  ;;  %v13873_v39 = vpack.c.bf16 %v3919_v0, %v3915_v2  ;;  %v3926_v32 = vld [vmem:[#allocation9 + $0x328] sm:$0xff]  ;;  %v3924_v58 = vld [vmem:[#allocation9 + $0x318] sm:$0xff]  ;;  %v13882_v43 = vpack.c.bf16 %v3925_v23, %v3921_v22  ;;  %v3923_v2 = vld [vmem:[#allocation9 + $0x310] sm:$0xff] }
 0x7f3   :  { %v13880_v16 = vpack.c.bf16 %v3928_v11, %v3924_v58  ;;  %v3927_v0 = vld [vmem:[#allocation9 + $0x330] sm:$0xff]  ;;  %v3929_v58 = vld [vmem:[#allocation9 + $0x340] sm:$0xff] }
 0x7f4   :  { %15945 = vst [vmem:[#allocation51_spill] sm:$0xff] %v13866_v29  ;;  %15948 = vst [vmem:[#allocation54_spill] sm:$0xff] %v13873_v39  ;;  %v3933_v11 = vld [vmem:[#allocation9 + $0x360] sm:$0xff] }
 0x7f5   :  { %10272 = vmatpush1.bf16.msra.mxu0 %v13858_v4  ;;  %10336 = vmatpush1.bf16.msra.mxu1 %v13861_v50  ;;  %v3922_v50 = vld [vmem:[#allocation9 + $0x308] sm:$0xff]  ;;  %15950 = vst [vmem:[#allocation56_spill] sm:$0xff] %v13880_v16  ;;  %15951 = vst [vmem:[#allocation57_spill] sm:$0xff] %v13882_v43  ;;  %v13894_v23 = vpack.c.bf16 %v3933_v11, %v3929_v58  ;;  %v3939_v58 = vld [vmem:[#allocation9 + $0x390] sm:$0xff] }
 0x7f6   :  { %10274 = vmatprep.subr.bf16.mxu0 %v13866_v29  ;;  %10338 = vmatprep.subr.bf16.mxu1 %v13868_v25  ;;  %v13878_v4 = vpack.c.bf16 %v3926_v32, %v3922_v50  ;;  %v13885_v25 = vpack.c.bf16 %v3927_v0, %v3923_v2  ;;  %v3934_v29 = vld [vmem:[#allocation9 + $0x368] sm:$0xff]  ;;  %v3936_v32 = vld [vmem:[#allocation9 + $0x378] sm:$0xff]  ;;  %v3931_v2 = vld [vmem:[#allocation9 + $0x350] sm:$0xff] }
 0x7f7   :  { %v13892_v22 = vpack.c.bf16 %v3936_v32, %v3932_v21  ;;  %15955 = vst [vmem:[#allocation61_spill] sm:$0xff] %v13894_v23  ;;  %v3935_v0 = vld [vmem:[#allocation9 + $0x370] sm:$0xff]  ;;  %v3937_v21 = vld [vmem:[#allocation9 + $0x380] sm:$0xff] }
 0x7f8   :  { %15949 = vst [vmem:[#allocation55_spill] sm:$0xff] %v13878_v4  ;;  %15952 = vst [vmem:[#allocation58_spill] sm:$0xff] %v13885_v25  ;;  %v3941_v32 = vld [vmem:[#allocation9 + $0x3a0] sm:$0xff] }
 0x7f9   :  { %10276 = vmatpush1.bf16.msra.mxu0 %v13870_v57  ;;  %10340 = vmatpush1.bf16.msra.mxu1 %v13873_v39  ;;  %v3930_v57 = vld [vmem:[#allocation9 + $0x348] sm:$0xff]  ;;  %15954 = vst [vmem:[#allocation60_spill] sm:$0xff] %v13892_v22  ;;  %v13897_v39 = vpack.c.bf16 %v3935_v0, %v3931_v2  ;;  %v13905_v11 = vpack.c.bf16 %v3941_v32, %v3937_v21  ;;  %v3949_v21 = vld [vmem:[#allocation9 + $0x3e0] sm:$0xff]  ;;  %v3947_v32 = vld [vmem:[#allocation9 + $0x3d0] sm:$0xff] }
 0x7fa   :  { %10278 = vmatprep.subr.bf16.mxu0 %v13878_v4  ;;  %10342 = vmatprep.subr.bf16.mxu1 %v13880_v16  ;;  %v13889_v50 = vpack.c.bf16 %v3934_v29, %v3930_v57  ;;  %v3938_v4 = vld [vmem:[#allocation9 + $0x388] sm:$0xff]  ;;  %v3944_v57 = vld [vmem:[#allocation9 + $0x3b8] sm:$0xff] }
 0x7fb   :  { %v3942_v16 = vld [vmem:[#allocation9 + $0x3a8] sm:$0xff]  ;;  %15958 = vst [vmem:[#allocation64_spill] sm:$0xff] %v13905_v11 }
 0x7fc   :  { %15953 = vst [vmem:[#allocation59_spill] sm:$0xff] %v13889_v50  ;;  %v13900_v29 = vpack.c.bf16 %v3942_v16, %v3938_v4  ;;  %v3950_v2 = vld [vmem:[#allocation9 + $0x3e8] sm:$0xff]  ;;  %v3952_v16 = vld [vmem:[#allocation9 + $0x3f8] sm:$0xff] }
 0x7fd   :  { %10280 = vmatpush1.bf16.msra.mxu0 %v13882_v43  ;;  %10344 = vmatpush1.bf16.msra.mxu1 %v13885_v25  ;;  %v3940_v43 = vld [vmem:[#allocation9 + $0x398] sm:$0xff]  ;;  %v3943_v25 = vld [vmem:[#allocation9 + $0x3b0] sm:$0xff] }
 0x7fe   :  { %10282 = vmatprep.subr.bf16.mxu0 %v13889_v50  ;;  %10346 = vmatprep.subr.bf16.mxu1 %v13892_v22  ;;  %15956 = vst [vmem:[#allocation62_spill] sm:$0xff] %v13900_v29  ;;  %v13902_v49 = vpack.c.bf16 %v3944_v57, %v3940_v43  ;;  %v3946_v50 = vld [vmem:[#allocation9 + $0x3c8] sm:$0xff]  ;;  %v13909_v0 = vpack.c.bf16 %v3943_v25, %v3939_v58  ;;  %v3948_v43 = vld [vmem:[#allocation9 + $0x3d8] sm:$0xff]  ;;  %v3945_v57 = vld [vmem:[#allocation9 + $0x3c0] sm:$0xff] }
 0x7ff   :  { %v13911_v4 = vpack.c.bf16 %v3950_v2, %v3946_v50  ;;  %v13914_v22 = vpack.c.bf16 %v3952_v16, %v3948_v43  ;;  %v13917_v34 = vpack.c.bf16 %v3949_v21, %v3945_v57 }
 0x800   :  { %15957 = vst [vmem:[#allocation63_spill] sm:$0xff] %v13902_v49  ;;  %15959 = vst [vmem:[#allocation68_spill] sm:$0xff] %v13909_v0 }
 0x801   :  { %10284 = vmatpush1.bf16.msra.mxu0 %v13894_v23  ;;  %10348 = vmatpush1.bf16.msra.mxu1 %v13897_v39  ;;  %15960 = vst [vmem:[#allocation69_spill] sm:$0xff] %v13911_v4  ;;  %15961 = vst [vmem:[#allocation70_spill] sm:$0xff] %v13914_v22  ;;  %v3951_v23 = vld [vmem:[#allocation9 + $0x3f0] sm:$0xff] }
 0x802   :  { %10286 = vmatprep.subr.bf16.mxu0 %v13900_v29  ;;  %10350 = vmatprep.subr.bf16.mxu1 %v13902_v49  ;;  %15962 = vst [vmem:[#allocation71_spill] sm:$0xff] %v13917_v34  ;;  %v13921_v25 = vpack.c.bf16 %v3951_v23, %v3947_v32 }
 0x804   :  { %15963 = vst [vmem:[#allocation72_spill] sm:$0xff] %v13921_v25 }
 0x805   :  { %10288 = vmatpush1.bf16.msra.mxu0 %v13905_v11  ;;  %10352 = vmatpush1.bf16.msra.mxu1 %v13909_v0 }
 0x806   :  { %10290 = vmatprep.subr.bf16.mxu0 %v13911_v4  ;;  %10354 = vmatprep.subr.bf16.mxu1 %v13914_v22 }
 0x809   :  { %10292 = vmatpush1.bf16.msra.mxu0 %v13917_v34  ;;  %10356 = vmatpush1.bf16.msra.mxu1 %v13921_v25 }
 0x80a   :  { %10358 = vmatprep.subr.bf16.mxu0 %v13634_v28  ;;  %10389 = vmatprep.subr.bf16.mxu1 %v15675_v3 }
 0x87f   :  { %v3506_v50 = vpop.f32.mrb[24].mxu0  ;;  %v3577_v58 = vpop.f32.mrb[28].mxu1 }
 0x880   :  { %v8076_v2 = vmul.f32 -1.442695, %v3506_v50  ;;  %v3508_v43 = vpop.f32.mrb[25].mxu0  ;;  %v3579_v16 = vpop.f32.mrb[29].mxu1 }
 0x881   :  { %v8077_v57 = vmul.f32 -1.442695, %v3508_v43 }
 0x882   :  { %11836 = vpow2.f32 %v8076_v2 }
 0x883   :  { %11838 = vpow2.f32 %v8077_v57 }
 0x88c   :  { %v11837_v23 = vpop.eup %11836 }
 0x88d   :  { %v3585_v21 = vadd.f32 1.0, %v11837_v23  ;;  %v11839_v32 = vpop.eup %11838 }
 0x88e   :  { %v3591_v22 = vadd.f32 1.0, %v11839_v32 }
 0x88f   :  { %11840 = vrcp.f32 %v3585_v21 }
 0x890   :  { %11842 = vrcp.f32 %v3591_v22 }
 0x899   :  { %v11841_v34 = vpop.eup %11840 }
 0x89a   :  { %v3594_v25 = vmul.f32 %v11841_v34, %v3579_v16  ;;  %v11843_v57 = vpop.eup %11842 }
 0x89b   :  { %v3597_v32 = vsub.f32 1.0, %v11843_v57 }
 0x89c   :  { %v3595_v4 = vadd.f32 %v3594_v25, %v3577_v58 }
 0x89e   :  { %11844 = vtanh.f32 %v3595_v4  ;;  %v3599_v4 = vmul.f32 %v11843_v57, %v13640_v7 }
 0x89f   :  { %v3716_v28 = vpop.f32.mrb[26].mxu0  ;;  %v3787_v0 = vpop.f32.mrb[30].mxu1 }
 0x8a0   :  { %v3792_v11 = vrot.slane %v3716_v28, 2  ;;  %v3718_v49 = vpop.f32.mrb[27].mxu0  ;;  %v8701_v50 = vpop.f32.mrb[31].mxu1 }
 0x8a1   :  { %v3802_v29 = vrot.slane %v3718_v49, 2  ;;  %v3812_v50 = vrot.slane %v3787_v0, 2  ;;  %v16003_v0 = vld [vmem:[#allocation61_spill] sm:$0xff] }
 0x8a2   :  { %v3794_v2 = vadd.f32 %v3792_v11, %v15723_v5 }
 0x8a3   :  { %v3804_v43 = vadd.f32 %v3802_v29, %v12710_v52 }
 0x8a4   :  { %v8078_v23 = vmul.f32 -1.442695, %v3794_v2 }
 0x8a5   :  { %v8079_v21 = vmul.f32 -1.442695, %v3804_v43  ;;  %v3819_v43 = vrot.slane %v13646_v48, 7  ;;  %v15964_v48 = vld [vmem:[#allocation22_spill] sm:$0xff] }
 0x8a6   :  { %11846 = vpow2.f32 %v8078_v23 }
 0x8a7   :  { %11848 = vpow2.f32 %v8079_v21 }
 0x8a8   :  { %v11845_v22 = vpop.eup %11844 }
 0x8a9   :  { %v3598_v34 = vmul.f32 %v11845_v22, %v3597_v32 }
 0x8ab   :  { %v13931_v25 = vadd.f32 %v3599_v4, %v3598_v34 }
 0x8ad   :  { %3601 = vst [vmem:[#allocation2 + $0x5] sm:$0x1] %v13931_v25  ;;  %v3824_v49 = vrot.slane %v13931_v25, 2 }
 0x8af   :  { %v3955_v58 = vrot.slane %v3824_v49, 6 }
 0x8b0   :  { %v11847_v11 = vpop.eup %11846 }
 0x8b1   :  { %v11849_v16 = vpop.eup %11848  ;;  %v3798_v29 = vadd.f32 1.0, %v11847_v11  ;;  %4022 = vmatprep.mubr.f32.mxu0 %v3955_v58  ;;  %4093 = vmatprep.mubr.f32.mxu1 %v3955_v58  ;;  %v16004_v58 = vld [vmem:[#allocation62_spill] sm:$0xff]  ;;  %v16005_v11 = vld [vmem:[#allocation63_spill] sm:$0xff] }
 0x8b2   :  { %v3808_v28 = vadd.f32 1.0, %v11849_v16  ;;  %v16006_v16 = vld [vmem:[#allocation64_spill] sm:$0xff] }
 0x8b3   :  { %11850 = vrcp.f32 %v3798_v29  ;;  %v16007_v29 = vld [vmem:[#allocation68_spill] sm:$0xff] }
 0x8b4   :  { %11852 = vrcp.f32 %v3808_v28  ;;  %v16008_v28 = vld [vmem:[#allocation69_spill] sm:$0xff] }
 0x8bd   :  { %v11851_v2 = vpop.eup %11850 }
 0x8be   :  { %v11853_v7 = vpop.eup %11852  ;;  %v3814_v57 = vmul.f32 %v11851_v2, %v3812_v50  ;;  %v16009_v50 = vld [vmem:[#allocation70_spill] sm:$0xff]  ;;  %v16010_v2 = vld [vmem:[#allocation71_spill] sm:$0xff] }
 0x8bf   :  { %v3821_v23 = vmul.f32 %v11853_v7, %v3819_v43  ;;  %v3817_v32 = vsub.f32 1.0, %v11853_v7  ;;  %v16011_v43 = vld [vmem:[#allocation72_spill] sm:$0xff]  ;;  %v4639_v7 = vld [vmem:[#allocation12 + $0x8] sm:$0xff] }
 0x8c0   :  { %v3815_v21 = vadd.f32 %v3814_v57, %v12716_v30 }
 0x8c2   :  { %11854 = vtanh.f32 %v3815_v21 }
 0x8cc   :  { %v11855_v22 = vpop.eup %11854 }
 0x8cd   :  { %v3818_v34 = vmul.f32 %v11855_v22, %v3817_v32 }
 0x8cf   :  { %v13937_v4 = vadd.f32 %v3821_v23, %v3818_v34 }
 0x8d1   :  { %v3954_v49 = vrot.slane %v13937_v4, 6 }
 0x8d3   :  { %4023 = vmatmul.mubr.f32.vlgmr.msra.gmra.mrb[28].mxu0 %v3954_v49  ;;  %4094 = vmatmul.mubr.f32.vlgmr.msra.gmra.mrb[32].mxu1 %v3954_v49 }
 0x8d4   :  { %10360 = vmatpush1.bf16.msra.mxu0 %v13648_v37  ;;  %10391 = vmatpush3.bf16.msra.mxu1 %v13650_v54  ;;  %v15965_v37 = vld [vmem:[#allocation23_spill] sm:$0xff]  ;;  %v15966_v54 = vld [vmem:[#allocation24_spill] sm:$0xff] }
 0x8d5   :  { %10362 = vmatprep.subr.bf16.mxu0 %v13655_v33  ;;  %10392 = vmatprep.subr.bf16.mxu1 %v15675_v3  ;;  %v15967_v33 = vld [vmem:[#allocation25_spill] sm:$0xff] }
 0x8d6   :  { %4232 = vmatprep.mubr.f32.mxu0 %v15680_v17  ;;  %8734 = vmatprep.mubr.msk.f32.mxu1 %vm12211_vm0, %v15680_v17 }
 0x8d8   :  { %10364 = vmatpush1.bf16.msra.mxu0 %v13661_v55  ;;  %10394 = vmatpush3.bf16.msra.mxu1 %v13663_v9  ;;  %v15968_v55 = vld [vmem:[#allocation26_spill] sm:$0xff]  ;;  %v15969_v9 = vld [vmem:[#allocation27_spill] sm:$0xff] }
 0x8d9   :  { %10366 = vmatprep.subr.bf16.mxu0 %v13667_v51  ;;  %10395 = vmatprep.subr.bf16.mxu1 %v15675_v3  ;;  %v15970_v51 = vld [vmem:[#allocation28_spill] sm:$0xff] }
 0x8dc   :  { %10368 = vmatpush1.bf16.msra.mxu0 %v13674_v60  ;;  %10397 = vmatpush3.bf16.msra.mxu1 %v13676_v47  ;;  %v15971_v60 = vld [vmem:[#allocation29_spill] sm:$0xff]  ;;  %v15972_v47 = vld [vmem:[#allocation30_spill] sm:$0xff] }
 0x8dd   :  { %10370 = vmatprep.subr.bf16.mxu0 %v13680_v15  ;;  %10398 = vmatprep.subr.bf16.mxu1 %v15675_v3  ;;  %v15973_v15 = vld [vmem:[#allocation31_spill] sm:$0xff] }
 0x8e0   :  { %10372 = vmatpush1.bf16.msra.mxu0 %v13684_v8  ;;  %10400 = vmatpush3.bf16.msra.mxu1 %v13686_v61  ;;  %v15974_v8 = vld [vmem:[#allocation32_spill] sm:$0xff]  ;;  %v15975_v61 = vld [vmem:[#allocation33_spill] sm:$0xff] }
 0x8e1   :  { %10374 = vmatprep.subr.bf16.mxu0 %v13690_v62  ;;  %10401 = vmatprep.subr.bf16.mxu1 %v15675_v3  ;;  %v15976_v62 = vld [vmem:[#allocation34_spill] sm:$0xff] }
 0x8e4   :  { %10376 = vmatpush1.bf16.msra.mxu0 %v13694_v40  ;;  %10403 = vmatpush3.bf16.msra.mxu1 %v13696_v24  ;;  %v15977_v40 = vld [vmem:[#allocation35_spill] sm:$0xff]  ;;  %v15978_v24 = vld [vmem:[#allocation36_spill] sm:$0xff] }
 0x8e5   :  { %10378 = vmatprep.subr.bf16.mxu0 %v13700_v19  ;;  %10404 = vmatprep.subr.bf16.mxu1 %v15675_v3  ;;  %v15979_v19 = vld [vmem:[#allocation37_spill] sm:$0xff] }
 0x8e8   :  { %10380 = vmatpush1.bf16.msra.mxu0 %v13704_v36  ;;  %10406 = vmatpush3.bf16.msra.mxu1 %v13706_v45  ;;  %v15980_v36 = vld [vmem:[#allocation38_spill] sm:$0xff]  ;;  %v15981_v45 = vld [vmem:[#allocation39_spill] sm:$0xff] }
 0x8e9   :  { %10382 = vmatprep.subr.bf16.mxu0 %v13710_v31  ;;  %10407 = vmatprep.subr.bf16.mxu1 %v15675_v3  ;;  %v15982_v31 = vld [vmem:[#allocation40_spill] sm:$0xff] }
 0x8ec   :  { %10384 = vmatpush1.bf16.msra.mxu0 %v13714_v59  ;;  %10409 = vmatpush3.bf16.msra.mxu1 %v13716_v26  ;;  %v15983_v59 = vld [vmem:[#allocation41_spill] sm:$0xff]  ;;  %v15984_v26 = vld [vmem:[#allocation42_spill] sm:$0xff] }
 0x8ed   :  { %10386 = vmatprep.subr.bf16.mxu0 %v13720_v56  ;;  %10410 = vmatprep.subr.bf16.mxu1 %v15675_v3  ;;  %v15985_v56 = vld [vmem:[#allocation43_spill] sm:$0xff] }
 0x8f0   :  { %10388 = vmatpush1.bf16.msra.mxu0 %v13724_v41  ;;  %10412 = vmatpush3.bf16.msra.mxu1 %v13726_v12  ;;  %v15986_v41 = vld [vmem:[#allocation44_spill] sm:$0xff]  ;;  %v15987_v12 = vld [vmem:[#allocation45_spill] sm:$0xff] }
 0x8f1   :  { %10414 = vmatprep.subr.bf16.mxu0 %v13734_v13  ;;  %10478 = vmatprep.subr.bf16.mxu1 %v13736_v14  ;;  %v15988_v13 = vld [vmem:[#allocation46_spill] sm:$0xff]  ;;  %v15989_v14 = vld [vmem:[#allocation47_spill] sm:$0xff] }
 0x8f3   :  { %4233 = vmatmul.mubr.f32.vlgmr.msra.gmra.mrb[30].mxu0 %v3954_v49  ;;  %8735 = vmatmul.mubr.f32.vlgmr.msra.gmra.mrb[34].mxu1 %v3954_v49 }
 0x8f4   :  { %10416 = vmatpush1.bf16.msra.mxu0 %v13738_v42  ;;  %10480 = vmatpush1.bf16.msra.mxu1 %v13741_v6  ;;  %v15990_v42 = vld [vmem:[#allocation48_spill] sm:$0xff]  ;;  %v15991_v6 = vld [vmem:[#allocation49_spill] sm:$0xff] }
 0x8f5   :  { %10418 = vmatprep.subr.bf16.mxu0 %v13746_v38  ;;  %10482 = vmatprep.subr.bf16.mxu1 %v13748_v20  ;;  %v15992_v38 = vld [vmem:[#allocation50_spill] sm:$0xff]  ;;  %v15993_v20 = vld [vmem:[#allocation51_spill] sm:$0xff] }
 0x8f8   :  { %10420 = vmatpush1.bf16.msra.mxu0 %v13750_v27  ;;  %10484 = vmatpush1.bf16.msra.mxu1 %v13753_v53  ;;  %v15994_v27 = vld [vmem:[#allocation52_spill] sm:$0xff]  ;;  %v15995_v53 = vld [vmem:[#allocation53_spill] sm:$0xff] }
 0x8f9   :  { %10422 = vmatprep.subr.bf16.mxu0 %v13758_v46  ;;  %10486 = vmatprep.subr.bf16.mxu1 %v13760_v1  ;;  %v15996_v46 = vld [vmem:[#allocation54_spill] sm:$0xff]  ;;  %v15997_v1 = vld [vmem:[#allocation55_spill] sm:$0xff] }
 0x8fc   :  { %10424 = vmatpush1.bf16.msra.mxu0 %v13762_v10  ;;  %10488 = vmatpush1.bf16.msra.mxu1 %v13765_v44  ;;  %v15998_v10 = vld [vmem:[#allocation56_spill] sm:$0xff]  ;;  %v15999_v44 = vld [vmem:[#allocation57_spill] sm:$0xff] }
 0x8fd   :  { %10426 = vmatprep.subr.bf16.mxu0 %v13770_v63  ;;  %10490 = vmatprep.subr.bf16.mxu1 %v13772_v18  ;;  %v16000_v63 = vld [vmem:[#allocation58_spill] sm:$0xff]  ;;  %v16001_v18 = vld [vmem:[#allocation59_spill] sm:$0xff] }
 0x900   :  { %10428 = vmatpush1.bf16.msra.mxu0 %v13774_v35  ;;  %10492 = vmatpush1.bf16.msra.mxu1 %v15964_v48  ;;  %v16002_v35 = vld [vmem:[#allocation60_spill] sm:$0xff] }
 0x901   :  { %10430 = vmatprep.subr.bf16.mxu0 %v15965_v37  ;;  %10494 = vmatprep.subr.bf16.mxu1 %v15966_v54 }
 0x904   :  { %10432 = vmatpush1.bf16.msra.mxu0 %v15967_v33  ;;  %10496 = vmatpush1.bf16.msra.mxu1 %v15968_v55 }
 0x905   :  { %10434 = vmatprep.subr.bf16.mxu0 %v15969_v9  ;;  %10498 = vmatprep.subr.bf16.mxu1 %v15970_v51 }
 0x908   :  { %10436 = vmatpush1.bf16.msra.mxu0 %v15971_v60  ;;  %10500 = vmatpush1.bf16.msra.mxu1 %v15972_v47 }
 0x909   :  { %10438 = vmatprep.subr.bf16.mxu0 %v15973_v15  ;;  %10502 = vmatprep.subr.bf16.mxu1 %v15974_v8 }
 0x90c   :  { %10440 = vmatpush1.bf16.msra.mxu0 %v15975_v61  ;;  %10504 = vmatpush1.bf16.msra.mxu1 %v15976_v62 }
 0x90d   :  { %10442 = vmatprep.subr.bf16.mxu0 %v15977_v40  ;;  %10506 = vmatprep.subr.bf16.mxu1 %v15978_v24 }
 0x910   :  { %10444 = vmatpush1.bf16.msra.mxu0 %v15979_v19  ;;  %10508 = vmatpush1.bf16.msra.mxu1 %v15980_v36 }
 0x911   :  { %10446 = vmatprep.subr.bf16.mxu0 %v15981_v45  ;;  %10510 = vmatprep.subr.bf16.mxu1 %v15982_v31 }
 0x914   :  { %10448 = vmatpush1.bf16.msra.mxu0 %v15983_v59  ;;  %10512 = vmatpush1.bf16.msra.mxu1 %v15984_v26 }
 0x915   :  { %10450 = vmatprep.subr.bf16.mxu0 %v15985_v56  ;;  %10514 = vmatprep.subr.bf16.mxu1 %v15986_v41 }
 0x918   :  { %10452 = vmatpush1.bf16.msra.mxu0 %v15987_v12  ;;  %10516 = vmatpush1.bf16.msra.mxu1 %v15988_v13 }
 0x919   :  { %10454 = vmatprep.subr.bf16.mxu0 %v15989_v14  ;;  %10518 = vmatprep.subr.bf16.mxu1 %v15990_v42 }
 0x91c   :  { %10456 = vmatpush1.bf16.msra.mxu0 %v15991_v6  ;;  %10520 = vmatpush1.bf16.msra.mxu1 %v15992_v38 }
 0x91d   :  { %10458 = vmatprep.subr.bf16.mxu0 %v15993_v20  ;;  %10522 = vmatprep.subr.bf16.mxu1 %v15994_v27  ;;  %v4337_v20 = vrot.slane %v13937_v4, 7  ;;  %v4644_v4 = vld [vmem:[#allocation12 + $0x30] sm:$0xff] }
 0x920   :  { %10460 = vmatpush1.bf16.msra.mxu0 %v15995_v53  ;;  %10524 = vmatpush1.bf16.msra.mxu1 %v15996_v46 }
 0x921   :  { %10462 = vmatprep.subr.bf16.mxu0 %v15997_v1  ;;  %10526 = vmatprep.subr.bf16.mxu1 %v15998_v10 }
 0x924   :  { %10464 = vmatpush1.bf16.msra.mxu0 %v15999_v44  ;;  %10528 = vmatpush1.bf16.msra.mxu1 %v16000_v63  ;;  %v4638_v44 = vld [vmem:[#allocation12] sm:$0xff] }
 0x925   :  { %10466 = vmatprep.subr.bf16.mxu0 %v16001_v18  ;;  %10530 = vmatprep.subr.bf16.mxu1 %v16002_v35  ;;  %v4641_v18 = vld [vmem:[#allocation12 + $0x18] sm:$0xff]  ;;  %v4640_v35 = vld [vmem:[#allocation12 + $0x10] sm:$0xff] }
 0x928   :  { %10468 = vmatpush1.bf16.msra.mxu0 %v16003_v0  ;;  %10532 = vmatpush1.bf16.msra.mxu1 %v13897_v39  ;;  %v4642_v39 = vld [vmem:[#allocation12 + $0x20] sm:$0xff]  ;;  %v4643_v0 = vld [vmem:[#allocation12 + $0x28] sm:$0xff] }
 0x929   :  { %10470 = vmatprep.subr.bf16.mxu0 %v16004_v58  ;;  %10534 = vmatprep.subr.bf16.mxu1 %v16005_v11  ;;  %v14038_v57 = vpack.c.bf16 %v4642_v39, %v4639_v7  ;;  %v4645_v58 = vld [vmem:[#allocation12 + $0x38] sm:$0xff]  ;;  %v4648_v11 = vld [vmem:[#allocation12 + $0x50] sm:$0xff]  ;;  %v4651_v39 = vld [vmem:[#allocation12 + $0x68] sm:$0xff] }
 0x92a   :  { %v4649_v7 = vld [vmem:[#allocation12 + $0x58] sm:$0xff] }
 0x92c   :  { %10472 = vmatpush1.bf16.msra.mxu0 %v16006_v16  ;;  %10536 = vmatpush1.bf16.msra.mxu1 %v16007_v29  ;;  %v14050_v29 = vpack.c.bf16 %v4641_v18, %v4638_v44  ;;  %v4679_v44 = vld [vmem:[#allocation12 + $0x148] sm:$0xff]  ;;  %v4684_v18 = vld [vmem:[#allocation12 + $0x170] sm:$0xff] }
 0x92d   :  { %10474 = vmatprep.subr.bf16.mxu0 %v16008_v28  ;;  %10538 = vmatprep.subr.bf16.mxu1 %v16009_v50  ;;  %v14052_v28 = vpack.c.bf16 %v4643_v0, %v4640_v35 }
 0x930   :  { %10476 = vmatpush1.bf16.msra.mxu0 %v16010_v2  ;;  %10540 = vmatpush1.bf16.msra.mxu1 %v16011_v43  ;;  %v14056_v2 = vpack.c.bf16 %v4648_v11, %v4645_v58  ;;  %v4646_v43 = vld [vmem:[#allocation12 + $0x40] sm:$0xff]  ;;  %v4680_v58 = vld [vmem:[#allocation12 + $0x150] sm:$0xff] }
 0x931   :  { %10573 = vmatprep.subr.bf16.mxu1 %v15675_v3  ;;  %10542 = vmatprep.subr.bf16.mxu0 %v14038_v57 }
 0x9a6   :  { %v4024_v23 = vpop.f32.mrb[28].mxu0  ;;  %v4095_v21 = vpop.f32.mrb[32].mxu1 }
 0x9a7   :  { %v8080_v32 = vmul.f32 -1.442695, %v4024_v23  ;;  %v4026_v22 = vpop.f32.mrb[29].mxu0  ;;  %v4097_v34 = vpop.f32.mrb[33].mxu1  ;;  %v4654_v23 = vld [vmem:[#allocation12 + $0x80] sm:$0xff] }
 0x9a8   :  { %v8081_v49 = vmul.f32 -1.442695, %v4026_v22  ;;  %v4650_v22 = vld [vmem:[#allocation12 + $0x60] sm:$0xff] }
 0x9a9   :  { %11856 = vpow2.f32 %v8080_v32  ;;  %v14064_v32 = vpack.c.bf16 %v4649_v7, %v4646_v43 }
 0x9aa   :  { %11858 = vpow2.f32 %v8081_v49  ;;  %v4653_v49 = vld [vmem:[#allocation12 + $0x78] sm:$0xff] }
 0x9b3   :  { %v11857_v48 = vpop.eup %11856 }
 0x9b4   :  { %v4103_v37 = vadd.f32 1.0, %v11857_v48  ;;  %v11859_v54 = vpop.eup %11858  ;;  %v4652_v48 = vld [vmem:[#allocation12 + $0x70] sm:$0xff] }
 0x9b5   :  { %v4109_v33 = vadd.f32 1.0, %v11859_v54  ;;  %v4657_v54 = vld [vmem:[#allocation12 + $0x98] sm:$0xff] }
 0x9b6   :  { %11860 = vrcp.f32 %v4103_v37  ;;  %v4655_v37 = vld [vmem:[#allocation12 + $0x88] sm:$0xff] }
 0x9b7   :  { %11862 = vrcp.f32 %v4109_v33  ;;  %v4660_v33 = vld [vmem:[#allocation12 + $0xb0] sm:$0xff] }
 0x9c0   :  { %v11861_v55 = vpop.eup %11860 }
 0x9c1   :  { %v4112_v9 = vmul.f32 %v11861_v55, %v4097_v34  ;;  %v11863_v19 = vpop.eup %11862  ;;  %v14068_v34 = vpack.c.bf16 %v4654_v23, %v4651_v39  ;;  %v14075_v55 = vpack.c.bf16 %v4653_v49, %v4650_v22  ;;  %v4849_v39 = vld [vmem:[#allocation13 + $0x8] sm:$0xff]  ;;  %v4851_v22 = vld [vmem:[#allocation13 + $0x18] sm:$0xff] }
 0x9c2   :  { %v4115_v31 = vsub.f32 1.0, %v11863_v19  ;;  %v4117_v56 = vmul.f32 %v11863_v19, %v13931_v25  ;;  %v4662_v19 = vld [vmem:[#allocation12 + $0xc0] sm:$0xff]  ;;  %v4853_v23 = vld [vmem:[#allocation13 + $0x28] sm:$0xff] }
 0x9c3   :  { %v4113_v51 = vadd.f32 %v4112_v9, %v4095_v21  ;;  %v14077_v9 = vpack.c.bf16 %v4655_v37, %v4652_v48  ;;  %v14135_v49 = vpack.c.bf16 %v4853_v23, %v4849_v39  ;;  %v4855_v48 = vld [vmem:[#allocation13 + $0x38] sm:$0xff]  ;;  %v4848_v37 = vld [vmem:[#allocation13] sm:$0xff]  ;;  %v4873_v39 = vld [vmem:[#allocation13 + $0xc8] sm:$0xff] }
 0x9c4   :  { %v4877_v23 = vld [vmem:[#allocation13 + $0xe8] sm:$0xff] }
 0x9c5   :  { %11864 = vtanh.f32 %v4113_v51  ;;  %v4656_v51 = vld [vmem:[#allocation12 + $0x90] sm:$0xff] }
 0x9c6   :  { %v4234_v60 = vpop.f32.mrb[30].mxu0  ;;  %v4305_v47 = vpop.f32.mrb[34].mxu1 }
 0x9c7   :  { %v4310_v15 = vrot.slane %v4234_v60, 1  ;;  %v4236_v8 = vpop.f32.mrb[31].mxu0  ;;  %v8736_v61 = vpop.f32.mrb[35].mxu1  ;;  %v4330_v6 = vrot.slane %v4305_v47, 1  ;;  %v14081_v60 = vpack.c.bf16 %v4660_v33, %v4657_v54  ;;  %v4659_v47 = vld [vmem:[#allocation12 + $0xa8] sm:$0xff]  ;;  %v4852_v54 = vld [vmem:[#allocation13 + $0x20] sm:$0xff]  ;;  %v14137_v33 = vpack.c.bf16 %v4855_v48, %v4851_v22 }
 0x9c8   :  { %v4320_v62 = vrot.slane %v4236_v8, 1  ;;  %v4661_v8 = vld [vmem:[#allocation12 + $0xb8] sm:$0xff]  ;;  %v4663_v61 = vld [vmem:[#allocation12 + $0xc8] sm:$0xff]  ;;  %v14171_v48 = vpack.c.bf16 %v4877_v23, %v4873_v39 }
 0x9c9   :  { %v4312_v40 = vadd.f32 %v4310_v15, %v15723_v5  ;;  %v4658_v15 = vld [vmem:[#allocation12 + $0xa0] sm:$0xff]  ;;  %v4875_v22 = vld [vmem:[#allocation13 + $0xd8] sm:$0xff]  ;;  %v4889_v39 = vld [vmem:[#allocation13 + $0x148] sm:$0xff] }
 0x9ca   :  { %v4322_v24 = vadd.f32 %v4320_v62, %v12710_v52  ;;  %v4666_v62 = vld [vmem:[#allocation12 + $0xe0] sm:$0xff]  ;;  %v4893_v23 = vld [vmem:[#allocation13 + $0x168] sm:$0xff] }
 0x9cb   :  { %v8082_v36 = vmul.f32 -1.442695, %v4312_v40  ;;  %v14085_v40 = vpack.c.bf16 %v4659_v47, %v4656_v51  ;;  %v14139_v51 = vpack.c.bf16 %v4852_v54, %v4848_v37  ;;  %v4850_v47 = vld [vmem:[#allocation13 + $0x10] sm:$0xff]  ;;  %v4879_v37 = vld [vmem:[#allocation13 + $0xf8] sm:$0xff]  ;;  %v4872_v54 = vld [vmem:[#allocation13 + $0xc0] sm:$0xff] }
 0x9cc   :  { %v8083_v45 = vmul.f32 -1.442695, %v4322_v24  ;;  %v14087_v24 = vpack.c.bf16 %v4661_v8, %v4658_v15  ;;  %v4854_v15 = vld [vmem:[#allocation13 + $0x30] sm:$0xff] }
 0x9cd   :  { %11866 = vpow2.f32 %v8082_v36  ;;  %v14091_v36 = vpack.c.bf16 %v4666_v62, %v4663_v61  ;;  %v14142_v8 = vpack.c.bf16 %v4854_v15, %v4850_v47  ;;  %v4857_v61 = vld [vmem:[#allocation13 + $0x48] sm:$0xff]  ;;  %v4876_v47 = vld [vmem:[#allocation13 + $0xe0] sm:$0xff]  ;;  %v14173_v15 = vpack.c.bf16 %v4879_v37, %v4875_v22  ;;  %v4891_v22 = vld [vmem:[#allocation13 + $0x158] sm:$0xff] }
 0x9ce   :  { %11868 = vpow2.f32 %v8083_v45  ;;  %v4665_v45 = vld [vmem:[#allocation12 + $0xd8] sm:$0xff]  ;;  %v4861_v62 = vld [vmem:[#allocation13 + $0x68] sm:$0xff]  ;;  %v14195_v37 = vpack.c.bf16 %v4893_v23, %v4889_v39  ;;  %v4896_v23 = vld [vmem:[#allocation13 + $0x180] sm:$0xff] }
 0x9cf   :  { %v11865_v59 = vpop.eup %11864  ;;  %v4903_v39 = vld [vmem:[#allocation13 + $0x1b8] sm:$0xff] }
 0x9d0   :  { %v4116_v26 = vmul.f32 %v11865_v59, %v4115_v31  ;;  %v4664_v31 = vld [vmem:[#allocation12 + $0xd0] sm:$0xff]  ;;  %v4667_v59 = vld [vmem:[#allocation12 + $0xe8] sm:$0xff]  ;;  %16015 = vst [vmem:[#allocation25_spill] sm:$0xff] %v14195_v37 }
 0x9d2   :  { %v14044_v41 = vadd.f32 %v4117_v56, %v4116_v26  ;;  %v4669_v26 = vld [vmem:[#allocation12 + $0xf8] sm:$0xff]  ;;  %v4672_v56 = vld [vmem:[#allocation12 + $0x110] sm:$0xff] }
 0x9d4   :  { %4119 = vst [vmem:[#allocation2 + $0x6] sm:$0x1] %v14044_v41  ;;  %v4342_v12 = vrot.slane %v14044_v41, 1 }
 0x9d6   :  { %v4473_v13 = vrot.slane %v4342_v12, 7  ;;  %v14095_v12 = vpack.c.bf16 %v4665_v45, %v4662_v19  ;;  %v4859_v19 = vld [vmem:[#allocation13 + $0x58] sm:$0xff]  ;;  %v14147_v45 = vpack.c.bf16 %v4861_v62, %v4857_v61  ;;  %v14175_v61 = vpack.c.bf16 %v4876_v47, %v4872_v54  ;;  %v4874_v62 = vld [vmem:[#allocation13 + $0xd0] sm:$0xff]  ;;  %v4888_v47 = vld [vmem:[#allocation13 + $0x140] sm:$0xff] }
 0x9d7   :  { %v11867_v5 = vpop.eup %11866  ;;  %v4895_v54 = vld [vmem:[#allocation13 + $0x178] sm:$0xff] }
 0x9d8   :  { %v11869_v14 = vpop.eup %11868  ;;  %v4316_v52 = vadd.f32 1.0, %v11867_v5  ;;  %4540 = vmatprep.mubr.f32.mxu0 %v4473_v13  ;;  %4611 = vmatprep.mubr.f32.mxu1 %v4473_v13  ;;  %v14097_v13 = vpack.c.bf16 %v4667_v59, %v4664_v31  ;;  %v4668_v5 = vld [vmem:[#allocation12 + $0xf0] sm:$0xff]  ;;  %v4863_v31 = vld [vmem:[#allocation13 + $0x78] sm:$0xff]  ;;  %v4856_v59 = vld [vmem:[#allocation13 + $0x40] sm:$0xff] }
 0x9d9   :  { %v4326_v42 = vadd.f32 1.0, %v11869_v14  ;;  %v14101_v14 = vpack.c.bf16 %v4672_v56, %v4669_v26  ;;  %v4860_v26 = vld [vmem:[#allocation13 + $0x60] sm:$0xff]  ;;  %v14149_v56 = vpack.c.bf16 %v4863_v31, %v4859_v19  ;;  %v4878_v19 = vld [vmem:[#allocation13 + $0xf0] sm:$0xff] }
 0x9da   :  { %11870 = vrcp.f32 %v4316_v52  ;;  %v4671_v52 = vld [vmem:[#allocation12 + $0x108] sm:$0xff]  ;;  %v14178_v31 = vpack.c.bf16 %v4878_v19, %v4874_v62  ;;  %v4892_v62 = vld [vmem:[#allocation13 + $0x160] sm:$0xff]  ;;  %v14197_v19 = vpack.c.bf16 %v4895_v54, %v4891_v22 }
 0x9db   :  { %11872 = vrcp.f32 %v4326_v42  ;;  %v4670_v42 = vld [vmem:[#allocation12 + $0x100] sm:$0xff] }
 0x9dc   :  { %16016 = vst [vmem:[#allocation26_spill] sm:$0xff] %v14197_v19  ;;  %v4900_v22 = vld [vmem:[#allocation13 + $0x1a0] sm:$0xff] }
 0x9e4   :  { %v11871_v38 = vpop.eup %11870 }
 0x9e5   :  { %v11873_v25 = vpop.eup %11872  ;;  %v4332_v27 = vmul.f32 %v11871_v38, %v4330_v6  ;;  %v4673_v6 = vld [vmem:[#allocation12 + $0x118] sm:$0xff]  ;;  %v4675_v38 = vld [vmem:[#allocation12 + $0x128] sm:$0xff] }
 0x9e6   :  { %v4339_v53 = vmul.f32 %v11873_v25, %v4337_v20  ;;  %v4335_v1 = vsub.f32 1.0, %v11873_v25  ;;  %v4678_v20 = vld [vmem:[#allocation12 + $0x140] sm:$0xff]  ;;  %v14105_v25 = vpack.c.bf16 %v4671_v52, %v4668_v5  ;;  %v14151_v5 = vpack.c.bf16 %v4860_v26, %v4856_v59  ;;  %v4858_v52 = vld [vmem:[#allocation13 + $0x50] sm:$0xff]  ;;  %v4881_v59 = vld [vmem:[#allocation13 + $0x108] sm:$0xff] }
 0x9e7   :  { %v4333_v46 = vadd.f32 %v4332_v27, %v12716_v30  ;;  %v4647_v30 = vld [vmem:[#allocation12 + $0x48] sm:$0xff]  ;;  %v14107_v27 = vpack.c.bf16 %v4673_v6, %v4670_v42  ;;  %v4862_v42 = vld [vmem:[#allocation13 + $0x70] sm:$0xff] }
 0x9e8   :  { %v14062_v21 = vpack.c.bf16 %v4647_v30, %v4644_v4  ;;  %v4682_v4 = vld [vmem:[#allocation12 + $0x160] sm:$0xff]  ;;  %v4685_v30 = vld [vmem:[#allocation12 + $0x178] sm:$0xff]  ;;  %v14154_v6 = vpack.c.bf16 %v4862_v42, %v4858_v52  ;;  %v4885_v26 = vld [vmem:[#allocation13 + $0x128] sm:$0xff] }
 0x9e9   :  { %11874 = vtanh.f32 %v4333_v46  ;;  %v14111_v46 = vpack.c.bf16 %v4678_v20, %v4675_v38  ;;  %v14127_v7 = vpack.c.bf16 %v4685_v30, %v4682_v4  ;;  %v4865_v38 = vld [vmem:[#allocation13 + $0x88] sm:$0xff]  ;;  %v4870_v4 = vld [vmem:[#allocation13 + $0xb0] sm:$0xff]  ;;  %v4883_v52 = vld [vmem:[#allocation13 + $0x118] sm:$0xff]  ;;  %v14183_v42 = vpack.c.bf16 %v4885_v26, %v4881_v59 }
 0x9ea   :  { %v4869_v20 = vld [vmem:[#allocation13 + $0xa8] sm:$0xff]  ;;  %v14199_v59 = vpack.c.bf16 %v4892_v62, %v4888_v47  ;;  %v4890_v26 = vld [vmem:[#allocation13 + $0x150] sm:$0xff]  ;;  %v14211_v47 = vpack.c.bf16 %v4900_v22, %v4896_v23  ;;  %v4908_v23 = vld [vmem:[#allocation13 + $0x1e0] sm:$0xff] }
 0x9eb   :  { %v4898_v62 = vld [vmem:[#allocation13 + $0x190] sm:$0xff] }
 0x9ec   :  { %16017 = vst [vmem:[#allocation27_spill] sm:$0xff] %v14199_v59  ;;  %16021 = vst [vmem:[#allocation31_spill] sm:$0xff] %v14211_v47 }
 0x9f3   :  { %v11875_v10 = vpop.eup %11874 }
 0x9f4   :  { %v4336_v63 = vmul.f32 %v11875_v10, %v4335_v1  ;;  %v4677_v1 = vld [vmem:[#allocation12 + $0x138] sm:$0xff]  ;;  %v4676_v10 = vld [vmem:[#allocation12 + $0x130] sm:$0xff] }
 0x9f5   :  { %v14117_v0 = vpack.c.bf16 %v4679_v44, %v4676_v10  ;;  %v4871_v10 = vld [vmem:[#allocation13 + $0xb8] sm:$0xff]  ;;  %v4864_v44 = vld [vmem:[#allocation13 + $0x80] sm:$0xff] }
 0x9f6   :  { %v4340_v16 = vadd.f32 %v4339_v53, %v4336_v63  ;;  %v4674_v53 = vld [vmem:[#allocation12 + $0x120] sm:$0xff]  ;;  %v4681_v63 = vld [vmem:[#allocation12 + $0x158] sm:$0xff] }
 0x9f7   :  { %v14115_v35 = vpack.c.bf16 %v4677_v1, %v4674_v53  ;;  %v14121_v11 = vpack.c.bf16 %v4684_v18, %v4681_v63  ;;  %v4867_v53 = vld [vmem:[#allocation13 + $0x98] sm:$0xff]  ;;  %v14159_v1 = vpack.c.bf16 %v4869_v20, %v4865_v38  ;;  %v4868_v63 = vld [vmem:[#allocation13 + $0xa0] sm:$0xff] }
 0x9f8   :  { %v14054_v50 = vrot.slane %v4340_v16, 7  ;;  %v4683_v16 = vld [vmem:[#allocation12 + $0x168] sm:$0xff]  ;;  %v14161_v18 = vpack.c.bf16 %v4871_v10, %v4867_v53  ;;  %v4887_v38 = vld [vmem:[#allocation13 + $0x138] sm:$0xff]  ;;  %v4880_v20 = vld [vmem:[#allocation13 + $0x100] sm:$0xff] }
 0x9f9   :  { %v14125_v43 = vpack.c.bf16 %v4683_v16, %v4680_v58  ;;  %v14163_v58 = vpack.c.bf16 %v4868_v63, %v4864_v44  ;;  %v4866_v16 = vld [vmem:[#allocation13 + $0x90] sm:$0xff]  ;;  %v4884_v53 = vld [vmem:[#allocation13 + $0x120] sm:$0xff]  ;;  %v14185_v10 = vpack.c.bf16 %v4887_v38, %v4883_v52 }
 0x9fa   :  { %4541 = vmatmul.mubr.f32.vlgmr.msra.gmra.mrb[32].mxu0 %v14054_v50  ;;  %4612 = vmatmul.mubr.f32.vlgmr.msra.gmra.mrb[36].mxu1 %v14054_v50  ;;  %v14166_v30 = vpack.c.bf16 %v4870_v4, %v4866_v16  ;;  %v14187_v44 = vpack.c.bf16 %v4884_v53, %v4880_v20  ;;  %v4882_v63 = vld [vmem:[#allocation13 + $0x110] sm:$0xff]  ;;  %v4897_v20 = vld [vmem:[#allocation13 + $0x188] sm:$0xff] }
 0x9fb   :  { %10544 = vmatpush1.bf16.msra.mxu0 %v14050_v29  ;;  %10575 = vmatpush3.bf16.msra.mxu1 %v14052_v28  ;;  %16012 = vst [vmem:[#allocation22_spill] sm:$0xff] %v14185_v10  ;;  %v4886_v16 = vld [vmem:[#allocation13 + $0x130] sm:$0xff]  ;;  %v4901_v53 = vld [vmem:[#allocation13 + $0x1a8] sm:$0xff] }
 0x9fc   :  { %10546 = vmatprep.subr.bf16.mxu0 %v14056_v2  ;;  %10576 = vmatprep.subr.bf16.mxu1 %v15675_v3  ;;  %16013 = vst [vmem:[#allocation23_spill] sm:$0xff] %v14187_v44  ;;  %v14190_v4 = vpack.c.bf16 %v4886_v16, %v4882_v63  ;;  %v4894_v52 = vld [vmem:[#allocation13 + $0x170] sm:$0xff]  ;;  %v4899_v63 = vld [vmem:[#allocation13 + $0x198] sm:$0xff]  ;;  %v14207_v16 = vpack.c.bf16 %v4901_v53, %v4897_v20  ;;  %v4909_v20 = vld [vmem:[#allocation13 + $0x1e8] sm:$0xff] }
 0x9fd   :  { %4750 = vmatprep.mubr.f32.mxu0 %v15680_v17  ;;  %8769 = vmatprep.mubr.msk.f32.mxu1 %vm12211_vm0, %v15680_v17  ;;  %v14202_v38 = vpack.c.bf16 %v4894_v52, %v4890_v26  ;;  %v14209_v54 = vpack.c.bf16 %v4903_v39, %v4899_v63  ;;  %v4902_v26 = vld [vmem:[#allocation13 + $0x1b0] sm:$0xff]  ;;  %v4907_v53 = vld [vmem:[#allocation13 + $0x1d8] sm:$0xff]  ;;  %v4904_v39 = vld [vmem:[#allocation13 + $0x1c0] sm:$0xff] }
 0x9fe   :  { %16014 = vst [vmem:[#allocation24_spill] sm:$0xff] %v14190_v4  ;;  %16019 = vst [vmem:[#allocation29_spill] sm:$0xff] %v14207_v16  ;;  %v14214_v52 = vpack.c.bf16 %v4902_v26, %v4898_v62  ;;  %v4911_v63 = vld [vmem:[#allocation13 + $0x1f8] sm:$0xff]  ;;  %v4906_v62 = vld [vmem:[#allocation13 + $0x1d0] sm:$0xff] }
 0x9ff   :  { %10548 = vmatpush1.bf16.msra.mxu0 %v14062_v21  ;;  %10578 = vmatpush3.bf16.msra.mxu1 %v14064_v32  ;;  %16018 = vst [vmem:[#allocation28_spill] sm:$0xff] %v14202_v38  ;;  %16020 = vst [vmem:[#allocation30_spill] sm:$0xff] %v14209_v54  ;;  %v14221_v22 = vpack.c.bf16 %v4911_v63, %v4907_v53  ;;  %v4910_v26 = vld [vmem:[#allocation13 + $0x1f0] sm:$0xff]  ;;  %v4919_v53 = vld [vmem:[#allocation13 + $0x238] sm:$0xff] }
 0xa00   :  { %10550 = vmatprep.subr.bf16.mxu0 %v14068_v34  ;;  %10579 = vmatprep.subr.bf16.mxu1 %v15675_v3  ;;  %16022 = vst [vmem:[#allocation32_spill] sm:$0xff] %v14214_v52  ;;  %v4912_v63 = vld [vmem:[#allocation13 + $0x200] sm:$0xff] }
 0xa01   :  { %16024 = vst [vmem:[#allocation34_spill] sm:$0xff] %v14221_v22 }
 0xa03   :  { %10552 = vmatpush1.bf16.msra.mxu0 %v14075_v55  ;;  %10581 = vmatpush3.bf16.msra.mxu1 %v14077_v9 }
 0xa04   :  { %10554 = vmatprep.subr.bf16.mxu0 %v14081_v60  ;;  %10582 = vmatprep.subr.bf16.mxu1 %v15675_v3 }
 0xa07   :  { %10556 = vmatpush1.bf16.msra.mxu0 %v14085_v40  ;;  %10584 = vmatpush3.bf16.msra.mxu1 %v14087_v24 }
 0xa08   :  { %10558 = vmatprep.subr.bf16.mxu0 %v14091_v36  ;;  %10585 = vmatprep.subr.bf16.mxu1 %v15675_v3 }
 0xa0b   :  { %10560 = vmatpush1.bf16.msra.mxu0 %v14095_v12  ;;  %10587 = vmatpush3.bf16.msra.mxu1 %v14097_v13 }
 0xa0c   :  { %10562 = vmatprep.subr.bf16.mxu0 %v14101_v14  ;;  %10588 = vmatprep.subr.bf16.mxu1 %v15675_v3 }
 0xa0f   :  { %10564 = vmatpush1.bf16.msra.mxu0 %v14105_v25  ;;  %10590 = vmatpush3.bf16.msra.mxu1 %v14107_v27 }
 0xa10   :  { %10566 = vmatprep.subr.bf16.mxu0 %v14111_v46  ;;  %10591 = vmatprep.subr.bf16.mxu1 %v15675_v3 }
 0xa13   :  { %10568 = vmatpush1.bf16.msra.mxu0 %v14115_v35  ;;  %10593 = vmatpush3.bf16.msra.mxu1 %v14117_v0 }
 0xa14   :  { %10570 = vmatprep.subr.bf16.mxu0 %v14121_v11  ;;  %10594 = vmatprep.subr.bf16.mxu1 %v15675_v3 }
 0xa17   :  { %10572 = vmatpush1.bf16.msra.mxu0 %v14125_v43  ;;  %10596 = vmatpush3.bf16.msra.mxu1 %v14127_v7 }
 0xa18   :  { %10598 = vmatprep.subr.bf16.mxu0 %v14135_v49  ;;  %10662 = vmatprep.subr.bf16.mxu1 %v14137_v33 }
 0xa1a   :  { %4751 = vmatmul.mubr.f32.vlgmr.msra.gmra.mrb[34].mxu0 %v14054_v50  ;;  %8770 = vmatmul.mubr.f32.vlgmr.msra.gmra.mrb[38].mxu1 %v14054_v50 }
 0xa1b   :  { %10600 = vmatpush1.bf16.msra.mxu0 %v14139_v51  ;;  %10664 = vmatpush1.bf16.msra.mxu1 %v14142_v8 }
 0xa1c   :  { %10602 = vmatprep.subr.bf16.mxu0 %v14147_v45  ;;  %10666 = vmatprep.subr.bf16.mxu1 %v14149_v56 }
 0xa1f   :  { %10604 = vmatpush1.bf16.msra.mxu0 %v14151_v5  ;;  %10668 = vmatpush1.bf16.msra.mxu1 %v14154_v6 }
 0xa20   :  { %10606 = vmatprep.subr.bf16.mxu0 %v14159_v1  ;;  %10670 = vmatprep.subr.bf16.mxu1 %v14161_v18 }
 0xa23   :  { %10608 = vmatpush1.bf16.msra.mxu0 %v14163_v58  ;;  %10672 = vmatpush1.bf16.msra.mxu1 %v14166_v30 }
 0xa24   :  { %10610 = vmatprep.subr.bf16.mxu0 %v14171_v48  ;;  %10674 = vmatprep.subr.bf16.mxu1 %v14173_v15 }
 0xa27   :  { %10612 = vmatpush1.bf16.msra.mxu0 %v14175_v61  ;;  %10676 = vmatpush1.bf16.msra.mxu1 %v14178_v31 }
 0xa28   :  { %10614 = vmatprep.subr.bf16.mxu0 %v14183_v42  ;;  %10678 = vmatprep.subr.bf16.mxu1 %v14185_v10 }
 0xa2b   :  { %10616 = vmatpush1.bf16.msra.mxu0 %v14187_v44  ;;  %10680 = vmatpush1.bf16.msra.mxu1 %v14190_v4  ;;  %v4967_v4 = vld [vmem:[#allocation13 + $0x3b8] sm:$0xff]  ;;  %v16060_v44 = vld [vmem:[#allocation66_spill] sm:$0xff] }
 0xa2c   :  { %10618 = vmatprep.subr.bf16.mxu0 %v14195_v37  ;;  %10682 = vmatprep.subr.bf16.mxu1 %v14197_v19  ;;  %v14223_v19 = vpack.c.bf16 %v4908_v23, %v4904_v39  ;;  %v4916_v39 = vld [vmem:[#allocation13 + $0x220] sm:$0xff]  ;;  %v4963_v37 = vld [vmem:[#allocation13 + $0x398] sm:$0xff] }
 0xa2e   :  { %16025 = vst [vmem:[#allocation35_spill] sm:$0xff] %v14223_v19 }
 0xa2f   :  { %10620 = vmatpush1.bf16.msra.mxu0 %v14199_v59  ;;  %10684 = vmatpush1.bf16.msra.mxu1 %v14202_v38  ;;  %v4905_v38 = vld [vmem:[#allocation13 + $0x1c8] sm:$0xff] }
 0xa30   :  { %10622 = vmatprep.subr.bf16.mxu0 %v14207_v16  ;;  %10686 = vmatprep.subr.bf16.mxu1 %v14209_v54  ;;  %v14219_v59 = vpack.c.bf16 %v4909_v20, %v4905_v38  ;;  %v14226_v54 = vpack.c.bf16 %v4910_v26, %v4906_v62  ;;  %v4917_v38 = vld [vmem:[#allocation13 + $0x228] sm:$0xff]  ;;  %v4915_v20 = vld [vmem:[#allocation13 + $0x218] sm:$0xff]  ;;  %v14235_v16 = vpack.c.bf16 %v4916_v39, %v4912_v63  ;;  %v4914_v62 = vld [vmem:[#allocation13 + $0x210] sm:$0xff] }
 0xa31   :  { %v14233_v23 = vpack.c.bf16 %v4919_v53, %v4915_v20  ;;  %v4918_v26 = vld [vmem:[#allocation13 + $0x230] sm:$0xff]  ;;  %v4927_v20 = vld [vmem:[#allocation13 + $0x278] sm:$0xff]  ;;  %v4920_v53 = vld [vmem:[#allocation13 + $0x240] sm:$0xff] }
 0xa32   :  { %16023 = vst [vmem:[#allocation33_spill] sm:$0xff] %v14219_v59  ;;  %16026 = vst [vmem:[#allocation36_spill] sm:$0xff] %v14226_v54  ;;  %v4924_v63 = vld [vmem:[#allocation13 + $0x260] sm:$0xff] }
 0xa33   :  { %10624 = vmatpush1.bf16.msra.mxu0 %v14211_v47  ;;  %10688 = vmatpush1.bf16.msra.mxu1 %v14214_v52  ;;  %v4913_v52 = vld [vmem:[#allocation13 + $0x208] sm:$0xff]  ;;  %16028 = vst [vmem:[#allocation38_spill] sm:$0xff] %v14233_v23  ;;  %16029 = vst [vmem:[#allocation39_spill] sm:$0xff] %v14235_v16 }
 0xa34   :  { %10626 = vmatprep.subr.bf16.mxu0 %v14219_v59  ;;  %10690 = vmatprep.subr.bf16.mxu1 %v14221_v22  ;;  %v14231_v47 = vpack.c.bf16 %v4917_v38, %v4913_v52  ;;  %v14238_v22 = vpack.c.bf16 %v4918_v26, %v4914_v62  ;;  %v4925_v52 = vld [vmem:[#allocation13 + $0x268] sm:$0xff]  ;;  %v4923_v38 = vld [vmem:[#allocation13 + $0x258] sm:$0xff]  ;;  %v14247_v59 = vpack.c.bf16 %v4924_v63, %v4920_v53  ;;  %v4922_v62 = vld [vmem:[#allocation13 + $0x250] sm:$0xff] }
 0xa35   :  { %v14245_v39 = vpack.c.bf16 %v4927_v20, %v4923_v38  ;;  %v4926_v26 = vld [vmem:[#allocation13 + $0x270] sm:$0xff]  ;;  %v4935_v38 = vld [vmem:[#allocation13 + $0x2b8] sm:$0xff]  ;;  %v4928_v20 = vld [vmem:[#allocation13 + $0x280] sm:$0xff] }
 0xa36   :  { %16027 = vst [vmem:[#allocation37_spill] sm:$0xff] %v14231_v47  ;;  %16030 = vst [vmem:[#allocation40_spill] sm:$0xff] %v14238_v22  ;;  %v4932_v53 = vld [vmem:[#allocation13 + $0x2a0] sm:$0xff] }
 0xa37   :  { %10628 = vmatpush1.bf16.msra.mxu0 %v14223_v19  ;;  %10692 = vmatpush1.bf16.msra.mxu1 %v14226_v54  ;;  %v4921_v54 = vld [vmem:[#allocation13 + $0x248] sm:$0xff]  ;;  %16032 = vst [vmem:[#allocation42_spill] sm:$0xff] %v14245_v39  ;;  %16033 = vst [vmem:[#allocation43_spill] sm:$0xff] %v14247_v59 }
 0xa38   :  { %10630 = vmatprep.subr.bf16.mxu0 %v14231_v47  ;;  %10694 = vmatprep.subr.bf16.mxu1 %v14233_v23  ;;  %v14243_v19 = vpack.c.bf16 %v4925_v52, %v4921_v54  ;;  %v14250_v23 = vpack.c.bf16 %v4926_v26, %v4922_v62  ;;  %v4933_v54 = vld [vmem:[#allocation13 + $0x2a8] sm:$0xff]  ;;  %v4931_v52 = vld [vmem:[#allocation13 + $0x298] sm:$0xff]  ;;  %v14259_v47 = vpack.c.bf16 %v4932_v53, %v4928_v20  ;;  %v4930_v62 = vld [vmem:[#allocation13 + $0x290] sm:$0xff] }
 0xa39   :  { %v14257_v63 = vpack.c.bf16 %v4935_v38, %v4931_v52  ;;  %v4934_v26 = vld [vmem:[#allocation13 + $0x2b0] sm:$0xff]  ;;  %v4943_v52 = vld [vmem:[#allocation13 + $0x2f8] sm:$0xff]  ;;  %v4936_v38 = vld [vmem:[#allocation13 + $0x2c0] sm:$0xff] }
 0xa3a   :  { %16031 = vst [vmem:[#allocation41_spill] sm:$0xff] %v14243_v19  ;;  %16034 = vst [vmem:[#allocation44_spill] sm:$0xff] %v14250_v23  ;;  %v4940_v20 = vld [vmem:[#allocation13 + $0x2e0] sm:$0xff] }
 0xa3b   :  { %10632 = vmatpush1.bf16.msra.mxu0 %v14235_v16  ;;  %10696 = vmatpush1.bf16.msra.mxu1 %v14238_v22  ;;  %v4929_v22 = vld [vmem:[#allocation13 + $0x288] sm:$0xff]  ;;  %16036 = vst [vmem:[#allocation46_spill] sm:$0xff] %v14257_v63  ;;  %16037 = vst [vmem:[#allocation47_spill] sm:$0xff] %v14259_v47 }
 0xa3c   :  { %10634 = vmatprep.subr.bf16.mxu0 %v14243_v19  ;;  %10698 = vmatprep.subr.bf16.mxu1 %v14245_v39  ;;  %v14255_v16 = vpack.c.bf16 %v4933_v54, %v4929_v22  ;;  %v14262_v39 = vpack.c.bf16 %v4934_v26, %v4930_v62  ;;  %v4941_v22 = vld [vmem:[#allocation13 + $0x2e8] sm:$0xff]  ;;  %v4939_v54 = vld [vmem:[#allocation13 + $0x2d8] sm:$0xff]  ;;  %v14271_v19 = vpack.c.bf16 %v4940_v20, %v4936_v38  ;;  %v4938_v62 = vld [vmem:[#allocation13 + $0x2d0] sm:$0xff] }
 0xa3d   :  { %v14269_v53 = vpack.c.bf16 %v4943_v52, %v4939_v54  ;;  %v4942_v26 = vld [vmem:[#allocation13 + $0x2f0] sm:$0xff]  ;;  %v4951_v54 = vld [vmem:[#allocation13 + $0x338] sm:$0xff]  ;;  %v4944_v52 = vld [vmem:[#allocation13 + $0x300] sm:$0xff] }
 0xa3e   :  { %16035 = vst [vmem:[#allocation45_spill] sm:$0xff] %v14255_v16  ;;  %16038 = vst [vmem:[#allocation48_spill] sm:$0xff] %v14262_v39  ;;  %v4948_v38 = vld [vmem:[#allocation13 + $0x320] sm:$0xff] }
 0xa3f   :  { %10636 = vmatpush1.bf16.msra.mxu0 %v14247_v59  ;;  %10700 = vmatpush1.bf16.msra.mxu1 %v14250_v23  ;;  %v4937_v23 = vld [vmem:[#allocation13 + $0x2c8] sm:$0xff]  ;;  %16040 = vst [vmem:[#allocation50_spill] sm:$0xff] %v14269_v53  ;;  %16041 = vst [vmem:[#allocation51_spill] sm:$0xff] %v14271_v19 }
 0xa40   :  { %10638 = vmatprep.subr.bf16.mxu0 %v14255_v16  ;;  %10702 = vmatprep.subr.bf16.mxu1 %v14257_v63  ;;  %v14267_v59 = vpack.c.bf16 %v4941_v22, %v4937_v23  ;;  %v14274_v63 = vpack.c.bf16 %v4942_v26, %v4938_v62  ;;  %v4949_v23 = vld [vmem:[#allocation13 + $0x328] sm:$0xff]  ;;  %v4947_v22 = vld [vmem:[#allocation13 + $0x318] sm:$0xff]  ;;  %v14283_v16 = vpack.c.bf16 %v4948_v38, %v4944_v52  ;;  %v4946_v62 = vld [vmem:[#allocation13 + $0x310] sm:$0xff] }
 0xa41   :  { %v14281_v20 = vpack.c.bf16 %v4951_v54, %v4947_v22  ;;  %v4950_v26 = vld [vmem:[#allocation13 + $0x330] sm:$0xff]  ;;  %v4959_v22 = vld [vmem:[#allocation13 + $0x378] sm:$0xff]  ;;  %v4952_v54 = vld [vmem:[#allocation13 + $0x340] sm:$0xff] }
 0xa42   :  { %16039 = vst [vmem:[#allocation49_spill] sm:$0xff] %v14267_v59  ;;  %16042 = vst [vmem:[#allocation52_spill] sm:$0xff] %v14274_v63  ;;  %v4956_v52 = vld [vmem:[#allocation13 + $0x360] sm:$0xff] }
 0xa43   :  { %10640 = vmatpush1.bf16.msra.mxu0 %v14259_v47  ;;  %10704 = vmatpush1.bf16.msra.mxu1 %v14262_v39  ;;  %v4945_v39 = vld [vmem:[#allocation13 + $0x308] sm:$0xff]  ;;  %16044 = vst [vmem:[#allocation54_spill] sm:$0xff] %v14281_v20  ;;  %16045 = vst [vmem:[#allocation55_spill] sm:$0xff] %v14283_v16 }
 0xa44   :  { %10642 = vmatprep.subr.bf16.mxu0 %v14267_v59  ;;  %10706 = vmatprep.subr.bf16.mxu1 %v14269_v53  ;;  %v14279_v47 = vpack.c.bf16 %v4949_v23, %v4945_v39  ;;  %v14286_v53 = vpack.c.bf16 %v4950_v26, %v4946_v62  ;;  %v4957_v39 = vld [vmem:[#allocation13 + $0x368] sm:$0xff]  ;;  %v4955_v23 = vld [vmem:[#allocation13 + $0x358] sm:$0xff]  ;;  %v14295_v59 = vpack.c.bf16 %v4956_v52, %v4952_v54  ;;  %v4954_v62 = vld [vmem:[#allocation13 + $0x350] sm:$0xff] }
 0xa45   :  { %v14293_v38 = vpack.c.bf16 %v4959_v22, %v4955_v23  ;;  %v4958_v26 = vld [vmem:[#allocation13 + $0x370] sm:$0xff]  ;;  %v4960_v23 = vld [vmem:[#allocation13 + $0x380] sm:$0xff] }
 0xa46   :  { %16043 = vst [vmem:[#allocation53_spill] sm:$0xff] %v14279_v47  ;;  %16046 = vst [vmem:[#allocation56_spill] sm:$0xff] %v14286_v53  ;;  %v4964_v22 = vld [vmem:[#allocation13 + $0x3a0] sm:$0xff]  ;;  %v4962_v54 = vld [vmem:[#allocation13 + $0x390] sm:$0xff] }
 0xa47   :  { %10644 = vmatpush1.bf16.msra.mxu0 %v14271_v19  ;;  %10708 = vmatpush1.bf16.msra.mxu1 %v14274_v63  ;;  %v4953_v63 = vld [vmem:[#allocation13 + $0x348] sm:$0xff]  ;;  %16048 = vst [vmem:[#allocation58_spill] sm:$0xff] %v14293_v38  ;;  %16049 = vst [vmem:[#allocation59_spill] sm:$0xff] %v14295_v59  ;;  %v14307_v52 = vpack.c.bf16 %v4964_v22, %v4960_v23  ;;  %v4974_v23 = vld [vmem:[#allocation13 + $0x3f0] sm:$0xff] }
 0xa48   :  { %10646 = vmatprep.subr.bf16.mxu0 %v14279_v47  ;;  %10710 = vmatprep.subr.bf16.mxu1 %v14281_v20  ;;  %v14291_v19 = vpack.c.bf16 %v4957_v39, %v4953_v63  ;;  %v4961_v47 = vld [vmem:[#allocation13 + $0x388] sm:$0xff]  ;;  %v14304_v39 = vpack.c.bf16 %v4967_v4, %v4963_v37  ;;  %v4971_v4 = vld [vmem:[#allocation13 + $0x3d8] sm:$0xff] }
 0xa49   :  { %v4965_v20 = vld [vmem:[#allocation13 + $0x3a8] sm:$0xff]  ;;  %16053 = vst [vmem:[#allocation63_spill] sm:$0xff] %v14307_v52  ;;  %v4975_v37 = vld [vmem:[#allocation13 + $0x3f8] sm:$0xff] }
 0xa4a   :  { %16047 = vst [vmem:[#allocation57_spill] sm:$0xff] %v14291_v19  ;;  %v14302_v63 = vpack.c.bf16 %v4965_v20, %v4961_v47  ;;  %16052 = vst [vmem:[#allocation62_spill] sm:$0xff] %v14304_v39  ;;  %v4968_v20 = vld [vmem:[#allocation13 + $0x3c0] sm:$0xff] }
 0xa4b   :  { %10648 = vmatpush1.bf16.msra.mxu0 %v14283_v16  ;;  %10712 = vmatpush1.bf16.msra.mxu1 %v14286_v53  ;;  %v14298_v16 = vpack.c.bf16 %v4958_v26, %v4954_v62  ;;  %v4966_v62 = vld [vmem:[#allocation13 + $0x3b0] sm:$0xff]  ;;  %v4969_v26 = vld [vmem:[#allocation13 + $0x3c8] sm:$0xff]  ;;  %v4972_v53 = vld [vmem:[#allocation13 + $0x3e0] sm:$0xff] }
 0xa4c   :  { %10650 = vmatprep.subr.bf16.mxu0 %v14291_v19  ;;  %10714 = vmatprep.subr.bf16.mxu1 %v14293_v38  ;;  %16051 = vst [vmem:[#allocation61_spill] sm:$0xff] %v14302_v63  ;;  %v4973_v19 = vld [vmem:[#allocation13 + $0x3e8] sm:$0xff]  ;;  %v14311_v38 = vpack.c.bf16 %v4966_v62, %v4962_v54  ;;  %v14318_v22 = vpack.c.bf16 %v4972_v53, %v4968_v20 }
 0xa4d   :  { %16050 = vst [vmem:[#allocation60_spill] sm:$0xff] %v14298_v16  ;;  %v14313_v47 = vpack.c.bf16 %v4973_v19, %v4969_v26 }
 0xa4e   :  { %16054 = vst [vmem:[#allocation64_spill] sm:$0xff] %v14311_v38  ;;  %16057 = vst [vmem:[#allocation70_spill] sm:$0xff] %v14318_v22 }
 0xa4f   :  { %10652 = vmatpush1.bf16.msra.mxu0 %v14295_v59  ;;  %10716 = vmatpush1.bf16.msra.mxu1 %v14298_v16  ;;  %16055 = vst [vmem:[#allocation68_spill] sm:$0xff] %v14313_v47  ;;  %v14315_v59 = vpack.c.bf16 %v4975_v37, %v4971_v4  ;;  %v4970_v16 = vld [vmem:[#allocation13 + $0x3d0] sm:$0xff] }
 0xa50   :  { %10654 = vmatprep.subr.bf16.mxu0 %v14302_v63  ;;  %10718 = vmatprep.subr.bf16.mxu1 %v14304_v39  ;;  %v14322_v54 = vpack.c.bf16 %v4974_v23, %v4970_v16 }
 0xa51   :  { %16056 = vst [vmem:[#allocation69_spill] sm:$0xff] %v14315_v59 }
 0xa52   :  { %16058 = vst [vmem:[#allocation71_spill] sm:$0xff] %v14322_v54 }
 0xa53   :  { %10656 = vmatpush1.bf16.msra.mxu0 %v14307_v52  ;;  %10720 = vmatpush1.bf16.msra.mxu1 %v14311_v38  ;;  %v16059_v52 = vld [vmem:[#allocation65_spill] sm:$0xff] }
 0xa54   :  { %10658 = vmatprep.subr.bf16.mxu0 %v14313_v47  ;;  %10722 = vmatprep.subr.bf16.mxu1 %v14315_v59 }
 0xa57   :  { %10660 = vmatpush1.bf16.msra.mxu0 %v14318_v22  ;;  %10724 = vmatpush1.bf16.msra.mxu1 %v14322_v54 }
 0xa58   :  { %10726 = vmatprep.subr.bf16.mxu0 %v14038_v57  ;;  %10757 = vmatprep.subr.bf16.mxu1 %v15675_v3 }
 0xacd   :  { %v4542_v19 = vpop.f32.mrb[32].mxu0  ;;  %v4613_v62 = vpop.f32.mrb[36].mxu1 }
 0xace   :  { %v8084_v53 = vmul.f32 -1.442695, %v4542_v19  ;;  %v4544_v26 = vpop.f32.mrb[33].mxu0  ;;  %v4615_v4 = vpop.f32.mrb[37].mxu1 }
 0xacf   :  { %v8085_v37 = vmul.f32 -1.442695, %v4544_v26 }
 0xad0   :  { %11876 = vpow2.f32 %v8084_v53 }
 0xad1   :  { %11878 = vpow2.f32 %v8085_v37 }
 0xada   :  { %v11877_v16 = vpop.eup %11876 }
 0xadb   :  { %v4621_v20 = vadd.f32 1.0, %v11877_v16  ;;  %v11879_v23 = vpop.eup %11878 }
 0xadc   :  { %v4627_v59 = vadd.f32 1.0, %v11879_v23 }
 0xadd   :  { %11880 = vrcp.f32 %v4621_v20 }
 0xade   :  { %11882 = vrcp.f32 %v4627_v59 }
 0xae7   :  { %v11881_v22 = vpop.eup %11880 }
 0xae8   :  { %v4630_v54 = vmul.f32 %v11881_v22, %v4615_v4  ;;  %v11883_v37 = vpop.eup %11882 }
 0xae9   :  { %v4633_v20 = vsub.f32 1.0, %v11883_v37  ;;  %v4635_v59 = vmul.f32 %v11883_v37, %v14044_v41 }
 0xaea   :  { %v4631_v47 = vadd.f32 %v4630_v54, %v4613_v62 }
 0xaec   :  { %11884 = vtanh.f32 %v4631_v47 }
 0xaed   :  { %v4752_v57 = vpop.f32.mrb[34].mxu0  ;;  %v4823_v38 = vpop.f32.mrb[38].mxu1 }
 0xaee   :  { %v4827_v39 = vadd.f32 %v4752_v57, %v16059_v52  ;;  %v4754_v19 = vpop.f32.mrb[35].mxu0  ;;  %v8771_v63 = vpop.f32.mrb[39].mxu1 }
 0xaef   :  { %v4834_v53 = vadd.f32 %v4754_v19, %v16060_v44 }
 0xaf0   :  { %v8086_v26 = vmul.f32 -1.442695, %v4827_v39 }
 0xaf1   :  { %v8087_v16 = vmul.f32 -1.442695, %v4834_v53 }
 0xaf2   :  { %11886 = vpow2.f32 %v8086_v26 }
 0xaf3   :  { %11888 = vpow2.f32 %v8087_v16 }
 0xaf6   :  { %v11885_v10 = vpop.eup %11884 }
 0xaf7   :  { %v4634_v23 = vmul.f32 %v11885_v10, %v4633_v20  ;;  %v16061_v10 = vld [vmem:[#allocation67_spill] sm:$0xff]  ;;  %v16104_v20 = vld [vmem:[#allocation64_spill] sm:$0xff] }
 0xaf9   :  { %v14332_v22 = vadd.f32 %v4635_v59, %v4634_v23  ;;  %v16105_v23 = vld [vmem:[#allocation68_spill] sm:$0xff]  ;;  %v16106_v59 = vld [vmem:[#allocation69_spill] sm:$0xff] }
 0xafb   :  { %4637 = vst [vmem:[#allocation2 + $0x7] sm:$0x1] %v14332_v22  ;;  %5040 = vmatprep.mubr.f32.mxu0 %v14332_v22  ;;  %5111 = vmatprep.mubr.f32.mxu1 %v14332_v22 }
 0xafc   :  { %v11887_v63 = vpop.eup %11886 }
 0xafd   :  { %v4831_v47 = vadd.f32 1.0, %v11887_v63  ;;  %v11889_v39 = vpop.eup %11888  ;;  %v16107_v63 = vld [vmem:[#allocation70_spill] sm:$0xff] }
 0xafe   :  { %v4838_v54 = vadd.f32 1.0, %v11889_v39  ;;  %v5658_v39 = vld [vmem:[#allocation12 + $0x8] sm:$0xff] }
 0xaff   :  { %11890 = vrcp.f32 %v4831_v47  ;;  %v16108_v47 = vld [vmem:[#allocation71_spill] sm:$0xff] }
 0xb00   :  { %11892 = vrcp.f32 %v4838_v54  ;;  %v5661_v54 = vld [vmem:[#allocation12 + $0x20] sm:$0xff] }
 0xb09   :  { %v11891_v62 = vpop.eup %11890 }
 0xb0a   :  { %v4841_v4 = vmul.f32 %v11891_v62, %v4823_v38  ;;  %v11893_v41 = vpop.eup %11892  ;;  %v16103_v38 = vld [vmem:[#allocation63_spill] sm:$0xff]  ;;  %v14443_v62 = vpack.c.bf16 %v5661_v54, %v5658_v39  ;;  %v5666_v54 = vld [vmem:[#allocation12 + $0x48] sm:$0xff] }
 0xb0b   :  { %v4844_v19 = vsub.f32 1.0, %v11893_v41  ;;  %v4846_v37 = vmul.f32 %v11893_v41, %v14054_v50  ;;  %v16064_v50 = vld [vmem:[#allocation24_spill] sm:$0xff] }
 0xb0c   :  { %v4842_v57 = vadd.f32 %v4841_v4, %v16061_v10 }
 0xb0e   :  { %11894 = vtanh.f32 %v4842_v57 }
 0xb18   :  { %v11895_v53 = vpop.eup %11894 }
 0xb19   :  { %v4845_v26 = vmul.f32 %v11895_v53, %v4844_v19 }
 0xb1b   :  { %v14339_v16 = vadd.f32 %v4846_v37, %v4845_v26 }
 0xb1d   :  { %5041 = vmatmul.mubr.f32.vlgmr.msra.gmra.mrb[36].mxu0 %v14339_v16  ;;  %5112 = vmatmul.mubr.f32.vlgmr.msra.gmra.mrb[40].mxu1 %v14339_v16 }
 0xb1e   :  { %10728 = vmatpush1.bf16.msra.mxu0 %v14050_v29  ;;  %10759 = vmatpush3.bf16.msra.mxu1 %v14052_v28  ;;  %v16062_v29 = vld [vmem:[#allocation22_spill] sm:$0xff]  ;;  %v16063_v28 = vld [vmem:[#allocation23_spill] sm:$0xff] }
 0xb1f   :  { %10730 = vmatprep.subr.bf16.mxu0 %v14056_v2  ;;  %10760 = vmatprep.subr.bf16.mxu1 %v15675_v3  ;;  %v16065_v2 = vld [vmem:[#allocation25_spill] sm:$0xff] }
 0xb20   :  { %5250 = vmatprep.mubr.f32.mxu0 %v15680_v17  ;;  %8804 = vmatprep.mubr.msk.f32.mxu1 %vm12211_vm0, %v15680_v17 }
 0xb22   :  { %10732 = vmatpush1.bf16.msra.mxu0 %v14062_v21  ;;  %10762 = vmatpush3.bf16.msra.mxu1 %v14064_v32  ;;  %v16066_v21 = vld [vmem:[#allocation26_spill] sm:$0xff]  ;;  %v16067_v32 = vld [vmem:[#allocation27_spill] sm:$0xff] }
 0xb23   :  { %10734 = vmatprep.subr.bf16.mxu0 %v14068_v34  ;;  %10763 = vmatprep.subr.bf16.mxu1 %v15675_v3  ;;  %v16068_v34 = vld [vmem:[#allocation28_spill] sm:$0xff] }
 0xb26   :  { %10736 = vmatpush1.bf16.msra.mxu0 %v14075_v55  ;;  %10765 = vmatpush3.bf16.msra.mxu1 %v14077_v9  ;;  %v16069_v55 = vld [vmem:[#allocation29_spill] sm:$0xff]  ;;  %v16070_v9 = vld [vmem:[#allocation30_spill] sm:$0xff] }
 0xb27   :  { %10738 = vmatprep.subr.bf16.mxu0 %v14081_v60  ;;  %10766 = vmatprep.subr.bf16.mxu1 %v15675_v3  ;;  %v16071_v60 = vld [vmem:[#allocation31_spill] sm:$0xff] }
 0xb2a   :  { %10740 = vmatpush1.bf16.msra.mxu0 %v14085_v40  ;;  %10768 = vmatpush3.bf16.msra.mxu1 %v14087_v24  ;;  %v16072_v40 = vld [vmem:[#allocation32_spill] sm:$0xff]  ;;  %v16073_v24 = vld [vmem:[#allocation33_spill] sm:$0xff] }
 0xb2b   :  { %10742 = vmatprep.subr.bf16.mxu0 %v14091_v36  ;;  %10769 = vmatprep.subr.bf16.mxu1 %v15675_v3  ;;  %v16074_v36 = vld [vmem:[#allocation34_spill] sm:$0xff] }
 0xb2e   :  { %10744 = vmatpush1.bf16.msra.mxu0 %v14095_v12  ;;  %10771 = vmatpush3.bf16.msra.mxu1 %v14097_v13  ;;  %v16075_v12 = vld [vmem:[#allocation35_spill] sm:$0xff]  ;;  %v16076_v13 = vld [vmem:[#allocation36_spill] sm:$0xff] }
 0xb2f   :  { %10746 = vmatprep.subr.bf16.mxu0 %v14101_v14  ;;  %10772 = vmatprep.subr.bf16.mxu1 %v15675_v3  ;;  %v16077_v14 = vld [vmem:[#allocation37_spill] sm:$0xff] }
 0xb32   :  { %10748 = vmatpush1.bf16.msra.mxu0 %v14105_v25  ;;  %10774 = vmatpush3.bf16.msra.mxu1 %v14107_v27  ;;  %v16078_v25 = vld [vmem:[#allocation38_spill] sm:$0xff]  ;;  %v16079_v27 = vld [vmem:[#allocation39_spill] sm:$0xff] }
 0xb33   :  { %10750 = vmatprep.subr.bf16.mxu0 %v14111_v46  ;;  %10775 = vmatprep.subr.bf16.mxu1 %v15675_v3  ;;  %v16080_v46 = vld [vmem:[#allocation40_spill] sm:$0xff] }
 0xb36   :  { %10752 = vmatpush1.bf16.msra.mxu0 %v14115_v35  ;;  %10777 = vmatpush3.bf16.msra.mxu1 %v14117_v0  ;;  %v16081_v35 = vld [vmem:[#allocation41_spill] sm:$0xff]  ;;  %v16082_v0 = vld [vmem:[#allocation42_spill] sm:$0xff] }
 0xb37   :  { %10754 = vmatprep.subr.bf16.mxu0 %v14121_v11  ;;  %10778 = vmatprep.subr.bf16.mxu1 %v15675_v3  ;;  %v16083_v11 = vld [vmem:[#allocation43_spill] sm:$0xff] }
 0xb3a   :  { %10756 = vmatpush1.bf16.msra.mxu0 %v14125_v43  ;;  %10780 = vmatpush3.bf16.msra.mxu1 %v14127_v7  ;;  %v16084_v43 = vld [vmem:[#allocation44_spill] sm:$0xff]  ;;  %v16085_v7 = vld [vmem:[#allocation45_spill] sm:$0xff] }
 0xb3b   :  { %10782 = vmatprep.subr.bf16.mxu0 %v14135_v49  ;;  %10846 = vmatprep.subr.bf16.mxu1 %v14137_v33  ;;  %v16086_v49 = vld [vmem:[#allocation46_spill] sm:$0xff]  ;;  %v16087_v33 = vld [vmem:[#allocation47_spill] sm:$0xff] }
 0xb3d   :  { %5251 = vmatmul.mubr.f32.vlgmr.msra.gmra.mrb[38].mxu0 %v14339_v16  ;;  %8805 = vmatmul.mubr.f32.vlgmr.msra.gmra.mrb[42].mxu1 %v14339_v16 }
 0xb3e   :  { %10784 = vmatpush1.bf16.msra.mxu0 %v14139_v51  ;;  %10848 = vmatpush1.bf16.msra.mxu1 %v14142_v8  ;;  %v16088_v51 = vld [vmem:[#allocation48_spill] sm:$0xff]  ;;  %v16089_v8 = vld [vmem:[#allocation49_spill] sm:$0xff] }
 0xb3f   :  { %10786 = vmatprep.subr.bf16.mxu0 %v14147_v45  ;;  %10850 = vmatprep.subr.bf16.mxu1 %v14149_v56  ;;  %v16090_v45 = vld [vmem:[#allocation50_spill] sm:$0xff]  ;;  %v16091_v56 = vld [vmem:[#allocation51_spill] sm:$0xff] }
 0xb42   :  { %10788 = vmatpush1.bf16.msra.mxu0 %v14151_v5  ;;  %10852 = vmatpush1.bf16.msra.mxu1 %v14154_v6  ;;  %v16092_v5 = vld [vmem:[#allocation52_spill] sm:$0xff]  ;;  %v16093_v6 = vld [vmem:[#allocation53_spill] sm:$0xff] }
 0xb43   :  { %10790 = vmatprep.subr.bf16.mxu0 %v14159_v1  ;;  %10854 = vmatprep.subr.bf16.mxu1 %v14161_v18  ;;  %v16094_v1 = vld [vmem:[#allocation54_spill] sm:$0xff]  ;;  %v16095_v18 = vld [vmem:[#allocation55_spill] sm:$0xff] }
 0xb46   :  { %10792 = vmatpush1.bf16.msra.mxu0 %v14163_v58  ;;  %10856 = vmatpush1.bf16.msra.mxu1 %v14166_v30  ;;  %v16096_v58 = vld [vmem:[#allocation56_spill] sm:$0xff]  ;;  %v16097_v30 = vld [vmem:[#allocation57_spill] sm:$0xff] }
 0xb47   :  { %10794 = vmatprep.subr.bf16.mxu0 %v14171_v48  ;;  %10858 = vmatprep.subr.bf16.mxu1 %v14173_v15  ;;  %v16098_v48 = vld [vmem:[#allocation58_spill] sm:$0xff]  ;;  %v16099_v15 = vld [vmem:[#allocation59_spill] sm:$0xff] }
 0xb4a   :  { %10796 = vmatpush1.bf16.msra.mxu0 %v14175_v61  ;;  %10860 = vmatpush1.bf16.msra.mxu1 %v14178_v31  ;;  %v16100_v61 = vld [vmem:[#allocation60_spill] sm:$0xff]  ;;  %v16101_v31 = vld [vmem:[#allocation61_spill] sm:$0xff] }
 0xb4b   :  { %10798 = vmatprep.subr.bf16.mxu0 %v14183_v42  ;;  %10862 = vmatprep.subr.bf16.mxu1 %v16062_v29  ;;  %v16102_v42 = vld [vmem:[#allocation62_spill] sm:$0xff] }
 0xb4e   :  { %10800 = vmatpush1.bf16.msra.mxu0 %v16063_v28  ;;  %10864 = vmatpush1.bf16.msra.mxu1 %v16064_v50 }
 0xb4f   :  { %10802 = vmatprep.subr.bf16.mxu0 %v16065_v2  ;;  %10866 = vmatprep.subr.bf16.mxu1 %v16066_v21 }
 0xb52   :  { %10804 = vmatpush1.bf16.msra.mxu0 %v16067_v32  ;;  %10868 = vmatpush1.bf16.msra.mxu1 %v16068_v34 }
 0xb53   :  { %10806 = vmatprep.subr.bf16.mxu0 %v16069_v55  ;;  %10870 = vmatprep.subr.bf16.mxu1 %v16070_v9 }
 0xb56   :  { %10808 = vmatpush1.bf16.msra.mxu0 %v16071_v60  ;;  %10872 = vmatpush1.bf16.msra.mxu1 %v16072_v40 }
 0xb57   :  { %10810 = vmatprep.subr.bf16.mxu0 %v16073_v24  ;;  %10874 = vmatprep.subr.bf16.mxu1 %v16074_v36 }
 0xb5a   :  { %10812 = vmatpush1.bf16.msra.mxu0 %v16075_v12  ;;  %10876 = vmatpush1.bf16.msra.mxu1 %v16076_v13 }
 0xb5b   :  { %10814 = vmatprep.subr.bf16.mxu0 %v16077_v14  ;;  %10878 = vmatprep.subr.bf16.mxu1 %v16078_v25 }
 0xb5e   :  { %10816 = vmatpush1.bf16.msra.mxu0 %v16079_v27  ;;  %10880 = vmatpush1.bf16.msra.mxu1 %v16080_v46 }
 0xb5f   :  { %10818 = vmatprep.subr.bf16.mxu0 %v16081_v35  ;;  %10882 = vmatprep.subr.bf16.mxu1 %v16082_v0 }
 0xb62   :  { %10820 = vmatpush1.bf16.msra.mxu0 %v16083_v11  ;;  %10884 = vmatpush1.bf16.msra.mxu1 %v16084_v43 }
 0xb63   :  { %10822 = vmatprep.subr.bf16.mxu0 %v16085_v7  ;;  %10886 = vmatprep.subr.bf16.mxu1 %v16086_v49 }
 0xb66   :  { %10824 = vmatpush1.bf16.msra.mxu0 %v16087_v33  ;;  %10888 = vmatpush1.bf16.msra.mxu1 %v16088_v51 }
 0xb67   :  { %10826 = vmatprep.subr.bf16.mxu0 %v16089_v8  ;;  %10890 = vmatprep.subr.bf16.mxu1 %v16090_v45 }
 0xb6a   :  { %10828 = vmatpush1.bf16.msra.mxu0 %v16091_v56  ;;  %10892 = vmatpush1.bf16.msra.mxu1 %v16092_v5  ;;  %v5356_v5 = vrot.slane %v14339_v16, 7 }
 0xb6b   :  { %10830 = vmatprep.subr.bf16.mxu0 %v16093_v6  ;;  %10894 = vmatprep.subr.bf16.mxu1 %v16094_v1 }
 0xb6e   :  { %10832 = vmatpush1.bf16.msra.mxu0 %v16095_v18  ;;  %10896 = vmatpush1.bf16.msra.mxu1 %v16096_v58 }
 0xb6f   :  { %10834 = vmatprep.subr.bf16.mxu0 %v16097_v30  ;;  %10898 = vmatprep.subr.bf16.mxu1 %v16098_v48  ;;  %v5657_v48 = vld [vmem:[#allocation12] sm:$0xff] }
 0xb72   :  { %10836 = vmatpush1.bf16.msra.mxu0 %v16099_v15  ;;  %10900 = vmatpush1.bf16.msra.mxu1 %v16100_v61  ;;  %v5660_v61 = vld [vmem:[#allocation12 + $0x18] sm:$0xff] }
 0xb73   :  { %10838 = vmatprep.subr.bf16.mxu0 %v16101_v31  ;;  %10902 = vmatprep.subr.bf16.mxu1 %v16102_v42  ;;  %v5659_v31 = vld [vmem:[#allocation12 + $0x10] sm:$0xff]  ;;  %v5662_v42 = vld [vmem:[#allocation12 + $0x28] sm:$0xff] }
 0xb74   :  { %v14459_v16 = vpack.c.bf16 %v5662_v42, %v5659_v31  ;;  %v5698_v31 = vld [vmem:[#allocation12 + $0x148] sm:$0xff]  ;;  %v5700_v42 = vld [vmem:[#allocation12 + $0x158] sm:$0xff] }
 0xb76   :  { %10840 = vmatpush1.bf16.msra.mxu0 %v16103_v38  ;;  %10904 = vmatpush1.bf16.msra.mxu1 %v16104_v20  ;;  %v5664_v38 = vld [vmem:[#allocation12 + $0x38] sm:$0xff]  ;;  %v5667_v20 = vld [vmem:[#allocation12 + $0x50] sm:$0xff] }
 0xb77   :  { %10842 = vmatprep.subr.bf16.mxu0 %v16105_v23  ;;  %10906 = vmatprep.subr.bf16.mxu1 %v16106_v59  ;;  %v14457_v59 = vpack.c.bf16 %v5660_v61, %v5657_v48  ;;  %v14464_v39 = vpack.c.bf16 %v5667_v20, %v5664_v38  ;;  %v5695_v61 = vld [vmem:[#allocation12 + $0x130] sm:$0xff] }
 0xb78   :  { %v5703_v38 = vld [vmem:[#allocation12 + $0x170] sm:$0xff] }
 0xb7a   :  { %10844 = vmatpush1.bf16.msra.mxu0 %v16107_v63  ;;  %10908 = vmatpush1.bf16.msra.mxu1 %v16108_v47  ;;  %v5663_v63 = vld [vmem:[#allocation12 + $0x30] sm:$0xff] }
 0xb7b   :  { %10941 = vmatprep.subr.bf16.mxu1 %v15675_v3  ;;  %10910 = vmatprep.subr.bf16.mxu0 %v14443_v62 }
 0xbf0   :  { %v5042_v4 = vpop.f32.mrb[36].mxu0  ;;  %v5113_v57 = vpop.f32.mrb[40].mxu1 }
 0xbf1   :  { %v8088_v41 = vmul.f32 -1.442695, %v5042_v4  ;;  %v5044_v19 = vpop.f32.mrb[37].mxu0  ;;  %v5115_v53 = vpop.f32.mrb[41].mxu1  ;;  %v5665_v4 = vld [vmem:[#allocation12 + $0x40] sm:$0xff] }
 0xbf2   :  { %v8089_v26 = vmul.f32 -1.442695, %v5044_v19  ;;  %v5673_v19 = vld [vmem:[#allocation12 + $0x80] sm:$0xff] }
 0xbf3   :  { %11896 = vpow2.f32 %v8088_v41  ;;  %v5670_v41 = vld [vmem:[#allocation12 + $0x68] sm:$0xff] }
 0xbf4   :  { %11898 = vpow2.f32 %v8089_v26 }
 0xbfd   :  { %v11897_v37 = vpop.eup %11896 }
 0xbfe   :  { %v5121_v29 = vadd.f32 1.0, %v11897_v37  ;;  %v11899_v28 = vpop.eup %11898  ;;  %v5669_v37 = vld [vmem:[#allocation12 + $0x60] sm:$0xff] }
 0xbff   :  { %v5127_v50 = vadd.f32 1.0, %v11899_v28  ;;  %v5672_v28 = vld [vmem:[#allocation12 + $0x78] sm:$0xff] }
 0xc00   :  { %11900 = vrcp.f32 %v5121_v29  ;;  %v14476_v29 = vpack.c.bf16 %v5673_v19, %v5670_v41  ;;  %v5701_v41 = vld [vmem:[#allocation12 + $0x160] sm:$0xff]  ;;  %v5704_v19 = vld [vmem:[#allocation12 + $0x178] sm:$0xff] }
 0xc01   :  { %11902 = vrcp.f32 %v5127_v50  ;;  %v5671_v50 = vld [vmem:[#allocation12 + $0x70] sm:$0xff] }
 0xc0a   :  { %v11901_v2 = vpop.eup %11900 }
 0xc0b   :  { %v5130_v21 = vmul.f32 %v11901_v2, %v5115_v53  ;;  %v11903_v13 = vpop.eup %11902  ;;  %v14470_v53 = vpack.c.bf16 %v5666_v54, %v5663_v63  ;;  %v5674_v2 = vld [vmem:[#allocation12 + $0x88] sm:$0xff]  ;;  %v14525_v63 = vpack.c.bf16 %v5698_v31, %v5695_v61  ;;  %v5699_v54 = vld [vmem:[#allocation12 + $0x150] sm:$0xff]  ;;  %v5899_v31 = vld [vmem:[#allocation13 + $0x98] sm:$0xff] }
 0xc0c   :  { %v5133_v27 = vsub.f32 1.0, %v11903_v13  ;;  %v5135_v0 = vmul.f32 %v11903_v13, %v14332_v22  ;;  %v5685_v13 = vld [vmem:[#allocation12 + $0xe0] sm:$0xff]  ;;  %v5901_v61 = vld [vmem:[#allocation13 + $0xa8] sm:$0xff] }
 0xc0d   :  { %v5131_v32 = vadd.f32 %v5130_v21, %v5113_v57  ;;  %v5668_v57 = vld [vmem:[#allocation12 + $0x58] sm:$0xff] }
 0xc0e   :  { %v14472_v26 = vpack.c.bf16 %v5668_v57, %v5665_v4  ;;  %v5676_v21 = vld [vmem:[#allocation12 + $0x98] sm:$0xff]  ;;  %v14529_v4 = vpack.c.bf16 %v5703_v38, %v5700_v42  ;;  %v5702_v57 = vld [vmem:[#allocation12 + $0x168] sm:$0xff] }
 0xc0f   :  { %11904 = vtanh.f32 %v5131_v32  ;;  %v5679_v32 = vld [vmem:[#allocation12 + $0xb0] sm:$0xff]  ;;  %v5903_v38 = vld [vmem:[#allocation13 + $0xb8] sm:$0xff] }
 0xc10   :  { %v5252_v34 = vpop.f32.mrb[38].mxu0  ;;  %v5323_v55 = vpop.f32.mrb[42].mxu1 }
 0xc11   :  { %v5328_v9 = vrot.slane %v5252_v34, 7  ;;  %v5254_v60 = vpop.f32.mrb[39].mxu0  ;;  %v8806_v40 = vpop.f32.mrb[43].mxu1  ;;  %v5348_v45 = vrot.slane %v5323_v55, 7  ;;  %v14483_v34 = vpack.c.bf16 %v5672_v28, %v5669_v37  ;;  %v14485_v55 = vpack.c.bf16 %v5674_v2, %v5671_v50  ;;  %v5881_v50 = vld [vmem:[#allocation13 + $0x8] sm:$0xff] }
 0xc12   :  { %v5338_v24 = vrot.slane %v5254_v60, 7  ;;  %v14489_v60 = vpack.c.bf16 %v5679_v32, %v5676_v21  ;;  %v5678_v40 = vld [vmem:[#allocation12 + $0xa8] sm:$0xff]  ;;  %v14533_v37 = vpack.c.bf16 %v5702_v57, %v5699_v54  ;;  %v14535_v28 = vpack.c.bf16 %v5704_v19, %v5701_v41  ;;  %v5883_v21 = vld [vmem:[#allocation13 + $0x18] sm:$0xff]  ;;  %v5896_v54 = vld [vmem:[#allocation13 + $0x80] sm:$0xff] }
 0xc13   :  { %v5330_v36 = vadd.f32 %v5328_v9, %v16059_v52  ;;  %v5675_v9 = vld [vmem:[#allocation12 + $0x90] sm:$0xff]  ;;  %v5885_v2 = vld [vmem:[#allocation13 + $0x28] sm:$0xff]  ;;  %v5900_v57 = vld [vmem:[#allocation13 + $0xa0] sm:$0xff]  ;;  %v14569_v41 = vpack.c.bf16 %v5903_v38, %v5899_v31 }
 0xc14   :  { %v5340_v12 = vadd.f32 %v5338_v24, %v16060_v44  ;;  %v5677_v24 = vld [vmem:[#allocation12 + $0xa0] sm:$0xff]  ;;  %v14543_v32 = vpack.c.bf16 %v5885_v2, %v5881_v50  ;;  %v14571_v19 = vpack.c.bf16 %v5900_v57, %v5896_v54  ;;  %v5898_v50 = vld [vmem:[#allocation13 + $0x90] sm:$0xff]  ;;  %v5919_v38 = vld [vmem:[#allocation13 + $0x138] sm:$0xff] }
 0xc15   :  { %v8090_v14 = vmul.f32 -1.442695, %v5330_v36  ;;  %v5680_v36 = vld [vmem:[#allocation12 + $0xb8] sm:$0xff]  ;;  %v5902_v2 = vld [vmem:[#allocation13 + $0xb0] sm:$0xff]  ;;  %v5912_v54 = vld [vmem:[#allocation13 + $0x100] sm:$0xff] }
 0xc16   :  { %v8091_v25 = vmul.f32 -1.442695, %v5340_v12  ;;  %v5682_v12 = vld [vmem:[#allocation12 + $0xc8] sm:$0xff]  ;;  %v5916_v57 = vld [vmem:[#allocation13 + $0x120] sm:$0xff] }
 0xc17   :  { %11906 = vpow2.f32 %v8090_v14  ;;  %v14493_v14 = vpack.c.bf16 %v5678_v40, %v5675_v9  ;;  %v5887_v9 = vld [vmem:[#allocation13 + $0x38] sm:$0xff]  ;;  %v5880_v40 = vld [vmem:[#allocation13] sm:$0xff] }
 0xc18   :  { %11908 = vpow2.f32 %v8091_v25  ;;  %v14495_v25 = vpack.c.bf16 %v5680_v36, %v5677_v24  ;;  %v5884_v24 = vld [vmem:[#allocation13 + $0x20] sm:$0xff]  ;;  %v14545_v36 = vpack.c.bf16 %v5887_v9, %v5883_v21  ;;  %v14574_v21 = vpack.c.bf16 %v5902_v2, %v5898_v50  ;;  %v5905_v9 = vld [vmem:[#allocation13 + $0xc8] sm:$0xff] }
 0xc19   :  { %v11905_v46 = vpop.eup %11904  ;;  %v14595_v2 = vpack.c.bf16 %v5916_v57, %v5912_v54  ;;  %v5922_v54 = vld [vmem:[#allocation13 + $0x150] sm:$0xff] }
 0xc1a   :  { %v5134_v35 = vmul.f32 %v11905_v46, %v5133_v27  ;;  %v5681_v27 = vld [vmem:[#allocation12 + $0xc0] sm:$0xff]  ;;  %v14499_v46 = vpack.c.bf16 %v5685_v13, %v5682_v12  ;;  %v14547_v12 = vpack.c.bf16 %v5884_v24, %v5880_v40  ;;  %v5882_v13 = vld [vmem:[#allocation13 + $0x10] sm:$0xff]  ;;  %v5909_v40 = vld [vmem:[#allocation13 + $0xe8] sm:$0xff] }
 0xc1b   :  { %v5907_v24 = vld [vmem:[#allocation13 + $0xd8] sm:$0xff]  ;;  %16112 = vst [vmem:[#allocation67_spill] sm:$0xff] %v14595_v2  ;;  %v5926_v57 = vld [vmem:[#allocation13 + $0x170] sm:$0xff] }
 0xc1c   :  { %v14449_v11 = vadd.f32 %v5135_v0, %v5134_v35  ;;  %v5684_v35 = vld [vmem:[#allocation12 + $0xd8] sm:$0xff]  ;;  %v5683_v0 = vld [vmem:[#allocation12 + $0xd0] sm:$0xff] }
 0xc1e   :  { %5137 = vst [vmem:[#allocation3] sm:$0x1] %v14449_v11  ;;  %v5361_v43 = vrot.slane %v14449_v11, 7 }
 0xc20   :  { %v5492_v7 = vrot.slane %v5361_v43, 1  ;;  %v5686_v43 = vld [vmem:[#allocation12 + $0xe8] sm:$0xff] }
 0xc21   :  { %v11907_v49 = vpop.eup %11906 }
 0xc22   :  { %v11909_v33 = vpop.eup %11908  ;;  %v5334_v51 = vadd.f32 1.0, %v11907_v49  ;;  %5559 = vmatprep.mubr.f32.mxu0 %v5492_v7  ;;  %5630 = vmatprep.mubr.f32.mxu1 %v5492_v7  ;;  %v5688_v7 = vld [vmem:[#allocation12 + $0xf8] sm:$0xff]  ;;  %v5691_v49 = vld [vmem:[#allocation12 + $0x110] sm:$0xff] }
 0xc23   :  { %v5344_v8 = vadd.f32 1.0, %v11909_v33  ;;  %v14503_v33 = vpack.c.bf16 %v5684_v35, %v5681_v27  ;;  %v5886_v27 = vld [vmem:[#allocation13 + $0x30] sm:$0xff] }
 0xc24   :  { %11910 = vrcp.f32 %v5334_v51  ;;  %v14505_v51 = vpack.c.bf16 %v5686_v43, %v5683_v0  ;;  %v14550_v35 = vpack.c.bf16 %v5886_v27, %v5882_v13  ;;  %v5893_v0 = vld [vmem:[#allocation13 + $0x68] sm:$0xff]  ;;  %v5891_v43 = vld [vmem:[#allocation13 + $0x58] sm:$0xff]  ;;  %v14579_v13 = vpack.c.bf16 %v5909_v40, %v5905_v9  ;;  %v5914_v9 = vld [vmem:[#allocation13 + $0x110] sm:$0xff] }
 0xc25   :  { %11912 = vrcp.f32 %v5344_v8  ;;  %v5687_v8 = vld [vmem:[#allocation12 + $0xf0] sm:$0xff]  ;;  %v5911_v27 = vld [vmem:[#allocation13 + $0xf8] sm:$0xff] }
 0xc26   :  { %v5918_v40 = vld [vmem:[#allocation13 + $0x130] sm:$0xff] }
 0xc2e   :  { %v11911_v56 = vpop.eup %11910 }
 0xc2f   :  { %v11913_v22 = vpop.eup %11912  ;;  %v5350_v6 = vmul.f32 %v11911_v56, %v5348_v45  ;;  %v14509_v45 = vpack.c.bf16 %v5691_v49, %v5688_v7  ;;  %v5690_v56 = vld [vmem:[#allocation12 + $0x108] sm:$0xff]  ;;  %v5895_v49 = vld [vmem:[#allocation13 + $0x78] sm:$0xff] }
 0xc30   :  { %v5358_v1 = vmul.f32 %v11913_v22, %v5356_v5  ;;  %v5353_v58 = vsub.f32 1.0, %v11913_v22  ;;  %v5689_v5 = vld [vmem:[#allocation12 + $0x100] sm:$0xff]  ;;  %v5692_v22 = vld [vmem:[#allocation12 + $0x118] sm:$0xff] }
 0xc31   :  { %v5351_v18 = vadd.f32 %v5350_v6, %v16061_v10  ;;  %v5694_v6 = vld [vmem:[#allocation12 + $0x128] sm:$0xff] }
 0xc33   :  { %11914 = vtanh.f32 %v5351_v18  ;;  %v14513_v18 = vpack.c.bf16 %v5690_v56, %v5687_v8  ;;  %v5888_v8 = vld [vmem:[#allocation13 + $0x40] sm:$0xff] }
 0xc34   :  { %v5892_v56 = vld [vmem:[#allocation13 + $0x60] sm:$0xff] }
 0xc3d   :  { %v11915_v30 = vpop.eup %11914 }
 0xc3e   :  { %v5354_v15 = vmul.f32 %v11915_v30, %v5353_v58  ;;  %v14515_v58 = vpack.c.bf16 %v5692_v22, %v5689_v5  ;;  %v5693_v30 = vld [vmem:[#allocation12 + $0x120] sm:$0xff]  ;;  %v14557_v5 = vpack.c.bf16 %v5895_v49, %v5891_v43  ;;  %v14559_v22 = vpack.c.bf16 %v5892_v56, %v5888_v8  ;;  %v5906_v8 = vld [vmem:[#allocation13 + $0xd0] sm:$0xff] }
 0xc3f   :  { %v14581_v43 = vpack.c.bf16 %v5911_v27, %v5907_v24  ;;  %v5910_v56 = vld [vmem:[#allocation13 + $0xf0] sm:$0xff]  ;;  %v14598_v24 = vpack.c.bf16 %v5918_v40, %v5914_v9  ;;  %v5921_v27 = vld [vmem:[#allocation13 + $0x148] sm:$0xff]  ;;  %v14610_v9 = vpack.c.bf16 %v5926_v57, %v5922_v54 }
 0xc40   :  { %v14455_v23 = vadd.f32 %v5358_v1, %v5354_v15  ;;  %v5697_v1 = vld [vmem:[#allocation12 + $0x140] sm:$0xff]  ;;  %v5696_v15 = vld [vmem:[#allocation12 + $0x138] sm:$0xff]  ;;  %v5929_v40 = vld [vmem:[#allocation13 + $0x188] sm:$0xff] }
 0xc41   :  { %v14519_v48 = vpack.c.bf16 %v5697_v1, %v5694_v6  ;;  %v14523_v20 = vpack.c.bf16 %v5696_v15, %v5693_v30  ;;  %v5890_v6 = vld [vmem:[#allocation13 + $0x50] sm:$0xff]  ;;  %v5897_v15 = vld [vmem:[#allocation13 + $0x88] sm:$0xff]  ;;  %16113 = vst [vmem:[#allocation22_spill] sm:$0xff] %v14598_v24  ;;  %16117 = vst [vmem:[#allocation26_spill] sm:$0xff] %v14610_v9 }
 0xc42   :  { %v14462_v47 = vrot.slane %v14455_v23, 1  ;;  %v5894_v1 = vld [vmem:[#allocation13 + $0x70] sm:$0xff]  ;;  %v14567_v42 = vpack.c.bf16 %v5901_v61, %v5897_v15  ;;  %v5917_v15 = vld [vmem:[#allocation13 + $0x128] sm:$0xff]  ;;  %v5915_v61 = vld [vmem:[#allocation13 + $0x118] sm:$0xff] }
 0xc43   :  { %v14562_v30 = vpack.c.bf16 %v5894_v1, %v5890_v6  ;;  %v14586_v6 = vpack.c.bf16 %v5910_v56, %v5906_v8  ;;  %v5913_v1 = vld [vmem:[#allocation13 + $0x108] sm:$0xff]  ;;  %v14593_v50 = vpack.c.bf16 %v5919_v38, %v5915_v61  ;;  %v5927_v56 = vld [vmem:[#allocation13 + $0x178] sm:$0xff]  ;;  %v5930_v54 = vld [vmem:[#allocation13 + $0x190] sm:$0xff] }
 0xc44   :  { %5560 = vmatmul.mubr.f32.vlgmr.msra.gmra.mrb[40].mxu0 %v14462_v47  ;;  %5631 = vmatmul.mubr.f32.vlgmr.msra.gmra.mrb[44].mxu1 %v14462_v47  ;;  %v14591_v31 = vpack.c.bf16 %v5917_v15, %v5913_v1  ;;  %v5920_v1 = vld [vmem:[#allocation13 + $0x140] sm:$0xff]  ;;  %v5934_v57 = vld [vmem:[#allocation13 + $0x1b0] sm:$0xff] }
 0xc45   :  { %10912 = vmatpush1.bf16.msra.mxu0 %v14457_v59  ;;  %10943 = vmatpush3.bf16.msra.mxu1 %v14459_v16  ;;  %16109 = vst [vmem:[#allocation72_spill] sm:$0xff] %v14586_v6  ;;  %16111 = vst [vmem:[#allocation66_spill] sm:$0xff] %v14593_v50  ;;  %v5924_v15 = vld [vmem:[#allocation13 + $0x160] sm:$0xff] }
 0xc46   :  { %10914 = vmatprep.subr.bf16.mxu0 %v14464_v39  ;;  %10944 = vmatprep.subr.bf16.mxu1 %v15675_v3  ;;  %16110 = vst [vmem:[#allocation65_spill] sm:$0xff] %v14591_v31  ;;  %v14607_v38 = vpack.c.bf16 %v5924_v15, %v5920_v1  ;;  %v5932_v1 = vld [vmem:[#allocation13 + $0x1a0] sm:$0xff] }
 0xc47   :  { %5769 = vmatprep.mubr.f32.mxu0 %v15680_v17  ;;  %8839 = vmatprep.mubr.msk.f32.mxu1 %vm12211_vm0, %v15680_v17 }
 0xc48   :  { %16116 = vst [vmem:[#allocation25_spill] sm:$0xff] %v14607_v38 }
 0xc49   :  { %10916 = vmatpush1.bf16.msra.mxu0 %v14470_v53  ;;  %10946 = vmatpush3.bf16.msra.mxu1 %v14472_v26 }
 0xc4a   :  { %10918 = vmatprep.subr.bf16.mxu0 %v14476_v29  ;;  %10947 = vmatprep.subr.bf16.mxu1 %v15675_v3 }
 0xc4d   :  { %10920 = vmatpush1.bf16.msra.mxu0 %v14483_v34  ;;  %10949 = vmatpush3.bf16.msra.mxu1 %v14485_v55 }
 0xc4e   :  { %10922 = vmatprep.subr.bf16.mxu0 %v14489_v60  ;;  %10950 = vmatprep.subr.bf16.mxu1 %v15675_v3 }
 0xc51   :  { %10924 = vmatpush1.bf16.msra.mxu0 %v14493_v14  ;;  %10952 = vmatpush3.bf16.msra.mxu1 %v14495_v25 }
 0xc52   :  { %10926 = vmatprep.subr.bf16.mxu0 %v14499_v46  ;;  %10953 = vmatprep.subr.bf16.mxu1 %v15675_v3 }
 0xc55   :  { %10928 = vmatpush1.bf16.msra.mxu0 %v14503_v33  ;;  %10955 = vmatpush3.bf16.msra.mxu1 %v14505_v51 }
 0xc56   :  { %10930 = vmatprep.subr.bf16.mxu0 %v14509_v45  ;;  %10956 = vmatprep.subr.bf16.mxu1 %v15675_v3 }
 0xc59   :  { %10932 = vmatpush1.bf16.msra.mxu0 %v14513_v18  ;;  %10958 = vmatpush3.bf16.msra.mxu1 %v14515_v58 }
 0xc5a   :  { %10934 = vmatprep.subr.bf16.mxu0 %v14519_v48  ;;  %10959 = vmatprep.subr.bf16.mxu1 %v15675_v3 }
 0xc5d   :  { %10936 = vmatpush1.bf16.msra.mxu0 %v14523_v20  ;;  %10961 = vmatpush3.bf16.msra.mxu1 %v14525_v63 }
 0xc5e   :  { %10938 = vmatprep.subr.bf16.mxu0 %v14529_v4  ;;  %10962 = vmatprep.subr.bf16.mxu1 %v15675_v3 }
 0xc61   :  { %10940 = vmatpush1.bf16.msra.mxu0 %v14533_v37  ;;  %10964 = vmatpush3.bf16.msra.mxu1 %v14535_v28 }
 0xc62   :  { %10966 = vmatprep.subr.bf16.mxu0 %v14543_v32  ;;  %11030 = vmatprep.subr.bf16.mxu1 %v14545_v36 }
 0xc64   :  { %5770 = vmatmul.mubr.f32.vlgmr.msra.gmra.mrb[42].mxu0 %v14462_v47  ;;  %8840 = vmatmul.mubr.f32.vlgmr.msra.gmra.mrb[46].mxu1 %v14462_v47  ;;  %v5889_v47 = vld [vmem:[#allocation13 + $0x48] sm:$0xff] }
 0xc65   :  { %10968 = vmatpush1.bf16.msra.mxu0 %v14547_v12  ;;  %11032 = vmatpush1.bf16.msra.mxu1 %v14550_v35  ;;  %v14555_v7 = vpack.c.bf16 %v5893_v0, %v5889_v47  ;;  %v5904_v47 = vld [vmem:[#allocation13 + $0xc0] sm:$0xff] }
 0xc66   :  { %11034 = vmatprep.subr.bf16.mxu1 %v14557_v5  ;;  %v5908_v0 = vld [vmem:[#allocation13 + $0xe0] sm:$0xff] }
 0xc67   :  { %10970 = vmatprep.subr.bf16.mxu0 %v14555_v7  ;;  %v14583_v49 = vpack.c.bf16 %v5908_v0, %v5904_v47  ;;  %v5925_v47 = vld [vmem:[#allocation13 + $0x168] sm:$0xff]  ;;  %v5923_v0 = vld [vmem:[#allocation13 + $0x158] sm:$0xff] }
 0xc68   :  { %v14603_v8 = vpack.c.bf16 %v5925_v47, %v5921_v27  ;;  %v14605_v61 = vpack.c.bf16 %v5927_v56, %v5923_v0  ;;  %v5933_v27 = vld [vmem:[#allocation13 + $0x1a8] sm:$0xff]  ;;  %v5931_v47 = vld [vmem:[#allocation13 + $0x198] sm:$0xff]  ;;  %v5928_v56 = vld [vmem:[#allocation13 + $0x180] sm:$0xff] }
 0xc69   :  { %10972 = vmatpush1.bf16.msra.mxu0 %v14559_v22  ;;  %11036 = vmatpush1.bf16.msra.mxu1 %v14562_v30  ;;  %v5935_v0 = vld [vmem:[#allocation13 + $0x1b8] sm:$0xff] }
 0xc6a   :  { %10974 = vmatprep.subr.bf16.mxu0 %v14567_v42  ;;  %11038 = vmatprep.subr.bf16.mxu1 %v14569_v41  ;;  %16114 = vst [vmem:[#allocation23_spill] sm:$0xff] %v14603_v8  ;;  %16115 = vst [vmem:[#allocation24_spill] sm:$0xff] %v14605_v61  ;;  %v14617_v15 = vpack.c.bf16 %v5935_v0, %v5931_v47  ;;  %v5943_v47 = vld [vmem:[#allocation13 + $0x1f8] sm:$0xff]  ;;  %v5936_v0 = vld [vmem:[#allocation13 + $0x1c0] sm:$0xff] }
 0xc6c   :  { %16119 = vst [vmem:[#allocation28_spill] sm:$0xff] %v14617_v15 }
 0xc6d   :  { %10976 = vmatpush1.bf16.msra.mxu0 %v14571_v19  ;;  %11040 = vmatpush1.bf16.msra.mxu1 %v14574_v21 }
 0xc6e   :  { %10978 = vmatprep.subr.bf16.mxu0 %v14579_v13  ;;  %11042 = vmatprep.subr.bf16.mxu1 %v14581_v43 }
 0xc71   :  { %10980 = vmatpush1.bf16.msra.mxu0 %v14583_v49  ;;  %11044 = vmatpush1.bf16.msra.mxu1 %v14586_v6 }
 0xc72   :  { %10982 = vmatprep.subr.bf16.mxu0 %v14591_v31  ;;  %11046 = vmatprep.subr.bf16.mxu1 %v14593_v50  ;;  %v5987_v50 = vld [vmem:[#allocation13 + $0x358] sm:$0xff] }
 0xc75   :  { %10984 = vmatpush1.bf16.msra.mxu0 %v14595_v2  ;;  %11048 = vmatpush1.bf16.msra.mxu1 %v14598_v24  ;;  %v14615_v24 = vpack.c.bf16 %v5933_v27, %v5929_v40  ;;  %v14619_v2 = vpack.c.bf16 %v5932_v1, %v5928_v56  ;;  %v5941_v40 = vld [vmem:[#allocation13 + $0x1e8] sm:$0xff]  ;;  %v5939_v27 = vld [vmem:[#allocation13 + $0x1d8] sm:$0xff]  ;;  %v5940_v56 = vld [vmem:[#allocation13 + $0x1e0] sm:$0xff] }
 0xc76   :  { %10986 = vmatprep.subr.bf16.mxu0 %v14603_v8  ;;  %11050 = vmatprep.subr.bf16.mxu1 %v14605_v61  ;;  %v14622_v61 = vpack.c.bf16 %v5934_v57, %v5930_v54  ;;  %v14629_v1 = vpack.c.bf16 %v5943_v47, %v5939_v27  ;;  %v14631_v8 = vpack.c.bf16 %v5940_v56, %v5936_v0  ;;  %v5938_v54 = vld [vmem:[#allocation13 + $0x1d0] sm:$0xff]  ;;  %v5951_v27 = vld [vmem:[#allocation13 + $0x238] sm:$0xff]  ;;  %v5944_v47 = vld [vmem:[#allocation13 + $0x200] sm:$0xff] }
 0xc77   :  { %16118 = vst [vmem:[#allocation27_spill] sm:$0xff] %v14615_v24  ;;  %16120 = vst [vmem:[#allocation29_spill] sm:$0xff] %v14619_v2  ;;  %v5942_v57 = vld [vmem:[#allocation13 + $0x1f0] sm:$0xff]  ;;  %v5948_v0 = vld [vmem:[#allocation13 + $0x220] sm:$0xff] }
 0xc78   :  { %16121 = vst [vmem:[#allocation30_spill] sm:$0xff] %v14622_v61  ;;  %16123 = vst [vmem:[#allocation32_spill] sm:$0xff] %v14629_v1 }
 0xc79   :  { %10988 = vmatpush1.bf16.msra.mxu0 %v14607_v38  ;;  %11052 = vmatpush1.bf16.msra.mxu1 %v14610_v9  ;;  %v5937_v9 = vld [vmem:[#allocation13 + $0x1c8] sm:$0xff]  ;;  %16124 = vst [vmem:[#allocation33_spill] sm:$0xff] %v14631_v8 }
 0xc7a   :  { %10990 = vmatprep.subr.bf16.mxu0 %v14615_v24  ;;  %11054 = vmatprep.subr.bf16.mxu1 %v14617_v15  ;;  %v14627_v38 = vpack.c.bf16 %v5941_v40, %v5937_v9  ;;  %v14634_v15 = vpack.c.bf16 %v5942_v57, %v5938_v54  ;;  %v5949_v9 = vld [vmem:[#allocation13 + $0x228] sm:$0xff]  ;;  %v5947_v40 = vld [vmem:[#allocation13 + $0x218] sm:$0xff]  ;;  %v14643_v24 = vpack.c.bf16 %v5948_v0, %v5944_v47  ;;  %v5946_v54 = vld [vmem:[#allocation13 + $0x210] sm:$0xff] }
 0xc7b   :  { %v14641_v56 = vpack.c.bf16 %v5951_v27, %v5947_v40  ;;  %v5950_v57 = vld [vmem:[#allocation13 + $0x230] sm:$0xff]  ;;  %v5959_v40 = vld [vmem:[#allocation13 + $0x278] sm:$0xff]  ;;  %v5952_v27 = vld [vmem:[#allocation13 + $0x240] sm:$0xff] }
 0xc7c   :  { %16122 = vst [vmem:[#allocation31_spill] sm:$0xff] %v14627_v38  ;;  %16125 = vst [vmem:[#allocation34_spill] sm:$0xff] %v14634_v15  ;;  %v5956_v47 = vld [vmem:[#allocation13 + $0x260] sm:$0xff] }
 0xc7d   :  { %10992 = vmatpush1.bf16.msra.mxu0 %v14619_v2  ;;  %11056 = vmatpush1.bf16.msra.mxu1 %v14622_v61  ;;  %v5945_v61 = vld [vmem:[#allocation13 + $0x208] sm:$0xff]  ;;  %16127 = vst [vmem:[#allocation36_spill] sm:$0xff] %v14641_v56  ;;  %16128 = vst [vmem:[#allocation37_spill] sm:$0xff] %v14643_v24 }
 0xc7e   :  { %10994 = vmatprep.subr.bf16.mxu0 %v14627_v38  ;;  %11058 = vmatprep.subr.bf16.mxu1 %v14629_v1  ;;  %v14639_v2 = vpack.c.bf16 %v5949_v9, %v5945_v61  ;;  %v14646_v1 = vpack.c.bf16 %v5950_v57, %v5946_v54  ;;  %v5957_v61 = vld [vmem:[#allocation13 + $0x268] sm:$0xff]  ;;  %v5955_v9 = vld [vmem:[#allocation13 + $0x258] sm:$0xff]  ;;  %v14655_v38 = vpack.c.bf16 %v5956_v47, %v5952_v27  ;;  %v5954_v54 = vld [vmem:[#allocation13 + $0x250] sm:$0xff] }
 0xc7f   :  { %v14653_v0 = vpack.c.bf16 %v5959_v40, %v5955_v9  ;;  %v5958_v57 = vld [vmem:[#allocation13 + $0x270] sm:$0xff]  ;;  %v5967_v9 = vld [vmem:[#allocation13 + $0x2b8] sm:$0xff]  ;;  %v5960_v40 = vld [vmem:[#allocation13 + $0x280] sm:$0xff] }
 0xc80   :  { %16126 = vst [vmem:[#allocation35_spill] sm:$0xff] %v14639_v2  ;;  %16129 = vst [vmem:[#allocation38_spill] sm:$0xff] %v14646_v1  ;;  %v5964_v27 = vld [vmem:[#allocation13 + $0x2a0] sm:$0xff] }
 0xc81   :  { %10996 = vmatpush1.bf16.msra.mxu0 %v14631_v8  ;;  %11060 = vmatpush1.bf16.msra.mxu1 %v14634_v15  ;;  %v5953_v15 = vld [vmem:[#allocation13 + $0x248] sm:$0xff]  ;;  %16131 = vst [vmem:[#allocation40_spill] sm:$0xff] %v14653_v0  ;;  %16132 = vst [vmem:[#allocation41_spill] sm:$0xff] %v14655_v38 }
 0xc82   :  { %10998 = vmatprep.subr.bf16.mxu0 %v14639_v2  ;;  %11062 = vmatprep.subr.bf16.mxu1 %v14641_v56  ;;  %v14651_v8 = vpack.c.bf16 %v5957_v61, %v5953_v15  ;;  %v14658_v56 = vpack.c.bf16 %v5958_v57, %v5954_v54  ;;  %v5965_v15 = vld [vmem:[#allocation13 + $0x2a8] sm:$0xff]  ;;  %v5963_v61 = vld [vmem:[#allocation13 + $0x298] sm:$0xff]  ;;  %v14667_v2 = vpack.c.bf16 %v5964_v27, %v5960_v40  ;;  %v5962_v54 = vld [vmem:[#allocation13 + $0x290] sm:$0xff] }
 0xc83   :  { %v14665_v47 = vpack.c.bf16 %v5967_v9, %v5963_v61  ;;  %v5966_v57 = vld [vmem:[#allocation13 + $0x2b0] sm:$0xff]  ;;  %v5975_v61 = vld [vmem:[#allocation13 + $0x2f8] sm:$0xff]  ;;  %v5968_v9 = vld [vmem:[#allocation13 + $0x2c0] sm:$0xff] }
 0xc84   :  { %16130 = vst [vmem:[#allocation39_spill] sm:$0xff] %v14651_v8  ;;  %16133 = vst [vmem:[#allocation42_spill] sm:$0xff] %v14658_v56  ;;  %v5972_v40 = vld [vmem:[#allocation13 + $0x2e0] sm:$0xff] }
 0xc85   :  { %11000 = vmatpush1.bf16.msra.mxu0 %v14643_v24  ;;  %11064 = vmatpush1.bf16.msra.mxu1 %v14646_v1  ;;  %v5961_v1 = vld [vmem:[#allocation13 + $0x288] sm:$0xff]  ;;  %16135 = vst [vmem:[#allocation44_spill] sm:$0xff] %v14665_v47  ;;  %16136 = vst [vmem:[#allocation45_spill] sm:$0xff] %v14667_v2 }
 0xc86   :  { %11002 = vmatprep.subr.bf16.mxu0 %v14651_v8  ;;  %11066 = vmatprep.subr.bf16.mxu1 %v14653_v0  ;;  %v14663_v24 = vpack.c.bf16 %v5965_v15, %v5961_v1  ;;  %v14670_v0 = vpack.c.bf16 %v5966_v57, %v5962_v54  ;;  %v5973_v1 = vld [vmem:[#allocation13 + $0x2e8] sm:$0xff]  ;;  %v5971_v15 = vld [vmem:[#allocation13 + $0x2d8] sm:$0xff]  ;;  %v14679_v8 = vpack.c.bf16 %v5972_v40, %v5968_v9  ;;  %v5970_v54 = vld [vmem:[#allocation13 + $0x2d0] sm:$0xff] }
 0xc87   :  { %v14677_v27 = vpack.c.bf16 %v5975_v61, %v5971_v15  ;;  %v5974_v57 = vld [vmem:[#allocation13 + $0x2f0] sm:$0xff]  ;;  %v5983_v15 = vld [vmem:[#allocation13 + $0x338] sm:$0xff]  ;;  %v5976_v61 = vld [vmem:[#allocation13 + $0x300] sm:$0xff] }
 0xc88   :  { %16134 = vst [vmem:[#allocation43_spill] sm:$0xff] %v14663_v24  ;;  %16137 = vst [vmem:[#allocation46_spill] sm:$0xff] %v14670_v0  ;;  %v5980_v9 = vld [vmem:[#allocation13 + $0x320] sm:$0xff] }
 0xc89   :  { %11004 = vmatpush1.bf16.msra.mxu0 %v14655_v38  ;;  %11068 = vmatpush1.bf16.msra.mxu1 %v14658_v56  ;;  %v5969_v56 = vld [vmem:[#allocation13 + $0x2c8] sm:$0xff]  ;;  %16139 = vst [vmem:[#allocation48_spill] sm:$0xff] %v14677_v27  ;;  %16140 = vst [vmem:[#allocation49_spill] sm:$0xff] %v14679_v8 }
 0xc8a   :  { %11006 = vmatprep.subr.bf16.mxu0 %v14663_v24  ;;  %11070 = vmatprep.subr.bf16.mxu1 %v14665_v47  ;;  %v14675_v38 = vpack.c.bf16 %v5973_v1, %v5969_v56  ;;  %v14682_v47 = vpack.c.bf16 %v5974_v57, %v5970_v54  ;;  %v5981_v56 = vld [vmem:[#allocation13 + $0x328] sm:$0xff]  ;;  %v5979_v1 = vld [vmem:[#allocation13 + $0x318] sm:$0xff]  ;;  %v14691_v24 = vpack.c.bf16 %v5980_v9, %v5976_v61  ;;  %v5978_v54 = vld [vmem:[#allocation13 + $0x310] sm:$0xff] }
 0xc8b   :  { %v14689_v40 = vpack.c.bf16 %v5983_v15, %v5979_v1  ;;  %v5982_v57 = vld [vmem:[#allocation13 + $0x330] sm:$0xff]  ;;  %v5984_v1 = vld [vmem:[#allocation13 + $0x340] sm:$0xff] }
 0xc8c   :  { %16138 = vst [vmem:[#allocation47_spill] sm:$0xff] %v14675_v38  ;;  %16141 = vst [vmem:[#allocation50_spill] sm:$0xff] %v14682_v47  ;;  %v5988_v15 = vld [vmem:[#allocation13 + $0x360] sm:$0xff] }
 0xc8d   :  { %11008 = vmatpush1.bf16.msra.mxu0 %v14667_v2  ;;  %11072 = vmatpush1.bf16.msra.mxu1 %v14670_v0  ;;  %v5977_v0 = vld [vmem:[#allocation13 + $0x308] sm:$0xff]  ;;  %16143 = vst [vmem:[#allocation52_spill] sm:$0xff] %v14689_v40  ;;  %16144 = vst [vmem:[#allocation53_spill] sm:$0xff] %v14691_v24  ;;  %v14703_v9 = vpack.c.bf16 %v5988_v15, %v5984_v1  ;;  %v5994_v1 = vld [vmem:[#allocation13 + $0x390] sm:$0xff] }
 0xc8e   :  { %11010 = vmatprep.subr.bf16.mxu0 %v14675_v38  ;;  %11074 = vmatprep.subr.bf16.mxu1 %v14677_v27  ;;  %v14687_v2 = vpack.c.bf16 %v5981_v56, %v5977_v0  ;;  %v14694_v27 = vpack.c.bf16 %v5982_v57, %v5978_v54  ;;  %v5989_v38 = vld [vmem:[#allocation13 + $0x368] sm:$0xff]  ;;  %v5991_v56 = vld [vmem:[#allocation13 + $0x378] sm:$0xff]  ;;  %v5986_v54 = vld [vmem:[#allocation13 + $0x350] sm:$0xff] }
 0xc8f   :  { %v14701_v61 = vpack.c.bf16 %v5991_v56, %v5987_v50  ;;  %16148 = vst [vmem:[#allocation57_spill] sm:$0xff] %v14703_v9  ;;  %v5990_v57 = vld [vmem:[#allocation13 + $0x370] sm:$0xff]  ;;  %v5992_v50 = vld [vmem:[#allocation13 + $0x380] sm:$0xff] }
 0xc90   :  { %16142 = vst [vmem:[#allocation51_spill] sm:$0xff] %v14687_v2  ;;  %16145 = vst [vmem:[#allocation54_spill] sm:$0xff] %v14694_v27  ;;  %v5996_v56 = vld [vmem:[#allocation13 + $0x3a0] sm:$0xff] }
 0xc91   :  { %11012 = vmatpush1.bf16.msra.mxu0 %v14679_v8  ;;  %11076 = vmatpush1.bf16.msra.mxu1 %v14682_v47  ;;  %v5985_v8 = vld [vmem:[#allocation13 + $0x348] sm:$0xff]  ;;  %16147 = vst [vmem:[#allocation56_spill] sm:$0xff] %v14701_v61  ;;  %v14706_v47 = vpack.c.bf16 %v5990_v57, %v5986_v54  ;;  %v14714_v15 = vpack.c.bf16 %v5996_v56, %v5992_v50  ;;  %v6004_v50 = vld [vmem:[#allocation13 + $0x3e0] sm:$0xff]  ;;  %v6002_v56 = vld [vmem:[#allocation13 + $0x3d0] sm:$0xff] }
 0xc92   :  { %11014 = vmatprep.subr.bf16.mxu0 %v14687_v2  ;;  %11078 = vmatprep.subr.bf16.mxu1 %v14689_v40  ;;  %v14698_v0 = vpack.c.bf16 %v5989_v38, %v5985_v8  ;;  %v5993_v2 = vld [vmem:[#allocation13 + $0x388] sm:$0xff]  ;;  %v5999_v8 = vld [vmem:[#allocation13 + $0x3b8] sm:$0xff] }
 0xc93   :  { %v5997_v40 = vld [vmem:[#allocation13 + $0x3a8] sm:$0xff]  ;;  %16151 = vst [vmem:[#allocation60_spill] sm:$0xff] %v14714_v15 }
 0xc94   :  { %16146 = vst [vmem:[#allocation55_spill] sm:$0xff] %v14698_v0  ;;  %v14709_v38 = vpack.c.bf16 %v5997_v40, %v5993_v2  ;;  %v6005_v54 = vld [vmem:[#allocation13 + $0x3e8] sm:$0xff]  ;;  %v6007_v40 = vld [vmem:[#allocation13 + $0x3f8] sm:$0xff] }
 0xc95   :  { %11016 = vmatpush1.bf16.msra.mxu0 %v14691_v24  ;;  %11080 = vmatpush1.bf16.msra.mxu1 %v14694_v27  ;;  %v5995_v24 = vld [vmem:[#allocation13 + $0x398] sm:$0xff]  ;;  %v5998_v27 = vld [vmem:[#allocation13 + $0x3b0] sm:$0xff] }
 0xc96   :  { %11018 = vmatprep.subr.bf16.mxu0 %v14698_v0  ;;  %11082 = vmatprep.subr.bf16.mxu1 %v14701_v61  ;;  %16149 = vst [vmem:[#allocation58_spill] sm:$0xff] %v14709_v38  ;;  %v14711_v31 = vpack.c.bf16 %v5999_v8, %v5995_v24  ;;  %v6001_v0 = vld [vmem:[#allocation13 + $0x3c8] sm:$0xff]  ;;  %v14718_v57 = vpack.c.bf16 %v5998_v27, %v5994_v1  ;;  %v6003_v24 = vld [vmem:[#allocation13 + $0x3d8] sm:$0xff]  ;;  %v6000_v8 = vld [vmem:[#allocation13 + $0x3c0] sm:$0xff] }
 0xc97   :  { %v14720_v2 = vpack.c.bf16 %v6005_v54, %v6001_v0  ;;  %v14723_v61 = vpack.c.bf16 %v6007_v40, %v6003_v24  ;;  %v14726_v6 = vpack.c.bf16 %v6004_v50, %v6000_v8 }
 0xc98   :  { %16150 = vst [vmem:[#allocation59_spill] sm:$0xff] %v14711_v31  ;;  %16152 = vst [vmem:[#allocation61_spill] sm:$0xff] %v14718_v57 }
 0xc99   :  { %11020 = vmatpush1.bf16.msra.mxu0 %v14703_v9  ;;  %11084 = vmatpush1.bf16.msra.mxu1 %v14706_v47  ;;  %16153 = vst [vmem:[#allocation62_spill] sm:$0xff] %v14720_v2  ;;  %16154 = vst [vmem:[#allocation63_spill] sm:$0xff] %v14723_v61  ;;  %v6006_v9 = vld [vmem:[#allocation13 + $0x3f0] sm:$0xff] }
 0xc9a   :  { %11022 = vmatprep.subr.bf16.mxu0 %v14709_v38  ;;  %11086 = vmatprep.subr.bf16.mxu1 %v14711_v31  ;;  %16155 = vst [vmem:[#allocation64_spill] sm:$0xff] %v14726_v6  ;;  %v14730_v27 = vpack.c.bf16 %v6006_v9, %v6002_v56 }
 0xc9c   :  { %16156 = vst [vmem:[#allocation68_spill] sm:$0xff] %v14730_v27 }
 0xc9d   :  { %11024 = vmatpush1.bf16.msra.mxu0 %v14714_v15  ;;  %11088 = vmatpush1.bf16.msra.mxu1 %v14718_v57 }
 0xc9e   :  { %11026 = vmatprep.subr.bf16.mxu0 %v14720_v2  ;;  %11090 = vmatprep.subr.bf16.mxu1 %v14723_v61 }
 0xca1   :  { %11028 = vmatpush1.bf16.msra.mxu0 %v14726_v6  ;;  %11092 = vmatpush1.bf16.msra.mxu1 %v14730_v27 }
 0xca2   :  { %11094 = vmatprep.subr.bf16.mxu0 %v14443_v62  ;;  %11125 = vmatprep.subr.bf16.mxu1 %v15675_v3 }
 0xd17   :  { %v5561_v0 = vpop.f32.mrb[40].mxu0  ;;  %v5632_v1 = vpop.f32.mrb[44].mxu1 }
 0xd18   :  { %v8092_v54 = vmul.f32 -1.442695, %v5561_v0  ;;  %v5563_v24 = vpop.f32.mrb[41].mxu0  ;;  %v5634_v40 = vpop.f32.mrb[45].mxu1 }
 0xd19   :  { %v8093_v8 = vmul.f32 -1.442695, %v5563_v24 }
 0xd1a   :  { %11916 = vpow2.f32 %v8092_v54 }
 0xd1b   :  { %11918 = vpow2.f32 %v8093_v8 }
 0xd24   :  { %v11917_v9 = vpop.eup %11916 }
 0xd25   :  { %v5640_v50 = vadd.f32 1.0, %v11917_v9  ;;  %v11919_v56 = vpop.eup %11918 }
 0xd26   :  { %v5646_v61 = vadd.f32 1.0, %v11919_v56 }
 0xd27   :  { %11920 = vrcp.f32 %v5640_v50 }
 0xd28   :  { %11922 = vrcp.f32 %v5646_v61 }
 0xd31   :  { %v11921_v6 = vpop.eup %11920 }
 0xd32   :  { %v5649_v27 = vmul.f32 %v11921_v6, %v5634_v40  ;;  %v11923_v8 = vpop.eup %11922 }
 0xd33   :  { %v5652_v56 = vsub.f32 1.0, %v11923_v8 }
 0xd34   :  { %v5650_v2 = vadd.f32 %v5649_v27, %v5632_v1 }
 0xd36   :  { %11924 = vtanh.f32 %v5650_v2  ;;  %v5654_v2 = vmul.f32 %v11923_v8, %v14449_v11 }
 0xd37   :  { %v5771_v62 = vpop.f32.mrb[42].mxu0  ;;  %v5842_v57 = vpop.f32.mrb[46].mxu1 }
 0xd38   :  { %v5847_v15 = vrot.slane %v5771_v62, 6  ;;  %v5773_v31 = vpop.f32.mrb[43].mxu0  ;;  %v8841_v0 = vpop.f32.mrb[47].mxu1 }
 0xd39   :  { %v5857_v38 = vrot.slane %v5773_v31, 6  ;;  %v5867_v0 = vrot.slane %v5842_v57, 6  ;;  %v16196_v57 = vld [vmem:[#allocation57_spill] sm:$0xff] }
 0xd3a   :  { %v5849_v54 = vadd.f32 %v5847_v15, %v16059_v52 }
 0xd3b   :  { %v5859_v24 = vadd.f32 %v5857_v38, %v16060_v44 }
 0xd3c   :  { %v8094_v9 = vmul.f32 -1.442695, %v5849_v54 }
 0xd3d   :  { %v8095_v50 = vmul.f32 -1.442695, %v5859_v24  ;;  %v5874_v24 = vrot.slane %v14455_v23, 7  ;;  %v16157_v23 = vld [vmem:[#allocation72_spill] sm:$0xff] }
 0xd3e   :  { %11926 = vpow2.f32 %v8094_v9 }
 0xd3f   :  { %11928 = vpow2.f32 %v8095_v50 }
 0xd40   :  { %v11925_v61 = vpop.eup %11924 }
 0xd41   :  { %v5653_v6 = vmul.f32 %v11925_v61, %v5652_v56 }
 0xd43   :  { %v14740_v27 = vadd.f32 %v5654_v2, %v5653_v6 }
 0xd45   :  { %5656 = vst [vmem:[#allocation3 + $0x1] sm:$0x1] %v14740_v27  ;;  %v5879_v31 = vrot.slane %v14740_v27, 6 }
 0xd47   :  { %v6010_v1 = vrot.slane %v5879_v31, 2 }
 0xd48   :  { %v11927_v15 = vpop.eup %11926 }
 0xd49   :  { %v11929_v40 = vpop.eup %11928  ;;  %v5853_v38 = vadd.f32 1.0, %v11927_v15  ;;  %6077 = vmatprep.mubr.f32.mxu0 %v6010_v1  ;;  %6148 = vmatprep.mubr.f32.mxu1 %v6010_v1  ;;  %v16197_v1 = vld [vmem:[#allocation58_spill] sm:$0xff]  ;;  %v16198_v15 = vld [vmem:[#allocation59_spill] sm:$0xff] }
 0xd4a   :  { %v5863_v62 = vadd.f32 1.0, %v11929_v40  ;;  %v16199_v40 = vld [vmem:[#allocation60_spill] sm:$0xff] }
 0xd4b   :  { %11930 = vrcp.f32 %v5853_v38  ;;  %v16200_v38 = vld [vmem:[#allocation61_spill] sm:$0xff] }
 0xd4c   :  { %11932 = vrcp.f32 %v5863_v62  ;;  %v16201_v62 = vld [vmem:[#allocation62_spill] sm:$0xff] }
 0xd55   :  { %v11931_v54 = vpop.eup %11930 }
 0xd56   :  { %v11933_v11 = vpop.eup %11932  ;;  %v5869_v8 = vmul.f32 %v11931_v54, %v5867_v0  ;;  %v16202_v0 = vld [vmem:[#allocation63_spill] sm:$0xff]  ;;  %v16203_v54 = vld [vmem:[#allocation64_spill] sm:$0xff] }
 0xd57   :  { %v5876_v9 = vmul.f32 %v11933_v11, %v5874_v24  ;;  %v5872_v56 = vsub.f32 1.0, %v11933_v11  ;;  %v16204_v24 = vld [vmem:[#allocation68_spill] sm:$0xff]  ;;  %v6694_v11 = vld [vmem:[#allocation12 + $0x8] sm:$0xff] }
 0xd58   :  { %v5870_v50 = vadd.f32 %v5869_v8, %v16061_v10 }
 0xd5a   :  { %11934 = vtanh.f32 %v5870_v50 }
 0xd64   :  { %v11935_v61 = vpop.eup %11934 }
 0xd65   :  { %v5873_v6 = vmul.f32 %v11935_v61, %v5872_v56 }
 0xd67   :  { %v14746_v2 = vadd.f32 %v5876_v9, %v5873_v6 }
 0xd69   :  { %v6009_v31 = vrot.slane %v14746_v2, 2 }
 0xd6b   :  { %6078 = vmatmul.mubr.f32.vlgmr.msra.gmra.mrb[44].mxu0 %v6009_v31  ;;  %6149 = vmatmul.mubr.f32.vlgmr.msra.gmra.mrb[48].mxu1 %v6009_v31 }
 0xd6c   :  { %11096 = vmatpush1.bf16.msra.mxu0 %v14457_v59  ;;  %11127 = vmatpush3.bf16.msra.mxu1 %v14459_v16  ;;  %v16158_v59 = vld [vmem:[#allocation65_spill] sm:$0xff]  ;;  %v16159_v16 = vld [vmem:[#allocation66_spill] sm:$0xff] }
 0xd6d   :  { %11098 = vmatprep.subr.bf16.mxu0 %v14464_v39  ;;  %11128 = vmatprep.subr.bf16.mxu1 %v15675_v3  ;;  %v16160_v39 = vld [vmem:[#allocation67_spill] sm:$0xff] }
 0xd6e   :  { %6287 = vmatprep.mubr.f32.mxu0 %v15680_v17  ;;  %8874 = vmatprep.mubr.msk.f32.mxu1 %vm12211_vm0, %v15680_v17 }
 0xd70   :  { %11100 = vmatpush1.bf16.msra.mxu0 %v14470_v53  ;;  %11130 = vmatpush3.bf16.msra.mxu1 %v14472_v26  ;;  %v16161_v53 = vld [vmem:[#allocation22_spill] sm:$0xff]  ;;  %v16162_v26 = vld [vmem:[#allocation23_spill] sm:$0xff] }
 0xd71   :  { %11102 = vmatprep.subr.bf16.mxu0 %v14476_v29  ;;  %11131 = vmatprep.subr.bf16.mxu1 %v15675_v3  ;;  %v16163_v29 = vld [vmem:[#allocation24_spill] sm:$0xff] }
 0xd74   :  { %11104 = vmatpush1.bf16.msra.mxu0 %v14483_v34  ;;  %11133 = vmatpush3.bf16.msra.mxu1 %v14485_v55  ;;  %v16164_v34 = vld [vmem:[#allocation25_spill] sm:$0xff]  ;;  %v16165_v55 = vld [vmem:[#allocation26_spill] sm:$0xff] }
 0xd75   :  { %11106 = vmatprep.subr.bf16.mxu0 %v14489_v60  ;;  %11134 = vmatprep.subr.bf16.mxu1 %v15675_v3  ;;  %v16166_v60 = vld [vmem:[#allocation27_spill] sm:$0xff] }
 0xd78   :  { %11108 = vmatpush1.bf16.msra.mxu0 %v14493_v14  ;;  %11136 = vmatpush3.bf16.msra.mxu1 %v14495_v25  ;;  %v16167_v14 = vld [vmem:[#allocation28_spill] sm:$0xff]  ;;  %v16168_v25 = vld [vmem:[#allocation29_spill] sm:$0xff] }
 0xd79   :  { %11110 = vmatprep.subr.bf16.mxu0 %v14499_v46  ;;  %11137 = vmatprep.subr.bf16.mxu1 %v15675_v3  ;;  %v16169_v46 = vld [vmem:[#allocation30_spill] sm:$0xff] }
 0xd7c   :  { %11112 = vmatpush1.bf16.msra.mxu0 %v14503_v33  ;;  %11139 = vmatpush3.bf16.msra.mxu1 %v14505_v51  ;;  %v16170_v33 = vld [vmem:[#allocation31_spill] sm:$0xff]  ;;  %v16171_v51 = vld [vmem:[#allocation32_spill] sm:$0xff] }
 0xd7d   :  { %11114 = vmatprep.subr.bf16.mxu0 %v14509_v45  ;;  %11140 = vmatprep.subr.bf16.mxu1 %v15675_v3  ;;  %v16172_v45 = vld [vmem:[#allocation33_spill] sm:$0xff] }
 0xd80   :  { %11116 = vmatpush1.bf16.msra.mxu0 %v14513_v18  ;;  %11142 = vmatpush3.bf16.msra.mxu1 %v14515_v58  ;;  %v16173_v18 = vld [vmem:[#allocation34_spill] sm:$0xff]  ;;  %v16174_v58 = vld [vmem:[#allocation35_spill] sm:$0xff] }
 0xd81   :  { %11118 = vmatprep.subr.bf16.mxu0 %v14519_v48  ;;  %11143 = vmatprep.subr.bf16.mxu1 %v15675_v3  ;;  %v16175_v48 = vld [vmem:[#allocation36_spill] sm:$0xff] }
 0xd84   :  { %11120 = vmatpush1.bf16.msra.mxu0 %v14523_v20  ;;  %11145 = vmatpush3.bf16.msra.mxu1 %v14525_v63  ;;  %v16176_v20 = vld [vmem:[#allocation37_spill] sm:$0xff]  ;;  %v16177_v63 = vld [vmem:[#allocation38_spill] sm:$0xff] }
 0xd85   :  { %11122 = vmatprep.subr.bf16.mxu0 %v14529_v4  ;;  %11146 = vmatprep.subr.bf16.mxu1 %v15675_v3  ;;  %v16178_v4 = vld [vmem:[#allocation39_spill] sm:$0xff] }
 0xd88   :  { %11124 = vmatpush1.bf16.msra.mxu0 %v14533_v37  ;;  %11148 = vmatpush3.bf16.msra.mxu1 %v14535_v28  ;;  %v16179_v37 = vld [vmem:[#allocation40_spill] sm:$0xff]  ;;  %v16180_v28 = vld [vmem:[#allocation41_spill] sm:$0xff] }
 0xd89   :  { %11150 = vmatprep.subr.bf16.mxu0 %v14543_v32  ;;  %11214 = vmatprep.subr.bf16.mxu1 %v14545_v36  ;;  %v16181_v32 = vld [vmem:[#allocation42_spill] sm:$0xff]  ;;  %v16182_v36 = vld [vmem:[#allocation43_spill] sm:$0xff] }
 0xd8b   :  { %6288 = vmatmul.mubr.f32.vlgmr.msra.gmra.mrb[46].mxu0 %v6009_v31  ;;  %8875 = vmatmul.mubr.f32.vlgmr.msra.gmra.mrb[50].mxu1 %v6009_v31 }
 0xd8c   :  { %11152 = vmatpush1.bf16.msra.mxu0 %v14547_v12  ;;  %11216 = vmatpush1.bf16.msra.mxu1 %v14550_v35  ;;  %v16183_v12 = vld [vmem:[#allocation44_spill] sm:$0xff]  ;;  %v16184_v35 = vld [vmem:[#allocation45_spill] sm:$0xff] }
 0xd8d   :  { %11154 = vmatprep.subr.bf16.mxu0 %v14555_v7  ;;  %11218 = vmatprep.subr.bf16.mxu1 %v14557_v5  ;;  %v16185_v7 = vld [vmem:[#allocation46_spill] sm:$0xff]  ;;  %v16186_v5 = vld [vmem:[#allocation47_spill] sm:$0xff] }
 0xd90   :  { %11156 = vmatpush1.bf16.msra.mxu0 %v14559_v22  ;;  %11220 = vmatpush1.bf16.msra.mxu1 %v14562_v30  ;;  %v16187_v22 = vld [vmem:[#allocation48_spill] sm:$0xff]  ;;  %v16188_v30 = vld [vmem:[#allocation49_spill] sm:$0xff] }
 0xd91   :  { %11158 = vmatprep.subr.bf16.mxu0 %v14567_v42  ;;  %11222 = vmatprep.subr.bf16.mxu1 %v14569_v41  ;;  %v16189_v42 = vld [vmem:[#allocation50_spill] sm:$0xff]  ;;  %v16190_v41 = vld [vmem:[#allocation51_spill] sm:$0xff] }
 0xd94   :  { %11160 = vmatpush1.bf16.msra.mxu0 %v14571_v19  ;;  %11224 = vmatpush1.bf16.msra.mxu1 %v14574_v21  ;;  %v16191_v19 = vld [vmem:[#allocation52_spill] sm:$0xff]  ;;  %v16192_v21 = vld [vmem:[#allocation53_spill] sm:$0xff] }
 0xd95   :  { %11162 = vmatprep.subr.bf16.mxu0 %v14579_v13  ;;  %11226 = vmatprep.subr.bf16.mxu1 %v14581_v43  ;;  %v16193_v13 = vld [vmem:[#allocation54_spill] sm:$0xff]  ;;  %v16194_v43 = vld [vmem:[#allocation55_spill] sm:$0xff] }
 0xd98   :  { %11164 = vmatpush1.bf16.msra.mxu0 %v14583_v49  ;;  %11228 = vmatpush1.bf16.msra.mxu1 %v16157_v23  ;;  %v16195_v49 = vld [vmem:[#allocation56_spill] sm:$0xff] }
 0xd99   :  { %11166 = vmatprep.subr.bf16.mxu0 %v16158_v59  ;;  %11230 = vmatprep.subr.bf16.mxu1 %v16159_v16 }
 0xd9c   :  { %11168 = vmatpush1.bf16.msra.mxu0 %v16160_v39  ;;  %11232 = vmatpush1.bf16.msra.mxu1 %v16161_v53 }
 0xd9d   :  { %11170 = vmatprep.subr.bf16.mxu0 %v16162_v26  ;;  %11234 = vmatprep.subr.bf16.mxu1 %v16163_v29 }
 0xda0   :  { %11172 = vmatpush1.bf16.msra.mxu0 %v16164_v34  ;;  %11236 = vmatpush1.bf16.msra.mxu1 %v16165_v55 }
 0xda1   :  { %11174 = vmatprep.subr.bf16.mxu0 %v16166_v60  ;;  %11238 = vmatprep.subr.bf16.mxu1 %v16167_v14 }
 0xda4   :  { %11176 = vmatpush1.bf16.msra.mxu0 %v16168_v25  ;;  %11240 = vmatpush1.bf16.msra.mxu1 %v16169_v46 }
 0xda5   :  { %11178 = vmatprep.subr.bf16.mxu0 %v16170_v33  ;;  %11242 = vmatprep.subr.bf16.mxu1 %v16171_v51 }
 0xda8   :  { %11180 = vmatpush1.bf16.msra.mxu0 %v16172_v45  ;;  %11244 = vmatpush1.bf16.msra.mxu1 %v16173_v18 }
 0xda9   :  { %11182 = vmatprep.subr.bf16.mxu0 %v16174_v58  ;;  %11246 = vmatprep.subr.bf16.mxu1 %v16175_v48 }
 0xdac   :  { %11184 = vmatpush1.bf16.msra.mxu0 %v16176_v20  ;;  %11248 = vmatpush1.bf16.msra.mxu1 %v16177_v63 }
 0xdad   :  { %11186 = vmatprep.subr.bf16.mxu0 %v16178_v4  ;;  %11250 = vmatprep.subr.bf16.mxu1 %v16179_v37 }
 0xdb0   :  { %11188 = vmatpush1.bf16.msra.mxu0 %v16180_v28  ;;  %11252 = vmatpush1.bf16.msra.mxu1 %v16181_v32 }
 0xdb1   :  { %11190 = vmatprep.subr.bf16.mxu0 %v16182_v36  ;;  %11254 = vmatprep.subr.bf16.mxu1 %v16183_v12 }
 0xdb4   :  { %11192 = vmatpush1.bf16.msra.mxu0 %v16184_v35  ;;  %11256 = vmatpush1.bf16.msra.mxu1 %v16185_v7 }
 0xdb5   :  { %11194 = vmatprep.subr.bf16.mxu0 %v16186_v5  ;;  %11258 = vmatprep.subr.bf16.mxu1 %v16187_v22 }
 0xdb8   :  { %11196 = vmatpush1.bf16.msra.mxu0 %v16188_v30  ;;  %11260 = vmatpush1.bf16.msra.mxu1 %v16189_v42  ;;  %v6392_v30 = vrot.slane %v14746_v2, 7 }
 0xdb9   :  { %11198 = vmatprep.subr.bf16.mxu0 %v16190_v41  ;;  %11262 = vmatprep.subr.bf16.mxu1 %v16191_v19 }
 0xdbc   :  { %11200 = vmatpush1.bf16.msra.mxu0 %v16192_v21  ;;  %11264 = vmatpush1.bf16.msra.mxu1 %v16193_v13 }
 0xdbd   :  { %11202 = vmatprep.subr.bf16.mxu0 %v16194_v43  ;;  %11266 = vmatprep.subr.bf16.mxu1 %v16195_v49  ;;  %v6693_v43 = vld [vmem:[#allocation12] sm:$0xff] }
 0xdc0   :  { %11204 = vmatpush1.bf16.msra.mxu0 %v16196_v57  ;;  %11268 = vmatpush1.bf16.msra.mxu1 %v14706_v47  ;;  %v6697_v47 = vld [vmem:[#allocation12 + $0x20] sm:$0xff]  ;;  %v6696_v57 = vld [vmem:[#allocation12 + $0x18] sm:$0xff] }
 0xdc1   :  { %11206 = vmatprep.subr.bf16.mxu0 %v16197_v1  ;;  %11270 = vmatprep.subr.bf16.mxu1 %v16198_v15  ;;  %v14847_v8 = vpack.c.bf16 %v6697_v47, %v6694_v11  ;;  %v6695_v1 = vld [vmem:[#allocation12 + $0x10] sm:$0xff]  ;;  %v6698_v15 = vld [vmem:[#allocation12 + $0x28] sm:$0xff] }
 0xdc2   :  { %v14863_v2 = vpack.c.bf16 %v6698_v15, %v6695_v1  ;;  %v6702_v47 = vld [vmem:[#allocation12 + $0x48] sm:$0xff]  ;;  %v6736_v15 = vld [vmem:[#allocation12 + $0x158] sm:$0xff] }
 0xdc3   :  { %v6734_v1 = vld [vmem:[#allocation12 + $0x148] sm:$0xff] }
 0xdc4   :  { %11208 = vmatpush1.bf16.msra.mxu0 %v16199_v40  ;;  %11272 = vmatpush1.bf16.msra.mxu1 %v16200_v38  ;;  %v6700_v40 = vld [vmem:[#allocation12 + $0x38] sm:$0xff]  ;;  %v6703_v38 = vld [vmem:[#allocation12 + $0x50] sm:$0xff] }
 0xdc5   :  { %11210 = vmatprep.subr.bf16.mxu0 %v16201_v62  ;;  %11274 = vmatprep.subr.bf16.mxu1 %v16202_v0  ;;  %v14861_v0 = vpack.c.bf16 %v6696_v57, %v6693_v43  ;;  %v14868_v11 = vpack.c.bf16 %v6703_v38, %v6700_v40  ;;  %v6731_v57 = vld [vmem:[#allocation12 + $0x130] sm:$0xff] }
 0xdc6   :  { %v6739_v40 = vld [vmem:[#allocation12 + $0x170] sm:$0xff] }
 0xdc8   :  { %11212 = vmatpush1.bf16.msra.mxu0 %v16203_v54  ;;  %11276 = vmatpush1.bf16.msra.mxu1 %v16204_v24  ;;  %v6699_v54 = vld [vmem:[#allocation12 + $0x30] sm:$0xff] }
 0xdc9   :  { %11309 = vmatprep.subr.bf16.mxu1 %v15675_v3  ;;  %11278 = vmatprep.subr.bf16.mxu0 %v14847_v8 }
 0xe3e   :  { %v6079_v9 = vpop.f32.mrb[44].mxu0  ;;  %v6150_v50 = vpop.f32.mrb[48].mxu1 }
 0xe3f   :  { %v8096_v56 = vmul.f32 -1.442695, %v6079_v9  ;;  %v6081_v61 = vpop.f32.mrb[45].mxu0  ;;  %v6152_v6 = vpop.f32.mrb[49].mxu1  ;;  %v6701_v9 = vld [vmem:[#allocation12 + $0x40] sm:$0xff] }
 0xe40   :  { %v8097_v31 = vmul.f32 -1.442695, %v6081_v61  ;;  %v6709_v61 = vld [vmem:[#allocation12 + $0x80] sm:$0xff] }
 0xe41   :  { %11936 = vpow2.f32 %v8096_v56  ;;  %v6706_v56 = vld [vmem:[#allocation12 + $0x68] sm:$0xff] }
 0xe42   :  { %11938 = vpow2.f32 %v8097_v31 }
 0xe4b   :  { %v11937_v23 = vpop.eup %11936 }
 0xe4c   :  { %v6158_v59 = vadd.f32 1.0, %v11937_v23  ;;  %v11939_v16 = vpop.eup %11938  ;;  %v6705_v23 = vld [vmem:[#allocation12 + $0x60] sm:$0xff] }
 0xe4d   :  { %v6164_v39 = vadd.f32 1.0, %v11939_v16  ;;  %v6708_v16 = vld [vmem:[#allocation12 + $0x78] sm:$0xff] }
 0xe4e   :  { %11940 = vrcp.f32 %v6158_v59  ;;  %v14880_v59 = vpack.c.bf16 %v6709_v61, %v6706_v56  ;;  %v6737_v56 = vld [vmem:[#allocation12 + $0x160] sm:$0xff]  ;;  %v6740_v61 = vld [vmem:[#allocation12 + $0x178] sm:$0xff] }
 0xe4f   :  { %11942 = vrcp.f32 %v6164_v39  ;;  %v6707_v39 = vld [vmem:[#allocation12 + $0x70] sm:$0xff] }
 0xe58   :  { %v11941_v53 = vpop.eup %11940 }
 0xe59   :  { %v6167_v26 = vmul.f32 %v11941_v53, %v6152_v6  ;;  %v11943_v45 = vpop.eup %11942  ;;  %v14874_v6 = vpack.c.bf16 %v6702_v47, %v6699_v54  ;;  %v6710_v53 = vld [vmem:[#allocation12 + $0x88] sm:$0xff]  ;;  %v14929_v54 = vpack.c.bf16 %v6734_v1, %v6731_v57  ;;  %v6735_v47 = vld [vmem:[#allocation12 + $0x150] sm:$0xff]  ;;  %v6935_v1 = vld [vmem:[#allocation13 + $0x98] sm:$0xff] }
 0xe5a   :  { %v6170_v48 = vsub.f32 1.0, %v11943_v45  ;;  %v6172_v4 = vmul.f32 %v11943_v45, %v14740_v27  ;;  %v6721_v45 = vld [vmem:[#allocation12 + $0xe0] sm:$0xff]  ;;  %v6937_v57 = vld [vmem:[#allocation13 + $0xa8] sm:$0xff] }
 0xe5b   :  { %v6168_v29 = vadd.f32 %v6167_v26, %v6150_v50  ;;  %v6704_v50 = vld [vmem:[#allocation12 + $0x58] sm:$0xff] }
 0xe5c   :  { %v14876_v31 = vpack.c.bf16 %v6704_v50, %v6701_v9  ;;  %v6712_v26 = vld [vmem:[#allocation12 + $0x98] sm:$0xff]  ;;  %v14933_v9 = vpack.c.bf16 %v6739_v40, %v6736_v15  ;;  %v6738_v50 = vld [vmem:[#allocation12 + $0x168] sm:$0xff] }
 0xe5d   :  { %11944 = vtanh.f32 %v6168_v29  ;;  %v6715_v29 = vld [vmem:[#allocation12 + $0xb0] sm:$0xff]  ;;  %v6939_v40 = vld [vmem:[#allocation13 + $0xb8] sm:$0xff] }
 0xe5e   :  { %v6289_v34 = vpop.f32.mrb[46].mxu0  ;;  %v6360_v55 = vpop.f32.mrb[50].mxu1 }
 0xe5f   :  { %v6365_v60 = vrot.slane %v6289_v34, 5  ;;  %v6291_v14 = vpop.f32.mrb[47].mxu0  ;;  %v8876_v25 = vpop.f32.mrb[51].mxu1  ;;  %v6385_v5 = vrot.slane %v6360_v55, 5  ;;  %v14887_v34 = vpack.c.bf16 %v6708_v16, %v6705_v23  ;;  %v14889_v55 = vpack.c.bf16 %v6710_v53, %v6707_v39  ;;  %v6917_v39 = vld [vmem:[#allocation13 + $0x8] sm:$0xff] }
 0xe60   :  { %v6375_v46 = vrot.slane %v6291_v14, 5  ;;  %v14893_v14 = vpack.c.bf16 %v6715_v29, %v6712_v26  ;;  %v6714_v25 = vld [vmem:[#allocation12 + $0xa8] sm:$0xff]  ;;  %v14937_v23 = vpack.c.bf16 %v6738_v50, %v6735_v47  ;;  %v14939_v16 = vpack.c.bf16 %v6740_v61, %v6737_v56  ;;  %v6919_v26 = vld [vmem:[#allocation13 + $0x18] sm:$0xff]  ;;  %v6932_v47 = vld [vmem:[#allocation13 + $0x80] sm:$0xff] }
 0xe61   :  { %v6367_v33 = vadd.f32 %v6365_v60, %v16059_v52  ;;  %v6711_v60 = vld [vmem:[#allocation12 + $0x90] sm:$0xff]  ;;  %v6921_v53 = vld [vmem:[#allocation13 + $0x28] sm:$0xff]  ;;  %v6936_v50 = vld [vmem:[#allocation13 + $0xa0] sm:$0xff]  ;;  %v14973_v56 = vpack.c.bf16 %v6939_v40, %v6935_v1 }
 0xe62   :  { %v6377_v51 = vadd.f32 %v6375_v46, %v16060_v44  ;;  %v6713_v46 = vld [vmem:[#allocation12 + $0xa0] sm:$0xff]  ;;  %v14947_v29 = vpack.c.bf16 %v6921_v53, %v6917_v39  ;;  %v14975_v61 = vpack.c.bf16 %v6936_v50, %v6932_v47  ;;  %v6934_v39 = vld [vmem:[#allocation13 + $0x90] sm:$0xff]  ;;  %v6955_v40 = vld [vmem:[#allocation13 + $0x138] sm:$0xff] }
 0xe63   :  { %v8098_v18 = vmul.f32 -1.442695, %v6367_v33  ;;  %v6716_v33 = vld [vmem:[#allocation12 + $0xb8] sm:$0xff]  ;;  %v6938_v53 = vld [vmem:[#allocation13 + $0xb0] sm:$0xff]  ;;  %v6948_v47 = vld [vmem:[#allocation13 + $0x100] sm:$0xff] }
 0xe64   :  { %v8099_v58 = vmul.f32 -1.442695, %v6377_v51  ;;  %v6718_v51 = vld [vmem:[#allocation12 + $0xc8] sm:$0xff]  ;;  %v6952_v50 = vld [vmem:[#allocation13 + $0x120] sm:$0xff] }
 0xe65   :  { %11946 = vpow2.f32 %v8098_v18  ;;  %v14897_v18 = vpack.c.bf16 %v6714_v25, %v6711_v60  ;;  %v6923_v60 = vld [vmem:[#allocation13 + $0x38] sm:$0xff]  ;;  %v6916_v25 = vld [vmem:[#allocation13] sm:$0xff] }
 0xe66   :  { %11948 = vpow2.f32 %v8099_v58  ;;  %v14899_v58 = vpack.c.bf16 %v6716_v33, %v6713_v46  ;;  %v6920_v46 = vld [vmem:[#allocation13 + $0x20] sm:$0xff]  ;;  %v14949_v33 = vpack.c.bf16 %v6923_v60, %v6919_v26  ;;  %v14978_v26 = vpack.c.bf16 %v6938_v53, %v6934_v39  ;;  %v6941_v60 = vld [vmem:[#allocation13 + $0xc8] sm:$0xff] }
 0xe67   :  { %v11945_v20 = vpop.eup %11944  ;;  %v14999_v53 = vpack.c.bf16 %v6952_v50, %v6948_v47  ;;  %v6958_v47 = vld [vmem:[#allocation13 + $0x150] sm:$0xff] }
 0xe68   :  { %v6171_v63 = vmul.f32 %v11945_v20, %v6170_v48  ;;  %v6717_v48 = vld [vmem:[#allocation12 + $0xc0] sm:$0xff]  ;;  %v14903_v20 = vpack.c.bf16 %v6721_v45, %v6718_v51  ;;  %v14951_v51 = vpack.c.bf16 %v6920_v46, %v6916_v25  ;;  %v6918_v45 = vld [vmem:[#allocation13 + $0x10] sm:$0xff]  ;;  %v6945_v25 = vld [vmem:[#allocation13 + $0xe8] sm:$0xff] }
 0xe69   :  { %v6943_v46 = vld [vmem:[#allocation13 + $0xd8] sm:$0xff]  ;;  %16208 = vst [vmem:[#allocation72_spill] sm:$0xff] %v14999_v53  ;;  %v6962_v50 = vld [vmem:[#allocation13 + $0x170] sm:$0xff] }
 0xe6a   :  { %v14853_v37 = vadd.f32 %v6172_v4, %v6171_v63  ;;  %v6720_v63 = vld [vmem:[#allocation12 + $0xd8] sm:$0xff]  ;;  %v6719_v4 = vld [vmem:[#allocation12 + $0xd0] sm:$0xff] }
 0xe6c   :  { %6174 = vst [vmem:[#allocation3 + $0x2] sm:$0x1] %v14853_v37  ;;  %v6397_v28 = vrot.slane %v14853_v37, 5 }
 0xe6e   :  { %v6528_v32 = vrot.slane %v6397_v28, 3  ;;  %v6722_v28 = vld [vmem:[#allocation12 + $0xe8] sm:$0xff] }
 0xe6f   :  { %v11947_v36 = vpop.eup %11946 }
 0xe70   :  { %v11949_v12 = vpop.eup %11948  ;;  %v6371_v35 = vadd.f32 1.0, %v11947_v36  ;;  %6595 = vmatprep.mubr.f32.mxu0 %v6528_v32  ;;  %6666 = vmatprep.mubr.f32.mxu1 %v6528_v32  ;;  %v6724_v32 = vld [vmem:[#allocation12 + $0xf8] sm:$0xff]  ;;  %v6727_v36 = vld [vmem:[#allocation12 + $0x110] sm:$0xff] }
 0xe71   :  { %v6381_v7 = vadd.f32 1.0, %v11949_v12  ;;  %v14907_v12 = vpack.c.bf16 %v6720_v63, %v6717_v48  ;;  %v6922_v48 = vld [vmem:[#allocation13 + $0x30] sm:$0xff] }
 0xe72   :  { %11950 = vrcp.f32 %v6371_v35  ;;  %v14909_v35 = vpack.c.bf16 %v6722_v28, %v6719_v4  ;;  %v14954_v63 = vpack.c.bf16 %v6922_v48, %v6918_v45  ;;  %v6929_v4 = vld [vmem:[#allocation13 + $0x68] sm:$0xff]  ;;  %v6927_v28 = vld [vmem:[#allocation13 + $0x58] sm:$0xff]  ;;  %v14983_v45 = vpack.c.bf16 %v6945_v25, %v6941_v60  ;;  %v6950_v60 = vld [vmem:[#allocation13 + $0x110] sm:$0xff] }
 0xe73   :  { %11952 = vrcp.f32 %v6381_v7  ;;  %v6723_v7 = vld [vmem:[#allocation12 + $0xf0] sm:$0xff]  ;;  %v6947_v48 = vld [vmem:[#allocation13 + $0xf8] sm:$0xff] }
 0xe74   :  { %v6954_v25 = vld [vmem:[#allocation13 + $0x130] sm:$0xff] }
 0xe7c   :  { %v11951_v22 = vpop.eup %11950 }
 0xe7d   :  { %v11953_v27 = vpop.eup %11952  ;;  %v6387_v42 = vmul.f32 %v11951_v22, %v6385_v5  ;;  %v14913_v5 = vpack.c.bf16 %v6727_v36, %v6724_v32  ;;  %v6726_v22 = vld [vmem:[#allocation12 + $0x108] sm:$0xff]  ;;  %v6931_v36 = vld [vmem:[#allocation13 + $0x78] sm:$0xff] }
 0xe7e   :  { %v6394_v41 = vmul.f32 %v11953_v27, %v6392_v30  ;;  %v6390_v21 = vsub.f32 1.0, %v11953_v27  ;;  %v6725_v30 = vld [vmem:[#allocation12 + $0x100] sm:$0xff]  ;;  %v6728_v27 = vld [vmem:[#allocation12 + $0x118] sm:$0xff] }
 0xe7f   :  { %v6388_v19 = vadd.f32 %v6387_v42, %v16061_v10  ;;  %v6730_v42 = vld [vmem:[#allocation12 + $0x128] sm:$0xff] }
 0xe81   :  { %11954 = vtanh.f32 %v6388_v19  ;;  %v14917_v19 = vpack.c.bf16 %v6726_v22, %v6723_v7  ;;  %v6924_v7 = vld [vmem:[#allocation13 + $0x40] sm:$0xff] }
 0xe82   :  { %v6928_v22 = vld [vmem:[#allocation13 + $0x60] sm:$0xff] }
 0xe8b   :  { %v11955_v13 = vpop.eup %11954 }
 0xe8c   :  { %v6391_v49 = vmul.f32 %v11955_v13, %v6390_v21  ;;  %v14919_v21 = vpack.c.bf16 %v6728_v27, %v6725_v30  ;;  %v6729_v13 = vld [vmem:[#allocation12 + $0x120] sm:$0xff]  ;;  %v14961_v30 = vpack.c.bf16 %v6931_v36, %v6927_v28  ;;  %v14963_v27 = vpack.c.bf16 %v6928_v22, %v6924_v7  ;;  %v6942_v7 = vld [vmem:[#allocation13 + $0xd0] sm:$0xff] }
 0xe8d   :  { %v14985_v28 = vpack.c.bf16 %v6947_v48, %v6943_v46  ;;  %v6946_v22 = vld [vmem:[#allocation13 + $0xf0] sm:$0xff]  ;;  %v15002_v46 = vpack.c.bf16 %v6954_v25, %v6950_v60  ;;  %v6957_v48 = vld [vmem:[#allocation13 + $0x148] sm:$0xff]  ;;  %v15014_v60 = vpack.c.bf16 %v6962_v50, %v6958_v47 }
 0xe8e   :  { %v14859_v62 = vadd.f32 %v6394_v41, %v6391_v49  ;;  %v6733_v41 = vld [vmem:[#allocation12 + $0x140] sm:$0xff]  ;;  %v6732_v49 = vld [vmem:[#allocation12 + $0x138] sm:$0xff]  ;;  %v6965_v25 = vld [vmem:[#allocation13 + $0x188] sm:$0xff] }
 0xe8f   :  { %v14923_v43 = vpack.c.bf16 %v6733_v41, %v6730_v42  ;;  %v14927_v38 = vpack.c.bf16 %v6732_v49, %v6729_v13  ;;  %v6926_v42 = vld [vmem:[#allocation13 + $0x50] sm:$0xff]  ;;  %v6933_v49 = vld [vmem:[#allocation13 + $0x88] sm:$0xff]  ;;  %16209 = vst [vmem:[#allocation65_spill] sm:$0xff] %v15002_v46  ;;  %16213 = vst [vmem:[#allocation23_spill] sm:$0xff] %v15014_v60 }
 0xe90   :  { %v14866_v24 = vrot.slane %v14859_v62, 3  ;;  %v6930_v41 = vld [vmem:[#allocation13 + $0x70] sm:$0xff]  ;;  %v14971_v15 = vpack.c.bf16 %v6937_v57, %v6933_v49  ;;  %v6953_v49 = vld [vmem:[#allocation13 + $0x128] sm:$0xff]  ;;  %v6951_v57 = vld [vmem:[#allocation13 + $0x118] sm:$0xff] }
 0xe91   :  { %v14966_v13 = vpack.c.bf16 %v6930_v41, %v6926_v42  ;;  %v14990_v42 = vpack.c.bf16 %v6946_v22, %v6942_v7  ;;  %v6949_v41 = vld [vmem:[#allocation13 + $0x108] sm:$0xff]  ;;  %v14997_v39 = vpack.c.bf16 %v6955_v40, %v6951_v57  ;;  %v6963_v22 = vld [vmem:[#allocation13 + $0x178] sm:$0xff]  ;;  %v6966_v47 = vld [vmem:[#allocation13 + $0x190] sm:$0xff] }
 0xe92   :  { %6596 = vmatmul.mubr.f32.vlgmr.msra.gmra.mrb[48].mxu0 %v14866_v24  ;;  %6667 = vmatmul.mubr.f32.vlgmr.msra.gmra.mrb[52].mxu1 %v14866_v24  ;;  %v14995_v1 = vpack.c.bf16 %v6953_v49, %v6949_v41  ;;  %v6956_v41 = vld [vmem:[#allocation13 + $0x140] sm:$0xff]  ;;  %v6970_v50 = vld [vmem:[#allocation13 + $0x1b0] sm:$0xff] }
 0xe93   :  { %11280 = vmatpush1.bf16.msra.mxu0 %v14861_v0  ;;  %11311 = vmatpush3.bf16.msra.mxu1 %v14863_v2  ;;  %16205 = vst [vmem:[#allocation69_spill] sm:$0xff] %v14990_v42  ;;  %16207 = vst [vmem:[#allocation71_spill] sm:$0xff] %v14997_v39  ;;  %v6960_v49 = vld [vmem:[#allocation13 + $0x160] sm:$0xff] }
 0xe94   :  { %11282 = vmatprep.subr.bf16.mxu0 %v14868_v11  ;;  %11312 = vmatprep.subr.bf16.mxu1 %v15675_v3  ;;  %16206 = vst [vmem:[#allocation70_spill] sm:$0xff] %v14995_v1  ;;  %v15011_v40 = vpack.c.bf16 %v6960_v49, %v6956_v41  ;;  %v6968_v41 = vld [vmem:[#allocation13 + $0x1a0] sm:$0xff] }
 0xe95   :  { %6805 = vmatprep.mubr.f32.mxu0 %v15680_v17  ;;  %8909 = vmatprep.mubr.msk.f32.mxu1 %vm12211_vm0, %v15680_v17 }
 0xe96   :  { %16212 = vst [vmem:[#allocation22_spill] sm:$0xff] %v15011_v40 }
 0xe97   :  { %11284 = vmatpush1.bf16.msra.mxu0 %v14874_v6  ;;  %11314 = vmatpush3.bf16.msra.mxu1 %v14876_v31 }
 0xe98   :  { %11286 = vmatprep.subr.bf16.mxu0 %v14880_v59  ;;  %11315 = vmatprep.subr.bf16.mxu1 %v15675_v3 }
 0xe9b   :  { %11288 = vmatpush1.bf16.msra.mxu0 %v14887_v34  ;;  %11317 = vmatpush3.bf16.msra.mxu1 %v14889_v55 }
 0xe9c   :  { %11290 = vmatprep.subr.bf16.mxu0 %v14893_v14  ;;  %11318 = vmatprep.subr.bf16.mxu1 %v15675_v3 }
 0xe9f   :  { %11292 = vmatpush1.bf16.msra.mxu0 %v14897_v18  ;;  %11320 = vmatpush3.bf16.msra.mxu1 %v14899_v58 }
 0xea0   :  { %11294 = vmatprep.subr.bf16.mxu0 %v14903_v20  ;;  %11321 = vmatprep.subr.bf16.mxu1 %v15675_v3 }
 0xea3   :  { %11296 = vmatpush1.bf16.msra.mxu0 %v14907_v12  ;;  %11323 = vmatpush3.bf16.msra.mxu1 %v14909_v35 }
 0xea4   :  { %11298 = vmatprep.subr.bf16.mxu0 %v14913_v5  ;;  %11324 = vmatprep.subr.bf16.mxu1 %v15675_v3 }
 0xea7   :  { %11300 = vmatpush1.bf16.msra.mxu0 %v14917_v19  ;;  %11326 = vmatpush3.bf16.msra.mxu1 %v14919_v21 }
 0xea8   :  { %11302 = vmatprep.subr.bf16.mxu0 %v14923_v43  ;;  %11327 = vmatprep.subr.bf16.mxu1 %v15675_v3 }
 0xeab   :  { %11304 = vmatpush1.bf16.msra.mxu0 %v14927_v38  ;;  %11329 = vmatpush3.bf16.msra.mxu1 %v14929_v54 }
 0xeac   :  { %11306 = vmatprep.subr.bf16.mxu0 %v14933_v9  ;;  %11330 = vmatprep.subr.bf16.mxu1 %v15675_v3 }
 0xeaf   :  { %11308 = vmatpush1.bf16.msra.mxu0 %v14937_v23  ;;  %11332 = vmatpush3.bf16.msra.mxu1 %v14939_v16 }
 0xeb0   :  { %11334 = vmatprep.subr.bf16.mxu0 %v14947_v29  ;;  %11398 = vmatprep.subr.bf16.mxu1 %v14949_v33 }
 0xeb2   :  { %6806 = vmatmul.mubr.f32.vlgmr.msra.gmra.mrb[50].mxu0 %v14866_v24  ;;  %8910 = vmatmul.mubr.f32.vlgmr.msra.gmra.mrb[54].mxu1 %v14866_v24  ;;  %v6925_v24 = vld [vmem:[#allocation13 + $0x48] sm:$0xff] }
 0xeb3   :  { %11336 = vmatpush1.bf16.msra.mxu0 %v14951_v51  ;;  %11400 = vmatpush1.bf16.msra.mxu1 %v14954_v63  ;;  %v14959_v32 = vpack.c.bf16 %v6929_v4, %v6925_v24  ;;  %v6940_v24 = vld [vmem:[#allocation13 + $0xc0] sm:$0xff] }
 0xeb4   :  { %11402 = vmatprep.subr.bf16.mxu1 %v14961_v30  ;;  %v6944_v4 = vld [vmem:[#allocation13 + $0xe0] sm:$0xff] }
 0xeb5   :  { %11338 = vmatprep.subr.bf16.mxu0 %v14959_v32  ;;  %v14987_v36 = vpack.c.bf16 %v6944_v4, %v6940_v24  ;;  %v6961_v24 = vld [vmem:[#allocation13 + $0x168] sm:$0xff]  ;;  %v6959_v4 = vld [vmem:[#allocation13 + $0x158] sm:$0xff] }
 0xeb6   :  { %v15007_v7 = vpack.c.bf16 %v6961_v24, %v6957_v48  ;;  %v15009_v57 = vpack.c.bf16 %v6963_v22, %v6959_v4  ;;  %v6969_v48 = vld [vmem:[#allocation13 + $0x1a8] sm:$0xff]  ;;  %v6967_v24 = vld [vmem:[#allocation13 + $0x198] sm:$0xff]  ;;  %v6964_v22 = vld [vmem:[#allocation13 + $0x180] sm:$0xff] }
 0xeb7   :  { %11340 = vmatpush1.bf16.msra.mxu0 %v14963_v27  ;;  %11404 = vmatpush1.bf16.msra.mxu1 %v14966_v13  ;;  %v6971_v4 = vld [vmem:[#allocation13 + $0x1b8] sm:$0xff] }
 0xeb8   :  { %11342 = vmatprep.subr.bf16.mxu0 %v14971_v15  ;;  %11406 = vmatprep.subr.bf16.mxu1 %v14973_v56  ;;  %16210 = vst [vmem:[#allocation66_spill] sm:$0xff] %v15007_v7  ;;  %16211 = vst [vmem:[#allocation67_spill] sm:$0xff] %v15009_v57  ;;  %v15021_v49 = vpack.c.bf16 %v6971_v4, %v6967_v24  ;;  %v6979_v24 = vld [vmem:[#allocation13 + $0x1f8] sm:$0xff]  ;;  %v6972_v4 = vld [vmem:[#allocation13 + $0x1c0] sm:$0xff] }
 0xeba   :  { %16215 = vst [vmem:[#allocation25_spill] sm:$0xff] %v15021_v49 }
 0xebb   :  { %11344 = vmatpush1.bf16.msra.mxu0 %v14975_v61  ;;  %11408 = vmatpush1.bf16.msra.mxu1 %v14978_v26 }
 0xebc   :  { %11346 = vmatprep.subr.bf16.mxu0 %v14983_v45  ;;  %11410 = vmatprep.subr.bf16.mxu1 %v14985_v28 }
 0xebf   :  { %11348 = vmatpush1.bf16.msra.mxu0 %v14987_v36  ;;  %11412 = vmatpush1.bf16.msra.mxu1 %v14990_v42 }
 0xec0   :  { %11350 = vmatprep.subr.bf16.mxu0 %v14995_v1  ;;  %11414 = vmatprep.subr.bf16.mxu1 %v14997_v39  ;;  %v7023_v39 = vld [vmem:[#allocation13 + $0x358] sm:$0xff] }
 0xec3   :  { %11352 = vmatpush1.bf16.msra.mxu0 %v14999_v53  ;;  %11416 = vmatpush1.bf16.msra.mxu1 %v15002_v46  ;;  %v15019_v46 = vpack.c.bf16 %v6969_v48, %v6965_v25  ;;  %v15023_v53 = vpack.c.bf16 %v6968_v41, %v6964_v22  ;;  %v6977_v25 = vld [vmem:[#allocation13 + $0x1e8] sm:$0xff]  ;;  %v6975_v48 = vld [vmem:[#allocation13 + $0x1d8] sm:$0xff]  ;;  %v6976_v22 = vld [vmem:[#allocation13 + $0x1e0] sm:$0xff] }
 0xec4   :  { %11354 = vmatprep.subr.bf16.mxu0 %v15007_v7  ;;  %11418 = vmatprep.subr.bf16.mxu1 %v15009_v57  ;;  %v15026_v57 = vpack.c.bf16 %v6970_v50, %v6966_v47  ;;  %v15033_v41 = vpack.c.bf16 %v6979_v24, %v6975_v48  ;;  %v15035_v7 = vpack.c.bf16 %v6976_v22, %v6972_v4  ;;  %v6974_v47 = vld [vmem:[#allocation13 + $0x1d0] sm:$0xff]  ;;  %v6987_v48 = vld [vmem:[#allocation13 + $0x238] sm:$0xff]  ;;  %v6980_v24 = vld [vmem:[#allocation13 + $0x200] sm:$0xff] }
 0xec5   :  { %16214 = vst [vmem:[#allocation24_spill] sm:$0xff] %v15019_v46  ;;  %16216 = vst [vmem:[#allocation26_spill] sm:$0xff] %v15023_v53  ;;  %v6978_v50 = vld [vmem:[#allocation13 + $0x1f0] sm:$0xff]  ;;  %v6984_v4 = vld [vmem:[#allocation13 + $0x220] sm:$0xff] }
 0xec6   :  { %16217 = vst [vmem:[#allocation27_spill] sm:$0xff] %v15026_v57  ;;  %16219 = vst [vmem:[#allocation29_spill] sm:$0xff] %v15033_v41 }
 0xec7   :  { %11356 = vmatpush1.bf16.msra.mxu0 %v15011_v40  ;;  %11420 = vmatpush1.bf16.msra.mxu1 %v15014_v60  ;;  %v6973_v60 = vld [vmem:[#allocation13 + $0x1c8] sm:$0xff]  ;;  %16220 = vst [vmem:[#allocation30_spill] sm:$0xff] %v15035_v7 }
 0xec8   :  { %11358 = vmatprep.subr.bf16.mxu0 %v15019_v46  ;;  %11422 = vmatprep.subr.bf16.mxu1 %v15021_v49  ;;  %v15031_v40 = vpack.c.bf16 %v6977_v25, %v6973_v60  ;;  %v15038_v49 = vpack.c.bf16 %v6978_v50, %v6974_v47  ;;  %v6985_v60 = vld [vmem:[#allocation13 + $0x228] sm:$0xff]  ;;  %v6983_v25 = vld [vmem:[#allocation13 + $0x218] sm:$0xff]  ;;  %v15047_v46 = vpack.c.bf16 %v6984_v4, %v6980_v24  ;;  %v6982_v47 = vld [vmem:[#allocation13 + $0x210] sm:$0xff] }
 0xec9   :  { %v15045_v22 = vpack.c.bf16 %v6987_v48, %v6983_v25  ;;  %v6986_v50 = vld [vmem:[#allocation13 + $0x230] sm:$0xff]  ;;  %v6995_v25 = vld [vmem:[#allocation13 + $0x278] sm:$0xff]  ;;  %v6988_v48 = vld [vmem:[#allocation13 + $0x240] sm:$0xff] }
 0xeca   :  { %16218 = vst [vmem:[#allocation28_spill] sm:$0xff] %v15031_v40  ;;  %16221 = vst [vmem:[#allocation31_spill] sm:$0xff] %v15038_v49  ;;  %v6992_v24 = vld [vmem:[#allocation13 + $0x260] sm:$0xff] }
 0xecb   :  { %11360 = vmatpush1.bf16.msra.mxu0 %v15023_v53  ;;  %11424 = vmatpush1.bf16.msra.mxu1 %v15026_v57  ;;  %v6981_v57 = vld [vmem:[#allocation13 + $0x208] sm:$0xff]  ;;  %16223 = vst [vmem:[#allocation33_spill] sm:$0xff] %v15045_v22  ;;  %16224 = vst [vmem:[#allocation34_spill] sm:$0xff] %v15047_v46 }
 0xecc   :  { %11362 = vmatprep.subr.bf16.mxu0 %v15031_v40  ;;  %11426 = vmatprep.subr.bf16.mxu1 %v15033_v41  ;;  %v15043_v53 = vpack.c.bf16 %v6985_v60, %v6981_v57  ;;  %v15050_v41 = vpack.c.bf16 %v6986_v50, %v6982_v47  ;;  %v6993_v57 = vld [vmem:[#allocation13 + $0x268] sm:$0xff]  ;;  %v6991_v60 = vld [vmem:[#allocation13 + $0x258] sm:$0xff]  ;;  %v15059_v40 = vpack.c.bf16 %v6992_v24, %v6988_v48  ;;  %v6990_v47 = vld [vmem:[#allocation13 + $0x250] sm:$0xff] }
 0xecd   :  { %v15057_v4 = vpack.c.bf16 %v6995_v25, %v6991_v60  ;;  %v6994_v50 = vld [vmem:[#allocation13 + $0x270] sm:$0xff]  ;;  %v7003_v60 = vld [vmem:[#allocation13 + $0x2b8] sm:$0xff]  ;;  %v6996_v25 = vld [vmem:[#allocation13 + $0x280] sm:$0xff] }
 0xece   :  { %16222 = vst [vmem:[#allocation32_spill] sm:$0xff] %v15043_v53  ;;  %16225 = vst [vmem:[#allocation35_spill] sm:$0xff] %v15050_v41  ;;  %v7000_v48 = vld [vmem:[#allocation13 + $0x2a0] sm:$0xff] }
 0xecf   :  { %11364 = vmatpush1.bf16.msra.mxu0 %v15035_v7  ;;  %11428 = vmatpush1.bf16.msra.mxu1 %v15038_v49  ;;  %v6989_v49 = vld [vmem:[#allocation13 + $0x248] sm:$0xff]  ;;  %16227 = vst [vmem:[#allocation37_spill] sm:$0xff] %v15057_v4  ;;  %16228 = vst [vmem:[#allocation38_spill] sm:$0xff] %v15059_v40 }
 0xed0   :  { %11366 = vmatprep.subr.bf16.mxu0 %v15043_v53  ;;  %11430 = vmatprep.subr.bf16.mxu1 %v15045_v22  ;;  %v15055_v7 = vpack.c.bf16 %v6993_v57, %v6989_v49  ;;  %v15062_v22 = vpack.c.bf16 %v6994_v50, %v6990_v47  ;;  %v7001_v49 = vld [vmem:[#allocation13 + $0x2a8] sm:$0xff]  ;;  %v6999_v57 = vld [vmem:[#allocation13 + $0x298] sm:$0xff]  ;;  %v15071_v53 = vpack.c.bf16 %v7000_v48, %v6996_v25  ;;  %v6998_v47 = vld [vmem:[#allocation13 + $0x290] sm:$0xff] }
 0xed1   :  { %v15069_v24 = vpack.c.bf16 %v7003_v60, %v6999_v57  ;;  %v7002_v50 = vld [vmem:[#allocation13 + $0x2b0] sm:$0xff]  ;;  %v7011_v57 = vld [vmem:[#allocation13 + $0x2f8] sm:$0xff]  ;;  %v7004_v60 = vld [vmem:[#allocation13 + $0x2c0] sm:$0xff] }
 0xed2   :  { %16226 = vst [vmem:[#allocation36_spill] sm:$0xff] %v15055_v7  ;;  %16229 = vst [vmem:[#allocation39_spill] sm:$0xff] %v15062_v22  ;;  %v7008_v25 = vld [vmem:[#allocation13 + $0x2e0] sm:$0xff] }
 0xed3   :  { %11368 = vmatpush1.bf16.msra.mxu0 %v15047_v46  ;;  %11432 = vmatpush1.bf16.msra.mxu1 %v15050_v41  ;;  %v6997_v41 = vld [vmem:[#allocation13 + $0x288] sm:$0xff]  ;;  %16231 = vst [vmem:[#allocation41_spill] sm:$0xff] %v15069_v24  ;;  %16232 = vst [vmem:[#allocation42_spill] sm:$0xff] %v15071_v53 }
 0xed4   :  { %11370 = vmatprep.subr.bf16.mxu0 %v15055_v7  ;;  %11434 = vmatprep.subr.bf16.mxu1 %v15057_v4  ;;  %v15067_v46 = vpack.c.bf16 %v7001_v49, %v6997_v41  ;;  %v15074_v4 = vpack.c.bf16 %v7002_v50, %v6998_v47  ;;  %v7009_v41 = vld [vmem:[#allocation13 + $0x2e8] sm:$0xff]  ;;  %v7007_v49 = vld [vmem:[#allocation13 + $0x2d8] sm:$0xff]  ;;  %v15083_v7 = vpack.c.bf16 %v7008_v25, %v7004_v60  ;;  %v7006_v47 = vld [vmem:[#allocation13 + $0x2d0] sm:$0xff] }
 0xed5   :  { %v15081_v48 = vpack.c.bf16 %v7011_v57, %v7007_v49  ;;  %v7010_v50 = vld [vmem:[#allocation13 + $0x2f0] sm:$0xff]  ;;  %v7019_v49 = vld [vmem:[#allocation13 + $0x338] sm:$0xff]  ;;  %v7012_v57 = vld [vmem:[#allocation13 + $0x300] sm:$0xff] }
 0xed6   :  { %16230 = vst [vmem:[#allocation40_spill] sm:$0xff] %v15067_v46  ;;  %16233 = vst [vmem:[#allocation43_spill] sm:$0xff] %v15074_v4  ;;  %v7016_v60 = vld [vmem:[#allocation13 + $0x320] sm:$0xff] }
 0xed7   :  { %11372 = vmatpush1.bf16.msra.mxu0 %v15059_v40  ;;  %11436 = vmatpush1.bf16.msra.mxu1 %v15062_v22  ;;  %v7005_v22 = vld [vmem:[#allocation13 + $0x2c8] sm:$0xff]  ;;  %16235 = vst [vmem:[#allocation45_spill] sm:$0xff] %v15081_v48  ;;  %16236 = vst [vmem:[#allocation46_spill] sm:$0xff] %v15083_v7 }
 0xed8   :  { %11374 = vmatprep.subr.bf16.mxu0 %v15067_v46  ;;  %11438 = vmatprep.subr.bf16.mxu1 %v15069_v24  ;;  %v15079_v40 = vpack.c.bf16 %v7009_v41, %v7005_v22  ;;  %v15086_v24 = vpack.c.bf16 %v7010_v50, %v7006_v47  ;;  %v7017_v22 = vld [vmem:[#allocation13 + $0x328] sm:$0xff]  ;;  %v7015_v41 = vld [vmem:[#allocation13 + $0x318] sm:$0xff]  ;;  %v15095_v46 = vpack.c.bf16 %v7016_v60, %v7012_v57  ;;  %v7014_v47 = vld [vmem:[#allocation13 + $0x310] sm:$0xff] }
 0xed9   :  { %v15093_v25 = vpack.c.bf16 %v7019_v49, %v7015_v41  ;;  %v7018_v50 = vld [vmem:[#allocation13 + $0x330] sm:$0xff]  ;;  %v7020_v41 = vld [vmem:[#allocation13 + $0x340] sm:$0xff] }
 0xeda   :  { %16234 = vst [vmem:[#allocation44_spill] sm:$0xff] %v15079_v40  ;;  %16237 = vst [vmem:[#allocation47_spill] sm:$0xff] %v15086_v24  ;;  %v7024_v49 = vld [vmem:[#allocation13 + $0x360] sm:$0xff] }
 0xedb   :  { %11376 = vmatpush1.bf16.msra.mxu0 %v15071_v53  ;;  %11440 = vmatpush1.bf16.msra.mxu1 %v15074_v4  ;;  %v7013_v4 = vld [vmem:[#allocation13 + $0x308] sm:$0xff]  ;;  %16239 = vst [vmem:[#allocation49_spill] sm:$0xff] %v15093_v25  ;;  %16240 = vst [vmem:[#allocation50_spill] sm:$0xff] %v15095_v46  ;;  %v15107_v60 = vpack.c.bf16 %v7024_v49, %v7020_v41  ;;  %v7030_v41 = vld [vmem:[#allocation13 + $0x390] sm:$0xff] }
 0xedc   :  { %11378 = vmatprep.subr.bf16.mxu0 %v15079_v40  ;;  %11442 = vmatprep.subr.bf16.mxu1 %v15081_v48  ;;  %v15091_v53 = vpack.c.bf16 %v7017_v22, %v7013_v4  ;;  %v15098_v48 = vpack.c.bf16 %v7018_v50, %v7014_v47  ;;  %v7025_v40 = vld [vmem:[#allocation13 + $0x368] sm:$0xff]  ;;  %v7027_v22 = vld [vmem:[#allocation13 + $0x378] sm:$0xff]  ;;  %v7022_v47 = vld [vmem:[#allocation13 + $0x350] sm:$0xff] }
 0xedd   :  { %v15105_v57 = vpack.c.bf16 %v7027_v22, %v7023_v39  ;;  %16244 = vst [vmem:[#allocation54_spill] sm:$0xff] %v15107_v60  ;;  %v7026_v50 = vld [vmem:[#allocation13 + $0x370] sm:$0xff]  ;;  %v7028_v39 = vld [vmem:[#allocation13 + $0x380] sm:$0xff] }
 0xede   :  { %16238 = vst [vmem:[#allocation48_spill] sm:$0xff] %v15091_v53  ;;  %16241 = vst [vmem:[#allocation51_spill] sm:$0xff] %v15098_v48  ;;  %v7032_v22 = vld [vmem:[#allocation13 + $0x3a0] sm:$0xff] }
 0xedf   :  { %11380 = vmatpush1.bf16.msra.mxu0 %v15083_v7  ;;  %11444 = vmatpush1.bf16.msra.mxu1 %v15086_v24  ;;  %v7021_v7 = vld [vmem:[#allocation13 + $0x348] sm:$0xff]  ;;  %16243 = vst [vmem:[#allocation53_spill] sm:$0xff] %v15105_v57  ;;  %v15110_v24 = vpack.c.bf16 %v7026_v50, %v7022_v47  ;;  %v15118_v49 = vpack.c.bf16 %v7032_v22, %v7028_v39  ;;  %v7040_v39 = vld [vmem:[#allocation13 + $0x3e0] sm:$0xff]  ;;  %v7038_v22 = vld [vmem:[#allocation13 + $0x3d0] sm:$0xff] }
 0xee0   :  { %11382 = vmatprep.subr.bf16.mxu0 %v15091_v53  ;;  %11446 = vmatprep.subr.bf16.mxu1 %v15093_v25  ;;  %v15102_v4 = vpack.c.bf16 %v7025_v40, %v7021_v7  ;;  %v7029_v53 = vld [vmem:[#allocation13 + $0x388] sm:$0xff]  ;;  %v7035_v7 = vld [vmem:[#allocation13 + $0x3b8] sm:$0xff] }
 0xee1   :  { %v7033_v25 = vld [vmem:[#allocation13 + $0x3a8] sm:$0xff]  ;;  %16247 = vst [vmem:[#allocation57_spill] sm:$0xff] %v15118_v49 }
 0xee2   :  { %16242 = vst [vmem:[#allocation52_spill] sm:$0xff] %v15102_v4  ;;  %v15113_v40 = vpack.c.bf16 %v7033_v25, %v7029_v53  ;;  %v7041_v47 = vld [vmem:[#allocation13 + $0x3e8] sm:$0xff]  ;;  %v7043_v25 = vld [vmem:[#allocation13 + $0x3f8] sm:$0xff] }
 0xee3   :  { %11384 = vmatpush1.bf16.msra.mxu0 %v15095_v46  ;;  %11448 = vmatpush1.bf16.msra.mxu1 %v15098_v48  ;;  %v7031_v46 = vld [vmem:[#allocation13 + $0x398] sm:$0xff]  ;;  %v7034_v48 = vld [vmem:[#allocation13 + $0x3b0] sm:$0xff] }
 0xee4   :  { %11386 = vmatprep.subr.bf16.mxu0 %v15102_v4  ;;  %11450 = vmatprep.subr.bf16.mxu1 %v15105_v57  ;;  %16245 = vst [vmem:[#allocation55_spill] sm:$0xff] %v15113_v40  ;;  %v15115_v1 = vpack.c.bf16 %v7035_v7, %v7031_v46  ;;  %v7037_v4 = vld [vmem:[#allocation13 + $0x3c8] sm:$0xff]  ;;  %v15122_v50 = vpack.c.bf16 %v7034_v48, %v7030_v41  ;;  %v7039_v46 = vld [vmem:[#allocation13 + $0x3d8] sm:$0xff]  ;;  %v7036_v7 = vld [vmem:[#allocation13 + $0x3c0] sm:$0xff] }
 0xee5   :  { %v15124_v53 = vpack.c.bf16 %v7041_v47, %v7037_v4  ;;  %v15127_v57 = vpack.c.bf16 %v7043_v25, %v7039_v46  ;;  %v15130_v42 = vpack.c.bf16 %v7040_v39, %v7036_v7 }
 0xee6   :  { %16246 = vst [vmem:[#allocation56_spill] sm:$0xff] %v15115_v1  ;;  %16248 = vst [vmem:[#allocation58_spill] sm:$0xff] %v15122_v50 }
 0xee7   :  { %11388 = vmatpush1.bf16.msra.mxu0 %v15107_v60  ;;  %11452 = vmatpush1.bf16.msra.mxu1 %v15110_v24  ;;  %16249 = vst [vmem:[#allocation59_spill] sm:$0xff] %v15124_v53  ;;  %16250 = vst [vmem:[#allocation60_spill] sm:$0xff] %v15127_v57  ;;  %v7042_v60 = vld [vmem:[#allocation13 + $0x3f0] sm:$0xff] }
 0xee8   :  { %11390 = vmatprep.subr.bf16.mxu0 %v15113_v40  ;;  %11454 = vmatprep.subr.bf16.mxu1 %v15115_v1  ;;  %16251 = vst [vmem:[#allocation61_spill] sm:$0xff] %v15130_v42  ;;  %v15134_v48 = vpack.c.bf16 %v7042_v60, %v7038_v22 }
 0xeea   :  { %16252 = vst [vmem:[#allocation62_spill] sm:$0xff] %v15134_v48 }
 0xeeb   :  { %11392 = vmatpush1.bf16.msra.mxu0 %v15118_v49  ;;  %11456 = vmatpush1.bf16.msra.mxu1 %v15122_v50 }
 0xeec   :  { %11394 = vmatprep.subr.bf16.mxu0 %v15124_v53  ;;  %11458 = vmatprep.subr.bf16.mxu1 %v15127_v57 }
 0xeef   :  { %11396 = vmatpush1.bf16.msra.mxu0 %v15130_v42  ;;  %11460 = vmatpush1.bf16.msra.mxu1 %v15134_v48 }
 0xef0   :  { %11462 = vmatprep.subr.bf16.mxu0 %v14847_v8  ;;  %11493 = vmatprep.subr.bf16.mxu1 %v15675_v3 }
 0xf65   :  { %v6597_v4 = vpop.f32.mrb[48].mxu0  ;;  %v6668_v41 = vpop.f32.mrb[52].mxu1 }
 0xf66   :  { %v8100_v47 = vmul.f32 -1.442695, %v6597_v4  ;;  %v6599_v46 = vpop.f32.mrb[49].mxu0  ;;  %v6670_v25 = vpop.f32.mrb[53].mxu1 }
 0xf67   :  { %v8101_v7 = vmul.f32 -1.442695, %v6599_v46 }
 0xf68   :  { %11956 = vpow2.f32 %v8100_v47 }
 0xf69   :  { %11958 = vpow2.f32 %v8101_v7 }
 0xf72   :  { %v11957_v60 = vpop.eup %11956 }
 0xf73   :  { %v6676_v39 = vadd.f32 1.0, %v11957_v60  ;;  %v11959_v22 = vpop.eup %11958 }
 0xf74   :  { %v6682_v57 = vadd.f32 1.0, %v11959_v22 }
 0xf75   :  { %11960 = vrcp.f32 %v6676_v39 }
 0xf76   :  { %11962 = vrcp.f32 %v6682_v57 }
 0xf7f   :  { %v11961_v42 = vpop.eup %11960 }
 0xf80   :  { %v6685_v48 = vmul.f32 %v11961_v42, %v6670_v25  ;;  %v11963_v7 = vpop.eup %11962 }
 0xf81   :  { %v6688_v22 = vsub.f32 1.0, %v11963_v7 }
 0xf82   :  { %v6686_v53 = vadd.f32 %v6685_v48, %v6668_v41 }
 0xf84   :  { %11964 = vtanh.f32 %v6686_v53  ;;  %v6690_v53 = vmul.f32 %v11963_v7, %v14853_v37 }
 0xf85   :  { %v6807_v8 = vpop.f32.mrb[50].mxu0  ;;  %v6878_v50 = vpop.f32.mrb[54].mxu1 }
 0xf86   :  { %v6883_v49 = vrot.slane %v6807_v8, 4  ;;  %v6809_v1 = vpop.f32.mrb[51].mxu0  ;;  %v8911_v4 = vpop.f32.mrb[55].mxu1 }
 0xf87   :  { %v6893_v40 = vrot.slane %v6809_v1, 4  ;;  %v6903_v4 = vrot.slane %v6878_v50, 4  ;;  %v16293_v50 = vld [vmem:[#allocation55_spill] sm:$0xff] }
 0xf88   :  { %v6885_v47 = vadd.f32 %v6883_v49, %v16059_v52 }
 0xf89   :  { %v6895_v46 = vadd.f32 %v6893_v40, %v16060_v44 }
 0xf8a   :  { %v8102_v60 = vmul.f32 -1.442695, %v6885_v47 }
 0xf8b   :  { %v8103_v39 = vmul.f32 -1.442695, %v6895_v46  ;;  %v6910_v46 = vrot.slane %v14859_v62, 7  ;;  %v16254_v62 = vld [vmem:[#allocation70_spill] sm:$0xff] }
 0xf8c   :  { %11966 = vpow2.f32 %v8102_v60 }
 0xf8d   :  { %11968 = vpow2.f32 %v8103_v39 }
 0xf8e   :  { %v11965_v57 = vpop.eup %11964 }
 0xf8f   :  { %v6689_v42 = vmul.f32 %v11965_v57, %v6688_v22 }
 0xf91   :  { %v15144_v48 = vadd.f32 %v6690_v53, %v6689_v42 }
 0xf93   :  { %6692 = vst [vmem:[#allocation3 + $0x3] sm:$0x1] %v15144_v48  ;;  %v6915_v1 = vrot.slane %v15144_v48, 4 }
 0xf95   :  { %v7046_v41 = vrot.slane %v6915_v1, 4 }
 0xf96   :  { %v11967_v49 = vpop.eup %11966 }
 0xf97   :  { %v11969_v25 = vpop.eup %11968  ;;  %v6889_v40 = vadd.f32 1.0, %v11967_v49  ;;  %7113 = vmatprep.mubr.f32.mxu0 %v7046_v41  ;;  %7184 = vmatprep.mubr.f32.mxu1 %v7046_v41  ;;  %v16294_v41 = vld [vmem:[#allocation56_spill] sm:$0xff]  ;;  %v16295_v49 = vld [vmem:[#allocation57_spill] sm:$0xff] }
 0xf98   :  { %v6899_v8 = vadd.f32 1.0, %v11969_v25  ;;  %v16296_v25 = vld [vmem:[#allocation58_spill] sm:$0xff] }
 0xf99   :  { %11970 = vrcp.f32 %v6889_v40  ;;  %v16297_v40 = vld [vmem:[#allocation59_spill] sm:$0xff] }
 0xf9a   :  { %11972 = vrcp.f32 %v6899_v8  ;;  %v16298_v8 = vld [vmem:[#allocation60_spill] sm:$0xff] }
 0xfa3   :  { %v11971_v47 = vpop.eup %11970 }
 0xfa4   :  { %v11973_v37 = vpop.eup %11972  ;;  %v6905_v7 = vmul.f32 %v11971_v47, %v6903_v4  ;;  %v16299_v4 = vld [vmem:[#allocation61_spill] sm:$0xff]  ;;  %v16300_v47 = vld [vmem:[#allocation62_spill] sm:$0xff] }
 0xfa5   :  { %v6912_v60 = vmul.f32 %v11973_v37, %v6910_v46  ;;  %v6908_v22 = vsub.f32 1.0, %v11973_v37 }
 0xfa6   :  { %v6906_v39 = vadd.f32 %v6905_v7, %v16061_v10 }
 0xfa8   :  { %11974 = vtanh.f32 %v6906_v39 }
 0xfb2   :  { %v11975_v57 = vpop.eup %11974 }
 0xfb3   :  { %v6909_v42 = vmul.f32 %v11975_v57, %v6908_v22 }
 0xfb5   :  { %v15150_v53 = vadd.f32 %v6912_v60, %v6909_v42 }
 0xfb7   :  { %v7045_v1 = vrot.slane %v15150_v53, 4 }
 0xfb9   :  { %7114 = vmatmul.mubr.f32.vlgmr.msra.gmra.mrb[52].mxu0 %v7045_v1  ;;  %7185 = vmatmul.mubr.f32.vlgmr.msra.gmra.mrb[56].mxu1 %v7045_v1 }
 0xfba   :  { %11464 = vmatpush1.bf16.msra.mxu0 %v14861_v0  ;;  %11495 = vmatpush3.bf16.msra.mxu1 %v14863_v2  ;;  %v16255_v0 = vld [vmem:[#allocation71_spill] sm:$0xff]  ;;  %v16256_v2 = vld [vmem:[#allocation72_spill] sm:$0xff] }
 0xfbb   :  { %11466 = vmatprep.subr.bf16.mxu0 %v14868_v11  ;;  %11496 = vmatprep.subr.bf16.mxu1 %v15675_v3  ;;  %v16257_v11 = vld [vmem:[#allocation65_spill] sm:$0xff] }
 0xfbc   :  { %7323 = vmatprep.mubr.f32.mxu0 %v15680_v17  ;;  %8944 = vmatprep.mubr.msk.f32.mxu1 %vm12211_vm0, %v15680_v17 }
 0xfbe   :  { %11468 = vmatpush1.bf16.msra.mxu0 %v14874_v6  ;;  %11498 = vmatpush3.bf16.msra.mxu1 %v14876_v31  ;;  %v16258_v6 = vld [vmem:[#allocation66_spill] sm:$0xff]  ;;  %v16259_v31 = vld [vmem:[#allocation67_spill] sm:$0xff] }
 0xfbf   :  { %11470 = vmatprep.subr.bf16.mxu0 %v14880_v59  ;;  %11499 = vmatprep.subr.bf16.mxu1 %v15675_v3  ;;  %v16260_v59 = vld [vmem:[#allocation22_spill] sm:$0xff] }
 0xfc2   :  { %11472 = vmatpush1.bf16.msra.mxu0 %v14887_v34  ;;  %11501 = vmatpush3.bf16.msra.mxu1 %v14889_v55  ;;  %v16261_v34 = vld [vmem:[#allocation23_spill] sm:$0xff]  ;;  %v16262_v55 = vld [vmem:[#allocation24_spill] sm:$0xff] }
 0xfc3   :  { %11474 = vmatprep.subr.bf16.mxu0 %v14893_v14  ;;  %11502 = vmatprep.subr.bf16.mxu1 %v15675_v3  ;;  %v16263_v14 = vld [vmem:[#allocation25_spill] sm:$0xff] }
 0xfc6   :  { %11476 = vmatpush1.bf16.msra.mxu0 %v14897_v18  ;;  %11504 = vmatpush3.bf16.msra.mxu1 %v14899_v58  ;;  %v16264_v18 = vld [vmem:[#allocation26_spill] sm:$0xff]  ;;  %v16265_v58 = vld [vmem:[#allocation27_spill] sm:$0xff] }
 0xfc7   :  { %11478 = vmatprep.subr.bf16.mxu0 %v14903_v20  ;;  %11505 = vmatprep.subr.bf16.mxu1 %v15675_v3  ;;  %v16266_v20 = vld [vmem:[#allocation28_spill] sm:$0xff] }
 0xfca   :  { %11480 = vmatpush1.bf16.msra.mxu0 %v14907_v12  ;;  %11507 = vmatpush3.bf16.msra.mxu1 %v14909_v35  ;;  %v16267_v12 = vld [vmem:[#allocation29_spill] sm:$0xff]  ;;  %v16268_v35 = vld [vmem:[#allocation30_spill] sm:$0xff] }
 0xfcb   :  { %11482 = vmatprep.subr.bf16.mxu0 %v14913_v5  ;;  %11508 = vmatprep.subr.bf16.mxu1 %v15675_v3  ;;  %v16269_v5 = vld [vmem:[#allocation31_spill] sm:$0xff] }
 0xfce   :  { %11484 = vmatpush1.bf16.msra.mxu0 %v14917_v19  ;;  %11510 = vmatpush3.bf16.msra.mxu1 %v14919_v21  ;;  %v16270_v19 = vld [vmem:[#allocation32_spill] sm:$0xff]  ;;  %v16271_v21 = vld [vmem:[#allocation33_spill] sm:$0xff] }
 0xfcf   :  { %11486 = vmatprep.subr.bf16.mxu0 %v14923_v43  ;;  %11511 = vmatprep.subr.bf16.mxu1 %v15675_v3  ;;  %v16272_v43 = vld [vmem:[#allocation34_spill] sm:$0xff] }
 0xfd2   :  { %11488 = vmatpush1.bf16.msra.mxu0 %v14927_v38  ;;  %11513 = vmatpush3.bf16.msra.mxu1 %v14929_v54  ;;  %v16273_v38 = vld [vmem:[#allocation35_spill] sm:$0xff]  ;;  %v16274_v54 = vld [vmem:[#allocation36_spill] sm:$0xff] }
 0xfd3   :  { %11490 = vmatprep.subr.bf16.mxu0 %v14933_v9  ;;  %11514 = vmatprep.subr.bf16.mxu1 %v15675_v3  ;;  %v16253_v3 = vld [vmem:[#allocation69_spill] sm:$0xff] }
 0xfd4   :  { %v16275_v9 = vld [vmem:[#allocation37_spill] sm:$0xff] }
 0xfd6   :  { %11492 = vmatpush1.bf16.msra.mxu0 %v14937_v23  ;;  %11516 = vmatpush3.bf16.msra.mxu1 %v14939_v16  ;;  %v16276_v23 = vld [vmem:[#allocation38_spill] sm:$0xff]  ;;  %v16277_v16 = vld [vmem:[#allocation39_spill] sm:$0xff] }
 0xfd7   :  { %11518 = vmatprep.subr.bf16.mxu0 %v14947_v29  ;;  %11582 = vmatprep.subr.bf16.mxu1 %v14949_v33  ;;  %v16278_v29 = vld [vmem:[#allocation40_spill] sm:$0xff]  ;;  %v16279_v33 = vld [vmem:[#allocation41_spill] sm:$0xff] }
 0xfd9   :  { %7324 = vmatmul.mubr.f32.vlgmr.msra.gmra.mrb[54].mxu0 %v7045_v1  ;;  %8945 = vmatmul.mubr.f32.vlgmr.msra.gmra.mrb[58].mxu1 %v7045_v1 }
 0xfda   :  { %11520 = vmatpush1.bf16.msra.mxu0 %v14951_v51  ;;  %11584 = vmatpush1.bf16.msra.mxu1 %v14954_v63  ;;  %v16280_v51 = vld [vmem:[#allocation42_spill] sm:$0xff]  ;;  %v16281_v63 = vld [vmem:[#allocation43_spill] sm:$0xff] }
 0xfdb   :  { %11522 = vmatprep.subr.bf16.mxu0 %v14959_v32  ;;  %11586 = vmatprep.subr.bf16.mxu1 %v14961_v30  ;;  %v16282_v32 = vld [vmem:[#allocation44_spill] sm:$0xff]  ;;  %v16283_v30 = vld [vmem:[#allocation45_spill] sm:$0xff] }
 0xfde   :  { %11524 = vmatpush1.bf16.msra.mxu0 %v14963_v27  ;;  %11588 = vmatpush1.bf16.msra.mxu1 %v14966_v13  ;;  %v16284_v27 = vld [vmem:[#allocation46_spill] sm:$0xff]  ;;  %v16285_v13 = vld [vmem:[#allocation47_spill] sm:$0xff] }
 0xfdf   :  { %11526 = vmatprep.subr.bf16.mxu0 %v14971_v15  ;;  %11590 = vmatprep.subr.bf16.mxu1 %v14973_v56  ;;  %v16286_v15 = vld [vmem:[#allocation48_spill] sm:$0xff]  ;;  %v16287_v56 = vld [vmem:[#allocation49_spill] sm:$0xff] }
 0xfe2   :  { %11528 = vmatpush1.bf16.msra.mxu0 %v14975_v61  ;;  %11592 = vmatpush1.bf16.msra.mxu1 %v14978_v26  ;;  %v16288_v61 = vld [vmem:[#allocation50_spill] sm:$0xff]  ;;  %v16289_v26 = vld [vmem:[#allocation51_spill] sm:$0xff] }
 0xfe3   :  { %11530 = vmatprep.subr.bf16.mxu0 %v14983_v45  ;;  %11594 = vmatprep.subr.bf16.mxu1 %v14985_v28  ;;  %v16290_v45 = vld [vmem:[#allocation52_spill] sm:$0xff]  ;;  %v16291_v28 = vld [vmem:[#allocation53_spill] sm:$0xff] }
 0xfe6   :  { %11532 = vmatpush1.bf16.msra.mxu0 %v14987_v36  ;;  %11596 = vmatpush1.bf16.msra.mxu1 %v16253_v3  ;;  %v16292_v36 = vld [vmem:[#allocation54_spill] sm:$0xff] }
 0xfe7   :  { %11534 = vmatprep.subr.bf16.mxu0 %v16254_v62  ;;  %11598 = vmatprep.subr.bf16.mxu1 %v16255_v0 }
 0xfea   :  { %11536 = vmatpush1.bf16.msra.mxu0 %v16256_v2  ;;  %11600 = vmatpush1.bf16.msra.mxu1 %v16257_v11 }
 0xfeb   :  { %11538 = vmatprep.subr.bf16.mxu0 %v16258_v6  ;;  %11602 = vmatprep.subr.bf16.mxu1 %v16259_v31 }
 0xfee   :  { %11540 = vmatpush1.bf16.msra.mxu0 %v16260_v59  ;;  %11604 = vmatpush1.bf16.msra.mxu1 %v16261_v34 }
 0xfef   :  { %11542 = vmatprep.subr.bf16.mxu0 %v16262_v55  ;;  %11606 = vmatprep.subr.bf16.mxu1 %v16263_v14 }
 0xff2   :  { %11544 = vmatpush1.bf16.msra.mxu0 %v16264_v18  ;;  %11608 = vmatpush1.bf16.msra.mxu1 %v16265_v58 }
 0xff3   :  { %11546 = vmatprep.subr.bf16.mxu0 %v16266_v20  ;;  %11610 = vmatprep.subr.bf16.mxu1 %v16267_v12 }
 0xff6   :  { %11548 = vmatpush1.bf16.msra.mxu0 %v16268_v35  ;;  %11612 = vmatpush1.bf16.msra.mxu1 %v16269_v5 }
 0xff7   :  { %11550 = vmatprep.subr.bf16.mxu0 %v16270_v19  ;;  %11614 = vmatprep.subr.bf16.mxu1 %v16271_v21 }
 0xffa   :  { %11552 = vmatpush1.bf16.msra.mxu0 %v16272_v43  ;;  %11616 = vmatpush1.bf16.msra.mxu1 %v16273_v38 }
 0xffb   :  { %11554 = vmatprep.subr.bf16.mxu0 %v16274_v54  ;;  %11618 = vmatprep.subr.bf16.mxu1 %v16275_v9 }
 0xffe   :  { %11556 = vmatpush1.bf16.msra.mxu0 %v16276_v23  ;;  %11620 = vmatpush1.bf16.msra.mxu1 %v16277_v16 }
 0xfff   :  { %11558 = vmatprep.subr.bf16.mxu0 %v16278_v29  ;;  %11622 = vmatprep.subr.bf16.mxu1 %v16279_v33  ;;  %v7428_v29 = vrot.slane %v15150_v53, 7 }
0x1002   :  { %11560 = vmatpush1.bf16.msra.mxu0 %v16280_v51  ;;  %11624 = vmatpush1.bf16.msra.mxu1 %v16281_v63 }
0x1003   :  { %11562 = vmatprep.subr.bf16.mxu0 %v16282_v32  ;;  %11626 = vmatprep.subr.bf16.mxu1 %v16283_v30 }
0x1006   :  { %11564 = vmatpush1.bf16.msra.mxu0 %v16284_v27  ;;  %11628 = vmatpush1.bf16.msra.mxu1 %v16285_v13 }
0x1007   :  { %11566 = vmatprep.subr.bf16.mxu0 %v16286_v15  ;;  %11630 = vmatprep.subr.bf16.mxu1 %v16287_v56  ;;  %v7729_v56 = vld [vmem:[#allocation2] sm:$0xff] }
0x100a   :  { %11568 = vmatpush1.bf16.msra.mxu0 %v16288_v61  ;;  %11632 = vmatpush1.bf16.msra.mxu1 %v16289_v26 }
0x100b   :  { %11570 = vmatprep.subr.bf16.mxu0 %v16290_v45  ;;  %11634 = vmatprep.subr.bf16.mxu1 %v16291_v28 }
0x100e   :  { %11572 = vmatpush1.bf16.msra.mxu0 %v16292_v36  ;;  %11636 = vmatpush1.bf16.msra.mxu1 %v15110_v24 }
0x100f   :  { %11574 = vmatprep.subr.bf16.mxu0 %v16293_v50  ;;  %11638 = vmatprep.subr.bf16.mxu1 %v16294_v41 }
0x1012   :  { %11576 = vmatpush1.bf16.msra.mxu0 %v16295_v49  ;;  %11640 = vmatpush1.bf16.msra.mxu1 %v16296_v25 }
0x1013   :  { %11578 = vmatprep.subr.bf16.mxu0 %v16297_v40  ;;  %11642 = vmatprep.subr.bf16.mxu1 %v16298_v8 }
0x1016   :  { %11580 = vmatpush1.bf16.msra.mxu0 %v16299_v4  ;;  %11644 = vmatpush1.bf16.msra.mxu1 %v16300_v47 }
0x1017   :  { %8947 = vmatprep.subr.mxu0 %v15680_v17  ;;  %8952 = vmatprep.subr.mxu1 %v15680_v17 }
0x108c   :  { %v7115_v24 = vpop.f32.mrb[52].mxu0  ;;  %v7186_v46 = vpop.f32.mrb[56].mxu1 }
0x108d   :  { %v8104_v37 = vmul.f32 -1.442695, %v7115_v24  ;;  %v7117_v7 = vpop.f32.mrb[53].mxu0  ;;  %v7188_v60 = vpop.f32.mrb[57].mxu1 }
0x108e   :  { %v8105_v39 = vmul.f32 -1.442695, %v7117_v7 }
0x108f   :  { %11976 = vpow2.f32 %v8104_v37 }
0x1090   :  { %11978 = vpow2.f32 %v8105_v39 }
0x1099   :  { %v11977_v22 = vpop.eup %11976 }
0x109a   :  { %v7194_v57 = vadd.f32 1.0, %v11977_v22  ;;  %v11979_v42 = vpop.eup %11978 }
0x109b   :  { %v7200_v1 = vadd.f32 1.0, %v11979_v42 }
0x109c   :  { %11980 = vrcp.f32 %v7194_v57 }
0x109d   :  { %11982 = vrcp.f32 %v7200_v1 }
0x10a6   :  { %v11981_v3 = vpop.eup %11980 }
0x10a7   :  { %v7203_v62 = vmul.f32 %v11981_v3, %v7188_v60  ;;  %v11983_v18 = vpop.eup %11982 }
0x10a8   :  { %v7206_v12 = vsub.f32 1.0, %v11983_v18  ;;  %v7208_v19 = vmul.f32 %v11983_v18, %v15144_v48  ;;  %v7891_v18 = vld [vmem:[#allocation15 + $0x20] sm:$0xff] }
0x10a9   :  { %v7204_v0 = vadd.f32 %v7203_v62, %v7186_v46 }
0x10ab   :  { %11984 = vtanh.f32 %v7204_v0  ;;  %v7888_v0 = vld [vmem:[#allocation15 + $0x8] sm:$0xff] }
0x10ac   :  { %v7325_v2 = vpop.f32.mrb[54].mxu0  ;;  %v7396_v11 = vpop.f32.mrb[58].mxu1 }
0x10ad   :  { %v7401_v6 = vrot.slane %v7325_v2, 3  ;;  %v7327_v31 = vpop.f32.mrb[55].mxu0  ;;  %v8946_v59 = vpop.f32.mrb[59].mxu1  ;;  %v7890_v2 = vld [vmem:[#allocation15 + $0x18] sm:$0xff] }
0x10ae   :  { %v7411_v34 = vrot.slane %v7327_v31, 3  ;;  %v7889_v31 = vld [vmem:[#allocation15 + $0x10] sm:$0xff]  ;;  %v7892_v59 = vld [vmem:[#allocation15 + $0x28] sm:$0xff] }
0x10af   :  { %v7403_v55 = vadd.f32 %v7401_v6, %v16059_v52  ;;  %v7421_v52 = vrot.slane %v7396_v11, 3  ;;  %v7887_v11 = vld [vmem:[#allocation15] sm:$0xff]  ;;  %v11645_v6 = vpack.c.bf16 %v7890_v2, %v7888_v0 }
0x10b0   :  { %v7413_v14 = vadd.f32 %v7411_v34, %v16060_v44  ;;  %v7894_v34 = vld [vmem:[#allocation15 + $0x38] sm:$0xff]  ;;  %v7927_v2 = vld [vmem:[#allocation15 + $0x140] sm:$0xff] }
0x10b1   :  { %v8106_v58 = vmul.f32 -1.442695, %v7403_v55  ;;  %v11647_v55 = vpack.c.bf16 %v7889_v31, %v7887_v11  ;;  %v7929_v11 = vld [vmem:[#allocation15 + $0x150] sm:$0xff]  ;;  %v7934_v31 = vld [vmem:[#allocation15 + $0x178] sm:$0xff] }
0x10b2   :  { %v8107_v20 = vmul.f32 -1.442695, %v7413_v14  ;;  %v11649_v14 = vpack.c.bf16 %v7894_v34, %v7892_v59  ;;  %v11687_v59 = vpack.c.bf16 %v7929_v11, %v7927_v2 }
0x10b3   :  { %11986 = vpow2.f32 %v8106_v58  ;;  %v7893_v58 = vld [vmem:[#allocation15 + $0x30] sm:$0xff] }
0x10b4   :  { %11988 = vpow2.f32 %v8107_v20  ;;  %v7896_v20 = vld [vmem:[#allocation15 + $0x48] sm:$0xff] }
0x10b5   :  { %v11985_v35 = vpop.eup %11984 }
0x10b6   :  { %v7207_v5 = vmul.f32 %v11985_v35, %v7206_v12  ;;  %v7898_v12 = vld [vmem:[#allocation15 + $0x58] sm:$0xff]  ;;  %v11651_v35 = vpack.c.bf16 %v7893_v58, %v7891_v18  ;;  %v7936_v18 = vld [vmem:[#allocation15 + $0x188] sm:$0xff] }
0x10b7   :  { %v7938_v58 = vld [vmem:[#allocation15 + $0x198] sm:$0xff] }
0x10b8   :  { %v7209_v21 = vadd.f32 %v7208_v19, %v7207_v5  ;;  %v11653_v5 = vpack.c.bf16 %v7898_v12, %v7896_v20  ;;  %v7895_v19 = vld [vmem:[#allocation15 + $0x40] sm:$0xff]  ;;  %v11693_v12 = vpack.c.bf16 %v7938_v58, %v7936_v18 }
0x10ba   :  { %7210 = vst [vmem:[#allocation3 + $0x4] sm:$0x1] %v7209_v21  ;;  %v7433_v43 = vrot.slane %v7209_v21, 3 }
0x10bc   :  { %v7564_v38 = vrot.slane %v7433_v43, 5  ;;  %v7900_v43 = vld [vmem:[#allocation15 + $0x68] sm:$0xff] }
0x10bd   :  { %v11987_v54 = vpop.eup %11986 }
0x10be   :  { %v11989_v9 = vpop.eup %11988  ;;  %v7407_v23 = vadd.f32 1.0, %v11987_v54  ;;  %7631 = vmatprep.mubr.f32.mxu0 %v7564_v38  ;;  %7702 = vmatprep.mubr.f32.mxu1 %v7564_v38  ;;  %v7902_v38 = vld [vmem:[#allocation15 + $0x78] sm:$0xff] }
0x10bf   :  { %v7417_v44 = vadd.f32 1.0, %v11989_v9  ;;  %v11657_v9 = vpack.c.bf16 %v7902_v38, %v7900_v43 }
0x10c0   :  { %11990 = vrcp.f32 %v7407_v23  ;;  %v7899_v23 = vld [vmem:[#allocation15 + $0x60] sm:$0xff] }
0x10c1   :  { %11992 = vrcp.f32 %v7417_v44  ;;  %v7901_v44 = vld [vmem:[#allocation15 + $0x70] sm:$0xff] }
0x10ca   :  { %v11991_v16 = vpop.eup %11990 }
0x10cb   :  { %v11993_v33 = vpop.eup %11992  ;;  %v7423_v51 = vmul.f32 %v11991_v16, %v7421_v52  ;;  %v7904_v52 = vld [vmem:[#allocation15 + $0x88] sm:$0xff]  ;;  %v7906_v16 = vld [vmem:[#allocation15 + $0x98] sm:$0xff] }
0x10cc   :  { %v7430_v63 = vmul.f32 %v11993_v33, %v7428_v29  ;;  %v7426_v32 = vsub.f32 1.0, %v11993_v33  ;;  %v11659_v29 = vpack.c.bf16 %v7901_v44, %v7899_v23  ;;  %v11661_v33 = vpack.c.bf16 %v7906_v16, %v7904_v52  ;;  %v7944_v23 = vld [vmem:[#allocation15 + $0x1c8] sm:$0xff]  ;;  %v7946_v44 = vld [vmem:[#allocation15 + $0x1d8] sm:$0xff] }
0x10cd   :  { %v7424_v48 = vadd.f32 %v7423_v51, %v16061_v10  ;;  %v7903_v51 = vld [vmem:[#allocation15 + $0x80] sm:$0xff]  ;;  %v11701_v16 = vpack.c.bf16 %v7946_v44, %v7944_v23 }
0x10cf   :  { %11994 = vtanh.f32 %v7424_v48  ;;  %v7908_v48 = vld [vmem:[#allocation15 + $0xa8] sm:$0xff] }
0x10d9   :  { %v11995_v30 = vpop.eup %11994 }
0x10da   :  { %v7427_v27 = vmul.f32 %v11995_v30, %v7426_v32  ;;  %v7910_v32 = vld [vmem:[#allocation15 + $0xb8] sm:$0xff] }
0x10dc   :  { %v7431_v13 = vadd.f32 %v7430_v63, %v7427_v27  ;;  %v7905_v63 = vld [vmem:[#allocation15 + $0x90] sm:$0xff]  ;;  %v11665_v27 = vpack.c.bf16 %v7910_v32, %v7908_v48 }
0x10dd   :  { %v11663_v30 = vpack.c.bf16 %v7905_v63, %v7903_v51  ;;  %v7948_v51 = vld [vmem:[#allocation15 + $0x1e8] sm:$0xff]  ;;  %v7950_v63 = vld [vmem:[#allocation15 + $0x1f8] sm:$0xff] }
0x10de   :  { %v7563_v15 = vrot.slane %v7431_v13, 5  ;;  %v7907_v13 = vld [vmem:[#allocation15 + $0xa0] sm:$0xff]  ;;  %v11705_v32 = vpack.c.bf16 %v7950_v63, %v7948_v51 }
0x10e0   :  { %7632 = vmatmul.mubr.f32.vlgmr.msra.gmra.mrb[56].mxu0 %v7563_v15  ;;  %7703 = vmatmul.mubr.f32.vlgmr.msra.gmra.mrb[60].mxu1 %v7563_v15  ;;  %v7909_v15 = vld [vmem:[#allocation15 + $0xb0] sm:$0xff] }
0x10e1   :  { %8948 = vmatpush3.xpose.msra.mxu0 %v7729_v56  ;;  %8953 = vmatpush3.msra.mxu1 %v7729_v56  ;;  %v7912_v56 = vld [vmem:[#allocation15 + $0xc8] sm:$0xff] }
0x10e2   :  { %8949 = vmatprep.mubr.msk.f32.mxu0 %vm12211_vm0, %v15680_v17  ;;  %8954 = vmatprep.mubr.msk.f32.mxu1 %vm12211_vm0, %v15680_v17 }
0x10e3   :  { %11646 = vmatprep.subr.bf16.mxu0 %v11645_v6  ;;  %v7932_v6 = vld [vmem:[#allocation15 + $0x168] sm:$0xff] }
0x10e4   :  { %v11689_v34 = vpack.c.bf16 %v7934_v31, %v7932_v6 }
0x11b3   :  { %v7633_v53 = vpop.f32.mrb[56].mxu0  ;;  %v7704_v61 = vpop.f32.mrb[60].mxu1 }
0x11b4   :  { %v8108_v10 = vmul.f32 -1.442695, %v7633_v53  ;;  %v7635_v26 = vpop.f32.mrb[57].mxu0  ;;  %v7706_v45 = vpop.f32.mrb[61].mxu1  ;;  %v7914_v53 = vld [vmem:[#allocation15 + $0xd8] sm:$0xff] }
0x11b5   :  { %v8109_v28 = vmul.f32 -1.442695, %v7635_v26  ;;  %v7911_v26 = vld [vmem:[#allocation15 + $0xc0] sm:$0xff] }
0x11b6   :  { %11996 = vpow2.f32 %v8108_v10  ;;  %v11669_v10 = vpack.c.bf16 %v7914_v53, %v7912_v56 }
0x11b7   :  { %11998 = vpow2.f32 %v8109_v28  ;;  %v7916_v28 = vld [vmem:[#allocation15 + $0xe8] sm:$0xff] }
0x11c0   :  { %v11997_v36 = vpop.eup %11996 }
0x11c1   :  { %v7712_v50 = vadd.f32 1.0, %v11997_v36  ;;  %v11999_v41 = vpop.eup %11998  ;;  %v7918_v36 = vld [vmem:[#allocation15 + $0xf8] sm:$0xff] }
0x11c2   :  { %v7718_v49 = vadd.f32 1.0, %v11999_v41  ;;  %v11673_v41 = vpack.c.bf16 %v7918_v36, %v7916_v28  ;;  %v7951_v36 = vld [vmem:[%s15293_s9] sm:$0x3] }
0x11c3   :  { %12000 = vrcp.f32 %v7712_v50 }
0x11c4   :  { %12002 = vrcp.f32 %v7718_v49  ;;  %v7915_v49 = vld [vmem:[#allocation15 + $0xe0] sm:$0xff] }
0x11cd   :  { %v12001_v25 = vpop.eup %12000 }
0x11ce   :  { %v7721_v40 = vmul.f32 %v12001_v25, %v7706_v45  ;;  %v12003_v4 = vpop.eup %12002  ;;  %v7913_v45 = vld [vmem:[#allocation15 + $0xd0] sm:$0xff] }
0x11cf   :  { %v7724_v17 = vsub.f32 1.0, %v12003_v4  ;;  %v7726_v24 = vmul.f32 %v12003_v4, %v7209_v21  ;;  %v7897_v21 = vld [vmem:[#allocation15 + $0x50] sm:$0xff]  ;;  %v11671_v50 = vpack.c.bf16 %v7913_v45, %v7911_v26  ;;  %v7953_v26 = vlaneseq }
0x11d0   :  { %v7722_v8 = vadd.f32 %v7721_v40, %v7704_v61  ;;  %v11655_v54 = vpack.c.bf16 %v7897_v21, %v7895_v19  ;;  %v11667_v61 = vpack.c.bf16 %v7909_v15, %v7907_v13  ;;  %v7917_v25 = vld [vmem:[#allocation15 + $0xf0] sm:$0xff]  ;;  %v7920_v40 = vld [vmem:[#allocation15 + $0x108] sm:$0xff]  ;;  %v7942_v21 = vld [vmem:[#allocation15 + $0x1b8] sm:$0xff] }
0x11d1   :  { %v11675_v4 = vpack.c.bf16 %v7917_v25, %v7915_v49  ;;  %v7940_v19 = vld [vmem:[#allocation15 + $0x1a8] sm:$0xff]  ;;  %v7954_v45 = vshrl.u32 %v7953_v26, 7 }
0x11d2   :  { %12004 = vtanh.f32 %v7722_v8  ;;  %v7922_v8 = vld [vmem:[#allocation15 + $0x118] sm:$0xff]  ;;  %v11697_v38 = vpack.c.bf16 %v7942_v21, %v7940_v19 }
0x11d3   :  { %v7955_v28 = vsub.s32 0, %v7954_v45 }
0x11dc   :  { %v12005_v47 = vpop.eup %12004 }
0x11dd   :  { %v7725_v46 = vmul.f32 %v12005_v47, %v7724_v17  ;;  %v11677_v17 = vpack.c.bf16 %v7922_v8, %v7920_v40  ;;  %v7919_v47 = vld [vmem:[#allocation15 + $0x100] sm:$0xff] }
0x11df   :  { %v7727_v37 = vadd.f32 %v7726_v24, %v7725_v46  ;;  %v7921_v24 = vld [vmem:[#allocation15 + $0x110] sm:$0xff]  ;;  %v7924_v46 = vld [vmem:[#allocation15 + $0x128] sm:$0xff] }
0x11e1   :  { %7728 = vst [vmem:[#allocation3 + $0x5] sm:$0x1] %v7727_v37  ;;  %v7926_v37 = vld [vmem:[#allocation15 + $0x138] sm:$0xff] }
0x11e8   :  { %v15261_v7 = vld [vmem:[#allocation3] sm:$0x3f] }
0x11e9   :  { %8950 = vmatmul.mubr.f32.vlgmr.msra.gmra.mrb[58].mxu0 %v15261_v7 }
0x11ea   :  { %11648 = vmatpush1.bf16.msra.mxu0 %v11647_v55  ;;  %v7931_v55 = vld [vmem:[#allocation15 + $0x160] sm:$0xff] }
0x11eb   :  { %11650 = vmatprep.subr.bf16.mxu0 %v11649_v14  ;;  %v7933_v14 = vld [vmem:[#allocation15 + $0x170] sm:$0xff] }
0x11ec   :  { %v11691_v20 = vpack.c.bf16 %v7933_v14, %v7931_v55 }
0x11ee   :  { %11652 = vmatpush1.bf16.msra.mxu0 %v11651_v35  ;;  %v7935_v35 = vld [vmem:[#allocation15 + $0x180] sm:$0xff] }
0x11ef   :  { %11654 = vmatprep.subr.bf16.mxu0 %v11653_v5  ;;  %v7937_v5 = vld [vmem:[#allocation15 + $0x190] sm:$0xff] }
0x11f0   :  { %v11695_v43 = vpack.c.bf16 %v7937_v5, %v7935_v35 }
0x11f2   :  { %11656 = vmatpush1.bf16.msra.mxu0 %v11655_v54  ;;  %v7939_v54 = vld [vmem:[#allocation15 + $0x1a0] sm:$0xff] }
0x11f3   :  { %11658 = vmatprep.subr.bf16.mxu0 %v11657_v9  ;;  %v7941_v9 = vld [vmem:[#allocation15 + $0x1b0] sm:$0xff] }
0x11f4   :  { %v11699_v52 = vpack.c.bf16 %v7941_v9, %v7939_v54 }
0x11f6   :  { %11660 = vmatpush1.bf16.msra.mxu0 %v11659_v29  ;;  %v7943_v29 = vld [vmem:[#allocation15 + $0x1c0] sm:$0xff] }
0x11f7   :  { %11662 = vmatprep.subr.bf16.mxu0 %v11661_v33  ;;  %v7945_v33 = vld [vmem:[#allocation15 + $0x1d0] sm:$0xff] }
0x11f8   :  { %v11703_v48 = vpack.c.bf16 %v7945_v33, %v7943_v29 }
0x11fa   :  { %11664 = vmatpush1.bf16.msra.mxu0 %v11663_v30  ;;  %v7947_v30 = vld [vmem:[#allocation15 + $0x1e0] sm:$0xff] }
0x11fb   :  { %11666 = vmatprep.subr.bf16.mxu0 %v11665_v27  ;;  %v7949_v27 = vld [vmem:[#allocation15 + $0x1f0] sm:$0xff] }
0x11fc   :  { %v11707_v13 = vpack.c.bf16 %v7949_v27, %v7947_v30 }
0x11fe   :  { %11668 = vmatpush1.bf16.msra.mxu0 %v11667_v61 }
0x11ff   :  { %11670 = vmatprep.subr.bf16.mxu0 %v11669_v10 }
0x1202   :  { %11672 = vmatpush1.bf16.msra.mxu0 %v11671_v50  ;;  %v7959_v50 = vsub.s32 1, %v7954_v45 }
0x1203   :  { %11674 = vmatprep.subr.bf16.mxu0 %v11673_v41  ;;  %v7956_v41 = vrot.slane %v7951_v36, %v7955_v28 }
0x1204   :  { %v7960_v49 = vrot.slane %v7951_v36, %v7959_v50 }
0x1206   :  { %11676 = vmatpush1.bf16.msra.mxu0 %v11675_v4 }
0x1207   :  { %11678 = vmatprep.subr.bf16.mxu0 %v11677_v17 }
0x12bc   :  { %v7797_v60 = vpop.f32.mrb[58].mxu0 }
0x12bd   :  { %v8951_v39 = vpop.f32.mrb[59].mxu0  ;;  %v7802_v22 = vsel %vm7801_vm1, %v7797_v60, -inf }
0x12be   :  { %7803 = vmax.xlane.f32.xlu0 %v7802_v22  ;;  %v11681_v39 = vpack.c.bf16 %v7926_v37, %v7924_v46  ;;  %v7923_v22 = vld [vmem:[#allocation15 + $0x120] sm:$0xff] }
0x134b   :  { %v7804_v57 = vpop.xlane.xlu0 %7803 }
0x134c   :  { %v7805_v42 = vsub.f32 %v7797_v60, %v7804_v57  ;;  %v11679_v60 = vpack.c.bf16 %v7921_v24, %v7919_v47  ;;  %v7925_v57 = vld [vmem:[#allocation15 + $0x130] sm:$0xff] }
0x134e   :  { %v7806_v1 = vmul.f32 1.442695, %v7805_v42  ;;  %v7928_v42 = vld [vmem:[#allocation15 + $0x148] sm:$0xff]  ;;  %11680 = vmatpush1.bf16.msra.mxu0 %v11679_v60 }
0x134f   :  { %11682 = vmatprep.subr.bf16.mxu0 %v11681_v39 }
0x1350   :  { %12006 = vpow2.f32 %v7806_v1  ;;  %v7930_v1 = vld [vmem:[#allocation15 + $0x158] sm:$0xff] }
0x1351   :  { %v11685_v0 = vpack.c.bf16 %v7930_v1, %v7928_v42 }
0x135a   :  { %v15264_v3 = vpop.eup %12006 }
0x135b   :  { %v7808_v62 = vsel %vm7801_vm1, %v15264_v3, 0.0 }
0x135c   :  { %7809 = vadd.xlane.f32.xlu0 %v7808_v62  ;;  %v11683_v62 = vpack.c.bf16 %v7925_v57, %v7923_v22 }
0x135e   :  { %11684 = vmatpush1.bf16.msra.mxu0 %v11683_v62 }
0x135f   :  { %11686 = vmatprep.subr.bf16.mxu0 %v11685_v0 }
0x1362   :  { %11688 = vmatpush1.bf16.msra.mxu0 %v11687_v59 }
0x1363   :  { %11690 = vmatprep.subr.bf16.mxu0 %v11689_v34 }
0x1366   :  { %11692 = vmatpush1.bf16.msra.mxu0 %v11691_v20 }
0x1367   :  { %11694 = vmatprep.subr.bf16.mxu0 %v11693_v12 }
0x136a   :  { %11696 = vmatpush1.bf16.msra.mxu0 %v11695_v43 }
0x136b   :  { %11698 = vmatprep.subr.bf16.mxu0 %v11697_v38 }
0x136e   :  { %11700 = vmatpush1.bf16.msra.mxu0 %v11699_v52 }
0x136f   :  { %11702 = vmatprep.subr.bf16.mxu0 %v11701_v16 }
0x1372   :  { %11704 = vmatpush1.bf16.msra.mxu0 %v11703_v48 }
0x1373   :  { %11706 = vmatprep.subr.bf16.mxu0 %v11705_v32 }
0x1376   :  { %11708 = vmatpush1.bf16.msra.mxu0 %v11707_v13 }
0x13e9   :  { %v7810_v15 = vpop.xlane.xlu0 %7809 }
0x13ea   :  { %12008 = vrcp.f32 %v7810_v15 }
0x13f4   :  { %v12009_v56 = vpop.eup %12008 }
0x13f5   :  { %v7812_v53 = vmul.f32 %v12009_v56, %v15264_v3 }
0x13f7   :  { %8955 = vmatmul.mubr.msk.f32.vlgmr.msra.gmra.mrb[62].mxu1 %vm7813_vm2, %v7812_v53 }
0x14ca   :  { %v7883_v61 = vpop.f32.mrb[62].mxu1 }
0x14cb   :  { %v8956_v10 = vpop.f32.mrb[63].mxu1  ;;  %8027 = vmatprep.mubr.f32.mxu0 %v7883_v61 }
0x14cc   :  { %8028 = vmatmul.mubr.f32.vlgmr.msra.gmra.mrb[60].mxu0 %v15261_v7 }
0x159f   :  { %v8029_v25 = vpop.f32.mrb[60].mxu0 }
0x15a0   :  { %v8030_v3 = vadd.f32 %v8029_v25, %v7956_v41  ;;  %v8031_v40 = vpop.f32.mrb[61].mxu0 }
0x15a1   :  { %v8032_v8 = vadd.f32 %v8031_v40, %v7960_v49 }
0x15a2   :  { %8034 = vst [vmem:[#allocation16] sm:$0x3f] %v8030_v3 }
0x15a3   :  { %8035 = vst [vmem:[#allocation16 + $0x8] sm:$0x3f] %v8032_v8 }
0x15a4   :  { %12175 = shalt.err (!%p12172_p4)
}
0x15a5   :  { %s12176_s20 = scalar_lea.hbm %s15294_s10, 256 }
0x15a6   :  { %p12177_p5 = scmp.ne.s32.totalorder %s15294_s10, %s12176_s20  ;;  %p12180_p6 = scmp.lt.u32.totalorder %s12176_s20, %s15294_s10 }
0x15a8   :  { %p12182_p7 = pnand %p12180_p6, %p12177_p5 }
0x15aa   :  { %12185 = shalt.err (!%p12182_p7)
}
0x15ab   :  { %8045 = dma.vmem_to_hbm [thread:$0]  %s8043_s23, 256, %s15294_s10, [#allocation6]  }
0x15ac   :  { %12194 = dma.done.wait [#allocation6], 256  }
0x15ad   :  { %12195 = vsyncadd [#allocation6], 4294967040 }
0x15ae   :  { %8049 = vsyncpa [#allocation5], 1 }
0x15af   :  { %8050 = vsyncpa [#allocation8], 1 }
0x15b0   :  { %8051 = vsyncpa [#allocation11], 1 }
0x15b1   :  { %8052 = vsyncpa [#allocation14], 1 }
0x15b2   :  { %8053 = vsyncpa [#allocation6], 1 }

</bundles_post_ra>
